<compile_context>
chip_gen: v5e
topology: v5e:2x2
jax: 0.10.0
libtpu: 0.0.40
codegen_flags: <defaults>
</compile_context>

<pallas_src>
import jax
import jax.numpy as jnp
from jax.experimental import pallas as pl
from jax.experimental.pallas import tpu as pltpu

C_IN = 672
C_OUT = 192
EPS = 1e-5


def conv_bn_relu(x_nchw, w_oihw, gamma, beta, *, co_tile=96):
    """x_nchw: (N, 672, H, W) f32 -> (N, 192, H, W) f32 (1x1 conv + BN(train) + ReLU)."""
    n, c, h, wd = x_nchw.shape
    assert c == C_IN
    hw = h * wd
    m_total = float(n * hw)  # BN training-mode normalizer (biased variance)

    if C_OUT % co_tile != 0:
        co_tile = C_OUT
    num_cb = C_OUT // co_tile

    # Free reshapes only -- no data movement in the wrapper.
    x3 = x_nchw.reshape(n, C_IN, hw)        # (N, C_IN, HW)
    w2 = w_oihw.reshape(C_OUT, C_IN)        # (C_OUT, C_IN)
    g2 = gamma.reshape(C_OUT, 1)
    b2 = beta.reshape(C_OUT, 1)

    def kernel(x_ref, w_ref, g_ref, b_ref, o_ref):
        # x_ref: (N, C_IN, HW)      -- resident across the grid (DMA'd once)
        # w_ref: (co_tile, C_IN)    -- this step's output-channel block of the weight
        # g_ref, b_ref: (co_tile, 1)
        # o_ref: (N, co_tile, HW)   -- this step's output block
        w = w_ref[...]

        s = jnp.zeros((co_tile, 1), jnp.float32)
        ss = jnp.zeros((co_tile, 1), jnp.float32)
        # n is static and small: unrolled Python loop over batch images.
        for b in range(n):
            y = jnp.dot(w, x_ref[b], preferred_element_type=jnp.float32)  # (co_tile, HW)
            o_ref[b] = y                                   # stage pre-BN result in VMEM
            s = s + jnp.sum(y, axis=1, keepdims=True)
            ss = ss + jnp.sum(y * y, axis=1, keepdims=True)

        inv_m = 1.0 / m_total
        mean = s * inv_m
        var = jnp.maximum(ss * inv_m - mean * mean, 0.0)   # biased var (PyTorch train)
        scale = g_ref[...] * jax.lax.rsqrt(var + EPS)
        shift = b_ref[...] - mean * scale

        for b in range(n):
            o_ref[b] = jnp.maximum(o_ref[b] * scale + shift, 0.0)

    out3 = pl.pallas_call(
        kernel,
        out_shape=jax.ShapeDtypeStruct((n, C_OUT, hw), jnp.float32),
        grid=(num_cb,),
        in_specs=[
            pl.BlockSpec((n, C_IN, hw), lambda cb: (0, 0, 0)),     # x resident in VMEM
            pl.BlockSpec((co_tile, C_IN), lambda cb: (cb, 0)),     # weight block
            pl.BlockSpec((co_tile, 1), lambda cb: (cb, 0)),        # gamma block
            pl.BlockSpec((co_tile, 1), lambda cb: (cb, 0)),        # beta block
        ],
        out_specs=pl.BlockSpec((n, co_tile, hw), lambda cb: (0, cb, 0)),
        compiler_params=pltpu.CompilerParams(
            dimension_semantics=("parallel",)),
    )(x3, w2, g2, b2)

    return out3.reshape(n, C_OUT, h, wd)


def reference(x_nchw, w_oihw, gamma, beta):
    """Pure-JAX f32 reference (PyTorch training-mode BN semantics)."""
    w2 = w_oihw.reshape(C_OUT, C_IN)
    y = jnp.einsum("oc,nchw->nohw", w2, x_nchw)
    mean = jnp.mean(y, axis=(0, 2, 3), keepdims=True)
    var = jnp.mean((y - mean) ** 2, axis=(0, 2, 3), keepdims=True)
    yn = (y - mean) * jax.lax.rsqrt(var + EPS) * gamma.reshape(1, C_OUT, 1, 1) \
         + beta.reshape(1, C_OUT, 1, 1)
    return jnp.maximum(yn, 0.0)


if __name__ == "__main__":
    key = jax.random.PRNGKey(0)
    kx, kw, kg, kb = jax.random.split(key, 4)

    # Shapes from the module spec: x124 = (1, 672, 28, 28).
    N, H, W = 1, 28, 28
    x = jax.random.normal(kx, (N, C_IN, H, W), dtype=jnp.float32)
    conv_weight = jax.random.normal(kw, (C_OUT, C_IN, 1, 1), dtype=jnp.float32) * 0.05
    gamma = jax.random.normal(kg, (C_OUT,), dtype=jnp.float32) * 0.1 + 1.0
    beta = jax.random.normal(kb, (C_OUT,), dtype=jnp.float32) * 0.1

    fn = jax.jit(conv_bn_relu)
    out = fn(x, conv_weight, gamma, beta)
    jax.block_until_ready(out)

    ref = reference(x, conv_weight, gamma, beta)
    assert out.shape == (N, C_OUT, H, W)
    assert jnp.allclose(out, ref, atol=1e-3, rtol=1e-3), "mismatch vs reference"

    print("KERNEL_OK")
</pallas_src>

<mosaic_0001>
module attributes {stable_mosaic.version = 11 : i64} {
  func.func @kernel(%arg0: i32, %arg1: memref<1x672x784xf32, #tpu.memory_space<vmem>>, %arg2: memref<96x672xf32, #tpu.memory_space<vmem>>, %arg3: memref<96x1xf32, #tpu.memory_space<vmem>>, %arg4: memref<96x1xf32, #tpu.memory_space<vmem>>, %arg5: memref<1x96x784xf32, #tpu.memory_space<vmem>>) attributes {dimension_semantics = [#tpu.dimension_semantics<parallel>], iteration_bounds = array<i64: 2>, scalar_prefetch = 0 : i64, scratch_operands = 0 : i64, tpu.core_type = #tpu.core_type<tc>, window_params = [{pipeline_mode = #tpu.pipeline_mode<synchronous>, transform_indices = @transform_0, window_bounds = array<i64: 1, 672, 784>}, {transform_indices = @transform_1, window_bounds = array<i64: 96, 672>}, {transform_indices = @transform_2, window_bounds = array<i64: 96, 1>}, {transform_indices = @transform_3, window_bounds = array<i64: 96, 1>}, {transform_indices = @transform_4, window_bounds = array<i64: 1, 96, 784>}]} {
    %c0 = arith.constant 0 : index
    %c0_0 = arith.constant 0 : index
    %0 = vector.load %arg2[%c0, %c0_0] : memref<96x672xf32, #tpu.memory_space<vmem>>, vector<96x672xf32>
    %cst = arith.constant 0.000000e+00 : f32
    %1 = vector.broadcast %cst : f32 to vector<96x1xf32>
    %cst_1 = arith.constant 0.000000e+00 : f32
    %2 = vector.broadcast %cst_1 : f32 to vector<96x1xf32>
    %c0_2 = arith.constant 0 : index
    %c0_3 = arith.constant 0 : index
    %c0_4 = arith.constant 0 : index
    %3 = vector.load %arg1[%c0_2, %c0_3, %c0_4] : memref<1x672x784xf32, #tpu.memory_space<vmem>>, vector<1x672x784xf32>
    %4 = vector.shape_cast %3 : vector<1x672x784xf32> to vector<672x784xf32>
    %cst_5 = arith.constant dense<0.000000e+00> : vector<96x784xf32>
    %5 = tpu.matmul %0, %4, %cst_5 {dimension_numbers = #tpu.dot_dimension_numbers<[1], [0], [0], [1], [0, 0, 1, 1], [], []>} : vector<96x672xf32>, vector<672x784xf32>, vector<96x784xf32> -> vector<96x784xf32>
    %c0_6 = arith.constant 0 : index
    %c0_7 = arith.constant 0 : index
    %c0_8 = arith.constant 0 : index
    %6 = vector.load %arg5[%c0_6, %c0_7, %c0_8] : memref<1x96x784xf32, #tpu.memory_space<vmem>>, vector<1x96x784xf32>
    %7 = vector.shape_cast %6 : vector<1x96x784xf32> to vector<96x784xf32>
    %8 = vector.shape_cast %5 : vector<96x784xf32> to vector<1x96x784xf32>
    tpu.vector_store %arg5[%c0_6, %c0_7, %c0_8], %8 {strides = array<i32>} : memref<1x96x784xf32, #tpu.memory_space<vmem>>, vector<1x96x784xf32>,
    %cst_9 = arith.constant dense<0.000000e+00> : vector<96xf32>
    %9 = vector.multi_reduction <add>, %5, %cst_9 [1] : vector<96x784xf32> to vector<96xf32>
    %10 = vector.shape_cast %9 : vector<96xf32> to vector<96x1xf32>
    %11 = arith.addf %1, %10 : vector<96x1xf32>
    %12 = arith.mulf %5, %5 : vector<96x784xf32>
    %cst_10 = arith.constant dense<0.000000e+00> : vector<96xf32>
    %13 = vector.multi_reduction <add>, %12, %cst_10 [1] : vector<96x784xf32> to vector<96xf32>
    %14 = vector.shape_cast %13 : vector<96xf32> to vector<96x1xf32>
    %15 = arith.addf %2, %14 : vector<96x1xf32>
    %cst_11 = arith.constant 0.00127551018 : f32
    %16 = vector.broadcast %cst_11 : f32 to vector<96x1xf32>
    %17 = arith.mulf %11, %16 : vector<96x1xf32>
    %cst_12 = arith.constant 0.00127551018 : f32
    %18 = vector.broadcast %cst_12 : f32 to vector<96x1xf32>
    %19 = arith.mulf %15, %18 : vector<96x1xf32>
    %20 = arith.mulf %17, %17 : vector<96x1xf32>
    %21 = arith.subf %19, %20 : vector<96x1xf32>
    %cst_13 = arith.constant 0.000000e+00 : f32
    %22 = vector.broadcast %cst_13 : f32 to vector<96x1xf32>
    %23 = arith.maximumf %21, %22 : vector<96x1xf32>
    %c0_14 = arith.constant 0 : index
    %c0_15 = arith.constant 0 : index
    %24 = vector.load %arg3[%c0_14, %c0_15] : memref<96x1xf32, #tpu.memory_space<vmem>>, vector<96x1xf32>
    %cst_16 = arith.constant 9.99999974E-6 : f32
    %25 = vector.broadcast %cst_16 : f32 to vector<96x1xf32>
    %26 = arith.addf %23, %25 : vector<96x1xf32>
    %27 = math.rsqrt %26 : vector<96x1xf32>
    %28 = arith.mulf %24, %27 : vector<96x1xf32>
    %c0_17 = arith.constant 0 : index
    %c0_18 = arith.constant 0 : index
    %29 = vector.load %arg4[%c0_17, %c0_18] : memref<96x1xf32, #tpu.memory_space<vmem>>, vector<96x1xf32>
    %30 = arith.mulf %17, %28 : vector<96x1xf32>
    %31 = arith.subf %29, %30 : vector<96x1xf32>
    %c0_19 = arith.constant 0 : index
    %c0_20 = arith.constant 0 : index
    %c0_21 = arith.constant 0 : index
    %32 = vector.load %arg5[%c0_19, %c0_20, %c0_21] : memref<1x96x784xf32, #tpu.memory_space<vmem>>, vector<1x96x784xf32>
    %33 = vector.shape_cast %32 : vector<1x96x784xf32> to vector<96x784xf32>
    %34 = vector.broadcast %28 : vector<96x1xf32> to vector<96x784xf32>
    %35 = arith.mulf %33, %34 : vector<96x784xf32>
    %36 = vector.broadcast %31 : vector<96x1xf32> to vector<96x784xf32>
    %37 = arith.addf %35, %36 : vector<96x784xf32>
    %cst_22 = arith.constant 0.000000e+00 : f32
    %38 = vector.broadcast %cst_22 : f32 to vector<96x784xf32>
    %39 = arith.maximumf %37, %38 : vector<96x784xf32>
    %c0_23 = arith.constant 0 : index
    %c0_24 = arith.constant 0 : index
    %c0_25 = arith.constant 0 : index
    %40 = vector.load %arg5[%c0_23, %c0_24, %c0_25] : memref<1x96x784xf32, #tpu.memory_space<vmem>>, vector<1x96x784xf32>
    %41 = vector.shape_cast %40 : vector<1x96x784xf32> to vector<96x784xf32>
    %42 = vector.shape_cast %39 : vector<96x784xf32> to vector<1x96x784xf32>
    tpu.vector_store %arg5[%c0_23, %c0_24, %c0_25], %42 {strides = array<i32>} : memref<1x96x784xf32, #tpu.memory_space<vmem>>, vector<1x96x784xf32>,
    return
  }
  func.func @transform_0(%arg0: i32) -> (i32, i32, i32) {
    %c0_i32 = arith.constant 0 : i32
    %c0_i32_0 = arith.constant 0 : i32
    %c0_i32_1 = arith.constant 0 : i32
    %c0_i32_2 = arith.constant 0 : i32
    return %c0_i32, %c0_i32_0, %c0_i32_1 : i32, i32, i32
  }
  func.func @transform_1(%arg0: i32) -> (i32, i32) {
    %c0_i32 = arith.constant 0 : i32
    %c0_i32_0 = arith.constant 0 : i32
    return %arg0, %c0_i32 : i32, i32
  }
  func.func @transform_2(%arg0: i32) -> (i32, i32) {
    %c0_i32 = arith.constant 0 : i32
    %c0_i32_0 = arith.constant 0 : i32
    return %arg0, %c0_i32 : i32, i32
  }
  func.func @transform_3(%arg0: i32) -> (i32, i32) {
    %c0_i32 = arith.constant 0 : i32
    %c0_i32_0 = arith.constant 0 : i32
    return %arg0, %c0_i32 : i32, i32
  }
  func.func @transform_4(%arg0: i32) -> (i32, i32, i32) {
    %c0_i32 = arith.constant 0 : i32
    %c0_i32_0 = arith.constant 0 : i32
    %c0_i32_1 = arith.constant 0 : i32
    return %c0_i32, %arg0, %c0_i32_0 : i32, i32, i32
  }
}

</mosaic_0001>

<bundles_post_ra>
// kernel: conv_bn_relu.1
= control target key start
LH: loop header
LB: loop body
LE: loop exit
PB: predicated region body
PF: predicated region fallthrough
CT: control target
= control target key end

     0   :  { %s4883_s15 = smov 0   ;;  %s9038_s0 = inlined_call_operand.vmem [shape: f32[1,672,784], index: 0, kind: input, shape index: {}]   ;;  %s9039_s1 = inlined_call_operand.vmem [shape: f32[192,672], index: 1, kind: input, shape index: {}]   ;;  %s9040_s2 = inlined_call_operand.vmem [shape: f32[192,1], index: 2, kind: input, shape index: {}]   ;;  %s9041_s3 = inlined_call_operand.vmem [shape: f32[192,1], index: 3, kind: input, shape index: {}]   ;;  %s9042_s4 = inlined_call_operand.vmem [shape: f32[1,192,784], index: 4, kind: output, shape index: {}]  }
   0x1 LB: > { %s4456_s16 = sadd.s32 4294967295, %s4855_s15   ;;  %p4460_p0 = scmp.ge.s32.totalorder %s4855_s15, 1  ;;  %s4855_s15 = sphi %s4883_s15, %s14_s15  }
   0x2   : > { %p186_p1 = scmp.lt.s32.totalorder %s4855_s15, 3 }
   0x4   : > { %p187_p2 = pnand %p4460_p0, %p186_p1 }
   0x6   : > { %190 = sbr.rel (%p187_p2) target bundleno = 1464 (0x5b8), region = 36 }
   0xb   : > { %v427_v0 = vld [vmem:[%s9038_s0 + $0x348] sm:$0xff]  ;;  %v420_v2 = vld [vmem:[%s9038_s0 + $0x310] sm:$0xff]  ;;  %v413_v4 = vld [vmem:[%s9038_s0 + $0x2d8] sm:$0xff]  ;;  %s224_s21 = smul.u32 12, %s4456_s16  ;;  %vm910_vm0 = vcmask 261120   ;;  %vm3179_vm1 = vcmask 130048  }
   0xc   : > { %v539_v1 = vld [vmem:[%s9038_s0 + $0x6c8] sm:$0xff]  ;;  %4551 = vmatpush.msra.mxu2 %v427_v0  ;;  %v532_v3 = vld [vmem:[%s9038_s0 + $0x690] sm:$0xff]  ;;  %v525_v5 = vld [vmem:[%s9038_s0 + $0x658] sm:$0xff]  ;;  %947 = vmatpush.msra.mxu0 %v427_v0 }
   0xd   : > { %4567 = vmatpush.msra.mxu3 %v539_v1  ;;  %1000 = vmatpush.msra.mxu1 %v539_v1  ;;  %v406_v6 = vld [vmem:[%s9038_s0 + $0x2a0] sm:$0xff]  ;;  %v399_v8 = vld [vmem:[%s9038_s0 + $0x268] sm:$0xff]  ;;  %v392_v10 = vld [vmem:[%s9038_s0 + $0x230] sm:$0xff]  ;;  %p225_p3 = scmp.lt.s32.totalorder %s224_s21, 23 }
   0xe   : > { %4552 = vmatpush.msra.mxu2 %v420_v2  ;;  %v518_v7 = vld [vmem:[%s9038_s0 + $0x620] sm:$0xff]  ;;  %948 = vmatpush.msra.mxu0 %v420_v2  ;;  %v511_v9 = vld [vmem:[%s9038_s0 + $0x5e8] sm:$0xff]  ;;  %v504_v11 = vld [vmem:[%s9038_s0 + $0x5b0] sm:$0xff] }
   0xf   : > { %4568 = vmatpush.msra.mxu3 %v532_v3  ;;  %1001 = vmatpush.msra.mxu1 %v532_v3  ;;  %v385_v12 = vld [vmem:[%s9038_s0 + $0x1f8] sm:$0xff]  ;;  %v378_v14 = vld [vmem:[%s9038_s0 + $0x1c0] sm:$0xff]  ;;  %v371_v16 = vld [vmem:[%s9038_s0 + $0x188] sm:$0xff]  ;;  %s9203_s21 = smov (!%p225_p3, %s224_s21), 23 }
  0x10   : > { %4553 = vmatpush.msra.mxu2 %v413_v4  ;;  %949 = vmatpush.msra.mxu0 %v413_v4  ;;  %v497_v13 = vld [vmem:[%s9038_s0 + $0x578] sm:$0xff]  ;;  %v490_v15 = vld [vmem:[%s9038_s0 + $0x540] sm:$0xff]  ;;  %v483_v17 = vld [vmem:[%s9038_s0 + $0x508] sm:$0xff]  ;;  %s4583_s22 = smul.u32 48, %s9203_s21 }
  0x11   : > { %4569 = vmatpush.msra.mxu3 %v525_v5  ;;  %1002 = vmatpush.msra.mxu1 %v525_v5  ;;  %v364_v18 = vld [vmem:[%s9038_s0 + $0x150] sm:$0xff]  ;;  %v357_v20 = vld [vmem:[%s9038_s0 + $0x118] sm:$0xff]  ;;  %v350_v22 = vld [vmem:[%s9038_s0 + $0xe0] sm:$0xff]  ;;  %s4584_s14 = smul.u32 56, %s9203_s21 }
  0x12   : > { %4554 = vmatpush.msra.mxu2 %v406_v6  ;;  %950 = vmatpush.msra.mxu0 %v406_v6  ;;  %v476_v19 = vld [vmem:[%s9038_s0 + $0x4d0] sm:$0xff]  ;;  %v469_v21 = vld [vmem:[%s9038_s0 + $0x498] sm:$0xff]  ;;  %v462_v23 = vld [vmem:[%s9038_s0 + $0x460] sm:$0xff]  ;;  %s4989_s6 = scalar_lea.vmem %s9039_s1, %s4583_s22 }
  0x13   : > { %4570 = vmatpush.msra.mxu3 %v518_v7  ;;  %1003 = vmatpush.msra.mxu1 %v518_v7  ;;  %v343_v24 = vld [vmem:[%s9038_s0 + $0xa8] sm:$0xff]  ;;  %v336_v26 = vld [vmem:[%s9038_s0 + $0x70] sm:$0xff]  ;;  %v329_v28 = vld [vmem:[%s9038_s0 + $0x38] sm:$0xff]  ;;  %s5787_s22 = scalar_lea.vmem %s9042_s4, %s4584_s14 }
  0x14   : > { %4555 = vmatpush.msra.mxu2 %v399_v8  ;;  %951 = vmatpush.msra.mxu0 %v399_v8  ;;  %v455_v25 = vld [vmem:[%s9038_s0 + $0x428] sm:$0xff]  ;;  %v448_v27 = vld [vmem:[%s9038_s0 + $0x3f0] sm:$0xff]  ;;  %v441_v29 = vld [vmem:[%s9038_s0 + $0x3b8] sm:$0xff] }
  0x15   : > { %4571 = vmatpush.msra.mxu3 %v511_v9  ;;  %1004 = vmatpush.msra.mxu1 %v511_v9  ;;  %v322_v30 = vld [vmem:[%s9038_s0] sm:$0xff]  ;;  %v287_v33 = vld [vmem:[%s4989_s6 + $0x128] sm:$0xff]  ;;  %v644_v36 = vld [vmem:[%s9038_s0 + $0xa10] sm:$0xff] }
  0x16   : > { %4556 = vmatpush.msra.mxu2 %v392_v10  ;;  %952 = vmatpush.msra.mxu0 %v392_v10  ;;  %v434_v31 = vld [vmem:[%s9038_s0 + $0x380] sm:$0xff]  ;;  %v651_v34 = vld [vmem:[%s9038_s0 + $0xa48] sm:$0xff]  ;;  %v756_v37 = vld [vmem:[%s9038_s0 + $0xd90] sm:$0xff] }
  0x17   : > { %4572 = vmatpush.msra.mxu3 %v504_v11  ;;  %1005 = vmatpush.msra.mxu1 %v504_v11  ;;  %v286_v32 = vld [vmem:[%s4989_s6 + $0x120] sm:$0xff]  ;;  %v763_v35 = vld [vmem:[%s9038_s0 + $0xdc8] sm:$0xff]  ;;  %v637_v40 = vld [vmem:[%s9038_s0 + $0x9d8] sm:$0xff] }
  0x18   : > { %4557 = vmatpush.msra.mxu2 %v385_v12  ;;  %953 = vmatpush.msra.mxu0 %v385_v12  ;;  %v5012_v38 = vld [vmem:[%s4989_s6] sm:$0xff]  ;;  %v5015_v39 = vld [vmem:[%s4989_s6 + $0x8] sm:$0xff]  ;;  %v749_v41 = vld [vmem:[%s9038_s0 + $0xd58] sm:$0xff] }
  0x19   : > { %4573 = vmatpush.msra.mxu3 %v497_v13  ;;  %1006 = vmatpush.msra.mxu1 %v497_v13  ;;  %v875_v42 = vld [vmem:[%s9038_s0 + $0x1148] sm:$0xff]  ;;  %v630_v44 = vld [vmem:[%s9038_s0 + $0x9a0] sm:$0xff]  ;;  %v292_v46 = vld [vmem:[%s4989_s6 + $0x150] sm:$0xff] }
  0x1a   : > { %4558 = vmatpush.msra.mxu2 %v378_v14  ;;  %954 = vmatpush.msra.mxu0 %v378_v14  ;;  %v903_v43 = vld [vmem:[%s9038_s0 + $0x1228] sm:$0xff]  ;;  %v742_v45 = vld [vmem:[%s9038_s0 + $0xd20] sm:$0xff]  ;;  %v293_v47 = vld [vmem:[%s4989_s6 + $0x158] sm:$0xff] }
  0x1b   : > { %4574 = vmatpush.msra.mxu3 %v490_v15  ;;  %1007 = vmatpush.msra.mxu1 %v490_v15  ;;  %v623_v48 = vld [vmem:[%s9038_s0 + $0x968] sm:$0xff]  ;;  %v868_v49 = vld [vmem:[%s9038_s0 + $0x1110] sm:$0xff]  ;;  %v861_v53 = vld [vmem:[%s9038_s0 + $0x10d8] sm:$0xff] }
  0x1c   : > { %4559 = vmatpush.msra.mxu2 %v371_v16  ;;  %955 = vmatpush.msra.mxu0 %v371_v16  ;;  %v735_v50 = vld [vmem:[%s9038_s0 + $0xce8] sm:$0xff]  ;;  %v896_v51 = vld [vmem:[%s9038_s0 + $0x11f0] sm:$0xff]  ;;  %v5064_v56 = vld [vmem:[%s4989_s6 + $0x38] sm:$0xff] }
  0x1d   : > { %4575 = vmatpush.msra.mxu3 %v483_v17  ;;  %1008 = vmatpush.msra.mxu1 %v483_v17  ;;  %v616_v52 = vld [vmem:[%s9038_s0 + $0x930] sm:$0xff]  ;;  %v609_v57 = vld [vmem:[%s9038_s0 + $0x8f8] sm:$0xff]  ;;  %v854_v58 = vld [vmem:[%s9038_s0 + $0x10a0] sm:$0xff] }
  0x1e   : > { %4560 = vmatpush.msra.mxu2 %v364_v18  ;;  %956 = vmatpush.msra.mxu0 %v364_v18  ;;  %v5058_v54 = vld [vmem:[%s4989_s6 + $0x30] sm:$0xff]  ;;  %v721_v59 = vld [vmem:[%s9038_s0 + $0xc78] sm:$0xff]  ;;  %v602_v60 = vld [vmem:[%s9038_s0 + $0x8c0] sm:$0xff] }
  0x1f   : > { %4576 = vmatpush.msra.mxu3 %v476_v19  ;;  %1009 = vmatpush.msra.mxu1 %v476_v19  ;;  %v728_v55 = vld [vmem:[%s9038_s0 + $0xcb0] sm:$0xff]  ;;  %v889_v61 = vld [vmem:[%s9038_s0 + $0x11b8] sm:$0xff]  ;;  %v298_v62 = vld [vmem:[%s4989_s6 + $0x180] sm:$0xff] }
  0x20   : > { %4561 = vmatpush.msra.mxu2 %v357_v20  ;;  %957 = vmatpush.msra.mxu0 %v357_v20  ;;  %v299_v63 = vld [vmem:[%s4989_s6 + $0x188] sm:$0xff]  ;;  %v714_v1 = vld [vmem:[%s9038_s0 + $0xc40] sm:$0xff]  ;;  %v840_v3 = vld [vmem:[%s9038_s0 + $0x1030] sm:$0xff] }
  0x21   : > { %4577 = vmatpush.msra.mxu3 %v469_v21  ;;  %1010 = vmatpush.msra.mxu1 %v469_v21  ;;  %v847_v0 = vld [vmem:[%s9038_s0 + $0x1068] sm:$0xff]  ;;  %v882_v5 = vld [vmem:[%s9038_s0 + $0x1180] sm:$0xff]  ;;  %v588_v7 = vld [vmem:[%s9038_s0 + $0x850] sm:$0xff] }
  0x22   : > { %4562 = vmatpush.msra.mxu2 %v350_v22  ;;  %958 = vmatpush.msra.mxu0 %v350_v22  ;;  %v595_v2 = vld [vmem:[%s9038_s0 + $0x888] sm:$0xff]  ;;  %v5104_v6 = vld [vmem:[%s4989_s6 + $0x60] sm:$0xff]  ;;  %v833_v9 = vld [vmem:[%s9038_s0 + $0xff8] sm:$0xff] }
  0x23   : > { %4578 = vmatpush.msra.mxu3 %v462_v23  ;;  %1011 = vmatpush.msra.mxu1 %v462_v23  ;;  %v707_v4 = vld [vmem:[%s9038_s0 + $0xc08] sm:$0xff]  ;;  %v700_v10 = vld [vmem:[%s9038_s0 + $0xbd0] sm:$0xff]  ;;  %v581_v11 = vld [vmem:[%s9038_s0 + $0x818] sm:$0xff] }
  0x24   : > { %4563 = vmatpush.msra.mxu2 %v343_v24  ;;  %959 = vmatpush.msra.mxu0 %v343_v24  ;;  %v5110_v8 = vld [vmem:[%s4989_s6 + $0x68] sm:$0xff]  ;;  %v826_v12 = vld [vmem:[%s9038_s0 + $0xfc0] sm:$0xff]  ;;  %v304_v13 = vld [vmem:[%s4989_s6 + $0x1b0] sm:$0xff] }
  0x25   : > { %4579 = vmatpush.msra.mxu3 %v455_v25  ;;  %1012 = vmatpush.msra.mxu1 %v455_v25  ;;  %v305_v14 = vld [vmem:[%s4989_s6 + $0x1b8] sm:$0xff]  ;;  %v574_v16 = vld [vmem:[%s9038_s0 + $0x7e0] sm:$0xff]  ;;  %v819_v17 = vld [vmem:[%s9038_s0 + $0xf88] sm:$0xff] }
  0x26   : > { %4564 = vmatpush.msra.mxu2 %v336_v26  ;;  %960 = vmatpush.msra.mxu0 %v336_v26  ;;  %v693_v15 = vld [vmem:[%s9038_s0 + $0xb98] sm:$0xff]  ;;  %v686_v18 = vld [vmem:[%s9038_s0 + $0xb60] sm:$0xff]  ;;  %v567_v19 = vld [vmem:[%s9038_s0 + $0x7a8] sm:$0xff] }
  0x27   : > { %4580 = vmatpush.msra.mxu3 %v448_v27  ;;  %1013 = vmatpush.msra.mxu1 %v448_v27  ;;  %v5144_v20 = vld [vmem:[%s4989_s6 + $0x90] sm:$0xff]  ;;  %v5150_v22 = vld [vmem:[%s4989_s6 + $0x98] sm:$0xff]  ;;  %v679_v24 = vld [vmem:[%s9038_s0 + $0xb28] sm:$0xff] }
  0x28   : > { %4565 = vmatpush.msra.mxu2 %v329_v28  ;;  %961 = vmatpush.msra.mxu0 %v329_v28  ;;  %v764_v21 = vld [vmem:[%s9038_s0 + $0xdd0] sm:$0xff]  ;;  %v805_v26 = vld [vmem:[%s9038_s0 + $0xf18] sm:$0xff]  ;;  %v310_v27 = vld [vmem:[%s4989_s6 + $0x1e0] sm:$0xff] }
  0x29   : > { %4581 = vmatpush.msra.mxu3 %v441_v29  ;;  %1014 = vmatpush.msra.mxu1 %v441_v29  ;;  %v812_v23 = vld [vmem:[%s9038_s0 + $0xf50] sm:$0xff]  ;;  %v311_v28 = vld [vmem:[%s4989_s6 + $0x1e8] sm:$0xff] }
  0x2a   : > { %4566 = vmatpush.msra.mxu2 %v322_v30  ;;  %962 = vmatpush.msra.mxu0 %v322_v30  ;;  %v560_v25 = vld [vmem:[%s9038_s0 + $0x770] sm:$0xff]  ;;  %v553_v30 = vld [vmem:[%s9038_s0 + $0x738] sm:$0xff] }
  0x2b   : > { %4582 = vmatpush.msra.mxu3 %v434_v31  ;;  %981 = vmatmul.f32.vlgmr.msra.gmra.mxu2 %v286_v32  ;;  %v672_v29 = vld [vmem:[%s9038_s0 + $0xaf0] sm:$0xff]  ;;  %v665_v32 = vld [vmem:[%s9038_s0 + $0xab8] sm:$0xff] }
  0x2c   : > { %1034 = vmatmul.f32.vlgmr.msra.gmra.mxu3 %v287_v33  ;;  %1053 = vmatpush.msrb.mxu2 %v651_v34  ;;  %v546_v33 = vld [vmem:[%s9038_s0 + $0x700] sm:$0xff] }
  0x2d   : > { %1106 = vmatpush.msrb.mxu3 %v763_v35  ;;  %1015 = vmatpush.msra.mxu1 %v434_v31  ;;  %v798_v31 = vld [vmem:[%s9038_s0 + $0xee0] sm:$0xff]  ;;  %v428_v35 = vld [vmem:[%s9038_s0 + $0x350] sm:$0xff] }
  0x2e   : > { %1054 = vmatpush.msrb.mxu2 %v644_v36  ;;  %963 = vmatmul.f32.vlgmr.msra.gmra.mxu0 %v5012_v38  ;;  %v5184_v34 = vld [vmem:[%s4989_s6 + $0xc0] sm:$0xff]  ;;  %v757_v36 = vld [vmem:[%s9038_s0 + $0xd98] sm:$0xff] }
  0x2f   : > { %1107 = vmatpush.msrb.mxu3 %v756_v37  ;;  %1016 = vmatmul.f32.vlgmr.msra.gmra.mxu1 %v5015_v39  ;;  %v5193_v37 = vld [vmem:[%s4989_s6 + $0xc8] sm:$0xff] }
  0x30   : > { %1055 = vmatpush.msrb.mxu2 %v637_v40  ;;  %1159 = vmatpush.msrb.mxu0 %v875_v42  ;;  %v791_v40 = vld [vmem:[%s9038_s0 + $0xea8] sm:$0xff]  ;;  %v421_v42 = vld [vmem:[%s9038_s0 + $0x318] sm:$0xff] }
  0x31   : > { %1108 = vmatpush.msrb.mxu3 %v749_v41  ;;  %1224 = vmatpush.msrb.mxu1 %v903_v43  ;;  %v658_v41 = vld [vmem:[%s9038_s0 + $0xa80] sm:$0xff]  ;;  %v784_v43 = vld [vmem:[%s9038_s0 + $0xe70] sm:$0xff] }
  0x32   : > { %1056 = vmatpush.msrb.mxu2 %v630_v44  ;;  %1160 = vmatpush.msrb.mxu0 %v868_v49  ;;  %v540_v44 = vld [vmem:[%s9038_s0 + $0x6d0] sm:$0xff]  ;;  %v414_v49 = vld [vmem:[%s9038_s0 + $0x2e0] sm:$0xff] }
  0x33   : > { %1109 = vmatpush.msrb.mxu3 %v742_v45  ;;  %984 = vmatmul.f32.gmra.mxu2 %v292_v46  ;;  %v5212_v45 = vld [vmem:[%s4989_s6 + $0x210] sm:$0xff]  ;;  %v5215_v46 = vld [vmem:[%s4989_s6 + $0x218] sm:$0xff] }
  0x34   : > { %1037 = vmatmul.f32.gmra.mxu3 %v293_v47  ;;  %1057 = vmatpush.msrb.mxu2 %v623_v48  ;;  %v777_v47 = vld [vmem:[%s9038_s0 + $0xe38] sm:$0xff] }
  0x35   : > { %1110 = vmatpush.msrb.mxu3 %v735_v50  ;;  %1225 = vmatpush.msrb.mxu1 %v896_v51  ;;  %v533_v48 = vld [vmem:[%s9038_s0 + $0x698] sm:$0xff]  ;;  %v770_v50 = vld [vmem:[%s9038_s0 + $0xe00] sm:$0xff] }
  0x36   : > { %1058 = vmatpush.msrb.mxu2 %v616_v52  ;;  %1161 = vmatpush.msrb.mxu0 %v861_v53  ;;  %v526_v51 = vld [vmem:[%s9038_s0 + $0x660] sm:$0xff]  ;;  %v5239_v53 = vld [vmem:[%s4989_s6 + $0xf0] sm:$0xff] }
  0x37   : > { %966 = vmatmul.f32.gmra.mxu0 %v5058_v54  ;;  %1111 = vmatpush.msrb.mxu3 %v728_v55  ;;  %v750_v52 = vld [vmem:[%s9038_s0 + $0xd60] sm:$0xff]  ;;  %v407_v55 = vld [vmem:[%s9038_s0 + $0x2a8] sm:$0xff] }
  0x38   : > { %1019 = vmatmul.f32.gmra.mxu1 %v5064_v56  ;;  %1059 = vmatpush.msrb.mxu2 %v609_v57  ;;  %v5245_v57 = vld [vmem:[%s4989_s6 + $0xf8] sm:$0xff] }
  0x39   : > { %1162 = vmatpush.msrb.mxu0 %v854_v58  ;;  %1112 = vmatpush.msrb.mxu3 %v721_v59  ;;  %v652_v58 = vld [vmem:[%s9038_s0 + $0xa50] sm:$0xff]  ;;  %v519_v59 = vld [vmem:[%s9038_s0 + $0x628] sm:$0xff] }
  0x3a   : > { %1060 = vmatpush.msrb.mxu2 %v602_v60  ;;  %1226 = vmatpush.msrb.mxu1 %v889_v61  ;;  %v400_v60 = vld [vmem:[%s9038_s0 + $0x270] sm:$0xff]  ;;  %v645_v61 = vld [vmem:[%s9038_s0 + $0xa18] sm:$0xff] }
  0x3b   : > { %987 = vmatmul.f32.gmra.mxu2 %v298_v62  ;;  %1163 = vmatpush.msrb.mxu0 %v847_v0  ;;  %v743_v62 = vld [vmem:[%s9038_s0 + $0xd28] sm:$0xff]  ;;  %v5267_v0 = vld [vmem:[%s4989_s6 + $0x18] sm:$0xff] }
  0x3c   : > { %1040 = vmatmul.f32.gmra.mxu3 %v299_v63  ;;  %1061 = vmatpush.msrb.mxu2 %v595_v2  ;;  %v5264_v63 = vld [vmem:[%s4989_s6 + $0x10] sm:$0xff] }
  0x3d   : > { %1113 = vmatpush.msrb.mxu3 %v714_v1  ;;  %1227 = vmatpush.msrb.mxu1 %v882_v5  ;;  %v638_v1 = vld [vmem:[%s9038_s0 + $0x9e0] sm:$0xff]  ;;  %v512_v2 = vld [vmem:[%s9038_s0 + $0x5f0] sm:$0xff]  ;;  %v505_v5 = vld [vmem:[%s9038_s0 + $0x5b8] sm:$0xff] }
  0x3e   : > { %1164 = vmatpush.msrb.mxu0 %v840_v3  ;;  %1062 = vmatpush.msrb.mxu2 %v588_v7  ;;  %v393_v3 = vld [vmem:[%s9038_s0 + $0x238] sm:$0xff]  ;;  %v5288_v7 = vld [vmem:[%s4989_s6 + $0x20] sm:$0xff] }
  0x3f   : > { %1114 = vmatpush.msrb.mxu3 %v707_v4  ;;  %969 = vmatmul.f32.gmra.mxu0 %v5104_v6  ;;  %v631_v4 = vld [vmem:[%s9038_s0 + $0x9a8] sm:$0xff] }
  0x40   : > { %1022 = vmatmul.f32.gmra.mxu1 %v5110_v8  ;;  %1165 = vmatpush.msrb.mxu0 %v833_v9  ;;  %v386_v9 = vld [vmem:[%s9038_s0 + $0x200] sm:$0xff] }
  0x41   : > { %1115 = vmatpush.msrb.mxu3 %v700_v10  ;;  %1063 = vmatpush.msrb.mxu2 %v581_v11  ;;  %v736_v10 = vld [vmem:[%s9038_s0 + $0xcf0] sm:$0xff]  ;;  %v5297_v11 = vld [vmem:[%s4989_s6 + $0x28] sm:$0xff] }
  0x42   : > { %1166 = vmatpush.msrb.mxu0 %v826_v12  ;;  %1424 = vmatpush.msra.mxu1 %v764_v21  ;;  %v624_v12 = vld [vmem:[%s9038_s0 + $0x970] sm:$0xff]  ;;  %v491_v21 = vld [vmem:[%s9038_s0 + $0x548] sm:$0xff] }
  0x43   : > { %990 = vmatmul.f32.gmra.mxu2 %v304_v13  ;;  %1116 = vmatpush.msrb.mxu3 %v693_v15  ;;  %v498_v13 = vld [vmem:[%s9038_s0 + $0x580] sm:$0xff]  ;;  %v5310_v15 = vld [vmem:[%s4989_s6 + $0x48] sm:$0xff] }
  0x44   : > { %1043 = vmatmul.f32.gmra.mxu3 %v305_v14  ;;  %1064 = vmatpush.msrb.mxu2 %v574_v16  ;;  %v5307_v14 = vld [vmem:[%s4989_s6 + $0x40] sm:$0xff]  ;;  %v5317_v16 = vld [vmem:[%s4989_s6 + $0x50] sm:$0xff] }
  0x45   : > { %1167 = vmatpush.msrb.mxu0 %v819_v17  ;;  %1117 = vmatpush.msrb.mxu3 %v686_v18  ;;  %v617_v17 = vld [vmem:[%s9038_s0 + $0x938] sm:$0xff]  ;;  %v379_v18 = vld [vmem:[%s9038_s0 + $0x1c8] sm:$0xff] }
  0x46   : > { %1065 = vmatpush.msrb.mxu2 %v567_v19  ;;  %1425 = vmatpush.msra.mxu1 %v757_v36  ;;  %v729_v19 = vld [vmem:[%s9038_s0 + $0xcb8] sm:$0xff]  ;;  %v5374_v36 = vld [vmem:[%s4989_s6 + $0xa0] sm:$0xff] }
  0x47   : > { %972 = vmatmul.f32.gmra.mxu0 %v5144_v20  ;;  %1118 = vmatpush.msrb.mxu3 %v679_v24  ;;  %v5335_v24 = vld [vmem:[%s4989_s6 + $0x58] sm:$0xff] }
  0x48   : > { %1025 = vmatmul.f32.gmra.mxu1 %v5150_v22  ;;  %1168 = vmatpush.msrb.mxu0 %v812_v23  ;;  %v610_v23 = vld [vmem:[%s9038_s0 + $0x900] sm:$0xff] }
  0x49   : > { %1066 = vmatpush.msrb.mxu2 %v560_v25  ;;  %1119 = vmatpush.msrb.mxu3 %v672_v29  ;;  %v5339_v25 = vld [vmem:[%s4989_s6 + $0x70] sm:$0xff]  ;;  %v722_v29 = vld [vmem:[%s9038_s0 + $0xc80] sm:$0xff] }
  0x4a   : > { %1169 = vmatpush.msrb.mxu0 %v805_v26  ;;  %1426 = vmatpush.msra.mxu1 %v750_v52  ;;  %v5342_v26 = vld [vmem:[%s4989_s6 + $0x78] sm:$0xff]  ;;  %v5416_v52 = vld [vmem:[%s4989_s6 + $0xe0] sm:$0xff] }
  0x4b   : > { %993 = vmatmul.f32.gmra.mxu2 %v310_v27  ;;  %1120 = vmatpush.msrb.mxu3 %v665_v32  ;;  %v5349_v27 = vld [vmem:[%s4989_s6 + $0x80] sm:$0xff]  ;;  %v365_v32 = vld [vmem:[%s9038_s0 + $0x158] sm:$0xff] }
  0x4c   : > { %1046 = vmatmul.f32.gmra.mxu3 %v311_v28  ;;  %1067 = vmatpush.msrb.mxu2 %v553_v30  ;;  %v372_v28 = vld [vmem:[%s9038_s0 + $0x190] sm:$0xff] }
  0x4d   : > { %1170 = vmatpush.msrb.mxu0 %v798_v31  ;;  %1121 = vmatpush.msrb.mxu3 %v658_v41  ;;  %v484_v30 = vld [vmem:[%s9038_s0 + $0x510] sm:$0xff]  ;;  %v603_v31 = vld [vmem:[%s9038_s0 + $0x8c8] sm:$0xff] }
  0x4e   : > { %1068 = vmatpush.msrb.mxu2 %v546_v33  ;;  %1427 = vmatpush.msra.mxu1 %v743_v62  ;;  %v5367_v33 = vld [vmem:[%s4989_s6 + $0x88] sm:$0xff]  ;;  %v5384_v41 = vld [vmem:[%s4989_s6 + $0xb0] sm:$0xff] }
  0x4f   : > { %975 = vmatmul.f32.gmra.mxu0 %v5184_v34  ;;  %1318 = vmatpush.msra.mxu3 %v540_v44  ;;  %v358_v44 = vld [vmem:[%s9038_s0 + $0x120] sm:$0xff]  ;;  %v5434_v62 = vld [vmem:[%s4989_s6 + $0xe8] sm:$0xff] }
  0x50   : > { %1265 = vmatpush.msra.mxu2 %v428_v35  ;;  %1028 = vmatmul.f32.gmra.mxu1 %v5193_v37  ;;  %v715_v35 = vld [vmem:[%s9038_s0 + $0xc48] sm:$0xff] }
  0x51   : > { %1171 = vmatpush.msrb.mxu0 %v791_v40  ;;  %1319 = vmatpush.msra.mxu3 %v533_v48  ;;  %v5377_v40 = vld [vmem:[%s4989_s6 + $0xa8] sm:$0xff]  ;;  %v470_v48 = vld [vmem:[%s9038_s0 + $0x4a0] sm:$0xff] }
  0x52   : > { %1266 = vmatpush.msra.mxu2 %v421_v42  ;;  %1428 = vmatpush.msra.mxu1 %v736_v10  ;;  %v477_v42 = vld [vmem:[%s9038_s0 + $0x4d8] sm:$0xff]  ;;  %v575_v10 = vld [vmem:[%s9038_s0 + $0x7e8] sm:$0xff] }
  0x53   : > { %1172 = vmatpush.msrb.mxu0 %v784_v43  ;;  %996 = vmatmul.f32.gmra.mxu2 %v5212_v45  ;;  %v596_v43 = vld [vmem:[%s9038_s0 + $0x890] sm:$0xff] }
  0x54   : > { %1049 = vmatmul.f32.gmra.mxu3 %v5215_v46  ;;  %1267 = vmatpush.msra.mxu2 %v414_v49  ;;  %v5402_v49 = vld [vmem:[%s4989_s6 + $0xb8] sm:$0xff] }
  0x55   : > { %1173 = vmatpush.msrb.mxu0 %v777_v47  ;;  %1320 = vmatpush.msra.mxu3 %v526_v51  ;;  %v708_v47 = vld [vmem:[%s9038_s0 + $0xc10] sm:$0xff]  ;;  %v5409_v51 = vld [vmem:[%s4989_s6 + $0xd8] sm:$0xff] }
  0x56   : > { %1268 = vmatpush.msra.mxu2 %v407_v55  ;;  %1429 = vmatpush.msra.mxu1 %v729_v19  ;;  %v589_v55 = vld [vmem:[%s9038_s0 + $0x858] sm:$0xff] }
  0x57   : > { %1174 = vmatpush.msrb.mxu0 %v770_v50  ;;  %1321 = vmatpush.msra.mxu3 %v519_v59  ;;  %v5406_v50 = vld [vmem:[%s4989_s6 + $0xd0] sm:$0xff]  ;;  %v701_v59 = vld [vmem:[%s9038_s0 + $0xbd8] sm:$0xff] }
  0x58   : > { %978 = vmatmul.f32.gmra.mxu0 %v5239_v53  ;;  %1031 = vmatmul.f32.gmra.mxu1 %v5245_v57  ;;  %v5476_v19 = vld [vmem:[%s4989_s6 + $0x138] sm:$0xff] }
  0x59   : > { %1371 = vmatpush.msra.mxu0 %v652_v58  ;;  %1269 = vmatpush.msra.mxu2 %v400_v60  ;;  %v351_v58 = vld [vmem:[%s9038_s0 + $0xe8] sm:$0xff] }
  0x5a   : > { %1322 = vmatpush.msra.mxu3 %v512_v2  ;;  %1430 = vmatpush.msra.mxu1 %v722_v29  ;;  %v463_v60 = vld [vmem:[%s9038_s0 + $0x468] sm:$0xff] }
  0x5b   : > { %1372 = vmatpush.msra.mxu0 %v645_v61  ;;  %1069 = vmatmul.f32.vlgmr.msrb.gmra.mxu2 %v5264_v63  ;;  %v582_v61 = vld [vmem:[%s9038_s0 + $0x820] sm:$0xff]  ;;  %v5441_v2 = vld [vmem:[%s4989_s6 + $0x108] sm:$0xff] }
  0x5c   : > { %1122 = vmatmul.f32.vlgmr.msrb.gmra.mxu3 %v5267_v0  ;;  %1270 = vmatpush.msra.mxu2 %v393_v3  ;;  %v5448_v3 = vld [vmem:[%s4989_s6 + $0x110] sm:$0xff]  ;;  %v5492_v29 = vld [vmem:[%s4989_s6 + $0x148] sm:$0xff] }
  0x5d   : > { %1373 = vmatpush.msra.mxu0 %v638_v1  ;;  %1323 = vmatpush.msra.mxu3 %v505_v5  ;;  %v5438_v1 = vld [vmem:[%s4989_s6 + $0x100] sm:$0xff]  ;;  %9080 = vst [vmem:[#allocation2_spill] sm:$0xff] %v5448_v3 }
  0x5e   : > { %1271 = vmatpush.msra.mxu2 %v386_v9  ;;  %1431 = vmatpush.msra.mxu1 %v715_v35  ;;  %v694_v5 = vld [vmem:[%s9038_s0 + $0xba0] sm:$0xff]  ;;  %v456_v9 = vld [vmem:[%s9038_s0 + $0x430] sm:$0xff]  ;;  %9083 = vst [vmem:[#allocation5_spill] sm:$0xff] %v5492_v29 }
  0x5f   : > { %1374 = vmatpush.msra.mxu0 %v631_v4  ;;  %1324 = vmatpush.msra.mxu3 %v498_v13  ;;  %v344_v4 = vld [vmem:[%s9038_s0 + $0xb0] sm:$0xff]  ;;  %v5466_v13 = vld [vmem:[%s4989_s6 + $0x118] sm:$0xff]  ;;  %v5505_v35 = vld [vmem:[%s4989_s6 + $0x160] sm:$0xff] }
  0x60   : > { %1175 = vmatmul.f32.vlgmr.msrb.gmra.mxu0 %v5288_v7  ;;  %4465 = vmatmul.msk.f32.vlgmr.msrb.gmra.mxu1 %vm910_vm0, %v5297_v11  ;;  %9081 = vst [vmem:[#allocation3_spill] sm:$0xff] %v5466_v13 }
  0x61   : > { %1375 = vmatpush.msra.mxu0 %v624_v12  ;;  %1272 = vmatpush.msra.mxu2 %v379_v18  ;;  %v337_v12 = vld [vmem:[%s9038_s0 + $0x78] sm:$0xff]  ;;  %v5473_v18 = vld [vmem:[%s4989_s6 + $0x130] sm:$0xff] }
  0x62   : > { %1325 = vmatpush.msra.mxu3 %v491_v21  ;;  %1432 = vmatpush.msra.mxu1 %v708_v47  ;;  %v449_v21 = vld [vmem:[%s9038_s0 + $0x3f8] sm:$0xff]  ;;  %v5521_v47 = vld [vmem:[%s4989_s6 + $0x170] sm:$0xff] }
  0x63   : > { %1072 = vmatmul.f32.gmra.mxu2 %v5307_v14  ;;  %1376 = vmatpush.msra.mxu0 %v617_v17  ;;  %v687_v17 = vld [vmem:[%s9038_s0 + $0xb68] sm:$0xff]  ;;  %9084 = vst [vmem:[#allocation6_spill] sm:$0xff] %v5521_v47 }
  0x64   : > { %1125 = vmatmul.f32.gmra.mxu3 %v5310_v15  ;;  %1273 = vmatpush.msra.mxu2 %v372_v28  ;;  %v5489_v28 = vld [vmem:[%s4989_s6 + $0x140] sm:$0xff] }
  0x65   : > { %1377 = vmatpush.msra.mxu0 %v610_v23  ;;  %1326 = vmatpush.msra.mxu3 %v484_v30  ;;  %v568_v23 = vld [vmem:[%s9038_s0 + $0x7b0] sm:$0xff]  ;;  %9082 = vst [vmem:[#allocation4_spill] sm:$0xff] %v5489_v28  ;;  %v330_v30 = vld [vmem:[%s9038_s0 + $0x40] sm:$0xff] }
  0x66   : > { %1274 = vmatpush.msra.mxu2 %v365_v32  ;;  %1433 = vmatpush.msra.mxu1 %v701_v59  ;;  %v442_v32 = vld [vmem:[%s9038_s0 + $0x3c0] sm:$0xff] }
  0x67   : > { %1378 = vmatpush.msra.mxu0 %v603_v31  ;;  %1327 = vmatpush.msra.mxu3 %v477_v42  ;;  %v680_v31 = vld [vmem:[%s9038_s0 + $0xb30] sm:$0xff]  ;;  %v5508_v42 = vld [vmem:[%s4989_s6 + $0x168] sm:$0xff]  ;;  %v554_v59 = vld [vmem:[%s9038_s0 + $0x740] sm:$0xff] }
  0x68   : > { %1178 = vmatmul.f32.gmra.mxu0 %v5317_v16  ;;  %4466 = vmatmul.msk.f32.gmra.mxu1 %vm910_vm0, %v5335_v24 }
  0x69   : > { %1379 = vmatpush.msra.mxu0 %v596_v43  ;;  %1275 = vmatpush.msra.mxu2 %v358_v44  ;;  %v561_v43 = vld [vmem:[%s9038_s0 + $0x778] sm:$0xff]  ;;  %v323_v44 = vld [vmem:[%s9038_s0 + $0x8] sm:$0xff] }
  0x6a   : > { %1328 = vmatpush.msra.mxu3 %v470_v48  ;;  %1434 = vmatpush.msra.mxu1 %v694_v5  ;;  %v673_v48 = vld [vmem:[%s9038_s0 + $0xaf8] sm:$0xff]  ;;  %v876_v5 = vld [vmem:[%s9038_s0 + $0x1150] sm:$0xff] }
  0x6b   : > { %1075 = vmatmul.f32.gmra.mxu2 %v5339_v25  ;;  %1380 = vmatpush.msra.mxu0 %v589_v55  ;;  %v5527_v55 = vld [vmem:[%s4989_s6 + $0x178] sm:$0xff] }
  0x6c   : > { %1128 = vmatmul.f32.gmra.mxu3 %v5342_v26  ;;  %1276 = vmatpush.msra.mxu2 %v351_v58  ;;  %9085 = vst [vmem:[#allocation7_spill] sm:$0xff] %v5527_v55  ;;  %v435_v58 = vld [vmem:[%s9038_s0 + $0x388] sm:$0xff] }
  0x6d   : > { %1329 = vmatpush.msra.mxu3 %v463_v60  ;;  %1381 = vmatpush.msra.mxu0 %v582_v61  ;;  %v5537_v60 = vld [vmem:[%s4989_s6 + $0x190] sm:$0xff]  ;;  %v5540_v61 = vld [vmem:[%s4989_s6 + $0x198] sm:$0xff] }
  0x6e   : > { %1277 = vmatpush.msra.mxu2 %v344_v4  ;;  %1435 = vmatpush.msra.mxu1 %v687_v17  ;;  %v666_v4 = vld [vmem:[%s9038_s0 + $0xac0] sm:$0xff]  ;;  %v547_v17 = vld [vmem:[%s9038_s0 + $0x708] sm:$0xff] }
  0x6f   : > { %1330 = vmatpush.msra.mxu3 %v456_v9  ;;  %1382 = vmatpush.msra.mxu0 %v575_v10  ;;  %v5553_v9 = vld [vmem:[%s4989_s6 + $0x1a0] sm:$0xff]  ;;  %v904_v10 = vld [vmem:[%s9038_s0 + $0x1230] sm:$0xff] }
  0x70   : > { %1181 = vmatmul.f32.gmra.mxu0 %v5349_v27  ;;  %4467 = vmatmul.msk.f32.gmra.mxu1 %vm910_vm0, %v5367_v33  ;;  %9086 = vst [vmem:[#allocation8_spill] sm:$0xff] %v5553_v9 }
  0x71   : > { %1278 = vmatpush.msra.mxu2 %v337_v12  ;;  %1331 = vmatpush.msra.mxu3 %v449_v21  ;;  %v5559_v12 = vld [vmem:[%s4989_s6 + $0x1a8] sm:$0xff] }
  0x72   : > { %1383 = vmatpush.msra.mxu0 %v568_v23  ;;  %1436 = vmatpush.msra.mxu1 %v680_v31  ;;  %9087 = vst [vmem:[#allocation9_spill] sm:$0xff] %v5559_v12  ;;  %v659_v21 = vld [vmem:[%s9038_s0 + $0xa88] sm:$0xff]  ;;  %v869_v23 = vld [vmem:[%s9038_s0 + $0x1118] sm:$0xff] }
  0x73   : > { %1078 = vmatmul.f32.gmra.mxu2 %v5374_v36  ;;  %1332 = vmatpush.msra.mxu3 %v442_v32  ;;  %v5575_v31 = vld [vmem:[%s4989_s6 + $0x1c8] sm:$0xff]  ;;  %v429_v32 = vld [vmem:[%s9038_s0 + $0x358] sm:$0xff] }
  0x74   : > { %1131 = vmatmul.f32.gmra.mxu3 %v5377_v40  ;;  %1279 = vmatpush.msra.mxu2 %v330_v30  ;;  %v5572_v30 = vld [vmem:[%s4989_s6 + $0x1c0] sm:$0xff] }
  0x75   : > { %1384 = vmatpush.msra.mxu0 %v561_v43  ;;  %1437 = vmatpush.msra.mxu1 %v673_v48  ;;  %v5585_v43 = vld [vmem:[%s4989_s6 + $0x1d0] sm:$0xff]  ;;  %v862_v48 = vld [vmem:[%s9038_s0 + $0x10e0] sm:$0xff] }
  0x76   : > { %1280 = vmatpush.msra.mxu2 %v323_v44  ;;  %1333 = vmatpush.msra.mxu3 %v435_v58  ;;  %9088 = vst [vmem:[#allocation10_spill] sm:$0xff] %v5585_v43  ;;  %v5588_v44 = vld [vmem:[%s4989_s6 + $0x1d8] sm:$0xff] }
  0x77   : > { %1385 = vmatpush.msra.mxu0 %v554_v59  ;;  %1438 = vmatpush.msra.mxu1 %v666_v4  ;;  %9089 = vst [vmem:[#allocation11_spill] sm:$0xff] %v5588_v44  ;;  %v541_v58 = vld [vmem:[%s9038_s0 + $0x6d8] sm:$0xff]  ;;  %v5598_v59 = vld [vmem:[%s4989_s6 + $0x1f0] sm:$0xff] }
  0x78   : > { %1184 = vmatmul.f32.gmra.mxu0 %v5384_v41  ;;  %4468 = vmatmul.msk.f32.gmra.mxu1 %vm910_vm0, %v5402_v49  ;;  %v5601_v4 = vld [vmem:[%s4989_s6 + $0x1f8] sm:$0xff] }
  0x79   : > { %1477 = vmatpush.msrb.mxu2 %v876_v5  ;;  %1542 = vmatpush.msrb.mxu3 %v904_v10  ;;  %v422_v5 = vld [vmem:[%s9038_s0 + $0x320] sm:$0xff]  ;;  %v855_v10 = vld [vmem:[%s9038_s0 + $0x10a8] sm:$0xff] }
  0x7a   : > { %1386 = vmatpush.msra.mxu0 %v547_v17  ;;  %1439 = vmatpush.msra.mxu1 %v659_v21  ;;  %v534_v17 = vld [vmem:[%s9038_s0 + $0x6a0] sm:$0xff] }
  0x7b   : > { %1081 = vmatmul.f32.gmra.mxu2 %v5406_v50 }
  0x7c   : > { %1134 = vmatmul.f32.gmra.mxu3 %v5409_v51  ;;  %1478 = vmatpush.msrb.mxu2 %v869_v23 }
  0x7d   : > { %1583 = vmatpush.msrb.mxu0 %v429_v32  ;;  %1636 = vmatpush.msrb.mxu1 %v541_v58  ;;  %v5621_v32 = vld [vmem:[%s4989_s6 + $0x200] sm:$0xff] }
  0x7e   : > { %1479 = vmatpush.msrb.mxu2 %v862_v48  ;;  %9090 = vst [vmem:[#allocation12_spill] sm:$0xff] %v5621_v32  ;;  %v5624_v48 = vld [vmem:[%s4989_s6 + $0x208] sm:$0xff] }
  0x7f   : > { %1584 = vmatpush.msrb.mxu0 %v422_v5  ;;  %9091 = vst [vmem:[#allocation13_spill] sm:$0xff] %v5624_v48  ;;  %1637 = vmatpush.msrb.mxu1 %v534_v17  ;;  %v527_v5 = vld [vmem:[%s9038_s0 + $0x668] sm:$0xff] }
  0x80   : > { %1187 = vmatmul.f32.gmra.mxu0 %v5416_v52  ;;  %4469 = vmatmul.msk.f32.gmra.mxu1 %vm910_vm0, %v5434_v62 }
  0x81   : > { %1480 = vmatpush.msrb.mxu2 %v855_v10  ;;  %v897_v10 = vld [vmem:[%s9038_s0 + $0x11f8] sm:$0xff]  ;;  %1638 = vmatpush.msrb.mxu1 %v527_v5  ;;  %v520_v5 = vld [vmem:[%s9038_s0 + $0x630] sm:$0xff] }
  0x82   : > { %1543 = vmatpush.msrb.mxu3 %v897_v10 }
  0x83   : > { %1084 = vmatmul.f32.gmra.mxu2 %v5438_v1  ;;  %1639 = vmatpush.msrb.mxu1 %v520_v5 }
  0x84   : > { %1137 = vmatmul.f32.gmra.mxu3 %v5441_v2 }
  0x88   : > { %1190 = vmatmul.f32.gmra.mxu0 %v5448_v3  ;;  %4470 = vmatmul.msk.f32.gmra.mxu1 %vm910_vm0, %v5466_v13 }
  0x8b   : > { %1087 = vmatmul.f32.gmra.mxu2 %v5473_v18 }
  0x8c   : > { %1140 = vmatmul.f32.gmra.mxu3 %v5476_v19 }
  0x90   : > { %1193 = vmatmul.f32.gmra.mxu0 %v5489_v28  ;;  %4471 = vmatmul.msk.f32.gmra.mxu1 %vm910_vm0, %v5492_v29  ;;  %v408_v28 = vld [vmem:[%s9038_s0 + $0x2b0] sm:$0xff] }
  0x93   : > { %1090 = vmatmul.f32.gmra.mxu2 %v5505_v35 }
  0x94   : > { %1143 = vmatmul.f32.gmra.mxu3 %v5508_v42 }
  0x98   : > { %1196 = vmatmul.f32.gmra.mxu0 %v5521_v47  ;;  %4472 = vmatmul.msk.f32.gmra.mxu1 %vm910_vm0, %v5527_v55  ;;  %v5636_v55 = vld [vmem:[%s4989_s6 + $0x228] sm:$0xff] }
  0x9b   : > { %1093 = vmatmul.f32.gmra.mxu2 %v5537_v60 }
  0x9c   : > { %1146 = vmatmul.f32.gmra.mxu3 %v5540_v61 }
  0xa0   : > { %1199 = vmatmul.f32.gmra.mxu0 %v5553_v9  ;;  %4473 = vmatmul.msk.f32.gmra.mxu1 %vm910_vm0, %v5559_v12  ;;  %v415_v12 = vld [vmem:[%s9038_s0 + $0x2e8] sm:$0xff]  ;;  %v5633_v9 = vld [vmem:[%s4989_s6 + $0x220] sm:$0xff] }
  0xa1   : > { %1585 = vmatpush.msrb.mxu0 %v415_v12 }
  0xa3   : > { %1096 = vmatmul.f32.gmra.mxu2 %v5572_v30  ;;  %1586 = vmatpush.msrb.mxu0 %v408_v28 }
  0xa4   : > { %1149 = vmatmul.f32.gmra.mxu3 %v5575_v31 }
  0xa8   : > { %1202 = vmatmul.f32.gmra.mxu0 %v5585_v43  ;;  %4474 = vmatmul.msk.f32.gmra.mxu1 %vm910_vm0, %v5588_v44 }
  0xab   : > { %1099 = vmatmul.f32.gmra.mxu2 %v5598_v59  ;;  %v5616_v21 = vpop.f32.mrf.mxu0 }
  0xac   : > { %1152 = vmatmul.f32.gmra.mxu3 %v5601_v4  ;;  %v5618_v23 = vpop.f32.mrf.mxu1 }
  0xae   : > { %v982_v58 = vpop.f32.mrf.mxu2 }
  0xaf   : > { %v1035_v44 = vpop.f32.mrf.mxu3 }
  0xb0   : > { %v5626_v43 = vadd.f32 %v1035_v44, %v982_v58  ;;  %1205 = vmatmul.f32.gmra.mxu0 %v5621_v32  ;;  %4475 = vmatmul.msk.f32.gmra.mxu1 %vm910_vm0, %v5624_v48  ;;  %v848_v44 = vld [vmem:[%s9038_s0 + $0x1070] sm:$0xff]  ;;  %v5659_v48 = vld [vmem:[%s4989_s6 + $0x238] sm:$0xff] }
  0xb1   : > { %v5654_v58 = vld [vmem:[%s4989_s6 + $0x230] sm:$0xff]  ;;  %1481 = vmatpush.msrb.mxu2 %v848_v44  ;;  %v841_v44 = vld [vmem:[%s9038_s0 + $0x1038] sm:$0xff] }
  0xb2   : > { %9092 = vst [vmem:[#allocation14_spill] sm:$0xff] %v5654_v58 }
  0xb3   : > { %1102 = vmatmul.f32.gmra.mxu2 %v5633_v9 }
  0xb4   : > { %1155 = vmatmul.f32.gmra.mxu3 %v5636_v55  ;;  %v5651_v17 = vpop.f32.mrf.mxu0  ;;  %1482 = vmatpush.msrb.mxu2 %v841_v44  ;;  %v394_v44 = vld [vmem:[%s9038_s0 + $0x240] sm:$0xff] }
  0xb5   : > { %v5656_v12 = vpop.f32.mrf.mxu1 }
  0xb6   : > { %v985_v32 = vpop.f32.mrf.mxu2 }
  0xb7   : > { %v1038_v47 = vpop.f32.mrf.mxu3 }
  0xb8   : > { %v5661_v29 = vadd.f32 %v1038_v47, %v985_v32  ;;  %1208 = vmatmul.f32.gmra.mxu0 %v5654_v58  ;;  %4476 = vmatmul.msk.f32.gmra.mxu1 %vm910_vm0, %v5659_v48  ;;  %v401_v47 = vld [vmem:[%s9038_s0 + $0x278] sm:$0xff] }
  0xb9   : > { %1587 = vmatpush.msrb.mxu0 %v401_v47 }
  0xbb   : > { %1281 = vmatmul.f32.vlgmr.msra.gmra.mxu2 %v5012_v38  ;;  %v834_v38 = vld [vmem:[%s9038_s0 + $0x1000] sm:$0xff]  ;;  %1588 = vmatpush.msrb.mxu0 %v394_v44 }
  0xbc   : > { %1334 = vmatmul.f32.vlgmr.msra.gmra.mxu3 %v5015_v39  ;;  %v5680_v32 = vpop.f32.mrf.mxu0  ;;  %v513_v39 = vld [vmem:[%s9038_s0 + $0x5f8] sm:$0xff]  ;;  %1483 = vmatpush.msrb.mxu2 %v834_v38 }
  0xbd   : > { %v5682_v10 = vpop.f32.mrf.mxu1  ;;  %1640 = vmatpush.msrb.mxu1 %v513_v39 }
  0xbe   : > { %v988_v58 = vpop.f32.mrf.mxu2 }
  0xbf   : > { %v1041_v13 = vpop.f32.mrf.mxu3 }
  0xc0   : > { %v5684_v3 = vadd.f32 %v1041_v13, %v988_v58  ;;  %1387 = vmatmul.f32.vlgmr.msra.gmra.mxu0 %v5264_v63  ;;  %1440 = vmatmul.f32.vlgmr.msra.gmra.mxu1 %v5267_v0 }
  0xc3   : > { %1284 = vmatmul.f32.gmra.mxu2 %v5058_v54  ;;  %v827_v54 = vld [vmem:[%s9038_s0 + $0xfc8] sm:$0xff] }
  0xc4   : > { %1337 = vmatmul.f32.gmra.mxu3 %v5064_v56  ;;  %v5696_v13 = vpop.f32.mrf.mxu0  ;;  %v506_v56 = vld [vmem:[%s9038_s0 + $0x5c0] sm:$0xff]  ;;  %1484 = vmatpush.msrb.mxu2 %v827_v54 }
  0xc5   : > { %v5698_v28 = vpop.f32.mrf.mxu1  ;;  %1641 = vmatpush.msrb.mxu1 %v506_v56 }
  0xc6   : > { %v991_v63 = vpop.f32.mrf.mxu2 }
  0xc7   : > { %v1044_v0 = vpop.f32.mrf.mxu3 }
  0xc8   : > { %v5700_v58 = vadd.f32 %v1044_v0, %v991_v63  ;;  %1390 = vmatmul.f32.gmra.mxu0 %v5307_v14  ;;  %1443 = vmatmul.f32.gmra.mxu1 %v5310_v15  ;;  %v387_v14 = vld [vmem:[%s9038_s0 + $0x208] sm:$0xff]  ;;  %v890_v15 = vld [vmem:[%s9038_s0 + $0x11c0] sm:$0xff]  ;;  %v813_v0 = vld [vmem:[%s9038_s0 + $0xf58] sm:$0xff] }
  0xc9   : > { %1589 = vmatpush.msrb.mxu0 %v387_v14  ;;  %1544 = vmatpush.msrb.mxu3 %v890_v15 }
  0xcb   : > { %1287 = vmatmul.f32.gmra.mxu2 %v5104_v6  ;;  %v820_v6 = vld [vmem:[%s9038_s0 + $0xf90] sm:$0xff] }
  0xcc   : > { %1340 = vmatmul.f32.gmra.mxu3 %v5110_v8  ;;  %v5718_v5 = vpop.f32.mrf.mxu0  ;;  %v499_v8 = vld [vmem:[%s9038_s0 + $0x588] sm:$0xff]  ;;  %1485 = vmatpush.msrb.mxu2 %v820_v6 }
  0xcd   : > { %v5720_v47 = vpop.f32.mrf.mxu1  ;;  %1642 = vmatpush.msrb.mxu1 %v499_v8 }
  0xce   : > { %v994_v38 = vpop.f32.mrf.mxu2  ;;  %1486 = vmatpush.msrb.mxu2 %v813_v0  ;;  %v366_v0 = vld [vmem:[%s9038_s0 + $0x160] sm:$0xff] }
  0xcf   : > { %v1047_v39 = vpop.f32.mrf.mxu3 }
  0xd0   : > { %v5722_v63 = vadd.f32 %v1047_v39, %v994_v38  ;;  %1393 = vmatmul.f32.gmra.mxu0 %v5339_v25  ;;  %1446 = vmatmul.f32.gmra.mxu1 %v5342_v26  ;;  %v380_v25 = vld [vmem:[%s9038_s0 + $0x1d0] sm:$0xff]  ;;  %v485_v39 = vld [vmem:[%s9038_s0 + $0x518] sm:$0xff] }
  0xd1   : > { %1590 = vmatpush.msrb.mxu0 %v380_v25  ;;  %v492_v26 = vld [vmem:[%s9038_s0 + $0x550] sm:$0xff] }
  0xd2   : > { %1643 = vmatpush.msrb.mxu1 %v492_v26  ;;  %v1021_v26 = vadd.f32 %v5656_v12, %v5651_v17  ;;  %v883_v17 = vld [vmem:[%s9038_s0 + $0x1188] sm:$0xff] }
  0xd3   : > { %1290 = vmatmul.f32.gmra.mxu2 %v5144_v20  ;;  %v373_v20 = vld [vmem:[%s9038_s0 + $0x198] sm:$0xff]  ;;  %1545 = vmatpush.msrb.mxu3 %v883_v17  ;;  %v338_v17 = vld [vmem:[%s9038_s0 + $0x80] sm:$0xff] }
  0xd4   : > { %1343 = vmatmul.f32.gmra.mxu3 %v5150_v22  ;;  %1591 = vmatpush.msrb.mxu0 %v373_v20  ;;  %v806_v22 = vld [vmem:[%s9038_s0 + $0xf20] sm:$0xff] }
  0xd5   : > { %v5746_v44 = vpop.f32.mrf.mxu0  ;;  %v5748_v54 = vpop.f32.mrf.mxu1  ;;  %1487 = vmatpush.msrb.mxu2 %v806_v22  ;;  %1644 = vmatpush.msrb.mxu1 %v485_v39  ;;  %v792_v22 = vld [vmem:[%s9038_s0 + $0xeb0] sm:$0xff]  ;;  %v471_v39 = vld [vmem:[%s9038_s0 + $0x4a8] sm:$0xff] }
  0xd6   : > { %v997_v56 = vpop.f32.mrf.mxu2  ;;  %1592 = vmatpush.msrb.mxu0 %v366_v0 }
  0xd7   : > { %v1050_v14 = vpop.f32.mrf.mxu3 }
  0xd8   : > { %v5750_v38 = vadd.f32 %v1050_v14, %v997_v56  ;;  %1396 = vmatmul.f32.gmra.mxu0 %v5374_v36  ;;  %1449 = vmatmul.f32.gmra.mxu1 %v5377_v40  ;;  %v1018_v40 = vadd.f32 %v5618_v23, %v5616_v21  ;;  %v359_v23 = vld [vmem:[%s9038_s0 + $0x128] sm:$0xff] }
  0xd9   : > { %1593 = vmatpush.msrb.mxu0 %v359_v23  ;;  %v345_v23 = vld [vmem:[%s9038_s0 + $0xb8] sm:$0xff] }
  0xdb   : > { %1293 = vmatmul.f32.gmra.mxu2 %v5184_v34  ;;  %v799_v34 = vld [vmem:[%s9038_s0 + $0xee8] sm:$0xff] }
  0xdc   : > { %1346 = vmatmul.f32.gmra.mxu3 %v5193_v37  ;;  %v478_v37 = vld [vmem:[%s9038_s0 + $0x4e0] sm:$0xff]  ;;  %1488 = vmatpush.msrb.mxu2 %v799_v34 }
  0xdd   : > { %v1176_v36 = vpop.f32.mrf.mxu0  ;;  %v1229_v6 = vpop.f32.mrf.mxu1  ;;  %1645 = vmatpush.msrb.mxu1 %v478_v37 }
  0xde   : > { %v1070_v8 = vpop.f32.mrf.mxu2  ;;  %1489 = vmatpush.msrb.mxu2 %v792_v22 }
  0xdf   : > { %v1123_v15 = vpop.f32.mrf.mxu3  ;;  %v1071_v25 = vadd.f32 %v1070_v8, %v1018_v40  ;;  %1646 = vmatpush.msrb.mxu1 %v471_v39  ;;  %v5807_v40 = vld [vmem:[%s4989_s6 + $0x120] sm:$0xff]  ;;  %v464_v8 = vld [vmem:[%s9038_s0 + $0x470] sm:$0xff] }
  0xe0   : > { %1399 = vmatmul.f32.gmra.mxu0 %v5406_v50  ;;  %1452 = vmatmul.f32.gmra.mxu1 %v5409_v51 }
  0xe1   : > { %v1124_v21 = vadd.f32 %v1123_v15, %v1071_v25  ;;  %1647 = vmatpush.msrb.mxu1 %v464_v8  ;;  %v1024_v25 = vadd.f32 %v5682_v10, %v5680_v32  ;;  %v778_v32 = vld [vmem:[%s9038_s0 + $0xe40] sm:$0xff]  ;;  %v457_v10 = vld [vmem:[%s9038_s0 + $0x438] sm:$0xff] }
  0xe3   : > { %v1177_v50 = vadd.f32 %v1176_v36, %v1124_v21  ;;  %1296 = vmatmul.f32.gmra.mxu2 %v5239_v53  ;;  %1648 = vmatpush.msrb.mxu1 %v457_v10  ;;  %v646_v10 = vld [vmem:[%s9038_s0 + $0xa20] sm:$0xff] }
  0xe4   : > { %1349 = vmatmul.f32.gmra.mxu3 %v5245_v57 }
  0xe5   : > { %v1179_v51 = vpop.f32.mrf.mxu0  ;;  %v1230_v56 = vadd.f32 %v1229_v6, %v1177_v50  ;;  %v1232_v14 = vpop.f32.mrf.mxu1  ;;  %v5811_v6 = vld [vmem:[%s4989_s6 + $0x128] sm:$0xff] }
  0xe6   : > { %v1073_v53 = vpop.f32.mrf.mxu2 }
  0xe7   : > { %v1126_v57 = vpop.f32.mrf.mxu3  ;;  %3173 = vst [vmem:[%s5787_s22] sm:$0xff] %v1230_v56  ;;  %v1074_v20 = vadd.f32 %v1073_v53, %v1021_v26  ;;  %v5835_v26 = vld [vmem:[%s4989_s6 + $0x150] sm:$0xff]  ;;  %v5839_v56 = vld [vmem:[%s4989_s6 + $0x158] sm:$0xff] }
  0xe8   : > { %1402 = vmatmul.f32.gmra.mxu0 %v5438_v1  ;;  %1455 = vmatmul.f32.gmra.mxu1 %v5441_v2  ;;  %v352_v1 = vld [vmem:[%s9038_s0 + $0xf0] sm:$0xff]  ;;  %v785_v2 = vld [vmem:[%s9038_s0 + $0xe78] sm:$0xff] }
  0xe9   : > { %v1127_v12 = vadd.f32 %v1126_v57, %v1074_v20  ;;  %1594 = vmatpush.msrb.mxu0 %v352_v1  ;;  %1490 = vmatpush.msrb.mxu2 %v785_v2  ;;  %v5857_v1 = vld [vmem:[%s4989_s6 + $0x180] sm:$0xff]  ;;  %v331_v2 = vld [vmem:[%s9038_s0 + $0x48] sm:$0xff] }
  0xeb   : > { %v1180_v36 = vadd.f32 %v1179_v51, %v1127_v12  ;;  %1299 = vmatmul.f32.gmra.mxu2 %v5807_v40  ;;  %1595 = vmatpush.msrb.mxu0 %v345_v23  ;;  %v771_v12 = vld [vmem:[%s9038_s0 + $0xe08] sm:$0xff] }
  0xec   : > { %1352 = vmatmul.f32.gmra.mxu3 %v5811_v6  ;;  %1491 = vmatpush.msrb.mxu2 %v778_v32  ;;  %v5889_v32 = vld [vmem:[%s4989_s6 + $0x1b8] sm:$0xff] }
  0xed   : > { %v1182_v15 = vpop.f32.mrf.mxu0  ;;  %v1233_v0 = vadd.f32 %v1232_v14, %v1180_v36  ;;  %v1235_v34 = vpop.f32.mrf.mxu1  ;;  %v1027_v14 = vadd.f32 %v5698_v28, %v5696_v13  ;;  %v450_v13 = vld [vmem:[%s9038_s0 + $0x400] sm:$0xff]  ;;  %1596 = vmatpush.msrb.mxu0 %v338_v17  ;;  %v5861_v36 = vld [vmem:[%s4989_s6 + $0x188] sm:$0xff]  ;;  %v877_v17 = vld [vmem:[%s9038_s0 + $0x1158] sm:$0xff] }
  0xee   : > { %v1076_v37 = vpop.f32.mrf.mxu2  ;;  %1492 = vmatpush.msrb.mxu2 %v771_v12  ;;  %1649 = vmatpush.msrb.mxu1 %v450_v13  ;;  %v5916_v13 = vld [vmem:[%s4989_s6 + $0x1e0] sm:$0xff] }
  0xef   : > { %v1129_v21 = vpop.f32.mrf.mxu3  ;;  %3181 = vst [vmem:[%s5787_s22 + $0x38] sm:$0xff] %v1233_v0  ;;  %v1077_v50 = vadd.f32 %v1076_v37, %v1024_v25  ;;  %1597 = vmatpush.msrb.mxu0 %v331_v2 }
  0xf0   : > { %1405 = vmatmul.f32.gmra.mxu0 %v5473_v18  ;;  %1458 = vmatmul.f32.gmra.mxu1 %v5476_v19 }
  0xf1   : > { %v1130_v51 = vadd.f32 %v1129_v21, %v1077_v50  ;;  %v443_v21 = vld [vmem:[%s9038_s0 + $0x3c8] sm:$0xff]  ;;  %v653_v50 = vld [vmem:[%s9038_s0 + $0xa58] sm:$0xff] }
  0xf2   : > { %1689 = vmatpush.msra.mxu2 %v653_v50  ;;  %1650 = vmatpush.msrb.mxu1 %v443_v21  ;;  %v863_v21 = vld [vmem:[%s9038_s0 + $0x10e8] sm:$0xff] }
  0xf3   : > { %v1183_v18 = vadd.f32 %v1182_v15, %v1130_v51  ;;  %1302 = vmatmul.f32.gmra.mxu2 %v5835_v26  ;;  %v5885_v51 = vld [vmem:[%s4989_s6 + $0x1b0] sm:$0xff] }
  0xf4   : > { %1355 = vmatmul.f32.gmra.mxu3 %v5839_v56  ;;  %1690 = vmatpush.msra.mxu2 %v646_v10 }
  0xf5   : > { %v1185_v19 = vpop.f32.mrf.mxu0  ;;  %v1236_v53 = vadd.f32 %v1235_v34, %v1183_v18  ;;  %v1238_v57 = vpop.f32.mrf.mxu1 }
  0xf6   : > { %v1079_v20 = vpop.f32.mrf.mxu2 }
  0xf7   : > { %v1132_v22 = vpop.f32.mrf.mxu3  ;;  %3188 = vst [vmem:[%s5787_s22 + $0x70] sm:$0xff] %v1236_v53  ;;  %v1080_v39 = vadd.f32 %v1079_v20, %v1027_v14 }
  0xf8   : > { %1408 = vmatmul.f32.gmra.mxu0 %v5505_v35  ;;  %1461 = vmatmul.f32.gmra.mxu1 %v5508_v42  ;;  %v1030_v42 = vadd.f32 %v5720_v47, %v5718_v5  ;;  %v765_v5 = vld [vmem:[%s9038_s0 + $0xdd8] sm:$0xff] }
  0xf9   : > { %v1133_v28 = vadd.f32 %v1132_v22, %v1080_v39  ;;  %1742 = vmatpush.msra.mxu3 %v765_v5  ;;  %v758_v39 = vld [vmem:[%s9038_s0 + $0xda0] sm:$0xff] }
  0xfb   : > { %v1186_v35 = vadd.f32 %v1185_v19, %v1133_v28  ;;  %1305 = vmatmul.f32.gmra.mxu2 %v5857_v1  ;;  %v1033_v19 = vadd.f32 %v5748_v54, %v5746_v44  ;;  %1743 = vmatpush.msra.mxu3 %v758_v39  ;;  %v639_v54 = vld [vmem:[%s9038_s0 + $0x9e8] sm:$0xff] }
  0xfc   : > { %1358 = vmatmul.f32.gmra.mxu3 %v5861_v36  ;;  %1691 = vmatpush.msra.mxu2 %v639_v54  ;;  %v751_v28 = vld [vmem:[%s9038_s0 + $0xd68] sm:$0xff] }
  0xfd   : > { %v1188_v8 = vpop.f32.mrf.mxu0  ;;  %v1239_v15 = vadd.f32 %v1238_v57, %v1186_v35  ;;  %v1241_v25 = vpop.f32.mrf.mxu1  ;;  %1744 = vmatpush.msra.mxu3 %v751_v28  ;;  %v5979_v39 = vld [vmem:[%s4989_s6 + $0x8] sm:$0xff] }
  0xfe   : > { %v1082_v0 = vpop.f32.mrf.mxu2 }
  0xff   : > { %v1135_v34 = vpop.f32.mrf.mxu3  ;;  %3195 = vst [vmem:[%s5787_s22 + $0xa8] sm:$0xff] %v1239_v15  ;;  %v1083_v37 = vadd.f32 %v1082_v0, %v1030_v42  ;;  %v870_v0 = vld [vmem:[%s9038_s0 + $0x1120] sm:$0xff] }
 0x100   : > { %1411 = vmatmul.f32.gmra.mxu0 %v5537_v60  ;;  %1464 = vmatmul.f32.gmra.mxu1 %v5540_v61  ;;  %v324_v60 = vld [vmem:[%s9038_s0 + $0x10] sm:$0xff] }
 0x101   : > { %v1136_v47 = vadd.f32 %v1135_v34, %v1083_v37  ;;  %1598 = vmatpush.msrb.mxu0 %v324_v60  ;;  %v436_v61 = vld [vmem:[%s9038_s0 + $0x390] sm:$0xff] }
 0x102   : > { %1651 = vmatpush.msrb.mxu1 %v436_v61  ;;  %v632_v34 = vld [vmem:[%s9038_s0 + $0x9b0] sm:$0xff] }
 0x103   : > { %v1189_v23 = vadd.f32 %v1188_v8, %v1136_v47  ;;  %1308 = vmatmul.f32.gmra.mxu2 %v5885_v51  ;;  %1795 = vmatpush.msra.mxu0 %v877_v17 }
 0x104   : > { %1361 = vmatmul.f32.gmra.mxu3 %v5889_v32  ;;  %1692 = vmatpush.msra.mxu2 %v632_v34  ;;  %v835_v34 = vld [vmem:[%s9038_s0 + $0x1008] sm:$0xff] }
 0x105   : > { %v1191_v18 = vpop.f32.mrf.mxu0  ;;  %v1242_v14 = vadd.f32 %v1241_v25, %v1189_v23  ;;  %v1244_v53 = vpop.f32.mrf.mxu1  ;;  %1796 = vmatpush.msra.mxu0 %v870_v0 }
 0x106   : > { %v1085_v57 = vpop.f32.mrf.mxu2 }
 0x107   : > { %v1138_v20 = vpop.f32.mrf.mxu3  ;;  %3202 = vst [vmem:[%s5787_s22 + $0xe0] sm:$0xff] %v1242_v14  ;;  %v1086_v22 = vadd.f32 %v1085_v57, %v1033_v19  ;;  %1797 = vmatpush.msra.mxu0 %v863_v21 }
 0x108   : > { %1414 = vmatmul.f32.gmra.mxu0 %v5572_v30  ;;  %1467 = vmatmul.f32.gmra.mxu1 %v5575_v31  ;;  %v905_v30 = vld [vmem:[%s9038_s0 + $0x1238] sm:$0xff]  ;;  %v5920_v31 = vld [vmem:[%s4989_s6 + $0x1e8] sm:$0xff] }
 0x109   : > { %v1139_v44 = vadd.f32 %v1138_v20, %v1086_v22  ;;  %1860 = vmatpush.msra.mxu1 %v905_v30  ;;  %v5966_v20 = vld [vmem:[%s4989_s6] sm:$0xff]  ;;  %v611_v22 = vld [vmem:[%s9038_s0 + $0x908] sm:$0xff] }
 0x10a   : > { %v842_v30 = vld [vmem:[%s9038_s0 + $0x1040] sm:$0xff] }
 0x10b   : > { %v1192_v12 = vadd.f32 %v1191_v18, %v1139_v44  ;;  %1311 = vmatmul.f32.gmra.mxu2 %v5916_v13  ;;  %v723_v44 = vld [vmem:[%s9038_s0 + $0xc88] sm:$0xff] }
 0x10c   : > { %1364 = vmatmul.f32.gmra.mxu3 %v5920_v31 }
 0x10d   : > { %v1194_v35 = vpop.f32.mrf.mxu0  ;;  %v1245_v2 = vadd.f32 %v1244_v53, %v1192_v12  ;;  %v1247_v8 = vpop.f32.mrf.mxu1  ;;  %v604_v12 = vld [vmem:[%s9038_s0 + $0x8d0] sm:$0xff] }
 0x10e   : > { %v1088_v42 = vpop.f32.mrf.mxu2 }
 0x10f   : > { %v1141_v15 = vpop.f32.mrf.mxu3  ;;  %3209 = vst [vmem:[%s5787_s22 + $0x118] sm:$0xff] %v1245_v2  ;;  %v1089_v25 = vadd.f32 %v1088_v42, %v5626_v43  ;;  %v744_v43 = vld [vmem:[%s9038_s0 + $0xd30] sm:$0xff] }
 0x110   : > { %1417 = vmatmul.f32.gmra.mxu0 %v5598_v59  ;;  %1470 = vmatmul.f32.gmra.mxu1 %v5601_v4 }
 0x111   : > { %v1142_v37 = vadd.f32 %v1141_v15, %v1089_v25  ;;  %1745 = vmatpush.msra.mxu3 %v744_v43  ;;  %v6000_v15 = vld [vmem:[%s4989_s6 + $0x30] sm:$0xff]  ;;  %v6007_v25 = vld [vmem:[%s4989_s6 + $0x38] sm:$0xff] }
 0x112   : > { %v709_v43 = vld [vmem:[%s9038_s0 + $0xc18] sm:$0xff] }
 0x113   : > { %v1195_v59 = vadd.f32 %v1194_v35, %v1142_v37  ;;  %1314 = vmatmul.f32.gmra.mxu2 %v5212_v45  ;;  %v625_v45 = vld [vmem:[%s9038_s0 + $0x978] sm:$0xff] }
 0x114   : > { %1367 = vmatmul.f32.gmra.mxu3 %v5215_v46  ;;  %v737_v46 = vld [vmem:[%s9038_s0 + $0xcf8] sm:$0xff]  ;;  %1693 = vmatpush.msra.mxu2 %v625_v45  ;;  %v590_v45 = vld [vmem:[%s9038_s0 + $0x860] sm:$0xff] }
 0x115   : > { %v1197_v50 = vpop.f32.mrf.mxu0  ;;  %v1248_v4 = vadd.f32 %v1247_v8, %v1195_v59  ;;  %v1250_v5 = vpop.f32.mrf.mxu1  ;;  %1746 = vmatpush.msra.mxu3 %v737_v46  ;;  %v597_v37 = vld [vmem:[%s9038_s0 + $0x898] sm:$0xff]  ;;  %v702_v46 = vld [vmem:[%s9038_s0 + $0xbe0] sm:$0xff] }
 0x116   : > { %v1091_v47 = vpop.f32.mrf.mxu2 }
 0x117   : > { %v1144_v60 = vpop.f32.mrf.mxu3  ;;  %3216 = vst [vmem:[%s5787_s22 + $0x150] sm:$0xff] %v1248_v4  ;;  %v1092_v23 = vadd.f32 %v1091_v47, %v5661_v29  ;;  %v856_v29 = vld [vmem:[%s9038_s0 + $0x10b0] sm:$0xff]  ;;  %v6025_v47 = vld [vmem:[%s4989_s6 + $0x60] sm:$0xff] }
 0x118   : > { %1420 = vmatmul.f32.gmra.mxu0 %v5633_v9  ;;  %1473 = vmatmul.f32.gmra.mxu1 %v5636_v55  ;;  %v618_v55 = vld [vmem:[%s9038_s0 + $0x940] sm:$0xff] }
 0x119   : > { %v1145_v61 = vadd.f32 %v1144_v60, %v1092_v23  ;;  %1798 = vmatpush.msra.mxu0 %v856_v29  ;;  %1694 = vmatpush.msra.mxu2 %v618_v55  ;;  %v6032_v60 = vld [vmem:[%s4989_s6 + $0x68] sm:$0xff] }
 0x11b   : > { %v1198_v9 = vadd.f32 %v1197_v50, %v1145_v61  ;;  %1493 = vmatmul.f32.vlgmr.msrb.gmra.mxu2 %v5288_v7  ;;  %v730_v7 = vld [vmem:[%s9038_s0 + $0xcc0] sm:$0xff]  ;;  %v821_v61 = vld [vmem:[%s9038_s0 + $0xf98] sm:$0xff] }
 0x11c   : > { %4477 = vmatmul.msk.f32.vlgmr.msrb.gmra.mxu3 %vm910_vm0, %v5297_v11  ;;  %v849_v11 = vld [vmem:[%s9038_s0 + $0x1078] sm:$0xff]  ;;  %1695 = vmatpush.msra.mxu2 %v611_v22  ;;  %v576_v22 = vld [vmem:[%s9038_s0 + $0x7f0] sm:$0xff] }
 0x11d   : > { %v1200_v10 = vpop.f32.mrf.mxu0  ;;  %v1251_v18 = vadd.f32 %v1250_v5, %v1198_v9  ;;  %v1253_v19 = vpop.f32.mrf.mxu1  ;;  %1747 = vmatpush.msra.mxu3 %v730_v7  ;;  %1799 = vmatpush.msra.mxu0 %v849_v11  ;;  %v814_v11 = vld [vmem:[%s9038_s0 + $0xf60] sm:$0xff] }
 0x11e   : > { %v1094_v14 = vpop.f32.mrf.mxu2  ;;  %1696 = vmatpush.msra.mxu2 %v604_v12  ;;  %v6077_v12 = vld [vmem:[%s4989_s6 + $0xc0] sm:$0xff] }
 0x11f   : > { %v1147_v53 = vpop.f32.mrf.mxu3  ;;  %3223 = vst [vmem:[%s5787_s22 + $0x188] sm:$0xff] %v1251_v18  ;;  %v1095_v57 = vadd.f32 %v1094_v14, %v5684_v3  ;;  %v898_v3 = vld [vmem:[%s9038_s0 + $0x1200] sm:$0xff]  ;;  %1748 = vmatpush.msra.mxu3 %v723_v44  ;;  %1800 = vmatpush.msra.mxu0 %v842_v30  ;;  %v891_v14 = vld [vmem:[%s9038_s0 + $0x11c8] sm:$0xff] }
 0x120   : > { %1599 = vmatmul.f32.vlgmr.msrb.gmra.mxu0 %v5966_v20  ;;  %1652 = vmatmul.f32.vlgmr.msrb.gmra.mxu1 %v5979_v39 }
 0x121   : > { %v1148_v17 = vadd.f32 %v1147_v53, %v1095_v57  ;;  %1861 = vmatpush.msra.mxu1 %v898_v3  ;;  %1801 = vmatpush.msra.mxu0 %v835_v34  ;;  %v6060_v53 = vld [vmem:[%s4989_s6 + $0x98] sm:$0xff] }
 0x122   : > { %1697 = vmatpush.msra.mxu2 %v597_v37 }
 0x123   : > { %v1201_v54 = vadd.f32 %v1200_v10, %v1148_v17  ;;  %1496 = vmatmul.f32.gmra.mxu2 %v5317_v16  ;;  %1862 = vmatpush.msra.mxu1 %v891_v14  ;;  %v667_v14 = vld [vmem:[%s9038_s0 + $0xac8] sm:$0xff] }
 0x124   : > { %4478 = vmatmul.msk.f32.gmra.mxu3 %vm910_vm0, %v5335_v24  ;;  %v716_v24 = vld [vmem:[%s9038_s0 + $0xc50] sm:$0xff]  ;;  %1698 = vmatpush.msra.mxu2 %v590_v45  ;;  %v9096_v45 = vld [vmem:[#allocation5_spill] sm:$0xff] }
 0x125   : > { %v1203_v28 = vpop.f32.mrf.mxu0  ;;  %v1254_v35 = vadd.f32 %v1253_v19, %v1201_v54  ;;  %v1256_v2 = vpop.f32.mrf.mxu1  ;;  %1749 = vmatpush.msra.mxu3 %v716_v24  ;;  %v583_v19 = vld [vmem:[%s9038_s0 + $0x828] sm:$0xff]  ;;  %v569_v24 = vld [vmem:[%s9038_s0 + $0x7b8] sm:$0xff] }
 0x126   : > { %v1097_v8 = vpop.f32.mrf.mxu2  ;;  %1699 = vmatpush.msra.mxu2 %v583_v19 }
 0x127   : > { %v1150_v42 = vpop.f32.mrf.mxu3  ;;  %3230 = vst [vmem:[%s5787_s22 + $0x1c0] sm:$0xff] %v1254_v35  ;;  %v1098_v16 = vadd.f32 %v1097_v8, %v5700_v58  ;;  %1750 = vmatpush.msra.mxu3 %v709_v43 }
 0x128   : > { %1602 = vmatmul.f32.gmra.mxu0 %v6000_v15  ;;  %1655 = vmatmul.f32.gmra.mxu1 %v6007_v25 }
 0x129   : > { %v1151_v0 = vadd.f32 %v1150_v42, %v1098_v16  ;;  %1751 = vmatpush.msra.mxu3 %v702_v46  ;;  %1700 = vmatpush.msra.mxu2 %v576_v22  ;;  %v9093_v42 = vld [vmem:[#allocation2_spill] sm:$0xff]  ;;  %v9094_v16 = vld [vmem:[#allocation3_spill] sm:$0xff]  ;;  %v793_v46 = vld [vmem:[%s9038_s0 + $0xeb8] sm:$0xff] }
 0x12b   : > { %v1204_v58 = vadd.f32 %v1203_v28, %v1151_v0  ;;  %1499 = vmatmul.f32.gmra.mxu2 %v5349_v27  ;;  %v6084_v28 = vld [vmem:[%s4989_s6 + $0xc8] sm:$0xff]  ;;  %v681_v0 = vld [vmem:[%s9038_s0 + $0xb38] sm:$0xff] }
 0x12c   : > { %4479 = vmatmul.msk.f32.gmra.mxu3 %vm910_vm0, %v5367_v33  ;;  %v828_v33 = vld [vmem:[%s9038_s0 + $0xfd0] sm:$0xff]  ;;  %1701 = vmatpush.msra.mxu2 %v569_v24 }
 0x12d   : > { %v1206_v59 = vpop.f32.mrf.mxu0  ;;  %v1257_v21 = vadd.f32 %v1256_v2, %v1204_v58  ;;  %v1259_v50 = vpop.f32.mrf.mxu1  ;;  %1802 = vmatpush.msra.mxu0 %v828_v33  ;;  %v807_v2 = vld [vmem:[%s9038_s0 + $0xf28] sm:$0xff] }
 0x12e   : > { %v1100_v4 = vpop.f32.mrf.mxu2 }
 0x12f   : > { %v1153_v5 = vpop.f32.mrf.mxu3  ;;  %3237 = vst [vmem:[%s5787_s22 + $0x1f8] sm:$0xff] %v1257_v21  ;;  %v1101_v27 = vadd.f32 %v1100_v4, %v5722_v63  ;;  %1803 = vmatpush.msra.mxu0 %v821_v61  ;;  %v6102_v21 = vld [vmem:[%s4989_s6 + $0xf0] sm:$0xff]  ;;  %v6109_v4 = vld [vmem:[%s4989_s6 + $0xf8] sm:$0xff] }
 0x130   : > { %1605 = vmatmul.f32.gmra.mxu0 %v6025_v47  ;;  %1658 = vmatmul.f32.gmra.mxu1 %v6032_v60 }
 0x131   : > { %v1154_v23 = vadd.f32 %v1153_v5, %v1101_v27  ;;  %1804 = vmatpush.msra.mxu0 %v814_v11  ;;  %v562_v27 = vld [vmem:[%s9038_s0 + $0x780] sm:$0xff] }
 0x132   : > { %1702 = vmatpush.msra.mxu2 %v562_v27 }
 0x133   : > { %v1207_v63 = vadd.f32 %v1206_v59, %v1154_v23  ;;  %1502 = vmatmul.f32.gmra.mxu2 %v5384_v41  ;;  %1805 = vmatpush.msra.mxu0 %v807_v2  ;;  %v9095_v23 = vld [vmem:[#allocation4_spill] sm:$0xff]  ;;  %v9100_v2 = vld [vmem:[#allocation9_spill] sm:$0xff] }
 0x134   : > { %4480 = vmatmul.msk.f32.gmra.mxu3 %vm910_vm0, %v5402_v49  ;;  %v6050_v49 = vld [vmem:[%s4989_s6 + $0x90] sm:$0xff] }
 0x135   : > { %v1209_v29 = vpop.f32.mrf.mxu0  ;;  %v1260_v9 = vadd.f32 %v1259_v50, %v1207_v63  ;;  %v1262_v55 = vpop.f32.mrf.mxu1  ;;  %v800_v50 = vld [vmem:[%s9038_s0 + $0xef0] sm:$0xff]  ;;  %v674_v63 = vld [vmem:[%s9038_s0 + $0xb00] sm:$0xff] }
 0x136   : > { %v1103_v10 = vpop.f32.mrf.mxu2  ;;  %1806 = vmatpush.msra.mxu0 %v800_v50  ;;  %v9101_v50 = vld [vmem:[#allocation10_spill] sm:$0xff] }
 0x137   : > { %v1156_v18 = vpop.f32.mrf.mxu3  ;;  %3244 = vst [vmem:[%s5787_s22 + $0x230] sm:$0xff] %v1260_v9  ;;  %v1104_v41 = vadd.f32 %v1103_v10, %v5750_v38  ;;  %v695_v38 = vld [vmem:[%s9038_s0 + $0xba8] sm:$0xff] }
 0x138   : > { %1608 = vmatmul.f32.gmra.mxu0 %v6050_v49  ;;  %1661 = vmatmul.f32.gmra.mxu1 %v6060_v53 }
 0x139   : > { %v1157_v57 = vadd.f32 %v1156_v18, %v1104_v41  ;;  %1752 = vmatpush.msra.mxu3 %v695_v38  ;;  %1807 = vmatpush.msra.mxu0 %v793_v46  ;;  %v555_v18 = vld [vmem:[%s9038_s0 + $0x748] sm:$0xff]  ;;  %v884_v41 = vld [vmem:[%s9038_s0 + $0x1190] sm:$0xff] }
 0x13a   : > { %1703 = vmatpush.msra.mxu2 %v555_v18  ;;  %1863 = vmatpush.msra.mxu1 %v884_v41  ;;  %v9098_v38 = vld [vmem:[#allocation7_spill] sm:$0xff]  ;;  %v9104_v18 = vld [vmem:[#allocation13_spill] sm:$0xff] }
 0x13b   : > { %v1210_v7 = vadd.f32 %v1209_v29, %v1157_v57  ;;  %1505 = vmatmul.f32.gmra.mxu2 %v5416_v52  ;;  %v647_v41 = vld [vmem:[%s9038_s0 + $0xa28] sm:$0xff] }
 0x13c   : > { %4481 = vmatmul.msk.f32.gmra.mxu3 %vm910_vm0, %v5434_v62  ;;  %v688_v62 = vld [vmem:[%s9038_s0 + $0xb70] sm:$0xff] }
 0x13d   : > { %v1388_v3 = vpop.f32.mrf.mxu0  ;;  %v1263_v17 = vadd.f32 %v1262_v55, %v1210_v7  ;;  %v1441_v44 = vpop.f32.mrf.mxu1  ;;  %1753 = vmatpush.msra.mxu3 %v688_v62  ;;  %v786_v7 = vld [vmem:[%s9038_s0 + $0xe80] sm:$0xff] }
 0x13e   : > { %v1282_v54 = vpop.f32.mrf.mxu2  ;;  %1808 = vmatpush.msra.mxu0 %v786_v7 }
 0x13f   : > { %v1335_v30 = vpop.f32.mrf.mxu3  ;;  %3251 = vst [vmem:[%s5787_s22 + $0x268] sm:$0xff] %v1263_v17  ;;  %1754 = vmatpush.msra.mxu3 %v681_v0 }
 0x140   : > { %v1336_v52 = vadd.f32 %v1335_v30, %v1282_v54  ;;  %1611 = vmatmul.f32.gmra.mxu0 %v6077_v12  ;;  %1664 = vmatmul.f32.gmra.mxu1 %v6084_v28  ;;  %v660_v54 = vld [vmem:[%s9038_s0 + $0xa90] sm:$0xff] }
 0x141   : > { %1755 = vmatpush.msra.mxu3 %v674_v63 }
 0x142   : > { %v1389_v35 = vadd.f32 %v1388_v3, %v1336_v52  ;;  %v779_v52 = vld [vmem:[%s9038_s0 + $0xe48] sm:$0xff] }
 0x143   : > { %1508 = vmatmul.f32.gmra.mxu2 %v9093_v42  ;;  %1756 = vmatpush.msra.mxu3 %v667_v14 }
 0x144   : > { %v6090_v8 = vadd.f32 %v1441_v44, %v1389_v35  ;;  %4482 = vmatmul.msk.f32.gmra.mxu3 %vm910_vm0, %v9094_v16  ;;  %1809 = vmatpush.msra.mxu0 %v779_v52  ;;  %v9099_v35 = vld [vmem:[#allocation8_spill] sm:$0xff] }
 0x145   : > { %v1391_v34 = vpop.f32.mrf.mxu0  ;;  %v1444_v58 = vpop.f32.mrf.mxu1  ;;  %1757 = vmatpush.msra.mxu3 %v660_v54  ;;  %v514_v54 = vld [vmem:[%s9038_s0 + $0x600] sm:$0xff] }
 0x146   : > { %v1285_v37 = vpop.f32.mrf.mxu2 }
 0x147   : > { %v1338_v43 = vpop.f32.mrf.mxu3 }
 0x148   : > { %v1339_v59 = vadd.f32 %v1338_v43, %v1285_v37  ;;  %1614 = vmatmul.f32.gmra.mxu0 %v6102_v21  ;;  %1667 = vmatmul.f32.gmra.mxu1 %v6109_v4  ;;  %v423_v43 = vld [vmem:[%s9038_s0 + $0x328] sm:$0xff] }
 0x14a   : > { %v1392_v5 = vadd.f32 %v1391_v34, %v1339_v59 }
 0x14b   : > { %1511 = vmatmul.f32.gmra.mxu2 %v9095_v23 }
 0x14c   : > { %v6115_v33 = vadd.f32 %v1444_v58, %v1392_v5  ;;  %4483 = vmatmul.msk.f32.gmra.mxu3 %vm910_vm0, %v9096_v45  ;;  %v772_v58 = vld [vmem:[%s9038_s0 + $0xe10] sm:$0xff]  ;;  %v9102_v5 = vld [vmem:[#allocation11_spill] sm:$0xff] }
 0x14d   : > { %v1394_v61 = vpop.f32.mrf.mxu0  ;;  %v1447_v29 = vpop.f32.mrf.mxu1  ;;  %1810 = vmatpush.msra.mxu0 %v772_v58  ;;  %v6247_v58 = vld [vmem:[%s4989_s6 + $0x10] sm:$0xff] }
 0x14e   : > { %v1288_v9 = vpop.f32.mrf.mxu2 }
 0x14f   : > { %v1341_v55 = vpop.f32.mrf.mxu3 }
 0x150   : > { %v1342_v10 = vadd.f32 %v1341_v55, %v1288_v9  ;;  %1617 = vmatmul.f32.gmra.mxu0 %v5807_v40  ;;  %1670 = vmatmul.f32.gmra.mxu1 %v5811_v6  ;;  %v9097_v40 = vld [vmem:[#allocation6_spill] sm:$0xff]  ;;  %v548_v6 = vld [vmem:[%s9038_s0 + $0x710] sm:$0xff] }
 0x151   : > { %1704 = vmatpush.msra.mxu2 %v548_v6  ;;  %v528_v55 = vld [vmem:[%s9038_s0 + $0x670] sm:$0xff] }
 0x152   : > { %v1395_v19 = vadd.f32 %v1394_v61, %v1342_v10  ;;  %v416_v61 = vld [vmem:[%s9038_s0 + $0x2f0] sm:$0xff] }
 0x153   : > { %1514 = vmatmul.f32.gmra.mxu2 %v9097_v40 }
 0x154   : > { %v6137_v57 = vadd.f32 %v1447_v29, %v1395_v19  ;;  %4484 = vmatmul.msk.f32.gmra.mxu3 %vm910_vm0, %v9098_v38  ;;  %v766_v29 = vld [vmem:[%s9038_s0 + $0xde0] sm:$0xff]  ;;  %v759_v19 = vld [vmem:[%s9038_s0 + $0xda8] sm:$0xff] }
 0x155   : > { %v1397_v11 = vpop.f32.mrf.mxu0  ;;  %v1450_v22 = vpop.f32.mrf.mxu1  ;;  %2060 = vmatpush.msrb.mxu1 %v766_v29  ;;  %v6266_v29 = vld [vmem:[%s4989_s6 + $0x40] sm:$0xff] }
 0x156   : > { %v1291_v3 = vpop.f32.mrf.mxu2 }
 0x157   : > { %v1344_v17 = vpop.f32.mrf.mxu3  ;;  %2061 = vmatpush.msrb.mxu1 %v759_v19 }
 0x158   : > { %v1345_v44 = vadd.f32 %v1344_v17, %v1291_v3  ;;  %1620 = vmatmul.f32.gmra.mxu0 %v5835_v26  ;;  %1673 = vmatmul.f32.gmra.mxu1 %v5839_v56  ;;  %v430_v26 = vld [vmem:[%s9038_s0 + $0x360] sm:$0xff]  ;;  %v640_v3 = vld [vmem:[%s9038_s0 + $0x9f0] sm:$0xff] }
 0x159   : > { %v542_v56 = vld [vmem:[%s9038_s0 + $0x6e0] sm:$0xff]  ;;  %1901 = vmatpush.msrb.mxu2 %v430_v26  ;;  %v4643_v26 = vld [vmem:[%s4989_s6 + $0x210] sm:$0xff] }
 0x15a   : > { %v1398_v30 = vadd.f32 %v1397_v11, %v1345_v44  ;;  %1954 = vmatpush.msrb.mxu3 %v542_v56  ;;  %v521_v11 = vld [vmem:[%s9038_s0 + $0x638] sm:$0xff]  ;;  %v9105_v44 = vld [vmem:[#allocation14_spill] sm:$0xff] }
 0x15b   : > { %1517 = vmatmul.f32.gmra.mxu2 %v9099_v35  ;;  %v633_v56 = vld [vmem:[%s9038_s0 + $0x9b8] sm:$0xff] }
 0x15c   : > { %v6156_v62 = vadd.f32 %v1450_v22, %v1398_v30  ;;  %4485 = vmatmul.msk.f32.gmra.mxu3 %vm910_vm0, %v9100_v2  ;;  %1902 = vmatpush.msrb.mxu2 %v423_v43  ;;  %v507_v43 = vld [vmem:[%s9038_s0 + $0x5c8] sm:$0xff] }
 0x15d   : > { %v1400_v42 = vpop.f32.mrf.mxu0  ;;  %v1453_v16 = vpop.f32.mrf.mxu1 }
 0x15e   : > { %v1294_v24 = vpop.f32.mrf.mxu2  ;;  %1903 = vmatpush.msrb.mxu2 %v416_v61 }
 0x15f   : > { %v1347_v0 = vpop.f32.mrf.mxu3 }
 0x160   : > { %v1348_v34 = vadd.f32 %v1347_v0, %v1294_v24  ;;  %1623 = vmatmul.f32.gmra.mxu0 %v5857_v1  ;;  %1676 = vmatmul.f32.gmra.mxu1 %v5861_v36  ;;  %v535_v1 = vld [vmem:[%s9038_s0 + $0x6a8] sm:$0xff]  ;;  %v654_v36 = vld [vmem:[%s9038_s0 + $0xa60] sm:$0xff]  ;;  %v745_v0 = vld [vmem:[%s9038_s0 + $0xd38] sm:$0xff] }
 0x161   : > { %1955 = vmatpush.msrb.mxu3 %v535_v1  ;;  %2007 = vmatpush.msrb.mxu0 %v654_v36  ;;  %v395_v24 = vld [vmem:[%s9038_s0 + $0x248] sm:$0xff] }
 0x162   : > { %v1401_v37 = vadd.f32 %v1400_v42, %v1348_v34  ;;  %v4644_v42 = vld [vmem:[%s4989_s6 + $0x218] sm:$0xff] }
 0x163   : > { %1520 = vmatmul.f32.gmra.mxu2 %v9101_v50  ;;  %1956 = vmatpush.msrb.mxu3 %v528_v55  ;;  %v626_v50 = vld [vmem:[%s9038_s0 + $0x980] sm:$0xff] }
 0x164   : > { %v6175_v59 = vadd.f32 %v1453_v16, %v1401_v37  ;;  %4486 = vmatmul.msk.f32.gmra.mxu3 %vm910_vm0, %v9102_v5  ;;  %2008 = vmatpush.msrb.mxu0 %v647_v41  ;;  %v6251_v37 = vld [vmem:[%s4989_s6 + $0x18] sm:$0xff]  ;;  %v738_v41 = vld [vmem:[%s9038_s0 + $0xd00] sm:$0xff] }
 0x165   : > { %v1403_v27 = vpop.f32.mrf.mxu0  ;;  %v1456_v23 = vpop.f32.mrf.mxu1  ;;  %1957 = vmatpush.msrb.mxu3 %v521_v11  ;;  %v4651_v11 = vld [vmem:[%s4989_s6 + $0x50] sm:$0xff] }
 0x166   : > { %v1297_v45 = vpop.f32.mrf.mxu2  ;;  %2009 = vmatpush.msrb.mxu0 %v640_v3 }
 0x167   : > { %v1350_v63 = vpop.f32.mrf.mxu3  ;;  %1958 = vmatpush.msrb.mxu3 %v514_v54 }
 0x168   : > { %v1351_v46 = vadd.f32 %v1350_v63, %v1297_v45  ;;  %1626 = vmatmul.f32.gmra.mxu0 %v5885_v51  ;;  %1679 = vmatmul.f32.gmra.mxu1 %v5889_v32  ;;  %v9103_v51 = vld [vmem:[#allocation12_spill] sm:$0xff]  ;;  %v409_v32 = vld [vmem:[%s9038_s0 + $0x2b8] sm:$0xff]  ;;  %v4647_v45 = vld [vmem:[%s4989_s6 + $0x20] sm:$0xff] }
 0x169   : > { %1904 = vmatpush.msrb.mxu2 %v409_v32  ;;  %2010 = vmatpush.msrb.mxu0 %v633_v56  ;;  %v4648_v63 = vld [vmem:[%s4989_s6 + $0x28] sm:$0xff]  ;;  %v500_v32 = vld [vmem:[%s9038_s0 + $0x590] sm:$0xff] }
 0x16a   : > { %v1404_v9 = vadd.f32 %v1403_v27, %v1351_v46  ;;  %1959 = vmatpush.msrb.mxu3 %v507_v43  ;;  %v724_v56 = vld [vmem:[%s9038_s0 + $0xc90] sm:$0xff] }
 0x16b   : > { %1523 = vmatmul.f32.gmra.mxu2 %v9103_v51  ;;  %2011 = vmatpush.msrb.mxu0 %v626_v50 }
 0x16c   : > { %v6197_v10 = vadd.f32 %v1456_v23, %v1404_v9  ;;  %4487 = vmatmul.msk.f32.gmra.mxu3 %vm910_vm0, %v9104_v18  ;;  %v6270_v9 = vld [vmem:[%s4989_s6 + $0x48] sm:$0xff]  ;;  %v388_v18 = vld [vmem:[%s9038_s0 + $0x210] sm:$0xff] }
 0x16d   : > { %v1406_v14 = vpop.f32.mrf.mxu0  ;;  %v1459_v40 = vpop.f32.mrf.mxu1  ;;  %1960 = vmatpush.msrb.mxu3 %v500_v32  ;;  %v4659_v32 = vld [vmem:[%s4989_s6 + $0xb0] sm:$0xff] }
 0x16e   : > { %v1300_v38 = vpop.f32.mrf.mxu2 }
 0x16f   : > { %v1353_v7 = vpop.f32.mrf.mxu3 }
 0x170   : > { %v1354_v6 = vadd.f32 %v1353_v7, %v1300_v38  ;;  %1629 = vmatmul.f32.gmra.mxu0 %v5916_v13  ;;  %1682 = vmatmul.f32.gmra.mxu1 %v5920_v31  ;;  %v402_v13 = vld [vmem:[%s9038_s0 + $0x280] sm:$0xff]  ;;  %v752_v31 = vld [vmem:[%s9038_s0 + $0xd70] sm:$0xff]  ;;  %v381_v38 = vld [vmem:[%s9038_s0 + $0x1d8] sm:$0xff] }
 0x171   : > { %1905 = vmatpush.msrb.mxu2 %v402_v13  ;;  %2062 = vmatpush.msrb.mxu1 %v752_v31  ;;  %v731_v7 = vld [vmem:[%s9038_s0 + $0xcc8] sm:$0xff]  ;;  %v6297_v13 = vld [vmem:[%s4989_s6 + $0x70] sm:$0xff]  ;;  %v6301_v31 = vld [vmem:[%s4989_s6 + $0x78] sm:$0xff] }
 0x172   : > { %v1407_v22 = vadd.f32 %v1406_v14, %v1354_v6 }
 0x173   : > { %1526 = vmatmul.f32.gmra.mxu2 %v9105_v44  ;;  %2063 = vmatpush.msrb.mxu1 %v745_v0  ;;  %v4656_v0 = vld [vmem:[%s4989_s6 + $0x88] sm:$0xff] }
 0x174   : > { %v6219_v17 = vadd.f32 %v1459_v40, %v1407_v22  ;;  %4488 = vmatmul.msk.f32.gmra.mxu3 %vm910_vm0, %v5659_v48  ;;  %1906 = vmatpush.msrb.mxu2 %v395_v24  ;;  %v619_v40 = vld [vmem:[%s9038_s0 + $0x948] sm:$0xff]  ;;  %v4652_v22 = vld [vmem:[%s4989_s6 + $0x58] sm:$0xff]  ;;  %v4655_v24 = vld [vmem:[%s4989_s6 + $0x80] sm:$0xff] }
 0x175   : > { %v1409_v30 = vpop.f32.mrf.mxu0  ;;  %v1462_v52 = vpop.f32.mrf.mxu1  ;;  %2064 = vmatpush.msrb.mxu1 %v738_v41  ;;  %2012 = vmatpush.msrb.mxu0 %v619_v40 }
 0x176   : > { %v1303_v35 = vpop.f32.mrf.mxu2  ;;  %1907 = vmatpush.msrb.mxu2 %v388_v18  ;;  %v598_v18 = vld [vmem:[%s9038_s0 + $0x8a0] sm:$0xff] }
 0x177   : > { %v1356_v48 = vpop.f32.mrf.mxu3  ;;  %2065 = vmatpush.msrb.mxu1 %v731_v7  ;;  %v6357_v7 = vld [vmem:[%s4989_s6 + $0xd8] sm:$0xff] }
 0x178   : > { %v1357_v2 = vadd.f32 %v1356_v48, %v1303_v35  ;;  %1632 = vmatmul.f32.gmra.mxu0 %v4643_v26  ;;  %1685 = vmatmul.f32.gmra.mxu1 %v4644_v42  ;;  %v612_v35 = vld [vmem:[%s9038_s0 + $0x910] sm:$0xff]  ;;  %v374_v48 = vld [vmem:[%s9038_s0 + $0x1a0] sm:$0xff] }
 0x179   : > { %1908 = vmatpush.msrb.mxu2 %v381_v38  ;;  %2013 = vmatpush.msrb.mxu0 %v612_v35  ;;  %v486_v42 = vld [vmem:[%s9038_s0 + $0x520] sm:$0xff]  ;;  %v6353_v38 = vld [vmem:[%s4989_s6 + $0xd0] sm:$0xff]  ;;  %v591_v35 = vld [vmem:[%s9038_s0 + $0x868] sm:$0xff] }
 0x17a   : > { %v1410_v16 = vadd.f32 %v1409_v30, %v1357_v2  ;;  %2066 = vmatpush.msrb.mxu1 %v724_v56  ;;  %v4663_v56 = vld [vmem:[%s4989_s6 + $0xe0] sm:$0xff] }
 0x17b   : > { %1705 = vmatmul.f32.vlgmr.msra.gmra.mxu2 %v6247_v58 }
 0x17c   : > { %v6244_v34 = vadd.f32 %v1462_v52, %v1410_v16  ;;  %1758 = vmatmul.f32.vlgmr.msra.gmra.mxu3 %v6251_v37  ;;  %v493_v52 = vld [vmem:[%s9038_s0 + $0x558] sm:$0xff]  ;;  %1909 = vmatpush.msrb.mxu2 %v374_v48 }
 0x17d   : > { %v1412_v5 = vpop.f32.mrf.mxu0  ;;  %v1465_v1 = vpop.f32.mrf.mxu1  ;;  %1961 = vmatpush.msrb.mxu3 %v493_v52  ;;  %v353_v48 = vld [vmem:[%s9038_s0 + $0xf8] sm:$0xff] }
 0x17e   : > { %v1306_v36 = vpop.f32.mrf.mxu2 }
 0x17f   : > { %v1359_v27 = vpop.f32.mrf.mxu3  ;;  %1962 = vmatpush.msrb.mxu3 %v486_v42  ;;  %v4664_v42 = vld [vmem:[%s4989_s6 + $0xe8] sm:$0xff] }
 0x180   : > { %v1360_v23 = vadd.f32 %v1359_v27, %v1306_v36  ;;  %1811 = vmatmul.f32.vlgmr.msra.gmra.mxu0 %v4647_v45  ;;  %4489 = vmatmul.msk.f32.vlgmr.msra.gmra.mxu1 %vm910_vm0, %v4648_v63  ;;  %v367_v45 = vld [vmem:[%s9038_s0 + $0x168] sm:$0xff]  ;;  %v717_v63 = vld [vmem:[%s9038_s0 + $0xc58] sm:$0xff] }
 0x181   : > { %1910 = vmatpush.msrb.mxu2 %v367_v45  ;;  %2067 = vmatpush.msrb.mxu1 %v717_v63 }
 0x182   : > { %v1413_v46 = vadd.f32 %v1412_v5, %v1360_v23  ;;  %v6325_v5 = vld [vmem:[%s4989_s6 + $0xa0] sm:$0xff]  ;;  %v605_v23 = vld [vmem:[%s9038_s0 + $0x8d8] sm:$0xff] }
 0x183   : > { %1708 = vmatmul.f32.gmra.mxu2 %v6266_v29  ;;  %2014 = vmatpush.msrb.mxu0 %v605_v23  ;;  %v346_v23 = vld [vmem:[%s9038_s0 + $0xc0] sm:$0xff] }
 0x184   : > { %v6263_v61 = vadd.f32 %v1465_v1, %v1413_v46  ;;  %1761 = vmatmul.f32.gmra.mxu3 %v6270_v9  ;;  %v6329_v1 = vld [vmem:[%s4989_s6 + $0xa8] sm:$0xff] }
 0x185   : > { %v1415_v55 = vpop.f32.mrf.mxu0  ;;  %v1468_v51 = vpop.f32.mrf.mxu1  ;;  %2015 = vmatpush.msrb.mxu0 %v598_v18  ;;  %v4667_v18 = vld [vmem:[%s4989_s6 + $0x110] sm:$0xff] }
 0x186   : > { %v1309_v19 = vpop.f32.mrf.mxu2 }
 0x187   : > { %v1362_v14 = vpop.f32.mrf.mxu3  ;;  %2016 = vmatpush.msrb.mxu0 %v591_v35 }
 0x188   : > { %v1363_v6 = vadd.f32 %v1362_v14, %v1309_v19  ;;  %1814 = vmatmul.f32.gmra.mxu0 %v4651_v11  ;;  %4490 = vmatmul.msk.f32.gmra.mxu1 %vm910_vm0, %v4652_v22  ;;  %v4660_v19 = vld [vmem:[%s4989_s6 + $0xb8] sm:$0xff]  ;;  %v360_v22 = vld [vmem:[%s9038_s0 + $0x130] sm:$0xff] }
 0x189   : > { %1911 = vmatpush.msrb.mxu2 %v360_v22 }
 0x18a   : > { %v1416_v3 = vadd.f32 %v1415_v55, %v1363_v6 }
 0x18b   : > { %1711 = vmatmul.f32.gmra.mxu2 %v6297_v13 }
 0x18c   : > { %v6294_v44 = vadd.f32 %v1468_v51, %v1416_v3  ;;  %1764 = vmatmul.f32.gmra.mxu3 %v6301_v31  ;;  %v479_v51 = vld [vmem:[%s9038_s0 + $0x4e8] sm:$0xff]  ;;  %v710_v3 = vld [vmem:[%s9038_s0 + $0xc20] sm:$0xff]  ;;  %1912 = vmatpush.msrb.mxu2 %v353_v48 }
 0x18d   : > { %v1418_v54 = vpop.f32.mrf.mxu0  ;;  %v1471_v30 = vpop.f32.mrf.mxu1  ;;  %1963 = vmatpush.msrb.mxu3 %v479_v51  ;;  %2068 = vmatpush.msrb.mxu1 %v710_v3  ;;  %v577_v3 = vld [vmem:[%s9038_s0 + $0x7f8] sm:$0xff]  ;;  %v451_v48 = vld [vmem:[%s9038_s0 + $0x408] sm:$0xff] }
 0x18e   : > { %v1312_v2 = vpop.f32.mrf.mxu2  ;;  %1913 = vmatpush.msrb.mxu2 %v346_v23  ;;  %v6465_v23 = vld [vmem:[%s4989_s6 + $0x168] sm:$0xff] }
 0x18f   : > { %v1365_v26 = vpop.f32.mrf.mxu3 }
 0x190   : > { %v1366_v16 = vadd.f32 %v1365_v26, %v1312_v2  ;;  %1817 = vmatmul.f32.gmra.mxu0 %v4655_v24  ;;  %4491 = vmatmul.msk.f32.gmra.mxu1 %vm910_vm0, %v4656_v0  ;;  %v703_v2 = vld [vmem:[%s9038_s0 + $0xbe8] sm:$0xff]  ;;  %v6391_v24 = vld [vmem:[%s4989_s6 + $0x100] sm:$0xff] }
 0x191   : > { %2069 = vmatpush.msrb.mxu1 %v703_v2  ;;  %v6395_v0 = vld [vmem:[%s4989_s6 + $0x108] sm:$0xff]  ;;  %v570_v2 = vld [vmem:[%s9038_s0 + $0x7c0] sm:$0xff] }
 0x192   : > { %v1419_v43 = vadd.f32 %v1418_v54, %v1366_v16  ;;  %v472_v54 = vld [vmem:[%s9038_s0 + $0x4b0] sm:$0xff] }
 0x193   : > { %1714 = vmatmul.f32.gmra.mxu2 %v6325_v5  ;;  %1964 = vmatpush.msrb.mxu3 %v472_v54  ;;  %v339_v54 = vld [vmem:[%s9038_s0 + $0x88] sm:$0xff] }
 0x194   : > { %v6322_v50 = vadd.f32 %v1471_v30, %v1419_v43  ;;  %1767 = vmatmul.f32.gmra.mxu3 %v6329_v1  ;;  %1914 = vmatpush.msrb.mxu2 %v339_v54  ;;  %v675_v54 = vld [vmem:[%s9038_s0 + $0xb08] sm:$0xff] }
 0x195   : > { %v1421_v36 = vpop.f32.mrf.mxu0  ;;  %v1474_v27 = vpop.f32.mrf.mxu1 }
 0x196   : > { %v1315_v46 = vpop.f32.mrf.mxu2 }
 0x197   : > { %v1368_v55 = vpop.f32.mrf.mxu3 }
 0x198   : > { %v1369_v41 = vadd.f32 %v1368_v55, %v1315_v46  ;;  %1820 = vmatmul.f32.gmra.mxu0 %v4659_v32  ;;  %4492 = vmatmul.msk.f32.gmra.mxu1 %vm910_vm0, %v4660_v19  ;;  %v696_v46 = vld [vmem:[%s9038_s0 + $0xbb0] sm:$0xff]  ;;  %v458_v55 = vld [vmem:[%s9038_s0 + $0x440] sm:$0xff] }
 0x199   : > { %2070 = vmatpush.msrb.mxu1 %v696_v46  ;;  %v6426_v19 = vld [vmem:[%s4989_s6 + $0x130] sm:$0xff]  ;;  %v682_v46 = vld [vmem:[%s9038_s0 + $0xb40] sm:$0xff] }
 0x19a   : > { %v1422_v14 = vadd.f32 %v1421_v36, %v1369_v41  ;;  %v465_v36 = vld [vmem:[%s9038_s0 + $0x478] sm:$0xff] }
 0x19b   : > { %1717 = vmatmul.f32.gmra.mxu2 %v6353_v38  ;;  %1965 = vmatpush.msrb.mxu3 %v465_v36  ;;  %v4668_v41 = vld [vmem:[%s4989_s6 + $0x118] sm:$0xff] }
 0x19c   : > { %v6350_v40 = vadd.f32 %v1474_v27, %v1422_v14  ;;  %1770 = vmatmul.f32.gmra.mxu3 %v6357_v7  ;;  %v584_v27 = vld [vmem:[%s9038_s0 + $0x830] sm:$0xff]  ;;  %v6430_v14 = vld [vmem:[%s4989_s6 + $0x138] sm:$0xff] }
 0x19d   : > { %v6360_v6 = vpop.f32.mrf.mxu0  ;;  %v6362_v11 = vpop.f32.mrf.mxu1  ;;  %2017 = vmatpush.msrb.mxu0 %v584_v27  ;;  %1966 = vmatpush.msrb.mxu3 %v458_v55  ;;  %v6461_v27 = vld [vmem:[%s4989_s6 + $0x160] sm:$0xff]  ;;  %v444_v55 = vld [vmem:[%s9038_s0 + $0x3d0] sm:$0xff] }
 0x19e   : > { %v1494_v30 = vpop.f32.mrf.mxu2 }
 0x19f   : > { %v1547_v52 = vpop.f32.mrf.mxu3  ;;  %v1495_v26 = vadd.f32 %v1494_v30, %v6090_v8  ;;  %v689_v30 = vld [vmem:[%s9038_s0 + $0xb78] sm:$0xff]  ;;  %2018 = vmatpush.msrb.mxu0 %v577_v3  ;;  %1967 = vmatpush.msrb.mxu3 %v451_v48 }
 0x1a0   : > { %1823 = vmatmul.f32.gmra.mxu0 %v4663_v56  ;;  %4493 = vmatmul.msk.f32.gmra.mxu1 %vm910_vm0, %v4664_v42  ;;  %v4671_v56 = vld [vmem:[%s4989_s6 + $0x140] sm:$0xff]  ;;  %v4672_v42 = vld [vmem:[%s4989_s6 + $0x148] sm:$0xff]  ;;  %v325_v3 = vld [vmem:[%s9038_s0 + $0x18] sm:$0xff] }
 0x1a1   : > { %v6386_v16 = vadd.f32 %v1547_v52, %v1495_v26  ;;  %2071 = vmatpush.msrb.mxu1 %v689_v30  ;;  %2019 = vmatpush.msrb.mxu0 %v570_v2  ;;  %v437_v2 = vld [vmem:[%s9038_s0 + $0x398] sm:$0xff] }
 0x1a2   : > { %1968 = vmatpush.msrb.mxu3 %v444_v55  ;;  %v878_v55 = vld [vmem:[%s9038_s0 + $0x1160] sm:$0xff] }
 0x1a3   : > { %3174 = vst [vmem:[%s5787_s22 + $0x8] sm:$0xff] %v6386_v16  ;;  %1720 = vmatmul.f32.gmra.mxu2 %v6391_v24  ;;  %2072 = vmatpush.msrb.mxu1 %v682_v46  ;;  %v668_v46 = vld [vmem:[%s9038_s0 + $0xad0] sm:$0xff] }
 0x1a4   : > { %1773 = vmatmul.f32.gmra.mxu3 %v6395_v0 }
 0x1a5   : > { %v6398_v8 = vpop.f32.mrf.mxu0  ;;  %v6400_v43 = vpop.f32.mrf.mxu1  ;;  %2073 = vmatpush.msrb.mxu1 %v675_v54  ;;  %1969 = vmatpush.msrb.mxu3 %v437_v2  ;;  %v4679_v54 = vld [vmem:[%s4989_s6 + $0x1a0] sm:$0xff] }
 0x1a6   : > { %v1497_v45 = vpop.f32.mrf.mxu2  ;;  %v6537_v2 = vld [vmem:[%s4989_s6 + $0x1c0] sm:$0xff] }
 0x1a7   : > { %v1550_v63 = vpop.f32.mrf.mxu3  ;;  %v1498_v51 = vadd.f32 %v1497_v45, %v6115_v33  ;;  %2074 = vmatpush.msrb.mxu1 %v668_v46  ;;  %9106 = vst [vmem:[#allocation2_spill] sm:$0xff] %v6537_v2 }
 0x1a8   : > { %1826 = vmatmul.f32.gmra.mxu0 %v4667_v18  ;;  %4494 = vmatmul.msk.f32.gmra.mxu1 %vm910_vm0, %v4668_v41  ;;  %v563_v41 = vld [vmem:[%s9038_s0 + $0x788] sm:$0xff] }
 0x1a9   : > { %v6421_v32 = vadd.f32 %v1550_v63, %v1498_v51  ;;  %v332_v63 = vld [vmem:[%s9038_s0 + $0x50] sm:$0xff]  ;;  %2020 = vmatpush.msrb.mxu0 %v563_v41  ;;  %v906_v41 = vld [vmem:[%s9038_s0 + $0x1240] sm:$0xff] }
 0x1aa   : > { %1915 = vmatpush.msrb.mxu2 %v332_v63  ;;  %v556_v63 = vld [vmem:[%s9038_s0 + $0x750] sm:$0xff]  ;;  %2178 = vmatpush.msra.mxu3 %v906_v41 }
 0x1ab   : > { %3182 = vst [vmem:[%s5787_s22 + $0x40] sm:$0xff] %v6421_v32  ;;  %1723 = vmatmul.f32.gmra.mxu2 %v6426_v19  ;;  %2021 = vmatpush.msrb.mxu0 %v556_v63  ;;  %v661_v63 = vld [vmem:[%s9038_s0 + $0xa98] sm:$0xff] }
 0x1ac   : > { %1776 = vmatmul.f32.gmra.mxu3 %v6430_v14  ;;  %1916 = vmatpush.msrb.mxu2 %v325_v3 }
 0x1ad   : > { %v6433_v33 = vpop.f32.mrf.mxu0  ;;  %v6435_v22 = vpop.f32.mrf.mxu1  ;;  %2075 = vmatpush.msrb.mxu1 %v661_v63 }
 0x1ae   : > { %v1500_v52 = vpop.f32.mrf.mxu2  ;;  %2113 = vmatpush.msra.mxu2 %v878_v55 }
 0x1af   : > { %v1553_v35 = vpop.f32.mrf.mxu3  ;;  %v1501_v26 = vadd.f32 %v1500_v52, %v6137_v57  ;;  %v4675_v52 = vld [vmem:[%s4989_s6 + $0x170] sm:$0xff] }
 0x1b0   : > { %1829 = vmatmul.f32.gmra.mxu0 %v4671_v56  ;;  %4495 = vmatmul.msk.f32.gmra.mxu1 %vm910_vm0, %v4672_v42 }
 0x1b1   : > { %v6456_v36 = vadd.f32 %v1553_v35, %v1501_v26  ;;  %v4676_v35 = vld [vmem:[%s4989_s6 + $0x178] sm:$0xff] }
 0x1b2   : > { %v6506_v26 = vld [vmem:[%s4989_s6 + $0x198] sm:$0xff] }
 0x1b3   : > { %3189 = vst [vmem:[%s5787_s22 + $0x78] sm:$0xff] %v6456_v36  ;;  %1726 = vmatmul.f32.gmra.mxu2 %v6461_v27 }
 0x1b4   : > { %1779 = vmatmul.f32.gmra.mxu3 %v6465_v23 }
 0x1b5   : > { %v6468_v57 = vpop.f32.mrf.mxu0  ;;  %v6470_v45 = vpop.f32.mrf.mxu1 }
 0x1b6   : > { %v1503_v51 = vpop.f32.mrf.mxu2 }
 0x1b7   : > { %v1556_v18 = vpop.f32.mrf.mxu3  ;;  %v1504_v30 = vadd.f32 %v1503_v51, %v6156_v62  ;;  %v6502_v62 = vld [vmem:[%s4989_s6 + $0x190] sm:$0xff] }
 0x1b8   : > { %1832 = vmatmul.f32.gmra.mxu0 %v4675_v52  ;;  %4496 = vmatmul.msk.f32.gmra.mxu1 %vm910_vm0, %v4676_v35  ;;  %v549_v35 = vld [vmem:[%s9038_s0 + $0x718] sm:$0xff] }
 0x1b9   : > { %v6494_v48 = vadd.f32 %v1556_v18, %v1504_v30  ;;  %v4680_v30 = vld [vmem:[%s4989_s6 + $0x1a8] sm:$0xff]  ;;  %2022 = vmatpush.msrb.mxu0 %v549_v35  ;;  %v4684_v35 = vld [vmem:[%s4989_s6 + $0x1d8] sm:$0xff] }
 0x1bb   : > { %3196 = vst [vmem:[%s5787_s22 + $0xb0] sm:$0xff] %v6494_v48  ;;  %1729 = vmatmul.f32.gmra.mxu2 %v6502_v62 }
 0x1bc   : > { %1782 = vmatmul.f32.gmra.mxu3 %v6506_v26 }
 0x1bd   : > { %v6509_v56 = vpop.f32.mrf.mxu0  ;;  %v6511_v42 = vpop.f32.mrf.mxu1 }
 0x1be   : > { %v1506_v51 = vpop.f32.mrf.mxu2 }
 0x1bf   : > { %v1559_v18 = vpop.f32.mrf.mxu3  ;;  %v1507_v3 = vadd.f32 %v1506_v51, %v6175_v59  ;;  %v6541_v59 = vld [vmem:[%s4989_s6 + $0x1c8] sm:$0xff] }
 0x1c0   : > { %1835 = vmatmul.f32.gmra.mxu0 %v4679_v54  ;;  %4497 = vmatmul.msk.f32.gmra.mxu1 %vm910_vm0, %v4680_v30  ;;  %9107 = vst [vmem:[#allocation3_spill] sm:$0xff] %v6541_v59  ;;  %v871_v51 = vld [vmem:[%s9038_s0 + $0x1128] sm:$0xff]  ;;  %v4683_v30 = vld [vmem:[%s4989_s6 + $0x1d0] sm:$0xff] }
 0x1c1   : > { %v6529_v52 = vadd.f32 %v1559_v18, %v1507_v3  ;;  %v431_v18 = vld [vmem:[%s9038_s0 + $0x368] sm:$0xff]  ;;  %2114 = vmatpush.msra.mxu2 %v871_v51 }
 0x1c2   : > { %2219 = vmatpush.msra.mxu0 %v431_v18  ;;  %v864_v18 = vld [vmem:[%s9038_s0 + $0x10f0] sm:$0xff] }
 0x1c3   : > { %3203 = vst [vmem:[%s5787_s22 + $0xe8] sm:$0xff] %v6529_v52  ;;  %1732 = vmatmul.f32.gmra.mxu2 %v6537_v2  ;;  %v6570_v2 = vld [vmem:[%s4989_s6 + $0x1f8] sm:$0xff] }
 0x1c4   : > { %1785 = vmatmul.f32.gmra.mxu3 %v6541_v59  ;;  %v6566_v59 = vld [vmem:[%s4989_s6 + $0x1f0] sm:$0xff]  ;;  %9110 = vst [vmem:[#allocation6_spill] sm:$0xff] %v6570_v2  ;;  %2115 = vmatpush.msra.mxu2 %v864_v18  ;;  %v6601_v18 = vld [vmem:[%s4989_s6 + $0x220] sm:$0xff] }
 0x1c5   : > { %v6547_v46 = vpop.f32.mrf.mxu0  ;;  %v6549_v55 = vpop.f32.mrf.mxu1  ;;  %9109 = vst [vmem:[#allocation5_spill] sm:$0xff] %v6566_v59 }
 0x1c6   : > { %v1509_v41 = vpop.f32.mrf.mxu2  ;;  %9113 = vst [vmem:[#allocation9_spill] sm:$0xff] %v6601_v18 }
 0x1c7   : > { %v1562_v3 = vpop.f32.mrf.mxu3  ;;  %v1510_v54 = vadd.f32 %v1509_v41, %v6197_v10  ;;  %v543_v41 = vld [vmem:[%s9038_s0 + $0x6e8] sm:$0xff] }
 0x1c8   : > { %1838 = vmatmul.f32.gmra.mxu0 %v4683_v30  ;;  %4498 = vmatmul.msk.f32.gmra.mxu1 %vm910_vm0, %v4684_v35  ;;  %v857_v35 = vld [vmem:[%s9038_s0 + $0x10b8] sm:$0xff] }
 0x1c9   : > { %v6561_v63 = vadd.f32 %v1562_v3, %v1510_v54  ;;  %v424_v3 = vld [vmem:[%s9038_s0 + $0x330] sm:$0xff]  ;;  %2272 = vmatpush.msra.mxu1 %v543_v41  ;;  %2116 = vmatpush.msra.mxu2 %v857_v35  ;;  %v6605_v41 = vld [vmem:[%s4989_s6 + $0x228] sm:$0xff] }
 0x1ca   : > { %2220 = vmatpush.msra.mxu0 %v424_v3  ;;  %9114 = vst [vmem:[#allocation10_spill] sm:$0xff] %v6605_v41 }
 0x1cb   : > { %9108 = vst [vmem:[#allocation4_spill] sm:$0xff] %v6561_v63  ;;  %1735 = vmatmul.f32.gmra.mxu2 %v6566_v59 }
 0x1cc   : > { %3210 = vst [vmem:[%s5787_s22 + $0x120] sm:$0xff] %v6561_v63  ;;  %1788 = vmatmul.f32.gmra.mxu3 %v6570_v2  ;;  %v536_v2 = vld [vmem:[%s9038_s0 + $0x6b0] sm:$0xff] }
 0x1cd   : > { %v6573_v10 = vpop.f32.mrf.mxu0  ;;  %v6575_v51 = vpop.f32.mrf.mxu1  ;;  %2273 = vmatpush.msra.mxu1 %v536_v2  ;;  %v417_v2 = vld [vmem:[%s9038_s0 + $0x2f8] sm:$0xff] }
 0x1ce   : > { %9111 = vst [vmem:[#allocation7_spill] sm:$0xff] %v6573_v10  ;;  %v1512_v54 = vpop.f32.mrf.mxu2  ;;  %v4688_v10 = vld [vmem:[%s4989_s6 + $0x208] sm:$0xff]  ;;  %2221 = vmatpush.msra.mxu0 %v417_v2 }
 0x1cf   : > { %9112 = vst [vmem:[#allocation8_spill] sm:$0xff] %v6575_v51  ;;  %v1565_v30 = vpop.f32.mrf.mxu3  ;;  %v1513_v59 = vadd.f32 %v1512_v54, %v6219_v17  ;;  %v4687_v51 = vld [vmem:[%s4989_s6 + $0x200] sm:$0xff] }
 0x1d0   : > { %1841 = vmatmul.f32.gmra.mxu0 %v4687_v51  ;;  %4499 = vmatmul.msk.f32.gmra.mxu1 %vm910_vm0, %v4688_v10  ;;  %v529_v51 = vld [vmem:[%s9038_s0 + $0x678] sm:$0xff] }
 0x1d1   : > { %v6596_v63 = vadd.f32 %v1565_v30, %v1513_v59  ;;  %v850_v59 = vld [vmem:[%s9038_s0 + $0x1080] sm:$0xff]  ;;  %v899_v30 = vld [vmem:[%s9038_s0 + $0x1208] sm:$0xff]  ;;  %2274 = vmatpush.msra.mxu1 %v529_v51 }
 0x1d2   : > { %2117 = vmatpush.msra.mxu2 %v850_v59  ;;  %2179 = vmatpush.msra.mxu3 %v899_v30  ;;  %v836_v30 = vld [vmem:[%s9038_s0 + $0x1010] sm:$0xff] }
 0x1d3   : > { %3217 = vst [vmem:[%s5787_s22 + $0x158] sm:$0xff] %v6596_v63  ;;  %1738 = vmatmul.f32.gmra.mxu2 %v6601_v18  ;;  %v4692_v18 = vld [vmem:[%s4989_s6 + $0x238] sm:$0xff] }
 0x1d4   : > { %1791 = vmatmul.f32.gmra.mxu3 %v6605_v41  ;;  %v4691_v41 = vld [vmem:[%s4989_s6 + $0x230] sm:$0xff] }
 0x1d5   : > { %v6608_v17 = vpop.f32.mrf.mxu0  ;;  %v6610_v10 = vpop.f32.mrf.mxu1 }
 0x1d6   : > { %9115 = vst [vmem:[#allocation11_spill] sm:$0xff] %v6610_v10  ;;  %v1515_v3 = vpop.f32.mrf.mxu2 }
 0x1d7   : > { %v1568_v54 = vpop.f32.mrf.mxu3  ;;  %v1516_v35 = vadd.f32 %v1515_v3, %v6244_v34  ;;  %v410_v34 = vld [vmem:[%s9038_s0 + $0x2c0] sm:$0xff] }
 0x1d8   : > { %1844 = vmatmul.f32.gmra.mxu0 %v4691_v41  ;;  %4500 = vmatmul.msk.f32.gmra.mxu1 %vm910_vm0, %v4692_v18  ;;  %v843_v18 = vld [vmem:[%s9038_s0 + $0x1048] sm:$0xff]  ;;  %v522_v41 = vld [vmem:[%s9038_s0 + $0x640] sm:$0xff] }
 0x1d9   : > { %v6628_v10 = vadd.f32 %v1568_v54, %v1516_v35  ;;  %2222 = vmatpush.msra.mxu0 %v410_v34  ;;  %2118 = vmatpush.msra.mxu2 %v843_v18  ;;  %v515_v35 = vld [vmem:[%s9038_s0 + $0x608] sm:$0xff] }
 0x1da   : > { %2275 = vmatpush.msra.mxu1 %v522_v41 }
 0x1db   : > { %3224 = vst [vmem:[%s5787_s22 + $0x190] sm:$0xff] %v6628_v10  ;;  %1917 = vmatmul.f32.vlgmr.msrb.gmra.mxu2 %v5966_v20 }
 0x1dc   : > { %1970 = vmatmul.f32.vlgmr.msrb.gmra.mxu3 %v5979_v39  ;;  %v403_v39 = vld [vmem:[%s9038_s0 + $0x288] sm:$0xff]  ;;  %2119 = vmatpush.msra.mxu2 %v836_v30  ;;  %v892_v30 = vld [vmem:[%s9038_s0 + $0x11d0] sm:$0xff] }
 0x1dd   : > { %v6634_v2 = vpop.f32.mrf.mxu0  ;;  %v6636_v59 = vpop.f32.mrf.mxu1  ;;  %2223 = vmatpush.msra.mxu0 %v403_v39  ;;  %2276 = vmatpush.msra.mxu1 %v515_v35 }
 0x1de   : > { %v1518_v20 = vpop.f32.mrf.mxu2  ;;  %2180 = vmatpush.msra.mxu3 %v892_v30 }
 0x1df   : > { %v1571_v51 = vpop.f32.mrf.mxu3  ;;  %v1519_v3 = vadd.f32 %v1518_v20, %v6263_v61  ;;  %v508_v20 = vld [vmem:[%s9038_s0 + $0x5d0] sm:$0xff] }
 0x1e0   : > { %2023 = vmatmul.f32.vlgmr.msrb.gmra.mxu0 %v6247_v58  ;;  %2076 = vmatmul.f32.vlgmr.msrb.gmra.mxu1 %v6251_v37 }
 0x1e1   : > { %v6653_v54 = vadd.f32 %v1571_v51, %v1519_v3  ;;  %2277 = vmatpush.msra.mxu1 %v508_v20  ;;  %v808_v20 = vld [vmem:[%s9038_s0 + $0xf30] sm:$0xff] }
 0x1e3   : > { %3231 = vst [vmem:[%s5787_s22 + $0x1c8] sm:$0xff] %v6653_v54  ;;  %1920 = vmatmul.f32.gmra.mxu2 %v6000_v15  ;;  %v396_v15 = vld [vmem:[%s9038_s0 + $0x250] sm:$0xff] }
 0x1e4   : > { %1973 = vmatmul.f32.gmra.mxu3 %v6007_v25  ;;  %v829_v25 = vld [vmem:[%s9038_s0 + $0xfd8] sm:$0xff]  ;;  %2224 = vmatpush.msra.mxu0 %v396_v15 }
 0x1e5   : > { %v6665_v58 = vpop.f32.mrf.mxu0  ;;  %v6667_v37 = vpop.f32.mrf.mxu1  ;;  %2120 = vmatpush.msra.mxu2 %v829_v25 }
 0x1e6   : > { %v1521_v61 = vpop.f32.mrf.mxu2 }
 0x1e7   : > { %v1574_v34 = vpop.f32.mrf.mxu3  ;;  %v1522_v18 = vadd.f32 %v1521_v61, %v6294_v44 }
 0x1e8   : > { %2026 = vmatmul.f32.gmra.mxu0 %v6266_v29  ;;  %2079 = vmatmul.f32.gmra.mxu1 %v6270_v9  ;;  %v389_v29 = vld [vmem:[%s9038_s0 + $0x218] sm:$0xff] }
 0x1e9   : > { %v6672_v41 = vadd.f32 %v1574_v34, %v1522_v18  ;;  %2225 = vmatpush.msra.mxu0 %v389_v29  ;;  %v487_v29 = vld [vmem:[%s9038_s0 + $0x528] sm:$0xff] }
 0x1eb   : > { %3238 = vst [vmem:[%s5787_s22 + $0x200] sm:$0xff] %v6672_v41  ;;  %1923 = vmatmul.f32.gmra.mxu2 %v6025_v47  ;;  %v822_v47 = vld [vmem:[%s9038_s0 + $0xfa0] sm:$0xff] }
 0x1ec   : > { %1976 = vmatmul.f32.gmra.mxu3 %v6032_v60  ;;  %v501_v60 = vld [vmem:[%s9038_s0 + $0x598] sm:$0xff]  ;;  %2121 = vmatpush.msra.mxu2 %v822_v47 }
 0x1ed   : > { %v6690_v9 = vpop.f32.mrf.mxu0  ;;  %v6692_v44 = vpop.f32.mrf.mxu1  ;;  %2278 = vmatpush.msra.mxu1 %v501_v60  ;;  %v4693_v60 = vld [vmem:[%s5787_s22] sm:$0xff] }
 0x1ee   : > { %v1524_v51 = vpop.f32.mrf.mxu2  ;;  %v3378_v30 = vmul.f32 %v4693_v60, %v4693_v60 }
 0x1ef   : > { %v1577_v39 = vpop.f32.mrf.mxu3  ;;  %v1525_v3 = vadd.f32 %v1524_v51, %v6322_v50  ;;  %v494_v50 = vld [vmem:[%s9038_s0 + $0x560] sm:$0xff] }
 0x1f0   : > { %2029 = vmatmul.f32.gmra.mxu0 %v6297_v13  ;;  %2082 = vmatmul.f32.gmra.mxu1 %v6301_v31  ;;  %v382_v13 = vld [vmem:[%s9038_s0 + $0x1e0] sm:$0xff]  ;;  %v815_v31 = vld [vmem:[%s9038_s0 + $0xf68] sm:$0xff] }
 0x1f1   : > { %v6706_v35 = vadd.f32 %v1577_v39, %v1525_v3  ;;  %2226 = vmatpush.msra.mxu0 %v382_v13  ;;  %2122 = vmatpush.msra.mxu2 %v815_v31  ;;  %v3258_v31 = vadd.f32 %v4693_v60, %v6386_v16 }
 0x1f2   : > { %2279 = vmatpush.msra.mxu1 %v494_v50  ;;  %v1657_v50 = vadd.f32 %v6400_v43, %v6398_v8  ;;  %v794_v43 = vld [vmem:[%s9038_s0 + $0xec0] sm:$0xff] }
 0x1f3   : > { %3245 = vst [vmem:[%s5787_s22 + $0x238] sm:$0xff] %v6706_v35  ;;  %1926 = vmatmul.f32.gmra.mxu2 %v6050_v49 }
 0x1f4   : > { %1979 = vmatmul.f32.gmra.mxu3 %v6060_v53  ;;  %v375_v53 = vld [vmem:[%s9038_s0 + $0x1a8] sm:$0xff]  ;;  %2123 = vmatpush.msra.mxu2 %v808_v20 }
 0x1f5   : > { %v6721_v61 = vpop.f32.mrf.mxu0  ;;  %v6723_v34 = vpop.f32.mrf.mxu1  ;;  %2227 = vmatpush.msra.mxu0 %v375_v53  ;;  %2280 = vmatpush.msra.mxu1 %v487_v29 }
 0x1f6   : > { %v1527_v18 = vpop.f32.mrf.mxu2 }
 0x1f7   : > { %v1580_v15 = vpop.f32.mrf.mxu3  ;;  %v1528_v49 = vadd.f32 %v1527_v18, %v6350_v40 }
 0x1f8   : > { %2032 = vmatmul.f32.gmra.mxu0 %v6325_v5  ;;  %2085 = vmatmul.f32.gmra.mxu1 %v6329_v1  ;;  %v1654_v1 = vadd.f32 %v6362_v11, %v6360_v6  ;;  %v480_v6 = vld [vmem:[%s9038_s0 + $0x4f0] sm:$0xff]  ;;  %v3379_v11 = vmul.f32 %v6386_v16, %v6386_v16 }
 0x1f9   : > { %v6731_v25 = vadd.f32 %v1580_v15, %v1528_v49  ;;  %2281 = vmatpush.msra.mxu1 %v480_v6 }
 0x1fa   : > { %v3462_v49 = vadd.f32 %v3379_v11, %v3378_v30 }
 0x1fb   : > { %3252 = vst [vmem:[%s5787_s22 + $0x270] sm:$0xff] %v6731_v25  ;;  %1929 = vmatmul.f32.gmra.mxu2 %v6077_v12  ;;  %v368_v12 = vld [vmem:[%s9038_s0 + $0x170] sm:$0xff] }
 0x1fc   : > { %1982 = vmatmul.f32.gmra.mxu3 %v6084_v28  ;;  %v801_v28 = vld [vmem:[%s9038_s0 + $0xef8] sm:$0xff]  ;;  %2228 = vmatpush.msra.mxu0 %v368_v12 }
 0x1fd   : > { %v1812_v5 = vpop.f32.mrf.mxu0  ;;  %v1865_v40 = vpop.f32.mrf.mxu1  ;;  %2124 = vmatpush.msra.mxu2 %v801_v28  ;;  %v4696_v12 = vld [vmem:[%s5787_s22 + $0x38] sm:$0xff] }
 0x1fe   : > { %v1706_v51 = vpop.f32.mrf.mxu2  ;;  %v3385_v28 = vmul.f32 %v4696_v12, %v4696_v12  ;;  %v3267_v11 = vadd.f32 %v4696_v12, %v6421_v32 }
 0x1ff   : > { %v1759_v39 = vpop.f32.mrf.mxu3  ;;  %v1707_v3 = vadd.f32 %v1706_v51, %v1654_v1  ;;  %v885_v1 = vld [vmem:[%s9038_s0 + $0x1198] sm:$0xff]  ;;  %2125 = vmatpush.msra.mxu2 %v794_v43  ;;  %v6789_v51 = vld [vmem:[%s4989_s6 + $0x120] sm:$0xff] }
 0x200   : > { %2035 = vmatmul.f32.gmra.mxu0 %v6353_v38  ;;  %2088 = vmatmul.f32.gmra.mxu1 %v6357_v7  ;;  %v361_v7 = vld [vmem:[%s9038_s0 + $0x138] sm:$0xff] }
 0x201   : > { %v1760_v47 = vadd.f32 %v1759_v39, %v1707_v3  ;;  %2229 = vmatpush.msra.mxu0 %v361_v7  ;;  %v6793_v39 = vld [vmem:[%s4989_s6 + $0x128] sm:$0xff]  ;;  %2181 = vmatpush.msra.mxu3 %v885_v1  ;;  %v1663_v1 = vadd.f32 %v6470_v45, %v6468_v57  ;;  %v340_v57 = vld [vmem:[%s9038_s0 + $0x90] sm:$0xff]  ;;  %v773_v45 = vld [vmem:[%s9038_s0 + $0xe18] sm:$0xff] }
 0x202   : > { %v787_v3 = vld [vmem:[%s9038_s0 + $0xe88] sm:$0xff] }
 0x203   : > { %v1813_v38 = vadd.f32 %v1812_v5, %v1760_v47  ;;  %1932 = vmatmul.f32.gmra.mxu2 %v6102_v21  ;;  %v473_v5 = vld [vmem:[%s9038_s0 + $0x4b8] sm:$0xff]  ;;  %v466_v47 = vld [vmem:[%s9038_s0 + $0x480] sm:$0xff] }
 0x204   : > { %1985 = vmatmul.f32.gmra.mxu3 %v6109_v4  ;;  %2282 = vmatpush.msra.mxu1 %v473_v5 }
 0x205   : > { %v1815_v13 = vpop.f32.mrf.mxu0  ;;  %v1866_v18 = vadd.f32 %v1865_v40, %v1813_v38  ;;  %v1868_v15 = vpop.f32.mrf.mxu1  ;;  %v1660_v38 = vadd.f32 %v6435_v22, %v6433_v33  ;;  %2126 = vmatpush.msra.mxu2 %v787_v3  ;;  %v347_v33 = vld [vmem:[%s9038_s0 + $0xc8] sm:$0xff]  ;;  %v780_v22 = vld [vmem:[%s9038_s0 + $0xe50] sm:$0xff] }
 0x206   : > { %v1709_v21 = vpop.f32.mrf.mxu2  ;;  %2283 = vmatpush.msra.mxu1 %v466_v47 }
 0x207   : > { %v1762_v53 = vpop.f32.mrf.mxu3  ;;  %3175 = vst [vmem:[%s5787_s22 + $0x10] sm:$0xff] %v1866_v18  ;;  %v6768_v4 = vadd.f32 %v3258_v31, %v1866_v18  ;;  %v3380_v20 = vmul.f32 %v1866_v18, %v1866_v18  ;;  %v1710_v29 = vadd.f32 %v1709_v21, %v1657_v50  ;;  %2127 = vmatpush.msra.mxu2 %v780_v22 }
 0x208   : > { %2038 = vmatmul.f32.gmra.mxu0 %v6391_v24  ;;  %2091 = vmatmul.f32.gmra.mxu1 %v6395_v0  ;;  %v3386_v24 = vmul.f32 %v6421_v32, %v6421_v32  ;;  %v354_v0 = vld [vmem:[%s9038_s0 + $0x100] sm:$0xff] }
 0x209   : > { %v6772_v16 = vadd.f32 %v3462_v49, %v3380_v20  ;;  %v1763_v8 = vadd.f32 %v1762_v53, %v1710_v29  ;;  %2230 = vmatpush.msra.mxu0 %v354_v0  ;;  %v6825_v53 = vld [vmem:[%s4989_s6 + $0x150] sm:$0xff]  ;;  %v6829_v20 = vld [vmem:[%s4989_s6 + $0x158] sm:$0xff]  ;;  %2128 = vmatpush.msra.mxu2 %v773_v45  ;;  %v1669_v45 = vadd.f32 %v6549_v55, %v6547_v46 }
 0x20a   : > { %v3471_v30 = vadd.f32 %v3386_v24, %v3385_v28  ;;  %v4699_v29 = vld [vmem:[%s5787_s22 + $0x70] sm:$0xff] }
 0x20b   : > { %v1816_v40 = vadd.f32 %v1815_v13, %v1763_v8  ;;  %1935 = vmatmul.f32.gmra.mxu2 %v6789_v51  ;;  %2231 = vmatpush.msra.mxu0 %v347_v33  ;;  %v3392_v8 = vmul.f32 %v4699_v29, %v4699_v29  ;;  %v3276_v5 = vadd.f32 %v4699_v29, %v6456_v36 }
 0x20c   : > { %1988 = vmatmul.f32.gmra.mxu3 %v6793_v39 }
 0x20d   : > { %v1818_v6 = vpop.f32.mrf.mxu0  ;;  %v1869_v7 = vadd.f32 %v1868_v15, %v1816_v40  ;;  %v1871_v60 = vpop.f32.mrf.mxu1  ;;  %v459_v15 = vld [vmem:[%s9038_s0 + $0x448] sm:$0xff]  ;;  %2232 = vmatpush.msra.mxu0 %v340_v57 }
 0x20e   : > { %v1712_v13 = vpop.f32.mrf.mxu2  ;;  %2284 = vmatpush.msra.mxu1 %v459_v15 }
 0x20f   : > { %v1765_v31 = vpop.f32.mrf.mxu3  ;;  %3183 = vst [vmem:[%s5787_s22 + $0x48] sm:$0xff] %v1869_v7  ;;  %v6807_v50 = vadd.f32 %v3267_v11, %v1869_v7  ;;  %v3387_v18 = vmul.f32 %v1869_v7, %v1869_v7  ;;  %v1713_v49 = vadd.f32 %v1712_v13, %v1660_v38  ;;  %v452_v11 = vld [vmem:[%s9038_s0 + $0x410] sm:$0xff]  ;;  %v6855_v7 = vld [vmem:[%s4989_s6 + $0x180] sm:$0xff]  ;;  %v4702_v13 = vld [vmem:[%s5787_s22 + $0xa8] sm:$0xff] }
 0x210   : > { %2041 = vmatmul.f32.gmra.mxu0 %v6426_v19  ;;  %2094 = vmatmul.f32.gmra.mxu1 %v6430_v14  ;;  %v3393_v19 = vmul.f32 %v6456_v36, %v6456_v36 }
 0x211   : > { %v1766_v32 = vadd.f32 %v1765_v31, %v1713_v49  ;;  %v6820_v21 = vadd.f32 %v3471_v30, %v3387_v18  ;;  %v333_v30 = vld [vmem:[%s9038_s0 + $0x58] sm:$0xff]  ;;  %v3399_v31 = vmul.f32 %v4702_v13, %v4702_v13  ;;  %2285 = vmatpush.msra.mxu1 %v452_v11  ;;  %v3285_v49 = vadd.f32 %v4702_v13, %v6494_v48 }
 0x212   : > { %v3480_v40 = vadd.f32 %v3393_v19, %v3392_v8  ;;  %2233 = vmatpush.msra.mxu0 %v333_v30 }
 0x213   : > { %v1819_v14 = vadd.f32 %v1818_v6, %v1766_v32  ;;  %1938 = vmatmul.f32.gmra.mxu2 %v6825_v53  ;;  %v1666_v32 = vadd.f32 %v6511_v42, %v6509_v56  ;;  %v445_v42 = vld [vmem:[%s9038_s0 + $0x3d8] sm:$0xff] }
 0x214   : > { %1991 = vmatmul.f32.gmra.mxu3 %v6829_v20  ;;  %2286 = vmatpush.msra.mxu1 %v445_v42  ;;  %v6934_v42 = vld [vmem:[%s4989_s6 + $0x1e8] sm:$0xff] }
 0x215   : > { %v1821_v43 = vpop.f32.mrf.mxu0  ;;  %v1872_v24 = vadd.f32 %v1871_v60, %v1819_v14  ;;  %v1874_v0 = vpop.f32.mrf.mxu1  ;;  %v6859_v60 = vld [vmem:[%s4989_s6 + $0x188] sm:$0xff] }
 0x216   : > { %v1715_v3 = vpop.f32.mrf.mxu2 }
 0x217   : > { %v1768_v47 = vpop.f32.mrf.mxu3  ;;  %3190 = vst [vmem:[%s5787_s22 + $0x80] sm:$0xff] %v1872_v24  ;;  %v6837_v12 = vadd.f32 %v3276_v5, %v1872_v24  ;;  %v3394_v28 = vmul.f32 %v1872_v24, %v1872_v24  ;;  %v1716_v6 = vadd.f32 %v1715_v3, %v1663_v1  ;;  %v655_v5 = vld [vmem:[%s9038_s0 + $0xa68] sm:$0xff]  ;;  %v438_v3 = vld [vmem:[%s9038_s0 + $0x3a0] sm:$0xff] }
 0x218   : > { %2044 = vmatmul.f32.gmra.mxu0 %v6461_v27  ;;  %2097 = vmatmul.f32.gmra.mxu1 %v6465_v23  ;;  %v3400_v27 = vmul.f32 %v6494_v48, %v6494_v48  ;;  %v767_v1 = vld [vmem:[%s9038_s0 + $0xde8] sm:$0xff] }
 0x219   : > { %v1769_v36 = vadd.f32 %v1768_v47, %v1716_v6  ;;  %v6850_v38 = vadd.f32 %v3480_v40, %v3394_v28  ;;  %2325 = vmatpush.msrb.mxu2 %v655_v5  ;;  %v6895_v40 = vld [vmem:[%s4989_s6 + $0x1b8] sm:$0xff]  ;;  %v648_v47 = vld [vmem:[%s9038_s0 + $0xa30] sm:$0xff]  ;;  %v4705_v28 = vld [vmem:[%s5787_s22 + $0xe0] sm:$0xff]  ;;  %2378 = vmatpush.msrb.mxu3 %v767_v1 }
 0x21a   : > { %v3489_v15 = vadd.f32 %v3400_v27, %v3399_v31  ;;  %v3406_v6 = vmul.f32 %v4705_v28, %v4705_v28  ;;  %v3294_v57 = vadd.f32 %v4705_v28, %v6529_v52  ;;  %2287 = vmatpush.msra.mxu1 %v438_v3  ;;  %v753_v5 = vld [vmem:[%s9038_s0 + $0xd78] sm:$0xff]  ;;  %v9119_v3 = vld [vmem:[#allocation7_spill] sm:$0xff] }
 0x21b   : > { %v1822_v23 = vadd.f32 %v1821_v43, %v1769_v36  ;;  %1941 = vmatmul.f32.gmra.mxu2 %v6855_v7  ;;  %v4708_v1 = vld [vmem:[%s5787_s22 + $0x118] sm:$0xff] }
 0x21c   : > { %1994 = vmatmul.f32.gmra.mxu3 %v6859_v60  ;;  %2326 = vmatpush.msrb.mxu2 %v648_v47  ;;  %v9120_v47 = vld [vmem:[#allocation8_spill] sm:$0xff] }
 0x21d   : > { %v1824_v18 = vpop.f32.mrf.mxu0  ;;  %v1875_v33 = vadd.f32 %v1874_v0, %v1822_v23  ;;  %v1877_v22 = vpop.f32.mrf.mxu1  ;;  %v6891_v0 = vld [vmem:[%s4989_s6 + $0x1b0] sm:$0xff]  ;;  %v1672_v28 = vadd.f32 %v9120_v47, %v9119_v3 }
 0x21e   : > { %v1718_v19 = vpop.f32.mrf.mxu2 }
 0x21f   : > { %v1771_v14 = vpop.f32.mrf.mxu3  ;;  %3197 = vst [vmem:[%s5787_s22 + $0xb8] sm:$0xff] %v1875_v33  ;;  %v6870_v29 = vadd.f32 %v3285_v49, %v1875_v33  ;;  %v3401_v8 = vmul.f32 %v1875_v33, %v1875_v33  ;;  %v1719_v43 = vadd.f32 %v1718_v19, %v1666_v32  ;;  %v9116_v32 = vld [vmem:[#allocation2_spill] sm:$0xff]  ;;  %v760_v33 = vld [vmem:[%s9038_s0 + $0xdb0] sm:$0xff] }
 0x220   : > { %2047 = vmatmul.f32.gmra.mxu0 %v6502_v62  ;;  %2100 = vmatmul.f32.gmra.mxu1 %v6506_v26  ;;  %v3407_v62 = vmul.f32 %v6529_v52, %v6529_v52  ;;  %v326_v26 = vld [vmem:[%s9038_s0 + $0x20] sm:$0xff]  ;;  %v9117_v52 = vld [vmem:[#allocation3_spill] sm:$0xff]  ;;  %v9118_v19 = vld [vmem:[#allocation4_spill] sm:$0xff] }
 0x221   : > { %v6874_v48 = vadd.f32 %v3489_v15, %v3401_v8  ;;  %v1772_v56 = vadd.f32 %v1771_v14, %v1719_v43  ;;  %2234 = vmatpush.msra.mxu0 %v326_v26  ;;  %v641_v15 = vld [vmem:[%s9038_s0 + $0x9f8] sm:$0xff]  ;;  %v3414_v14 = vmul.f32 %v9118_v19, %v9118_v19  ;;  %2379 = vmatpush.msrb.mxu3 %v760_v33  ;;  %v907_v8 = vld [vmem:[%s9038_s0 + $0x1248] sm:$0xff]  ;;  %v746_v33 = vld [vmem:[%s9038_s0 + $0xd40] sm:$0xff] }
 0x222   : > { %v3498_v23 = vadd.f32 %v3407_v62, %v3406_v6  ;;  %v3413_v62 = vmul.f32 %v4708_v1, %v4708_v1  ;;  %2327 = vmatpush.msrb.mxu2 %v641_v15  ;;  %2496 = vmatpush.msrb.mxu1 %v907_v8  ;;  %v865_v8 = vld [vmem:[%s9038_s0 + $0x10f8] sm:$0xff] }
 0x223   : > { %v1825_v24 = vadd.f32 %v1824_v18, %v1772_v56  ;;  %1944 = vmatmul.f32.gmra.mxu2 %v6891_v0  ;;  %v6930_v56 = vld [vmem:[%s4989_s6 + $0x1e0] sm:$0xff]  ;;  %2380 = vmatpush.msrb.mxu3 %v753_v5 }
 0x224   : > { %1997 = vmatmul.f32.gmra.mxu3 %v6895_v40 }
 0x225   : > { %v1827_v36 = vpop.f32.mrf.mxu0  ;;  %v1878_v11 = vadd.f32 %v1877_v22, %v1825_v24  ;;  %v1880_v27 = vpop.f32.mrf.mxu1  ;;  %v879_v22 = vld [vmem:[%s9038_s0 + $0x1168] sm:$0xff]  ;;  %v3303_v24 = vadd.f32 %v4708_v1, %v9118_v19  ;;  %v6963_v19 = vld [vmem:[%s4989_s6 + $0x210] sm:$0xff]  ;;  %2381 = vmatpush.msrb.mxu3 %v746_v33  ;;  %v6996_v33 = vld [vmem:[%s4989_s6 + $0x20] sm:$0xff] }
 0x226   : > { %v1721_v30 = vpop.f32.mrf.mxu2  ;;  %2431 = vmatpush.msrb.mxu0 %v879_v22  ;;  %v3421_v22 = vmul.f32 %v6596_v63, %v6596_v63 }
 0x227   : > { %v1774_v13 = vpop.f32.mrf.mxu3  ;;  %3204 = vst [vmem:[%s5787_s22 + $0xf0] sm:$0xff] %v1878_v11  ;;  %v6909_v31 = vadd.f32 %v3294_v57, %v1878_v11  ;;  %v3408_v18 = vmul.f32 %v1878_v11, %v1878_v11  ;;  %v1722_v49 = vadd.f32 %v1721_v30, %v1669_v45  ;;  %v3507_v57 = vadd.f32 %v3414_v14, %v3413_v62  ;;  %v6967_v14 = vld [vmem:[%s4989_s6 + $0x218] sm:$0xff] }
 0x228   : > { %2050 = vmatmul.f32.gmra.mxu0 %v9116_v32  ;;  %2103 = vmatmul.f32.gmra.mxu1 %v9117_v52  ;;  %v872_v52 = vld [vmem:[%s9038_s0 + $0x1130] sm:$0xff] }
 0x229   : > { %v6913_v46 = vadd.f32 %v3498_v23, %v3408_v18  ;;  %v1775_v55 = vadd.f32 %v1774_v13, %v1722_v49  ;;  %v9121_v18 = vld [vmem:[#allocation5_spill] sm:$0xff]  ;;  %v9122_v49 = vld [vmem:[#allocation6_spill] sm:$0xff]  ;;  %2432 = vmatpush.msrb.mxu0 %v872_v52  ;;  %v3428_v52 = vmul.f32 %v6628_v10, %v6628_v10 }
 0x22b   : > { %v1828_v43 = vadd.f32 %v1827_v36, %v1775_v55  ;;  %1947 = vmatmul.f32.gmra.mxu2 %v6930_v56  ;;  %v634_v55 = vld [vmem:[%s9038_s0 + $0x9c0] sm:$0xff]  ;;  %2433 = vmatpush.msrb.mxu0 %v865_v8  ;;  %v4714_v8 = vld [vmem:[%s5787_s22 + $0x188] sm:$0xff] }
 0x22c   : > { %2000 = vmatmul.f32.gmra.mxu3 %v6934_v42  ;;  %2328 = vmatpush.msrb.mxu2 %v634_v55 }
 0x22d   : > { %v1830_v26 = vpop.f32.mrf.mxu0  ;;  %v1881_v6 = vadd.f32 %v1880_v27, %v1828_v43  ;;  %v1883_v36 = vpop.f32.mrf.mxu1  ;;  %v4711_v43 = vld [vmem:[%s5787_s22 + $0x150] sm:$0xff] }
 0x22e   : > { %v1724_v45 = vpop.f32.mrf.mxu2  ;;  %v3420_v5 = vmul.f32 %v4711_v43, %v4711_v43  ;;  %v3312_v62 = vadd.f32 %v4711_v43, %v6596_v63  ;;  %v3427_v43 = vmul.f32 %v4714_v8, %v4714_v8 }
 0x22f   : > { %v1777_v11 = vpop.f32.mrf.mxu3  ;;  %3211 = vst [vmem:[%s5787_s22 + $0x128] sm:$0xff] %v1881_v6  ;;  %v6945_v23 = vadd.f32 %v3303_v24, %v1881_v6  ;;  %v3415_v30 = vmul.f32 %v1881_v6, %v1881_v6  ;;  %v1725_v13 = vadd.f32 %v1724_v45, %v1672_v28 }
 0x230   : > { %2053 = vmatmul.f32.gmra.mxu0 %v9121_v18  ;;  %2106 = vmatmul.f32.gmra.mxu1 %v9122_v49  ;;  %v3516_v28 = vadd.f32 %v3421_v22, %v3420_v5  ;;  %v9125_v18 = vld [vmem:[#allocation10_spill] sm:$0xff]  ;;  %v739_v49 = vld [vmem:[%s9038_s0 + $0xd08] sm:$0xff] }
 0x231   : > { %v6949_v32 = vadd.f32 %v3507_v57, %v3415_v30  ;;  %v1778_v27 = vadd.f32 %v1777_v11, %v1725_v13  ;;  %v9124_v13 = vld [vmem:[#allocation9_spill] sm:$0xff]  ;;  %2382 = vmatpush.msrb.mxu3 %v739_v49  ;;  %v7000_v22 = vld [vmem:[%s4989_s6 + $0x28] sm:$0xff]  ;;  %v900_v49 = vld [vmem:[%s9038_s0 + $0x1210] sm:$0xff] }
 0x232   : > { %2497 = vmatpush.msrb.mxu1 %v900_v49 }
 0x233   : > { %v1831_v15 = vadd.f32 %v1830_v26, %v1778_v27  ;;  %1950 = vmatmul.f32.gmra.mxu2 %v6963_v19  ;;  %v9123_v26 = vld [vmem:[#allocation11_spill] sm:$0xff]  ;;  %v858_v27 = vld [vmem:[%s9038_s0 + $0x10c0] sm:$0xff] }
 0x234   : > { %2003 = vmatmul.f32.gmra.mxu3 %v6967_v14  ;;  %v1675_v24 = vadd.f32 %v9123_v26, %v6608_v17  ;;  %2434 = vmatpush.msrb.mxu0 %v858_v27  ;;  %v725_v27 = vld [vmem:[%s9038_s0 + $0xc98] sm:$0xff] }
 0x235   : > { %v1833_v1 = vpop.f32.mrf.mxu0  ;;  %v1884_v3 = vadd.f32 %v1883_v36, %v1831_v15  ;;  %v1886_v47 = vpop.f32.mrf.mxu1  ;;  %v627_v36 = vld [vmem:[%s9038_s0 + $0x988] sm:$0xff]  ;;  %v620_v15 = vld [vmem:[%s9038_s0 + $0x950] sm:$0xff] }
 0x236   : > { %v1727_v6 = vpop.f32.mrf.mxu2  ;;  %2329 = vmatpush.msrb.mxu2 %v627_v36  ;;  %v3435_v36 = vmul.f32 %v6653_v54, %v6653_v54 }
 0x237   : > { %v1780_v57 = vpop.f32.mrf.mxu3  ;;  %3218 = vst [vmem:[%s5787_s22 + $0x160] sm:$0xff] %v1884_v3  ;;  %v6978_v45 = vadd.f32 %v3312_v62, %v1884_v3  ;;  %v3422_v11 = vmul.f32 %v1884_v3, %v1884_v3  ;;  %v1728_v30 = vadd.f32 %v1727_v6, %v1675_v24  ;;  %v1678_v62 = vadd.f32 %v6636_v59, %v6634_v2  ;;  %v732_v2 = vld [vmem:[%s9038_s0 + $0xcd0] sm:$0xff]  ;;  %v851_v59 = vld [vmem:[%s9038_s0 + $0x1088] sm:$0xff] }
 0x238   : > { %2056 = vmatmul.f32.gmra.mxu0 %v9124_v13  ;;  %2109 = vmatmul.f32.gmra.mxu1 %v9125_v18  ;;  %v3525_v3 = vadd.f32 %v3428_v52, %v3427_v43  ;;  %v4715_v13 = vld [vmem:[%s4989_s6] sm:$0xff]  ;;  %v4716_v18 = vld [vmem:[%s4989_s6 + $0x8] sm:$0xff] }
 0x239   : > { %v6982_v63 = vadd.f32 %v3516_v28, %v3422_v11  ;;  %v1781_v17 = vadd.f32 %v1780_v57, %v1728_v30  ;;  %2330 = vmatpush.msrb.mxu2 %v620_v15  ;;  %2383 = vmatpush.msrb.mxu3 %v732_v2  ;;  %v7040_v15 = vld [vmem:[%s4989_s6 + $0x58] sm:$0xff]  ;;  %v606_v43 = vld [vmem:[%s9038_s0 + $0x8e0] sm:$0xff] }
 0x23a   : > { %2435 = vmatpush.msrb.mxu0 %v851_v59 }
 0x23b   : > { %v1834_v55 = vadd.f32 %v1833_v1, %v1781_v17  ;;  %2129 = vmatmul.f32.vlgmr.msra.gmra.mxu2 %v6996_v33  ;;  %v3321_v1 = vadd.f32 %v4714_v8, %v6628_v10  ;;  %v844_v8 = vld [vmem:[%s9038_s0 + $0x1050] sm:$0xff]  ;;  %2384 = vmatpush.msrb.mxu3 %v725_v27  ;;  %v7070_v27 = vld [vmem:[%s4989_s6 + $0x80] sm:$0xff] }
 0x23c   : > { %4501 = vmatmul.msk.f32.vlgmr.msra.gmra.mxu3 %vm910_vm0, %v7000_v22  ;;  %2436 = vmatpush.msrb.mxu0 %v844_v8  ;;  %v599_v8 = vld [vmem:[%s9038_s0 + $0x8a8] sm:$0xff] }
 0x23d   : > { %v1836_v5 = vpop.f32.mrf.mxu0  ;;  %v1887_v26 = vadd.f32 %v1886_v47, %v1834_v55  ;;  %v1889_v24 = vpop.f32.mrf.mxu1  ;;  %v613_v47 = vld [vmem:[%s9038_s0 + $0x918] sm:$0xff]  ;;  %v7036_v55 = vld [vmem:[%s4989_s6 + $0x50] sm:$0xff] }
 0x23e   : > { %v1730_v28 = vpop.f32.mrf.mxu2  ;;  %2331 = vmatpush.msrb.mxu2 %v613_v47  ;;  %v837_v47 = vld [vmem:[%s9038_s0 + $0x1018] sm:$0xff] }
 0x23f   : > { %v1783_v6 = vpop.f32.mrf.mxu3  ;;  %3225 = vst [vmem:[%s5787_s22 + $0x198] sm:$0xff] %v1887_v26  ;;  %v7012_v57 = vadd.f32 %v3321_v1, %v1887_v26  ;;  %v3429_v11 = vmul.f32 %v1887_v26, %v1887_v26  ;;  %v1731_v30 = vadd.f32 %v1730_v28, %v1678_v62  ;;  %v4719_v1 = vld [vmem:[%s5787_s22 + $0x1c0] sm:$0xff]  ;;  %2437 = vmatpush.msrb.mxu0 %v837_v47 }
 0x240   : > { %2235 = vmatmul.f32.vlgmr.msra.gmra.mxu0 %v4715_v13  ;;  %2288 = vmatmul.f32.vlgmr.msra.gmra.mxu1 %v4716_v18  ;;  %v3330_v26 = vadd.f32 %v4719_v1, %v6653_v54  ;;  %v4720_v54 = vld [vmem:[%s4989_s6 + $0x30] sm:$0xff]  ;;  %v3449_v47 = vmul.f32 %v6706_v35, %v6706_v35 }
 0x241   : > { %v7016_v10 = vadd.f32 %v3525_v3, %v3429_v11  ;;  %v1784_v17 = vadd.f32 %v1783_v6, %v1731_v30  ;;  %v1681_v3 = vadd.f32 %v6667_v37, %v6665_v58  ;;  %2332 = vmatpush.msrb.mxu2 %v606_v43  ;;  %v718_v58 = vld [vmem:[%s9038_s0 + $0xc60] sm:$0xff]  ;;  %v4721_v37 = vld [vmem:[%s4989_s6 + $0x38] sm:$0xff]  ;;  %v711_v43 = vld [vmem:[%s9038_s0 + $0xc28] sm:$0xff] }
 0x242   : > { %2385 = vmatpush.msrb.mxu3 %v718_v58 }
 0x243   : > { %v1837_v52 = vadd.f32 %v1836_v5, %v1784_v17  ;;  %2132 = vmatmul.f32.gmra.mxu2 %v7036_v55  ;;  %v3434_v5 = vmul.f32 %v4719_v1, %v4719_v1  ;;  %v4724_v1 = vld [vmem:[%s5787_s22 + $0x1f8] sm:$0xff] }
 0x244   : > { %4502 = vmatmul.msk.f32.gmra.mxu3 %vm910_vm0, %v7040_v15  ;;  %2333 = vmatpush.msrb.mxu2 %v599_v8  ;;  %v7108_v8 = vld [vmem:[%s4989_s6 + $0xb8] sm:$0xff] }
 0x245   : > { %v1839_v62 = vpop.f32.mrf.mxu0  ;;  %v1890_v28 = vadd.f32 %v1889_v24, %v1837_v52  ;;  %v1892_v6 = vpop.f32.mrf.mxu1  ;;  %v3534_v11 = vadd.f32 %v3435_v36, %v3434_v5  ;;  %v3442_v36 = vmul.f32 %v6672_v41, %v6672_v41  ;;  %v7074_v52 = vld [vmem:[%s4989_s6 + $0x88] sm:$0xff]  ;;  %v3441_v5 = vmul.f32 %v4724_v1, %v4724_v1  ;;  %2386 = vmatpush.msrb.mxu3 %v711_v43  ;;  %v704_v43 = vld [vmem:[%s9038_s0 + $0xbf0] sm:$0xff] }
 0x246   : > { %v1733_v30 = vpop.f32.mrf.mxu2 }
 0x247   : > { %v1786_v13 = vpop.f32.mrf.mxu3  ;;  %3232 = vst [vmem:[%s5787_s22 + $0x1d0] sm:$0xff] %v1890_v28  ;;  %v7055_v18 = vadd.f32 %v3330_v26, %v1890_v28  ;;  %v3436_v17 = vmul.f32 %v1890_v28, %v1890_v28  ;;  %v1734_v2 = vadd.f32 %v1733_v30, %v1681_v3  ;;  %v3339_v26 = vadd.f32 %v4724_v1, %v6672_v41  ;;  %v830_v41 = vld [vmem:[%s9038_s0 + $0xfe0] sm:$0xff]  ;;  %v823_v1 = vld [vmem:[%s9038_s0 + $0xfa8] sm:$0xff] }
 0x248   : > { %2238 = vmatmul.f32.gmra.mxu0 %v4720_v54  ;;  %2291 = vmatmul.f32.gmra.mxu1 %v4721_v37  ;;  %v1684_v3 = vadd.f32 %v6692_v44, %v6690_v9  ;;  %v3543_v30 = vadd.f32 %v3442_v36, %v3441_v5  ;;  %v4725_v37 = vld [vmem:[%s4989_s6 + $0x60] sm:$0xff]  ;;  %v4726_v9 = vld [vmem:[%s4989_s6 + $0x68] sm:$0xff]  ;;  %v4729_v5 = vld [vmem:[%s5787_s22 + $0x230] sm:$0xff] }
 0x249   : > { %v7062_v24 = vadd.f32 %v3534_v11, %v3436_v17  ;;  %v1787_v59 = vadd.f32 %v1786_v13, %v1734_v2  ;;  %2438 = vmatpush.msrb.mxu0 %v830_v41  ;;  %2387 = vmatpush.msrb.mxu3 %v704_v43 }
 0x24b   : > { %v1840_v49 = vadd.f32 %v1839_v62, %v1787_v59  ;;  %2135 = vmatmul.f32.gmra.mxu2 %v7070_v27  ;;  %v592_v59 = vld [vmem:[%s9038_s0 + $0x870] sm:$0xff]  ;;  %2439 = vmatpush.msrb.mxu0 %v823_v1  ;;  %v7141_v1 = vld [vmem:[%s4989_s6 + $0xe0] sm:$0xff] }
 0x24c   : > { %4503 = vmatmul.msk.f32.gmra.mxu3 %vm910_vm0, %v7074_v52  ;;  %2334 = vmatpush.msrb.mxu2 %v592_v59 }
 0x24d   : > { %v1842_v62 = vpop.f32.mrf.mxu0  ;;  %v1893_v28 = vadd.f32 %v1892_v6, %v1840_v49  ;;  %v1895_v11 = vpop.f32.mrf.mxu1  ;;  %v7104_v49 = vld [vmem:[%s4989_s6 + $0xb0] sm:$0xff] }
 0x24e   : > { %v1736_v13 = vpop.f32.mrf.mxu2 }
 0x24f   : > { %v1789_v17 = vpop.f32.mrf.mxu3  ;;  %3239 = vst [vmem:[%s5787_s22 + $0x208] sm:$0xff] %v1893_v28  ;;  %v7089_v2 = vadd.f32 %v3339_v26, %v1893_v28  ;;  %v3443_v54 = vmul.f32 %v1893_v28, %v1893_v28  ;;  %v1737_v58 = vadd.f32 %v1736_v13, %v1684_v3  ;;  %v3348_v3 = vadd.f32 %v4729_v5, %v6706_v35  ;;  %v585_v35 = vld [vmem:[%s9038_s0 + $0x838] sm:$0xff] }
 0x250   : > { %2241 = vmatmul.f32.gmra.mxu0 %v4725_v37  ;;  %2294 = vmatmul.f32.gmra.mxu1 %v4726_v9  ;;  %v1687_v28 = vadd.f32 %v6723_v34, %v6721_v61  ;;  %v893_v61 = vld [vmem:[%s9038_s0 + $0x11d8] sm:$0xff] }
 0x251   : > { %9126 = vst [vmem:[#allocation12_spill] sm:$0xff] %v7089_v2  ;;  %v7096_v44 = vadd.f32 %v3543_v30, %v3443_v54  ;;  %v1790_v6 = vadd.f32 %v1789_v17, %v1737_v58  ;;  %v4731_v34 = vld [vmem:[%s4989_s6 + $0x98] sm:$0xff]  ;;  %2335 = vmatpush.msrb.mxu2 %v585_v35  ;;  %2498 = vmatpush.msrb.mxu1 %v893_v61 }
 0x253   : > { %9127 = vst [vmem:[#allocation13_spill] sm:$0xff] %v7096_v44  ;;  %v1843_v36 = vadd.f32 %v1842_v62, %v1790_v6  ;;  %2138 = vmatmul.f32.gmra.mxu2 %v7104_v49  ;;  %v3448_v62 = vmul.f32 %v4729_v5, %v4729_v5  ;;  %v4730_v6 = vld [vmem:[%s4989_s6 + $0x90] sm:$0xff]  ;;  %v7145_v5 = vld [vmem:[%s4989_s6 + $0xe8] sm:$0xff] }
 0x254   : > { %4504 = vmatmul.msk.f32.gmra.mxu3 %vm910_vm0, %v7108_v8  ;;  %v7386_v44 = vld [vmem:[%s4989_s6 + $0x48] sm:$0xff] }
 0x255   : > { %v1845_v26 = vpop.f32.mrf.mxu0  ;;  %v1896_v30 = vadd.f32 %v1895_v11, %v1843_v36  ;;  %v1898_v13 = vpop.f32.mrf.mxu1  ;;  %v3552_v17 = vadd.f32 %v3449_v47, %v3448_v62  ;;  %v697_v47 = vld [vmem:[%s9038_s0 + $0xbb8] sm:$0xff]  ;;  %v3456_v36 = vmul.f32 %v6731_v25, %v6731_v25  ;;  %v816_v62 = vld [vmem:[%s9038_s0 + $0xf70] sm:$0xff]  ;;  %9133 = vst [vmem:[#allocation8_spill] sm:$0xff] %v7386_v44 }
 0x256   : > { %v1739_v54 = vpop.f32.mrf.mxu2  ;;  %2388 = vmatpush.msrb.mxu3 %v697_v47  ;;  %2440 = vmatpush.msrb.mxu0 %v816_v62  ;;  %v690_v47 = vld [vmem:[%s9038_s0 + $0xb80] sm:$0xff]  ;;  %v4736_v62 = vld [vmem:[%s4989_s6 + $0xc8] sm:$0xff] }
 0x257   : > { %v1792_v58 = vpop.f32.mrf.mxu3  ;;  %3246 = vst [vmem:[%s5787_s22 + $0x240] sm:$0xff] %v1896_v30  ;;  %v7123_v37 = vadd.f32 %v3348_v3, %v1896_v30  ;;  %v3450_v41 = vmul.f32 %v1896_v30, %v1896_v30  ;;  %v1740_v9 = vadd.f32 %v1739_v54, %v1687_v28  ;;  %v578_v3 = vld [vmem:[%s9038_s0 + $0x800] sm:$0xff] }
 0x258   : > { %2244 = vmatmul.f32.gmra.mxu0 %v4730_v6  ;;  %2297 = vmatmul.f32.gmra.mxu1 %v4731_v34 }
 0x259   : > { %9128 = vst [vmem:[#allocation14_spill] sm:$0xff] %v7123_v37  ;;  %v7133_v11 = vadd.f32 %v3552_v17, %v3450_v41  ;;  %v1793_v59 = vadd.f32 %v1792_v58, %v1740_v9  ;;  %2336 = vmatpush.msrb.mxu2 %v578_v3  ;;  %2389 = vmatpush.msrb.mxu3 %v690_v47  ;;  %v7173_v3 = vld [vmem:[%s4989_s6 + $0x110] sm:$0xff]  ;;  %v7382_v37 = vld [vmem:[%s4989_s6 + $0x40] sm:$0xff] }
 0x25a   : > { %v564_v47 = vld [vmem:[%s9038_s0 + $0x790] sm:$0xff]  ;;  %9132 = vst [vmem:[#allocation7_spill] sm:$0xff] %v7382_v37 }
 0x25b   : > { %9129 = vst [vmem:[#allocation2_spill] sm:$0xff] %v7133_v11  ;;  %v1846_v43 = vadd.f32 %v1845_v26, %v1793_v59  ;;  %2141 = vmatmul.f32.gmra.mxu2 %v7141_v1  ;;  %v4734_v26 = vld [vmem:[%s5787_s22 + $0x268] sm:$0xff]  ;;  %v4735_v59 = vld [vmem:[%s4989_s6 + $0xc0] sm:$0xff] }
 0x25c   : > { %4505 = vmatmul.msk.f32.gmra.mxu3 %vm910_vm0, %v7145_v5  ;;  %v3455_v28 = vmul.f32 %v4734_v26, %v4734_v26  ;;  %v3357_v17 = vadd.f32 %v4734_v26, %v6731_v25  ;;  %v7177_v26 = vld [vmem:[%s4989_s6 + $0x118] sm:$0xff] }
 0x25d   : > { %v2024_v30 = vpop.f32.mrf.mxu0  ;;  %v1899_v54 = vadd.f32 %v1898_v13, %v1846_v43  ;;  %v2077_v58 = vpop.f32.mrf.mxu1 }
 0x25e   : > { %v3561_v41 = vadd.f32 %v3456_v36, %v3455_v28  ;;  %v1918_v9 = vpop.f32.mrf.mxu2  ;;  %v809_v36 = vld [vmem:[%s9038_s0 + $0xf38] sm:$0xff]  ;;  %v571_v28 = vld [vmem:[%s9038_s0 + $0x7c8] sm:$0xff] }
 0x25f   : > { %v1971_v6 = vpop.f32.mrf.mxu3  ;;  %3253 = vst [vmem:[%s5787_s22 + $0x278] sm:$0xff] %v1899_v54  ;;  %v7158_v35 = vadd.f32 %v3357_v17, %v1899_v54  ;;  %v3457_v61 = vmul.f32 %v1899_v54, %v1899_v54  ;;  %2441 = vmatpush.msrb.mxu0 %v809_v36  ;;  %2337 = vmatpush.msrb.mxu2 %v571_v28  ;;  %v7202_v36 = vld [vmem:[%s4989_s6 + $0x148] sm:$0xff]  ;;  %v676_v28 = vld [vmem:[%s9038_s0 + $0xb10] sm:$0xff] }
 0x260   : > { %v1972_v34 = vadd.f32 %v1971_v6, %v1918_v9  ;;  %2247 = vmatmul.f32.gmra.mxu0 %v4735_v59  ;;  %2300 = vmatmul.f32.gmra.mxu1 %v4736_v62  ;;  %v4739_v6 = vld [vmem:[%s4989_s6 + $0xf0] sm:$0xff] }
 0x261   : > { %9130 = vst [vmem:[#allocation3_spill] sm:$0xff] %v7158_v35  ;;  %v7165_v25 = vadd.f32 %v3561_v41, %v3457_v61  ;;  %v802_v61 = vld [vmem:[%s9038_s0 + $0xf00] sm:$0xff]  ;;  %2338 = vmatpush.msrb.mxu2 %v564_v47 }
 0x262   : > { %v2025_v13 = vadd.f32 %v2024_v30, %v1972_v34  ;;  %v683_v30 = vld [vmem:[%s9038_s0 + $0xb48] sm:$0xff]  ;;  %v4740_v34 = vld [vmem:[%s4989_s6 + $0xf8] sm:$0xff]  ;;  %2442 = vmatpush.msrb.mxu0 %v802_v61  ;;  %v886_v61 = vld [vmem:[%s9038_s0 + $0x11a0] sm:$0xff] }
 0x263   : > { %9131 = vst [vmem:[#allocation4_spill] sm:$0xff] %v7165_v25  ;;  %2144 = vmatmul.f32.gmra.mxu2 %v7173_v3  ;;  %2390 = vmatpush.msrb.mxu3 %v683_v30  ;;  %v795_v30 = vld [vmem:[%s9038_s0 + $0xec8] sm:$0xff] }
 0x264   : > { %v7170_v43 = vadd.f32 %v2077_v58, %v2025_v13  ;;  %4506 = vmatmul.msk.f32.gmra.mxu3 %vm910_vm0, %v7177_v26  ;;  %v7198_v13 = vld [vmem:[%s4989_s6 + $0x140] sm:$0xff]  ;;  %2443 = vmatpush.msrb.mxu0 %v795_v30  ;;  %v523_v25 = vld [vmem:[%s9038_s0 + $0x648] sm:$0xff] }
 0x265   : > { %v2027_v17 = vpop.f32.mrf.mxu0  ;;  %v2080_v54 = vpop.f32.mrf.mxu1  ;;  %2391 = vmatpush.msrb.mxu3 %v676_v28  ;;  %2499 = vmatpush.msrb.mxu1 %v886_v61  ;;  %v7230_v28 = vld [vmem:[%s4989_s6 + $0x178] sm:$0xff]  ;;  %v550_v30 = vld [vmem:[%s9038_s0 + $0x720] sm:$0xff] }
 0x266   : > { %v1921_v58 = vpop.f32.mrf.mxu2 }
 0x267   : > { %v1974_v41 = vpop.f32.mrf.mxu3 }
 0x268   : > { %v1975_v9 = vadd.f32 %v1974_v41, %v1921_v58  ;;  %2250 = vmatmul.f32.gmra.mxu0 %v4739_v6  ;;  %2303 = vmatmul.f32.gmra.mxu1 %v4740_v34  ;;  %v557_v6 = vld [vmem:[%s9038_s0 + $0x758] sm:$0xff] }
 0x269   : > { %2339 = vmatpush.msrb.mxu2 %v557_v6  ;;  %v662_v6 = vld [vmem:[%s9038_s0 + $0xaa0] sm:$0xff] }
 0x26a   : > { %v2028_v59 = vadd.f32 %v2027_v17, %v1975_v9 }
 0x26b   : > { %2147 = vmatmul.f32.gmra.mxu2 %v7198_v13 }
 0x26c   : > { %v7195_v62 = vadd.f32 %v2080_v54, %v2028_v59  ;;  %4507 = vmatmul.msk.f32.gmra.mxu3 %vm910_vm0, %v7202_v36  ;;  %v669_v59 = vld [vmem:[%s9038_s0 + $0xad8] sm:$0xff]  ;;  %2340 = vmatpush.msrb.mxu2 %v550_v30  ;;  %v544_v30 = vld [vmem:[%s9038_s0 + $0x6f0] sm:$0xff] }
 0x26d   : > { %v2030_v17 = vpop.f32.mrf.mxu0  ;;  %v2083_v54 = vpop.f32.mrf.mxu1  ;;  %2392 = vmatpush.msrb.mxu3 %v669_v59 }
 0x26e   : > { %v1924_v58 = vpop.f32.mrf.mxu2 }
 0x26f   : > { %v1977_v41 = vpop.f32.mrf.mxu3  ;;  %2393 = vmatpush.msrb.mxu3 %v662_v6  ;;  %v774_v6 = vld [vmem:[%s9038_s0 + $0xe20] sm:$0xff] }
 0x270   : > { %v1978_v9 = vadd.f32 %v1977_v41, %v1924_v58  ;;  %2253 = vmatmul.f32.gmra.mxu0 %v6789_v51  ;;  %2306 = vmatmul.f32.gmra.mxu1 %v6793_v39  ;;  %v7226_v51 = vld [vmem:[%s4989_s6 + $0x170] sm:$0xff] }
 0x271   : > { %v788_v39 = vld [vmem:[%s9038_s0 + $0xe90] sm:$0xff]  ;;  %2590 = vmatpush.msra.mxu3 %v544_v30 }
 0x272   : > { %v2031_v34 = vadd.f32 %v2030_v17, %v1978_v9  ;;  %2444 = vmatpush.msrb.mxu0 %v788_v39  ;;  %v7251_v39 = vld [vmem:[%s4989_s6 + $0x1a0] sm:$0xff]  ;;  %v7276_v30 = vld [vmem:[%s4989_s6 + $0x1d0] sm:$0xff] }
 0x273   : > { %2150 = vmatmul.f32.gmra.mxu2 %v7226_v51 }
 0x274   : > { %v7223_v47 = vadd.f32 %v2083_v54, %v2031_v34  ;;  %4508 = vmatmul.msk.f32.gmra.mxu3 %vm910_vm0, %v7230_v28  ;;  %v781_v34 = vld [vmem:[%s9038_s0 + $0xe58] sm:$0xff] }
 0x275   : > { %v2033_v17 = vpop.f32.mrf.mxu0  ;;  %v2086_v54 = vpop.f32.mrf.mxu1  ;;  %2445 = vmatpush.msrb.mxu0 %v781_v34  ;;  %v425_v34 = vld [vmem:[%s9038_s0 + $0x338] sm:$0xff] }
 0x276   : > { %v1927_v58 = vpop.f32.mrf.mxu2 }
 0x277   : > { %v1980_v41 = vpop.f32.mrf.mxu3  ;;  %2446 = vmatpush.msrb.mxu0 %v774_v6 }
 0x278   : > { %v1981_v9 = vadd.f32 %v1980_v41, %v1927_v58  ;;  %2256 = vmatmul.f32.gmra.mxu0 %v6825_v53  ;;  %2309 = vmatmul.f32.gmra.mxu1 %v6829_v20  ;;  %v7255_v53 = vld [vmem:[%s4989_s6 + $0x1a8] sm:$0xff]  ;;  %v432_v20 = vld [vmem:[%s9038_s0 + $0x370] sm:$0xff] }
 0x279   : > { %2537 = vmatpush.msra.mxu2 %v432_v20 }
 0x27a   : > { %v2034_v61 = vadd.f32 %v2033_v17, %v1981_v9 }
 0x27b   : > { %2153 = vmatmul.f32.gmra.mxu2 %v7251_v39 }
 0x27c   : > { %v7248_v59 = vadd.f32 %v2086_v54, %v2034_v61  ;;  %4509 = vmatmul.msk.f32.gmra.mxu3 %vm910_vm0, %v7255_v53  ;;  %2538 = vmatpush.msra.mxu2 %v425_v34  ;;  %v768_v34 = vld [vmem:[%s9038_s0 + $0xdf0] sm:$0xff] }
 0x27d   : > { %v2036_v17 = vpop.f32.mrf.mxu0  ;;  %v2089_v54 = vpop.f32.mrf.mxu1  ;;  %2696 = vmatpush.msra.mxu1 %v768_v34 }
 0x27e   : > { %v1930_v58 = vpop.f32.mrf.mxu2 }
 0x27f   : > { %v1983_v41 = vpop.f32.mrf.mxu3 }
 0x280   : > { %v1984_v9 = vadd.f32 %v1983_v41, %v1930_v58  ;;  %2259 = vmatmul.f32.gmra.mxu0 %v6855_v7  ;;  %2312 = vmatmul.f32.gmra.mxu1 %v6859_v60  ;;  %v7280_v7 = vld [vmem:[%s4989_s6 + $0x1d8] sm:$0xff] }
 0x281   : > { %v537_v60 = vld [vmem:[%s9038_s0 + $0x6b8] sm:$0xff] }
 0x282   : > { %v2037_v61 = vadd.f32 %v2036_v17, %v1984_v9  ;;  %v656_v17 = vld [vmem:[%s9038_s0 + $0xa70] sm:$0xff]  ;;  %2591 = vmatpush.msra.mxu3 %v537_v60 }
 0x283   : > { %2156 = vmatmul.f32.gmra.mxu2 %v7276_v30  ;;  %2643 = vmatpush.msra.mxu0 %v656_v17  ;;  %v530_v17 = vld [vmem:[%s9038_s0 + $0x680] sm:$0xff] }
 0x284   : > { %v7273_v20 = vadd.f32 %v2089_v54, %v2037_v61  ;;  %4510 = vmatmul.msk.f32.gmra.mxu3 %vm910_vm0, %v7280_v7  ;;  %v418_v61 = vld [vmem:[%s9038_s0 + $0x300] sm:$0xff] }
 0x285   : > { %v2039_v58 = vpop.f32.mrf.mxu0  ;;  %v2092_v54 = vpop.f32.mrf.mxu1  ;;  %2539 = vmatpush.msra.mxu2 %v418_v61  ;;  %2592 = vmatpush.msra.mxu3 %v530_v17 }
 0x286   : > { %v1933_v41 = vpop.f32.mrf.mxu2 }
 0x287   : > { %v1986_v9 = vpop.f32.mrf.mxu3  ;;  %2593 = vmatpush.msra.mxu3 %v523_v25  ;;  %v754_v25 = vld [vmem:[%s9038_s0 + $0xd80] sm:$0xff] }
 0x288   : > { %v1987_v6 = vadd.f32 %v1986_v9, %v1933_v41  ;;  %2262 = vmatmul.f32.gmra.mxu0 %v6891_v0  ;;  %2315 = vmatmul.f32.gmra.mxu1 %v6895_v40  ;;  %v7304_v0 = vld [vmem:[%s4989_s6 + $0x200] sm:$0xff]  ;;  %v7308_v9 = vld [vmem:[%s4989_s6 + $0x208] sm:$0xff]  ;;  %v649_v40 = vld [vmem:[%s9038_s0 + $0xa38] sm:$0xff] }
 0x289   : > { %2644 = vmatpush.msra.mxu0 %v649_v40  ;;  %v642_v40 = vld [vmem:[%s9038_s0 + $0xa00] sm:$0xff] }
 0x28a   : > { %v2040_v60 = vadd.f32 %v2039_v58, %v1987_v6  ;;  %v411_v58 = vld [vmem:[%s9038_s0 + $0x2c8] sm:$0xff] }
 0x28b   : > { %2159 = vmatmul.f32.gmra.mxu2 %v7304_v0  ;;  %2645 = vmatpush.msra.mxu0 %v642_v40  ;;  %v635_v40 = vld [vmem:[%s9038_s0 + $0x9c8] sm:$0xff] }
 0x28c   : > { %v7301_v41 = vadd.f32 %v2092_v54, %v2040_v60  ;;  %4511 = vmatmul.msk.f32.gmra.mxu3 %vm910_vm0, %v7308_v9  ;;  %v761_v54 = vld [vmem:[%s9038_s0 + $0xdb8] sm:$0xff]  ;;  %2540 = vmatpush.msra.mxu2 %v411_v58 }
 0x28d   : > { %v2042_v6 = vpop.f32.mrf.mxu0  ;;  %v2095_v61 = vpop.f32.mrf.mxu1  ;;  %2697 = vmatpush.msra.mxu1 %v761_v54  ;;  %v7332_v54 = vld [vmem:[%s4989_s6 + $0x230] sm:$0xff]  ;;  %2646 = vmatpush.msra.mxu0 %v635_v40 }
 0x28e   : > { %v1936_v34 = vpop.f32.mrf.mxu2 }
 0x28f   : > { %v1989_v60 = vpop.f32.mrf.mxu3  ;;  %2698 = vmatpush.msra.mxu1 %v754_v25  ;;  %v747_v25 = vld [vmem:[%s9038_s0 + $0xd48] sm:$0xff] }
 0x290   : > { %v1990_v17 = vadd.f32 %v1989_v60, %v1936_v34  ;;  %2265 = vmatmul.f32.gmra.mxu0 %v6930_v56  ;;  %2318 = vmatmul.f32.gmra.mxu1 %v6934_v42  ;;  %v7336_v56 = vld [vmem:[%s4989_s6 + $0x238] sm:$0xff]  ;;  %v404_v42 = vld [vmem:[%s9038_s0 + $0x290] sm:$0xff] }
 0x291   : > { %2541 = vmatpush.msra.mxu2 %v404_v42  ;;  %v397_v42 = vld [vmem:[%s9038_s0 + $0x258] sm:$0xff]  ;;  %2699 = vmatpush.msra.mxu1 %v747_v25 }
 0x292   : > { %v2043_v35 = vadd.f32 %v2042_v6, %v1990_v17 }
 0x293   : > { %2162 = vmatmul.f32.gmra.mxu2 %v7332_v54 }
 0x294   : > { %v7329_v58 = vadd.f32 %v2095_v61, %v2043_v35  ;;  %4512 = vmatmul.msk.f32.gmra.mxu3 %vm910_vm0, %v7336_v56  ;;  %v516_v35 = vld [vmem:[%s9038_s0 + $0x610] sm:$0xff]  ;;  %2542 = vmatpush.msra.mxu2 %v397_v42 }
 0x295   : > { %v2045_v6 = vpop.f32.mrf.mxu0  ;;  %v2098_v61 = vpop.f32.mrf.mxu1  ;;  %2594 = vmatpush.msra.mxu3 %v516_v35 }
 0x296   : > { %v1939_v34 = vpop.f32.mrf.mxu2 }
 0x297   : > { %v1992_v60 = vpop.f32.mrf.mxu3 }
 0x298   : > { %v1993_v17 = vadd.f32 %v1992_v60, %v1939_v34  ;;  %2268 = vmatmul.f32.gmra.mxu0 %v6963_v19  ;;  %2321 = vmatmul.f32.gmra.mxu1 %v6967_v14  ;;  %v7363_v19 = vld [vmem:[%s4989_s6 + $0x10] sm:$0xff]  ;;  %v7367_v14 = vld [vmem:[%s4989_s6 + $0x18] sm:$0xff] }
 0x299   : > { %v628_v34 = vld [vmem:[%s9038_s0 + $0x990] sm:$0xff] }
 0x29a   : > { %v2046_v11 = vadd.f32 %v2045_v6, %v1993_v17  ;;  %v509_v6 = vld [vmem:[%s9038_s0 + $0x5d8] sm:$0xff]  ;;  %2647 = vmatpush.msra.mxu0 %v628_v34 }
 0x29b   : > { %2341 = vmatmul.f32.vlgmr.msrb.gmra.mxu2 %v7363_v19  ;;  %2595 = vmatpush.msra.mxu3 %v509_v6  ;;  %v390_v6 = vld [vmem:[%s9038_s0 + $0x220] sm:$0xff] }
 0x29c   : > { %v7360_v35 = vadd.f32 %v2098_v61, %v2046_v11  ;;  %2394 = vmatmul.f32.vlgmr.msrb.gmra.mxu3 %v7367_v14  ;;  %2543 = vmatpush.msra.mxu2 %v390_v6 }
 0x29d   : > { %v2048_v11 = vpop.f32.mrf.mxu0  ;;  %v2101_v61 = vpop.f32.mrf.mxu1 }
 0x29e   : > { %v1942_v60 = vpop.f32.mrf.mxu2 }
 0x29f   : > { %v1995_v17 = vpop.f32.mrf.mxu3 }
 0x2a0   : > { %v1996_v40 = vadd.f32 %v1995_v17, %v1942_v60  ;;  %2447 = vmatmul.f32.vlgmr.msrb.gmra.mxu0 %v6996_v33  ;;  %4513 = vmatmul.msk.f32.vlgmr.msrb.gmra.mxu1 %vm910_vm0, %v7000_v22  ;;  %v740_v33 = vld [vmem:[%s9038_s0 + $0xd10] sm:$0xff]  ;;  %v502_v22 = vld [vmem:[%s9038_s0 + $0x5a0] sm:$0xff]  ;;  %v733_v60 = vld [vmem:[%s9038_s0 + $0xcd8] sm:$0xff] }
 0x2a1   : > { %2700 = vmatpush.msra.mxu1 %v740_v33  ;;  %2596 = vmatpush.msra.mxu3 %v502_v22  ;;  %v495_v22 = vld [vmem:[%s9038_s0 + $0x568] sm:$0xff] }
 0x2a2   : > { %v2049_v42 = vadd.f32 %v2048_v11, %v1996_v40  ;;  %v621_v11 = vld [vmem:[%s9038_s0 + $0x958] sm:$0xff] }
 0x2a3   : > { %2344 = vmatmul.f32.gmra.mxu2 %v7382_v37  ;;  %2648 = vmatpush.msra.mxu0 %v621_v11  ;;  %v7417_v37 = vld [vmem:[%s4989_s6 + $0x78] sm:$0xff]  ;;  %v726_v11 = vld [vmem:[%s9038_s0 + $0xca0] sm:$0xff] }
 0x2a4   : > { %v7379_v25 = vadd.f32 %v2101_v61, %v2049_v42  ;;  %2397 = vmatmul.f32.gmra.mxu3 %v7386_v44  ;;  %v383_v61 = vld [vmem:[%s9038_s0 + $0x1e8] sm:$0xff]  ;;  %2701 = vmatpush.msra.mxu1 %v733_v60  ;;  %v7413_v44 = vld [vmem:[%s4989_s6 + $0x70] sm:$0xff] }
 0x2a5   : > { %v2051_v34 = vpop.f32.mrf.mxu0  ;;  %v2104_v17 = vpop.f32.mrf.mxu1  ;;  %2544 = vmatpush.msra.mxu2 %v383_v61  ;;  %2597 = vmatpush.msra.mxu3 %v495_v22  ;;  %v488_v61 = vld [vmem:[%s9038_s0 + $0x530] sm:$0xff]  ;;  %v7441_v22 = vld [vmem:[%s4989_s6 + $0xa0] sm:$0xff] }
 0x2a6   : > { %v1945_v40 = vpop.f32.mrf.mxu2  ;;  %2702 = vmatpush.msra.mxu1 %v726_v11  ;;  %v481_v11 = vld [vmem:[%s9038_s0 + $0x4f8] sm:$0xff] }
 0x2a7   : > { %v1998_v42 = vpop.f32.mrf.mxu3  ;;  %2598 = vmatpush.msra.mxu3 %v488_v61  ;;  %v600_v61 = vld [vmem:[%s9038_s0 + $0x8b0] sm:$0xff] }
 0x2a8   : > { %v1999_v6 = vadd.f32 %v1998_v42, %v1945_v40  ;;  %2450 = vmatmul.f32.gmra.mxu0 %v7036_v55  ;;  %4514 = vmatmul.msk.f32.gmra.mxu1 %vm910_vm0, %v7040_v15  ;;  %v614_v55 = vld [vmem:[%s9038_s0 + $0x920] sm:$0xff]  ;;  %v376_v15 = vld [vmem:[%s9038_s0 + $0x1b0] sm:$0xff] }
 0x2a9   : > { %2649 = vmatpush.msra.mxu0 %v614_v55  ;;  %2545 = vmatpush.msra.mxu2 %v376_v15  ;;  %v7445_v55 = vld [vmem:[%s4989_s6 + $0xa8] sm:$0xff] }
 0x2aa   : > { %v2052_v33 = vadd.f32 %v2051_v34, %v1999_v6  ;;  %9134 = vst [vmem:[#allocation5_spill] sm:$0xff] %v7445_v55  ;;  %v607_v15 = vld [vmem:[%s9038_s0 + $0x8e8] sm:$0xff]  ;;  %2599 = vmatpush.msra.mxu3 %v481_v11  ;;  %v593_v11 = vld [vmem:[%s9038_s0 + $0x878] sm:$0xff] }
 0x2ab   : > { %2347 = vmatmul.f32.gmra.mxu2 %v7413_v44  ;;  %2650 = vmatpush.msra.mxu0 %v607_v15 }
 0x2ac   : > { %v7410_v2 = vadd.f32 %v2104_v17, %v2052_v33  ;;  %2400 = vmatmul.f32.gmra.mxu3 %v7417_v37 }
 0x2ad   : > { %v2054_v34 = vpop.f32.mrf.mxu0  ;;  %v2107_v60 = vpop.f32.mrf.mxu1  ;;  %2651 = vmatpush.msra.mxu0 %v600_v61  ;;  %v355_v61 = vld [vmem:[%s9038_s0 + $0x108] sm:$0xff] }
 0x2ae   : > { %v1948_v17 = vpop.f32.mrf.mxu2 }
 0x2af   : > { %v2001_v40 = vpop.f32.mrf.mxu3  ;;  %2652 = vmatpush.msra.mxu0 %v593_v11 }
 0x2b0   : > { %v2002_v42 = vadd.f32 %v2001_v40, %v1948_v17  ;;  %2453 = vmatmul.f32.gmra.mxu0 %v7070_v27  ;;  %4515 = vmatmul.msk.f32.gmra.mxu1 %vm910_vm0, %v7074_v52  ;;  %v369_v27 = vld [vmem:[%s9038_s0 + $0x178] sm:$0xff]  ;;  %v719_v52 = vld [vmem:[%s9038_s0 + $0xc68] sm:$0xff] }
 0x2b1   : > { %2546 = vmatpush.msra.mxu2 %v369_v27  ;;  %2703 = vmatpush.msra.mxu1 %v719_v52  ;;  %v7469_v27 = vld [vmem:[%s4989_s6 + $0xd0] sm:$0xff]  ;;  %v362_v52 = vld [vmem:[%s9038_s0 + $0x140] sm:$0xff] }
 0x2b2   : > { %v2055_v6 = vadd.f32 %v2054_v34, %v2002_v42 }
 0x2b3   : > { %2350 = vmatmul.f32.gmra.mxu2 %v7441_v22 }
 0x2b4   : > { %v7438_v33 = vadd.f32 %v2107_v60, %v2055_v6  ;;  %2403 = vmatmul.f32.gmra.mxu3 %v7445_v55  ;;  %v7473_v55 = vld [vmem:[%s4989_s6 + $0xd8] sm:$0xff]  ;;  %2547 = vmatpush.msra.mxu2 %v362_v52 }
 0x2b5   : > { %v2057_v34 = vpop.f32.mrf.mxu0  ;;  %v2110_v60 = vpop.f32.mrf.mxu1  ;;  %9135 = vst [vmem:[#allocation6_spill] sm:$0xff] %v7473_v55 }
 0x2b6   : > { %v1951_v17 = vpop.f32.mrf.mxu2  ;;  %2548 = vmatpush.msra.mxu2 %v355_v61 }
 0x2b7   : > { %v2004_v40 = vpop.f32.mrf.mxu3 }
 0x2b8   : > { %v2005_v42 = vadd.f32 %v2004_v40, %v1951_v17  ;;  %2456 = vmatmul.f32.gmra.mxu0 %v7104_v49  ;;  %4516 = vmatmul.msk.f32.gmra.mxu1 %vm910_vm0, %v7108_v8  ;;  %v712_v49 = vld [vmem:[%s9038_s0 + $0xc30] sm:$0xff]  ;;  %v474_v8 = vld [vmem:[%s9038_s0 + $0x4c0] sm:$0xff] }
 0x2b9   : > { %2704 = vmatpush.msra.mxu1 %v712_v49  ;;  %2600 = vmatpush.msra.mxu3 %v474_v8  ;;  %v7508_v8 = vld [vmem:[%s4989_s6 + $0x108] sm:$0xff] }
 0x2ba   : > { %v2058_v6 = vadd.f32 %v2057_v34, %v2005_v42  ;;  %9136 = vst [vmem:[#allocation11_spill] sm:$0xff] %v7508_v8 }
 0x2bb   : > { %2353 = vmatmul.f32.gmra.mxu2 %v7469_v27 }
 0x2bc   : > { %v7466_v15 = vadd.f32 %v2110_v60, %v2058_v6  ;;  %2406 = vmatmul.f32.gmra.mxu3 %v7473_v55  ;;  %v705_v60 = vld [vmem:[%s9038_s0 + $0xbf8] sm:$0xff]  ;;  %v7504_v55 = vld [vmem:[%s4989_s6 + $0x100] sm:$0xff] }
 0x2bd   : > { %v7485_v34 = vpop.f32.mrf.mxu0  ;;  %v7496_v17 = vpop.f32.mrf.mxu1  ;;  %2705 = vmatpush.msra.mxu1 %v705_v60  ;;  %v698_v60 = vld [vmem:[%s9038_s0 + $0xbc0] sm:$0xff] }
 0x2be   : > { %v2130_v40 = vpop.f32.mrf.mxu2 }
 0x2bf   : > { %v2183_v42 = vpop.f32.mrf.mxu3  ;;  %v2131_v6 = vadd.f32 %v2130_v40, %v7170_v43  ;;  %v467_v43 = vld [vmem:[%s9038_s0 + $0x488] sm:$0xff]  ;;  %v460_v40 = vld [vmem:[%s9038_s0 + $0x450] sm:$0xff]  ;;  %2706 = vmatpush.msra.mxu1 %v698_v60 }
 0x2c0   : > { %2459 = vmatmul.f32.gmra.mxu0 %v7141_v1  ;;  %4517 = vmatmul.msk.f32.gmra.mxu1 %vm910_vm0, %v7145_v5  ;;  %v586_v1 = vld [vmem:[%s9038_s0 + $0x840] sm:$0xff]  ;;  %v348_v5 = vld [vmem:[%s9038_s0 + $0xd0] sm:$0xff] }
 0x2c1   : > { %v2184_v52 = vadd.f32 %v2183_v42, %v2131_v6  ;;  %2601 = vmatpush.msra.mxu3 %v467_v43  ;;  %2653 = vmatpush.msra.mxu0 %v586_v1  ;;  %v7545_v60 = vld [vmem:[%s4989_s6 + $0x130] sm:$0xff] }
 0x2c2   : > { %2549 = vmatpush.msra.mxu2 %v348_v5 }
 0x2c3   : > { %3176 = vst [vmem:[%s5787_s22 + $0x18] sm:$0xff] %v2184_v52  ;;  %v3381_v49 = vmul.f32 %v2184_v52, %v2184_v52  ;;  %2356 = vmatmul.f32.gmra.mxu2 %v7504_v55  ;;  %v7521_v11 = vadd.f32 %v6768_v4, %v2184_v52  ;;  %2602 = vmatpush.msra.mxu3 %v460_v40  ;;  %v572_v40 = vld [vmem:[%s9038_s0 + $0x7d0] sm:$0xff] }
 0x2c4   : > { %2409 = vmatmul.f32.gmra.mxu3 %v7508_v8 }
 0x2c5   : > { %v7523_v61 = vpop.f32.mrf.mxu0  ;;  %v7531_v42 = vpop.f32.mrf.mxu1  ;;  %v7534_v4 = vadd.f32 %v6772_v16, %v3381_v49  ;;  %v7549_v16 = vld [vmem:[%s4989_s6 + $0x138] sm:$0xff] }
 0x2c6   : > { %v2133_v6 = vpop.f32.mrf.mxu2  ;;  %9137 = vst [vmem:[#allocation9_spill] sm:$0xff] %v7549_v16  ;;  %v453_v49 = vld [vmem:[%s9038_s0 + $0x418] sm:$0xff] }
 0x2c7   : > { %v2186_v52 = vpop.f32.mrf.mxu3  ;;  %v2134_v43 = vadd.f32 %v2133_v6, %v7195_v62  ;;  %2603 = vmatpush.msra.mxu3 %v453_v49  ;;  %v7583_v49 = vld [vmem:[%s4989_s6 + $0x160] sm:$0xff] }
 0x2c8   : > { %2462 = vmatmul.f32.gmra.mxu0 %v7173_v3  ;;  %4518 = vmatmul.msk.f32.gmra.mxu1 %vm910_vm0, %v7177_v26  ;;  %v579_v3 = vld [vmem:[%s9038_s0 + $0x808] sm:$0xff]  ;;  %v341_v26 = vld [vmem:[%s9038_s0 + $0x98] sm:$0xff] }
 0x2c9   : > { %v2187_v1 = vadd.f32 %v2186_v52, %v2134_v43  ;;  %2654 = vmatpush.msra.mxu0 %v579_v3  ;;  %2550 = vmatpush.msra.mxu2 %v341_v26 }
 0x2cb   : > { %3184 = vst [vmem:[%s5787_s22 + $0x50] sm:$0xff] %v2187_v1  ;;  %v7542_v8 = vadd.f32 %v6807_v50, %v2187_v1  ;;  %v3388_v5 = vmul.f32 %v2187_v1, %v2187_v1  ;;  %2359 = vmatmul.f32.gmra.mxu2 %v7545_v60  ;;  %v691_v50 = vld [vmem:[%s9038_s0 + $0xb88] sm:$0xff]  ;;  %2655 = vmatpush.msra.mxu0 %v572_v40 }
 0x2cc   : > { %2412 = vmatmul.f32.gmra.mxu3 %v7549_v16  ;;  %2707 = vmatpush.msra.mxu1 %v691_v50  ;;  %v327_v40 = vld [vmem:[%s9038_s0 + $0x28] sm:$0xff] }
 0x2cd   : > { %v7561_v62 = vpop.f32.mrf.mxu0  ;;  %v7569_v6 = vpop.f32.mrf.mxu1  ;;  %v7572_v52 = vadd.f32 %v6820_v21, %v3388_v5  ;;  %v7587_v21 = vld [vmem:[%s4989_s6 + $0x168] sm:$0xff]  ;;  %v565_v5 = vld [vmem:[%s9038_s0 + $0x798] sm:$0xff] }
 0x2ce   : > { %v2136_v43 = vpop.f32.mrf.mxu2  ;;  %9138 = vst [vmem:[#allocation10_spill] sm:$0xff] %v7587_v21  ;;  %2656 = vmatpush.msra.mxu0 %v565_v5  ;;  %v7627_v5 = vld [vmem:[%s4989_s6 + $0x190] sm:$0xff] }
 0x2cf   : > { %v2189_v1 = vpop.f32.mrf.mxu3  ;;  %v2137_v3 = vadd.f32 %v2136_v43, %v7223_v47  ;;  %v677_v43 = vld [vmem:[%s9038_s0 + $0xb18] sm:$0xff] }
 0x2d0   : > { %2465 = vmatmul.f32.gmra.mxu0 %v7198_v13  ;;  %4519 = vmatmul.msk.f32.gmra.mxu1 %vm910_vm0, %v7202_v36  ;;  %v334_v13 = vld [vmem:[%s9038_s0 + $0x60] sm:$0xff]  ;;  %v684_v36 = vld [vmem:[%s9038_s0 + $0xb50] sm:$0xff] }
 0x2d1   : > { %v2190_v26 = vadd.f32 %v2189_v1, %v2137_v3  ;;  %2551 = vmatpush.msra.mxu2 %v334_v13  ;;  %2708 = vmatpush.msra.mxu1 %v684_v36 }
 0x2d3   : > { %3191 = vst [vmem:[%s5787_s22 + $0x88] sm:$0xff] %v2190_v26  ;;  %v7580_v16 = vadd.f32 %v6837_v12, %v2190_v26  ;;  %v3395_v50 = vmul.f32 %v2190_v26, %v2190_v26  ;;  %2362 = vmatmul.f32.gmra.mxu2 %v7583_v49  ;;  %v446_v12 = vld [vmem:[%s9038_s0 + $0x3e0] sm:$0xff]  ;;  %2709 = vmatpush.msra.mxu1 %v677_v43 }
 0x2d4   : > { %2415 = vmatmul.f32.gmra.mxu3 %v7587_v21  ;;  %2552 = vmatpush.msra.mxu2 %v327_v40  ;;  %v908_v40 = vld [vmem:[%s9038_s0 + $0x1250] sm:$0xff] }
 0x2d5   : > { %v7599_v47 = vpop.f32.mrf.mxu0  ;;  %v7610_v1 = vpop.f32.mrf.mxu1  ;;  %2604 = vmatpush.msra.mxu3 %v446_v12  ;;  %v7613_v3 = vadd.f32 %v6850_v38, %v3395_v50  ;;  %v439_v12 = vld [vmem:[%s9038_s0 + $0x3a8] sm:$0xff] }
 0x2d6   : > { %v2139_v26 = vpop.f32.mrf.mxu2 }
 0x2d7   : > { %v2192_v13 = vpop.f32.mrf.mxu3  ;;  %v2140_v36 = vadd.f32 %v2139_v26, %v7248_v59  ;;  %2605 = vmatpush.msra.mxu3 %v439_v12  ;;  %v7631_v59 = vld [vmem:[%s4989_s6 + $0x198] sm:$0xff] }
 0x2d8   : > { %2468 = vmatmul.f32.gmra.mxu0 %v7226_v51  ;;  %4520 = vmatmul.msk.f32.gmra.mxu1 %vm910_vm0, %v7230_v28  ;;  %v558_v51 = vld [vmem:[%s9038_s0 + $0x760] sm:$0xff] }
 0x2d9   : > { %v2193_v21 = vadd.f32 %v2192_v13, %v2140_v36  ;;  %v670_v28 = vld [vmem:[%s9038_s0 + $0xae0] sm:$0xff]  ;;  %2657 = vmatpush.msra.mxu0 %v558_v51  ;;  %2814 = vmatpush.msrb.mxu3 %v908_v40 }
 0x2da   : > { %2710 = vmatpush.msra.mxu1 %v670_v28  ;;  %v551_v28 = vld [vmem:[%s9038_s0 + $0x728] sm:$0xff] }
 0x2db   : > { %3198 = vst [vmem:[%s5787_s22 + $0xc0] sm:$0xff] %v2193_v21  ;;  %v7624_v38 = vadd.f32 %v6870_v29, %v2193_v21  ;;  %v3402_v50 = vmul.f32 %v2193_v21, %v2193_v21  ;;  %2365 = vmatmul.f32.gmra.mxu2 %v7627_v5  ;;  %v880_v29 = vld [vmem:[%s9038_s0 + $0x1170] sm:$0xff]  ;;  %2658 = vmatpush.msra.mxu0 %v551_v28 }
 0x2dc   : > { %2418 = vmatmul.f32.gmra.mxu3 %v7631_v59  ;;  %2749 = vmatpush.msrb.mxu2 %v880_v29 }
 0x2dd   : > { %v7643_v21 = vpop.f32.mrf.mxu0  ;;  %v7648_v43 = vpop.f32.mrf.mxu1  ;;  %v7651_v26 = vadd.f32 %v6874_v48, %v3402_v50  ;;  %v7665_v50 = vld [vmem:[%s4989_s6 + $0x1c0] sm:$0xff] }
 0x2de   : > { %v2142_v13 = vpop.f32.mrf.mxu2 }
 0x2df   : > { %v2195_v36 = vpop.f32.mrf.mxu3  ;;  %v2143_v12 = vadd.f32 %v2142_v13, %v7273_v20  ;;  %v7669_v20 = vld [vmem:[%s4989_s6 + $0x1c8] sm:$0xff] }
 0x2e0   : > { %2471 = vmatmul.f32.gmra.mxu0 %v7251_v39  ;;  %4521 = vmatmul.msk.f32.gmra.mxu1 %vm910_vm0, %v7255_v53  ;;  %9140 = vst [vmem:[#allocation16_spill] sm:$0xff] %v7669_v20  ;;  %v663_v39 = vld [vmem:[%s9038_s0 + $0xaa8] sm:$0xff]  ;;  %v873_v53 = vld [vmem:[%s9038_s0 + $0x1138] sm:$0xff] }
 0x2e1   : > { %v2196_v51 = vadd.f32 %v2195_v36, %v2143_v12  ;;  %2711 = vmatpush.msra.mxu1 %v663_v39  ;;  %2750 = vmatpush.msrb.mxu2 %v873_v53 }
 0x2e3   : > { %3205 = vst [vmem:[%s5787_s22 + $0xf8] sm:$0xff] %v2196_v51  ;;  %v7662_v29 = vadd.f32 %v6909_v31, %v2196_v51  ;;  %v3409_v48 = vmul.f32 %v2196_v51, %v2196_v51  ;;  %2368 = vmatmul.f32.gmra.mxu2 %v7665_v50  ;;  %v433_v31 = vld [vmem:[%s9038_s0 + $0x378] sm:$0xff] }
 0x2e4   : > { %2421 = vmatmul.f32.gmra.mxu3 %v7669_v20  ;;  %2855 = vmatpush.msrb.mxu0 %v433_v31 }
 0x2e5   : > { %9139 = vst [vmem:[#allocation15_spill] sm:$0xff] %v7662_v29  ;;  %v7681_v40 = vpop.f32.mrf.mxu0  ;;  %v7683_v13 = vpop.f32.mrf.mxu1  ;;  %v7686_v36 = vadd.f32 %v6913_v46, %v3409_v48  ;;  %v7697_v29 = vld [vmem:[%s4989_s6 + $0x1f0] sm:$0xff]  ;;  %v7701_v46 = vld [vmem:[%s4989_s6 + $0x1f8] sm:$0xff]  ;;  %v859_v48 = vld [vmem:[%s9038_s0 + $0x10c8] sm:$0xff] }
 0x2e6   : > { %v2145_v12 = vpop.f32.mrf.mxu2  ;;  %9142 = vst [vmem:[#allocation18_spill] sm:$0xff] %v7701_v46 }
 0x2e7   : > { %v2198_v51 = vpop.f32.mrf.mxu3  ;;  %v2146_v28 = vadd.f32 %v2145_v12, %v7301_v41 }
 0x2e8   : > { %2474 = vmatmul.f32.gmra.mxu0 %v7276_v30  ;;  %4522 = vmatmul.msk.f32.gmra.mxu1 %vm910_vm0, %v7280_v7  ;;  %v866_v30 = vld [vmem:[%s9038_s0 + $0x1100] sm:$0xff]  ;;  %v545_v7 = vld [vmem:[%s9038_s0 + $0x6f8] sm:$0xff] }
 0x2e9   : > { %v2199_v20 = vadd.f32 %v2198_v51, %v2146_v28  ;;  %2751 = vmatpush.msrb.mxu2 %v866_v30  ;;  %2908 = vmatpush.msrb.mxu1 %v545_v7 }
 0x2eb   : > { %3212 = vst [vmem:[%s5787_s22 + $0x130] sm:$0xff] %v2199_v20  ;;  %v7694_v39 = vadd.f32 %v6945_v23, %v2199_v20  ;;  %v3416_v53 = vmul.f32 %v2199_v20, %v2199_v20  ;;  %2371 = vmatmul.f32.gmra.mxu2 %v7697_v29  ;;  %v426_v23 = vld [vmem:[%s9038_s0 + $0x340] sm:$0xff] }
 0x2ec   : > { %2424 = vmatmul.f32.gmra.mxu3 %v7701_v46  ;;  %v538_v20 = vld [vmem:[%s9038_s0 + $0x6c0] sm:$0xff]  ;;  %2856 = vmatpush.msrb.mxu0 %v426_v23 }
 0x2ed   : > { %9141 = vst [vmem:[#allocation17_spill] sm:$0xff] %v7694_v39  ;;  %v7713_v41 = vpop.f32.mrf.mxu0  ;;  %v7721_v31 = vpop.f32.mrf.mxu1  ;;  %v7724_v12 = vadd.f32 %v6949_v32, %v3416_v53  ;;  %2752 = vmatpush.msrb.mxu2 %v859_v48  ;;  %2909 = vmatpush.msrb.mxu1 %v538_v20  ;;  %v7735_v39 = vld [vmem:[%s4989_s6 + $0x220] sm:$0xff]  ;;  %v7739_v32 = vld [vmem:[%s4989_s6 + $0x228] sm:$0xff]  ;;  %v901_v53 = vld [vmem:[%s9038_s0 + $0x1218] sm:$0xff] }
 0x2ee   : > { %v2148_v51 = vpop.f32.mrf.mxu2  ;;  %2815 = vmatpush.msrb.mxu3 %v901_v53 }
 0x2ef   : > { %v2201_v28 = vpop.f32.mrf.mxu3  ;;  %v2149_v30 = vadd.f32 %v2148_v51, %v7329_v58 }
 0x2f0   : > { %2477 = vmatmul.f32.gmra.mxu0 %v7304_v0  ;;  %4523 = vmatmul.msk.f32.gmra.mxu1 %vm910_vm0, %v7308_v9  ;;  %v419_v0 = vld [vmem:[%s9038_s0 + $0x308] sm:$0xff]  ;;  %v852_v9 = vld [vmem:[%s9038_s0 + $0x1090] sm:$0xff] }
 0x2f1   : > { %v2202_v7 = vadd.f32 %v2201_v28, %v2149_v30  ;;  %2857 = vmatpush.msrb.mxu0 %v419_v0  ;;  %2753 = vmatpush.msrb.mxu2 %v852_v9 }
 0x2f3   : > { %3219 = vst [vmem:[%s5787_s22 + $0x168] sm:$0xff] %v2202_v7  ;;  %v7732_v46 = vadd.f32 %v6978_v45, %v2202_v7  ;;  %v3423_v23 = vmul.f32 %v2202_v7, %v2202_v7  ;;  %2374 = vmatmul.f32.gmra.mxu2 %v7735_v39  ;;  %v531_v45 = vld [vmem:[%s9038_s0 + $0x688] sm:$0xff] }
 0x2f4   : > { %2427 = vmatmul.f32.gmra.mxu3 %v7739_v32  ;;  %2910 = vmatpush.msrb.mxu1 %v531_v45  ;;  %v7770_v45 = vld [vmem:[%s4989_s6] sm:$0xff] }
 0x2f5   : > { %v7751_v58 = vpop.f32.mrf.mxu0  ;;  %v7756_v48 = vpop.f32.mrf.mxu1  ;;  %v7759_v20 = vadd.f32 %v6982_v63, %v3423_v23  ;;  %v7774_v63 = vld [vmem:[%s4989_s6 + $0x8] sm:$0xff]  ;;  %v405_v23 = vld [vmem:[%s9038_s0 + $0x298] sm:$0xff] }
 0x2f6   : > { %v2151_v51 = vpop.f32.mrf.mxu2 }
 0x2f7   : > { %v2204_v28 = vpop.f32.mrf.mxu3  ;;  %v2152_v30 = vadd.f32 %v2151_v51, %v7360_v35 }
 0x2f8   : > { %2480 = vmatmul.f32.gmra.mxu0 %v7332_v54  ;;  %4524 = vmatmul.msk.f32.gmra.mxu1 %vm910_vm0, %v7336_v56  ;;  %v412_v54 = vld [vmem:[%s9038_s0 + $0x2d0] sm:$0xff]  ;;  %v845_v56 = vld [vmem:[%s9038_s0 + $0x1058] sm:$0xff] }
 0x2f9   : > { %v2205_v7 = vadd.f32 %v2204_v28, %v2152_v30  ;;  %2858 = vmatpush.msrb.mxu0 %v412_v54  ;;  %2754 = vmatpush.msrb.mxu2 %v845_v56  ;;  %v838_v56 = vld [vmem:[%s9038_s0 + $0x1020] sm:$0xff] }
 0x2fb   : > { %3226 = vst [vmem:[%s5787_s22 + $0x1a0] sm:$0xff] %v2205_v7  ;;  %v7767_v0 = vadd.f32 %v7012_v57, %v2205_v7  ;;  %v3430_v9 = vmul.f32 %v2205_v7, %v2205_v7  ;;  %2553 = vmatmul.f32.vlgmr.msra.gmra.mxu2 %v7770_v45  ;;  %v524_v57 = vld [vmem:[%s9038_s0 + $0x650] sm:$0xff]  ;;  %2859 = vmatpush.msrb.mxu0 %v405_v23 }
 0x2fc   : > { %2606 = vmatmul.f32.vlgmr.msra.gmra.mxu3 %v7774_v63  ;;  %2911 = vmatpush.msrb.mxu1 %v524_v57  ;;  %v7810_v57 = vld [vmem:[%s4989_s6 + $0x30] sm:$0xff] }
 0x2fd   : > { %v7786_v35 = vpop.f32.mrf.mxu0  ;;  %v7791_v53 = vpop.f32.mrf.mxu1  ;;  %v7794_v51 = vadd.f32 %v7016_v10, %v3430_v9  ;;  %v517_v10 = vld [vmem:[%s9038_s0 + $0x618] sm:$0xff]  ;;  %2755 = vmatpush.msrb.mxu2 %v838_v56  ;;  %v398_v56 = vld [vmem:[%s9038_s0 + $0x260] sm:$0xff] }
 0x2fe   : > { %v2154_v28 = vpop.f32.mrf.mxu2  ;;  %2912 = vmatpush.msrb.mxu1 %v517_v10  ;;  %v831_v10 = vld [vmem:[%s9038_s0 + $0xfe8] sm:$0xff]  ;;  %2860 = vmatpush.msrb.mxu0 %v398_v56 }
 0x2ff   : > { %v2207_v30 = vpop.f32.mrf.mxu3  ;;  %v2155_v7 = vadd.f32 %v2154_v28, %v7379_v25  ;;  %2756 = vmatpush.msrb.mxu2 %v831_v10  ;;  %v391_v56 = vld [vmem:[%s9038_s0 + $0x228] sm:$0xff]  ;;  %v9152_v10 = vld [vmem:[#allocation13_spill] sm:$0xff] }
 0x300   : > { %2659 = vmatmul.f32.vlgmr.msra.gmra.mxu0 %v7363_v19  ;;  %2712 = vmatmul.f32.vlgmr.msra.gmra.mxu1 %v7367_v14  ;;  %v7814_v19 = vld [vmem:[%s4989_s6 + $0x38] sm:$0xff] }
 0x301   : > { %v2208_v54 = vadd.f32 %v2207_v30, %v2155_v7  ;;  %9144 = vst [vmem:[#allocation20_spill] sm:$0xff] %v7814_v19  ;;  %2861 = vmatpush.msrb.mxu0 %v391_v56  ;;  %v503_v56 = vld [vmem:[%s9038_s0 + $0x5a8] sm:$0xff] }
 0x303   : > { %3233 = vst [vmem:[%s5787_s22 + $0x1d8] sm:$0xff] %v2208_v54  ;;  %v7807_v9 = vadd.f32 %v7055_v18, %v2208_v54  ;;  %v3437_v25 = vmul.f32 %v2208_v54, %v2208_v54  ;;  %2556 = vmatmul.f32.gmra.mxu2 %v7810_v57  ;;  %v9146_v54 = vld [vmem:[#allocation7_spill] sm:$0xff] }
 0x304   : > { %2609 = vmatmul.f32.gmra.mxu3 %v7814_v19  ;;  %v7841_v19 = vld [vmem:[%s4989_s6 + $0x60] sm:$0xff] }
 0x305   : > { %9143 = vst [vmem:[#allocation19_spill] sm:$0xff] %v7807_v9  ;;  %v7817_v14 = vpop.f32.mrf.mxu0  ;;  %v7819_v23 = vpop.f32.mrf.mxu1  ;;  %v7822_v28 = vadd.f32 %v7062_v24, %v3437_v25  ;;  %v510_v24 = vld [vmem:[%s9038_s0 + $0x5e0] sm:$0xff]  ;;  %v9147_v25 = vld [vmem:[#allocation8_spill] sm:$0xff]  ;;  %v7845_v9 = vld [vmem:[%s4989_s6 + $0x68] sm:$0xff] }
 0x306   : > { %v2157_v18 = vpop.f32.mrf.mxu2  ;;  %2913 = vmatpush.msrb.mxu1 %v510_v24  ;;  %9150 = vst [vmem:[#allocation8_spill] sm:$0xff] %v7841_v19 }
 0x307   : > { %9145 = vst [vmem:[#allocation21_spill] sm:$0xff] %v7822_v28  ;;  %v2210_v30 = vpop.f32.mrf.mxu3  ;;  %v2158_v7 = vadd.f32 %v2157_v18, %v7410_v2  ;;  %v9148_v2 = vld [vmem:[#allocation12_spill] sm:$0xff] }
 0x308   : > { %2662 = vmatmul.f32.gmra.mxu0 %v9146_v54  ;;  %2715 = vmatmul.f32.gmra.mxu1 %v9147_v25  ;;  %9151 = vst [vmem:[#allocation12_spill] sm:$0xff] %v7845_v9 }
 0x309   : > { %v2211_v28 = vadd.f32 %v2210_v30, %v2158_v7  ;;  %2914 = vmatpush.msrb.mxu1 %v503_v56  ;;  %v9156_v56 = vld [vmem:[#allocation2_spill] sm:$0xff] }
 0x30b   : > { %3240 = vst [vmem:[%s5787_s22 + $0x210] sm:$0xff] %v2211_v28  ;;  %v7838_v18 = vadd.f32 %v9148_v2, %v2211_v28  ;;  %v3444_v54 = vmul.f32 %v2211_v28, %v2211_v28  ;;  %2559 = vmatmul.f32.gmra.mxu2 %v7841_v19  ;;  %v7882_v19 = vld [vmem:[%s4989_s6 + $0x98] sm:$0xff] }
 0x30c   : > { %2612 = vmatmul.f32.gmra.mxu3 %v7845_v9  ;;  %v824_v9 = vld [vmem:[%s9038_s0 + $0xfb0] sm:$0xff] }
 0x30d   : > { %9149 = vst [vmem:[#allocation7_spill] sm:$0xff] %v7838_v18  ;;  %v7851_v30 = vpop.f32.mrf.mxu0  ;;  %v7853_v7 = vpop.f32.mrf.mxu1  ;;  %v7856_v28 = vadd.f32 %v9152_v10, %v3444_v54  ;;  %v894_v54 = vld [vmem:[%s9038_s0 + $0x11e0] sm:$0xff]  ;;  %2757 = vmatpush.msrb.mxu2 %v824_v9  ;;  %v7878_v18 = vld [vmem:[%s4989_s6 + $0x90] sm:$0xff] }
 0x30e   : > { %v2160_v24 = vpop.f32.mrf.mxu2  ;;  %2816 = vmatpush.msrb.mxu3 %v894_v54  ;;  %v496_v9 = vld [vmem:[%s9038_s0 + $0x570] sm:$0xff] }
 0x30f   : > { %9153 = vst [vmem:[#allocation13_spill] sm:$0xff] %v7856_v28  ;;  %v2213_v25 = vpop.f32.mrf.mxu3  ;;  %v2161_v2 = vadd.f32 %v2160_v24, %v7438_v33  ;;  %v9154_v33 = vld [vmem:[#allocation14_spill] sm:$0xff]  ;;  %2915 = vmatpush.msrb.mxu1 %v496_v9 }
 0x310   : > { %2665 = vmatmul.f32.gmra.mxu0 %v7413_v44  ;;  %2718 = vmatmul.f32.gmra.mxu1 %v7417_v37  ;;  %v384_v44 = vld [vmem:[%s9038_s0 + $0x1f0] sm:$0xff]  ;;  %9155 = vst [vmem:[#allocation14_spill] sm:$0xff] %v7882_v19  ;;  %v817_v37 = vld [vmem:[%s9038_s0 + $0xf78] sm:$0xff] }
 0x311   : > { %v2214_v10 = vadd.f32 %v2213_v25, %v2161_v2  ;;  %2862 = vmatpush.msrb.mxu0 %v384_v44  ;;  %2758 = vmatpush.msrb.mxu2 %v817_v37  ;;  %v9158_v37 = vld [vmem:[#allocation5_spill] sm:$0xff] }
 0x313   : > { %3247 = vst [vmem:[%s5787_s22 + $0x248] sm:$0xff] %v2214_v10  ;;  %v7875_v24 = vadd.f32 %v9154_v33, %v2214_v10  ;;  %v3451_v28 = vmul.f32 %v2214_v10, %v2214_v10  ;;  %2562 = vmatmul.f32.gmra.mxu2 %v7878_v18 }
 0x314   : > { %2615 = vmatmul.f32.gmra.mxu3 %v7882_v19  ;;  %v377_v19 = vld [vmem:[%s9038_s0 + $0x1b8] sm:$0xff] }
 0x315   : > { %v7891_v25 = vpop.f32.mrf.mxu0  ;;  %v7893_v2 = vpop.f32.mrf.mxu1  ;;  %v7896_v54 = vadd.f32 %v9156_v56, %v3451_v28  ;;  %2863 = vmatpush.msrb.mxu0 %v377_v19  ;;  %v810_v28 = vld [vmem:[%s9038_s0 + $0xf40] sm:$0xff]  ;;  %v489_v56 = vld [vmem:[%s9038_s0 + $0x538] sm:$0xff]  ;;  %v7919_v19 = vld [vmem:[%s4989_s6 + $0xc8] sm:$0xff] }
 0x316   : > { %v2163_v10 = vpop.f32.mrf.mxu2  ;;  %2759 = vmatpush.msrb.mxu2 %v810_v28  ;;  %2916 = vmatpush.msrb.mxu1 %v489_v56  ;;  %9162 = vst [vmem:[#allocation22_spill] sm:$0xff] %v7919_v19  ;;  %v9163_v28 = vld [vmem:[#allocation4_spill] sm:$0xff] }
 0x317   : > { %9157 = vst [vmem:[#allocation2_spill] sm:$0xff] %v7896_v54  ;;  %v2216_v44 = vpop.f32.mrf.mxu3  ;;  %v2164_v33 = vadd.f32 %v2163_v10, %v7466_v15  ;;  %v7915_v54 = vld [vmem:[%s4989_s6 + $0xc0] sm:$0xff] }
 0x318   : > { %2668 = vmatmul.f32.gmra.mxu0 %v7441_v22  ;;  %2721 = vmatmul.f32.gmra.mxu1 %v9158_v37  ;;  %v9159_v22 = vld [vmem:[#allocation3_spill] sm:$0xff] }
 0x319   : > { %v2217_v9 = vadd.f32 %v2216_v44, %v2164_v33  ;;  %9161 = vst [vmem:[#allocation3_spill] sm:$0xff] %v7915_v54  ;;  %v2290_v33 = vadd.f32 %v7496_v17, %v7485_v34  ;;  %v482_v34 = vld [vmem:[%s9038_s0 + $0x500] sm:$0xff] }
 0x31a   : > { %v9165_v17 = vld [vmem:[#allocation6_spill] sm:$0xff]  ;;  %2917 = vmatpush.msrb.mxu1 %v482_v34 }
 0x31b   : > { %3254 = vst [vmem:[%s5787_s22 + $0x280] sm:$0xff] %v2217_v9  ;;  %v7912_v15 = vadd.f32 %v9159_v22, %v2217_v9  ;;  %v3458_v10 = vmul.f32 %v2217_v9, %v2217_v9  ;;  %2565 = vmatmul.f32.gmra.mxu2 %v7915_v54  ;;  %v370_v54 = vld [vmem:[%s9038_s0 + $0x180] sm:$0xff] }
 0x31c   : > { %2618 = vmatmul.f32.gmra.mxu3 %v7919_v19  ;;  %v803_v19 = vld [vmem:[%s9038_s0 + $0xf08] sm:$0xff]  ;;  %2864 = vmatpush.msrb.mxu0 %v370_v54  ;;  %v2293_v54 = vadd.f32 %v7531_v42, %v7523_v61 }
 0x31d   : > { %9160 = vst [vmem:[#allocation5_spill] sm:$0xff] %v7912_v15  ;;  %v2448_v44 = vpop.f32.mrf.mxu0  ;;  %v2501_v37 = vpop.f32.mrf.mxu1  ;;  %v7925_v56 = vadd.f32 %v9163_v28, %v3458_v10  ;;  %2760 = vmatpush.msrb.mxu2 %v803_v19  ;;  %v7943_v28 = vld [vmem:[%s4989_s6 + $0xf8] sm:$0xff]  ;;  %v887_v61 = vld [vmem:[%s9038_s0 + $0x11a8] sm:$0xff] }
 0x31e   : > { %v2342_v22 = vpop.f32.mrf.mxu2  ;;  %9166 = vst [vmem:[#allocation6_spill] sm:$0xff] %v7943_v28  ;;  %2817 = vmatpush.msrb.mxu3 %v887_v61 }
 0x31f   : > { %9164 = vst [vmem:[#allocation4_spill] sm:$0xff] %v7925_v56  ;;  %v2395_v9 = vpop.f32.mrf.mxu3  ;;  %v2343_v15 = vadd.f32 %v2342_v22, %v2290_v33  ;;  %v7939_v33 = vld [vmem:[%s4989_s6 + $0xf0] sm:$0xff]  ;;  %v363_v22 = vld [vmem:[%s9038_s0 + $0x148] sm:$0xff] }
 0x320   : > { %2671 = vmatmul.f32.gmra.mxu0 %v7469_v27  ;;  %2724 = vmatmul.f32.gmra.mxu1 %v9165_v17 }
 0x321   : > { %v2396_v10 = vadd.f32 %v2395_v9, %v2343_v15  ;;  %2865 = vmatpush.msrb.mxu0 %v363_v22  ;;  %v475_v22 = vld [vmem:[%s9038_s0 + $0x4c8] sm:$0xff] }
 0x322   : > { %2918 = vmatpush.msrb.mxu1 %v475_v22 }
 0x323   : > { %v2449_v27 = vadd.f32 %v2448_v44, %v2396_v10  ;;  %2568 = vmatmul.f32.gmra.mxu2 %v7939_v33  ;;  %v796_v10 = vld [vmem:[%s9038_s0 + $0xed0] sm:$0xff] }
 0x324   : > { %2621 = vmatmul.f32.gmra.mxu3 %v7943_v28  ;;  %2761 = vmatpush.msrb.mxu2 %v796_v10  ;;  %v7973_v28 = vld [vmem:[%s4989_s6 + $0x120] sm:$0xff] }
 0x325   : > { %v2451_v56 = vpop.f32.mrf.mxu0  ;;  %v2502_v15 = vadd.f32 %v2501_v37, %v2449_v27  ;;  %v2504_v19 = vpop.f32.mrf.mxu1  ;;  %v9167_v37 = vld [vmem:[#allocation11_spill] sm:$0xff]  ;;  %v356_v27 = vld [vmem:[%s9038_s0 + $0x110] sm:$0xff] }
 0x326   : > { %v2345_v44 = vpop.f32.mrf.mxu2  ;;  %2866 = vmatpush.msrb.mxu0 %v356_v27 }
 0x327   : > { %v2398_v9 = vpop.f32.mrf.mxu3  ;;  %3177 = vst [vmem:[%s5787_s22 + $0x20] sm:$0xff] %v2502_v15  ;;  %v3382_v34 = vmul.f32 %v2502_v15, %v2502_v15  ;;  %v2346_v17 = vadd.f32 %v2345_v44, %v2293_v54  ;;  %v7963_v42 = vadd.f32 %v7521_v11, %v2502_v15  ;;  %v7977_v11 = vld [vmem:[%s4989_s6 + $0x128] sm:$0xff]  ;;  %v789_v15 = vld [vmem:[%s9038_s0 + $0xe98] sm:$0xff] }
 0x328   : > { %2674 = vmatmul.f32.gmra.mxu0 %v7504_v55  ;;  %2727 = vmatmul.f32.gmra.mxu1 %v9167_v37  ;;  %v349_v37 = vld [vmem:[%s9038_s0 + $0xd8] sm:$0xff] }
 0x329   : > { %v2399_v55 = vadd.f32 %v2398_v9, %v2346_v17  ;;  %v7970_v54 = vadd.f32 %v7534_v4, %v3382_v34  ;;  %v468_v4 = vld [vmem:[%s9038_s0 + $0x490] sm:$0xff]  ;;  %2762 = vmatpush.msrb.mxu2 %v789_v15  ;;  %v9168_v15 = vld [vmem:[#allocation9_spill] sm:$0xff]  ;;  %2867 = vmatpush.msrb.mxu0 %v349_v37 }
 0x32a   : > { %2919 = vmatpush.msrb.mxu1 %v468_v4  ;;  %v8011_v4 = vld [vmem:[%s4989_s6 + $0x158] sm:$0xff] }
 0x32b   : > { %v2452_v44 = vadd.f32 %v2451_v56, %v2399_v55  ;;  %2571 = vmatmul.f32.gmra.mxu2 %v7973_v28  ;;  %v2296_v56 = vadd.f32 %v7569_v6, %v7561_v62  ;;  %v782_v6 = vld [vmem:[%s9038_s0 + $0xe60] sm:$0xff] }
 0x32c   : > { %2624 = vmatmul.f32.gmra.mxu3 %v7977_v11  ;;  %2763 = vmatpush.msrb.mxu2 %v782_v6 }
 0x32d   : > { %v2454_v9 = vpop.f32.mrf.mxu0  ;;  %v2505_v34 = vadd.f32 %v2504_v19, %v2452_v44  ;;  %v2507_v17 = vpop.f32.mrf.mxu1  ;;  %v8007_v44 = vld [vmem:[%s4989_s6 + $0x150] sm:$0xff] }
 0x32e   : > { %v2348_v10 = vpop.f32.mrf.mxu2 }
 0x32f   : > { %v2401_v22 = vpop.f32.mrf.mxu3  ;;  %3185 = vst [vmem:[%s5787_s22 + $0x58] sm:$0xff] %v2505_v34  ;;  %v2349_v61 = vadd.f32 %v2348_v10, %v2296_v56  ;;  %v3389_v55 = vmul.f32 %v2505_v34, %v2505_v34  ;;  %v7994_v27 = vadd.f32 %v7542_v8, %v2505_v34  ;;  %v2299_v34 = vadd.f32 %v7610_v1, %v7599_v47  ;;  %v454_v47 = vld [vmem:[%s9038_s0 + $0x420] sm:$0xff] }
 0x330   : > { %2677 = vmatmul.f32.gmra.mxu0 %v7545_v60  ;;  %2730 = vmatmul.f32.gmra.mxu1 %v9168_v15  ;;  %v461_v60 = vld [vmem:[%s9038_s0 + $0x458] sm:$0xff]  ;;  %v9169_v15 = vld [vmem:[#allocation10_spill] sm:$0xff] }
 0x331   : > { %v2402_v62 = vadd.f32 %v2401_v22, %v2349_v61  ;;  %v8004_v19 = vadd.f32 %v7572_v52, %v3389_v55  ;;  %2920 = vmatpush.msrb.mxu1 %v461_v60  ;;  %v775_v55 = vld [vmem:[%s9038_s0 + $0xe28] sm:$0xff]  ;;  %v8035_v60 = vld [vmem:[%s4989_s6 + $0x180] sm:$0xff] }
 0x332   : > { %2764 = vmatpush.msrb.mxu2 %v775_v55  ;;  %v447_v55 = vld [vmem:[%s9038_s0 + $0x3e8] sm:$0xff] }
 0x333   : > { %v2455_v8 = vadd.f32 %v2454_v9, %v2402_v62  ;;  %2574 = vmatmul.f32.gmra.mxu2 %v8007_v44  ;;  %v342_v9 = vld [vmem:[%s9038_s0 + $0xa0] sm:$0xff]  ;;  %2921 = vmatpush.msrb.mxu1 %v454_v47  ;;  %v657_v47 = vld [vmem:[%s9038_s0 + $0xa78] sm:$0xff] }
 0x334   : > { %2627 = vmatmul.f32.gmra.mxu3 %v8011_v4  ;;  %2868 = vmatpush.msrb.mxu0 %v342_v9 }
 0x335   : > { %v2457_v56 = vpop.f32.mrf.mxu0  ;;  %v2508_v10 = vadd.f32 %v2507_v17, %v2455_v8  ;;  %v2510_v22 = vpop.f32.mrf.mxu1  ;;  %v8039_v8 = vld [vmem:[%s4989_s6 + $0x188] sm:$0xff]  ;;  %2961 = vmatpush.msra.mxu2 %v657_v47  ;;  %2922 = vmatpush.msrb.mxu1 %v447_v55  ;;  %v881_v55 = vld [vmem:[%s9038_s0 + $0x1178] sm:$0xff] }
 0x336   : > { %v2351_v61 = vpop.f32.mrf.mxu2 }
 0x337   : > { %v2404_v52 = vpop.f32.mrf.mxu3  ;;  %3192 = vst [vmem:[%s5787_s22 + $0x90] sm:$0xff] %v2508_v10  ;;  %v2352_v37 = vadd.f32 %v2351_v61, %v2299_v34  ;;  %v3396_v1 = vmul.f32 %v2508_v10, %v2508_v10  ;;  %v8028_v17 = vadd.f32 %v7580_v16, %v2508_v10  ;;  %v335_v16 = vld [vmem:[%s9038_s0 + $0x68] sm:$0xff]  ;;  %v2302_v10 = vadd.f32 %v7648_v43, %v7643_v21  ;;  %v769_v21 = vld [vmem:[%s9038_s0 + $0xdf8] sm:$0xff] }
 0x338   : > { %2680 = vmatmul.f32.gmra.mxu0 %v7583_v49  ;;  %2733 = vmatmul.f32.gmra.mxu1 %v9169_v15 }
 0x339   : > { %v2405_v49 = vadd.f32 %v2404_v52, %v2352_v37  ;;  %v8032_v62 = vadd.f32 %v7613_v3, %v3396_v1  ;;  %2869 = vmatpush.msrb.mxu0 %v335_v16  ;;  %3014 = vmatpush.msra.mxu3 %v769_v21  ;;  %v2305_v16 = vadd.f32 %v7683_v13, %v7681_v40  ;;  %v9170_v40 = vld [vmem:[#allocation15_spill] sm:$0xff]  ;;  %v909_v21 = vld [vmem:[%s9038_s0 + $0x1258] sm:$0xff] }
 0x33b   : > { %v2458_v6 = vadd.f32 %v2457_v56, %v2405_v49  ;;  %2577 = vmatmul.f32.gmra.mxu2 %v8035_v60  ;;  %v8069_v49 = vld [vmem:[%s4989_s6 + $0x1b0] sm:$0xff] }
 0x33c   : > { %2630 = vmatmul.f32.gmra.mxu3 %v8039_v8 }
 0x33d   : > { %v2460_v34 = vpop.f32.mrf.mxu0  ;;  %v2511_v3 = vadd.f32 %v2510_v22, %v2458_v6  ;;  %v2513_v61 = vpop.f32.mrf.mxu1  ;;  %v328_v22 = vld [vmem:[%s9038_s0 + $0x30] sm:$0xff] }
 0x33e   : > { %v2354_v56 = vpop.f32.mrf.mxu2  ;;  %2870 = vmatpush.msrb.mxu0 %v328_v22 }
 0x33f   : > { %v2407_v52 = vpop.f32.mrf.mxu3  ;;  %3199 = vst [vmem:[%s5787_s22 + $0xc8] sm:$0xff] %v2511_v3  ;;  %v3403_v37 = vmul.f32 %v2511_v3, %v2511_v3  ;;  %v2355_v9 = vadd.f32 %v2354_v56, %v2302_v10  ;;  %v8059_v43 = vadd.f32 %v7624_v38, %v2511_v3  ;;  %v8073_v38 = vld [vmem:[%s4989_s6 + $0x1b8] sm:$0xff] }
 0x340   : > { %2683 = vmatmul.f32.gmra.mxu0 %v7627_v5  ;;  %2736 = vmatmul.f32.gmra.mxu1 %v7631_v59  ;;  %v440_v59 = vld [vmem:[%s9038_s0 + $0x3b0] sm:$0xff] }
 0x341   : > { %v2408_v5 = vadd.f32 %v2407_v52, %v2355_v9  ;;  %v8066_v1 = vadd.f32 %v7651_v26, %v3403_v37  ;;  %v650_v26 = vld [vmem:[%s9038_s0 + $0xa40] sm:$0xff]  ;;  %2923 = vmatpush.msrb.mxu1 %v440_v59  ;;  %3067 = vmatpush.msra.mxu0 %v881_v55  ;;  %v8110_v59 = vld [vmem:[%s4989_s6 + $0x1e8] sm:$0xff]  ;;  %v636_v55 = vld [vmem:[%s9038_s0 + $0x9d0] sm:$0xff] }
 0x342   : > { %2962 = vmatpush.msra.mxu2 %v650_v26  ;;  %v762_v9 = vld [vmem:[%s9038_s0 + $0xdc0] sm:$0xff]  ;;  %v755_v26 = vld [vmem:[%s9038_s0 + $0xd88] sm:$0xff] }
 0x343   : > { %v2461_v15 = vadd.f32 %v2460_v34, %v2408_v5  ;;  %2580 = vmatmul.f32.gmra.mxu2 %v8069_v49  ;;  %3015 = vmatpush.msra.mxu3 %v762_v9  ;;  %v874_v9 = vld [vmem:[%s9038_s0 + $0x1140] sm:$0xff] }
 0x344   : > { %2633 = vmatmul.f32.gmra.mxu3 %v8073_v38  ;;  %3132 = vmatpush.msra.mxu1 %v909_v21  ;;  %v8141_v21 = vld [vmem:[%s4989_s6 + $0x218] sm:$0xff] }
 0x345   : > { %v2463_v6 = vpop.f32.mrf.mxu0  ;;  %v2514_v34 = vadd.f32 %v2513_v61, %v2461_v15  ;;  %v2516_v10 = vpop.f32.mrf.mxu1  ;;  %v9171_v61 = vld [vmem:[#allocation16_spill] sm:$0xff]  ;;  %v8106_v15 = vld [vmem:[%s4989_s6 + $0x1e0] sm:$0xff]  ;;  %3016 = vmatpush.msra.mxu3 %v755_v26  ;;  %3068 = vmatpush.msra.mxu0 %v874_v9  ;;  %v741_v9 = vld [vmem:[%s9038_s0 + $0xd18] sm:$0xff] }
 0x346   : > { %v2357_v3 = vpop.f32.mrf.mxu2 }
 0x347   : > { %v2410_v56 = vpop.f32.mrf.mxu3  ;;  %3206 = vst [vmem:[%s5787_s22 + $0x100] sm:$0xff] %v2514_v34  ;;  %v3410_v52 = vmul.f32 %v2514_v34, %v2514_v34  ;;  %v2358_v37 = vadd.f32 %v2357_v3, %v2305_v16  ;;  %v8093_v13 = vadd.f32 %v9170_v40, %v2514_v34 }
 0x348   : > { %2686 = vmatmul.f32.gmra.mxu0 %v7665_v50  ;;  %2739 = vmatmul.f32.gmra.mxu1 %v9171_v61  ;;  %v643_v50 = vld [vmem:[%s9038_s0 + $0xa08] sm:$0xff] }
 0x349   : > { %v2411_v47 = vadd.f32 %v2410_v56, %v2358_v37  ;;  %v8103_v5 = vadd.f32 %v7686_v36, %v3410_v52  ;;  %2963 = vmatpush.msra.mxu2 %v643_v50  ;;  %v2308_v36 = vadd.f32 %v7721_v31, %v7713_v41  ;;  %v9172_v41 = vld [vmem:[#allocation17_spill] sm:$0xff]  ;;  %v8137_v50 = vld [vmem:[%s4989_s6 + $0x210] sm:$0xff] }
 0x34b   : > { %v2464_v22 = vadd.f32 %v2463_v6, %v2411_v47  ;;  %2583 = vmatmul.f32.gmra.mxu2 %v8106_v15 }
 0x34c   : > { %2636 = vmatmul.f32.gmra.mxu3 %v8110_v59  ;;  %2964 = vmatpush.msra.mxu2 %v636_v55 }
 0x34d   : > { %v2466_v16 = vpop.f32.mrf.mxu0  ;;  %v2517_v34 = vadd.f32 %v2516_v10, %v2464_v22  ;;  %v2519_v3 = vpop.f32.mrf.mxu1  ;;  %v9173_v10 = vld [vmem:[#allocation18_spill] sm:$0xff]  ;;  %v867_v22 = vld [vmem:[%s9038_s0 + $0x1108] sm:$0xff] }
 0x34e   : > { %v2360_v6 = vpop.f32.mrf.mxu2  ;;  %3069 = vmatpush.msra.mxu0 %v867_v22 }
 0x34f   : > { %v2413_v56 = vpop.f32.mrf.mxu3  ;;  %3213 = vst [vmem:[%s5787_s22 + $0x138] sm:$0xff] %v2517_v34  ;;  %v3417_v52 = vmul.f32 %v2517_v34, %v2517_v34  ;;  %v2361_v37 = vadd.f32 %v2360_v6, %v2308_v36  ;;  %v8127_v31 = vadd.f32 %v9172_v41, %v2517_v34  ;;  %v8168_v41 = vld [vmem:[%s4989_s6 + $0x20] sm:$0xff] }
 0x350   : > { %2689 = vmatmul.f32.gmra.mxu0 %v7697_v29  ;;  %2742 = vmatmul.f32.gmra.mxu1 %v9173_v10  ;;  %v748_v29 = vld [vmem:[%s9038_s0 + $0xd50] sm:$0xff] }
 0x351   : > { %v2414_v40 = vadd.f32 %v2413_v56, %v2361_v37  ;;  %v8134_v61 = vadd.f32 %v7724_v12, %v3417_v52  ;;  %3017 = vmatpush.msra.mxu3 %v748_v29  ;;  %v2311_v12 = vadd.f32 %v7756_v48, %v7751_v58  ;;  %v629_v37 = vld [vmem:[%s9038_s0 + $0x998] sm:$0xff] }
 0x352   : > { %2965 = vmatpush.msra.mxu2 %v629_v37  ;;  %v846_v37 = vld [vmem:[%s9038_s0 + $0x1060] sm:$0xff] }
 0x353   : > { %v2467_v47 = vadd.f32 %v2466_v16, %v2414_v40  ;;  %2586 = vmatmul.f32.gmra.mxu2 %v8137_v50  ;;  %3018 = vmatpush.msra.mxu3 %v741_v9 }
 0x354   : > { %2639 = vmatmul.f32.gmra.mxu3 %v8141_v21 }
 0x355   : > { %v2469_v26 = vpop.f32.mrf.mxu0  ;;  %v2520_v36 = vadd.f32 %v2519_v3, %v2467_v47  ;;  %v2522_v34 = vpop.f32.mrf.mxu1 }
 0x356   : > { %v2363_v16 = vpop.f32.mrf.mxu2 }
 0x357   : > { %v2416_v6 = vpop.f32.mrf.mxu3  ;;  %3220 = vst [vmem:[%s5787_s22 + $0x170] sm:$0xff] %v2520_v36  ;;  %v3424_v56 = vmul.f32 %v2520_v36, %v2520_v36  ;;  %v2364_v52 = vadd.f32 %v2363_v16, %v2311_v12  ;;  %v8158_v58 = vadd.f32 %v7732_v46, %v2520_v36  ;;  %v8172_v46 = vld [vmem:[%s4989_s6 + $0x28] sm:$0xff]  ;;  %v734_v36 = vld [vmem:[%s9038_s0 + $0xce0] sm:$0xff]  ;;  %v853_v16 = vld [vmem:[%s9038_s0 + $0x1098] sm:$0xff] }
 0x358   : > { %2692 = vmatmul.f32.gmra.mxu0 %v7735_v39  ;;  %2745 = vmatmul.f32.gmra.mxu1 %v7739_v32  ;;  %v860_v39 = vld [vmem:[%s9038_s0 + $0x10d0] sm:$0xff]  ;;  %v622_v32 = vld [vmem:[%s9038_s0 + $0x960] sm:$0xff] }
 0x359   : > { %v2417_v48 = vadd.f32 %v2416_v6, %v2364_v52  ;;  %v8165_v3 = vadd.f32 %v7759_v20, %v3424_v56  ;;  %3070 = vmatpush.msra.mxu0 %v860_v39  ;;  %2966 = vmatpush.msra.mxu2 %v622_v32  ;;  %v2314_v20 = vadd.f32 %v7791_v53, %v7786_v35  ;;  %v615_v35 = vld [vmem:[%s9038_s0 + $0x928] sm:$0xff]  ;;  %v8210_v52 = vld [vmem:[%s4989_s6 + $0x58] sm:$0xff] }
 0x35a   : > { %3019 = vmatpush.msra.mxu3 %v734_v36  ;;  %v727_v6 = vld [vmem:[%s9038_s0 + $0xca8] sm:$0xff] }
 0x35b   : > { %v2470_v55 = vadd.f32 %v2469_v26, %v2417_v48  ;;  %2765 = vmatmul.f32.vlgmr.msrb.gmra.mxu2 %v8168_v41  ;;  %3071 = vmatpush.msra.mxu0 %v853_v16  ;;  %v2317_v48 = vadd.f32 %v7819_v23, %v7817_v14  ;;  %v839_v23 = vld [vmem:[%s9038_s0 + $0x1028] sm:$0xff]  ;;  %v8238_v16 = vld [vmem:[%s4989_s6 + $0x80] sm:$0xff] }
 0x35c   : > { %4525 = vmatmul.msk.f32.vlgmr.msrb.gmra.mxu3 %vm910_vm0, %v8172_v46  ;;  %2967 = vmatpush.msra.mxu2 %v615_v35  ;;  %v8242_v35 = vld [vmem:[%s4989_s6 + $0x88] sm:$0xff] }
 0x35d   : > { %v2472_v10 = vpop.f32.mrf.mxu0  ;;  %v2523_v40 = vadd.f32 %v2522_v34, %v2470_v55  ;;  %v2525_v29 = vpop.f32.mrf.mxu1  ;;  %3020 = vmatpush.msra.mxu3 %v727_v6  ;;  %3072 = vmatpush.msra.mxu0 %v846_v37 }
 0x35e   : > { %v2366_v47 = vpop.f32.mrf.mxu2 }
 0x35f   : > { %v2419_v22 = vpop.f32.mrf.mxu3  ;;  %3227 = vst [vmem:[%s5787_s22 + $0x1a8] sm:$0xff] %v2523_v40  ;;  %v3431_v26 = vmul.f32 %v2523_v40, %v2523_v40  ;;  %v2367_v12 = vadd.f32 %v2366_v47, %v2314_v20  ;;  %v8193_v53 = vadd.f32 %v7767_v0, %v2523_v40  ;;  %v720_v47 = vld [vmem:[%s9038_s0 + $0xc70] sm:$0xff]  ;;  %3073 = vmatpush.msra.mxu0 %v839_v23 }
 0x360   : > { %2871 = vmatmul.f32.vlgmr.msrb.gmra.mxu0 %v7770_v45  ;;  %2924 = vmatmul.f32.vlgmr.msrb.gmra.mxu1 %v7774_v63  ;;  %v902_v45 = vld [vmem:[%s9038_s0 + $0x1220] sm:$0xff]  ;;  %v8206_v63 = vld [vmem:[%s4989_s6 + $0x50] sm:$0xff] }
 0x361   : > { %v2420_v34 = vadd.f32 %v2419_v22, %v2367_v12  ;;  %v8203_v56 = vadd.f32 %v7794_v51, %v3431_v26  ;;  %3133 = vmatpush.msra.mxu1 %v902_v45  ;;  %v608_v51 = vld [vmem:[%s9038_s0 + $0x8f0] sm:$0xff]  ;;  %v9174_v22 = vld [vmem:[#allocation19_spill] sm:$0xff]  ;;  %3021 = vmatpush.msra.mxu3 %v720_v47  ;;  %v601_v45 = vld [vmem:[%s9038_s0 + $0x8b8] sm:$0xff] }
 0x362   : > { %2968 = vmatpush.msra.mxu2 %v608_v51  ;;  %v9175_v12 = vld [vmem:[#allocation20_spill] sm:$0xff] }
 0x363   : > { %v2473_v0 = vadd.f32 %v2472_v10, %v2420_v34  ;;  %2768 = vmatmul.f32.gmra.mxu2 %v8206_v63  ;;  %v713_v34 = vld [vmem:[%s9038_s0 + $0xc38] sm:$0xff]  ;;  %v8270_v23 = vld [vmem:[%s4989_s6 + $0xb0] sm:$0xff] }
 0x364   : > { %4526 = vmatmul.msk.f32.gmra.mxu3 %vm910_vm0, %v8210_v52  ;;  %2969 = vmatpush.msra.mxu2 %v601_v45  ;;  %v825_v45 = vld [vmem:[%s9038_s0 + $0xfb8] sm:$0xff] }
 0x365   : > { %v2475_v9 = vpop.f32.mrf.mxu0  ;;  %v2526_v39 = vadd.f32 %v2525_v29, %v2473_v0  ;;  %v2528_v55 = vpop.f32.mrf.mxu1  ;;  %v9176_v29 = vld [vmem:[#allocation21_spill] sm:$0xff]  ;;  %3022 = vmatpush.msra.mxu3 %v713_v34  ;;  %v2320_v0 = vadd.f32 %v7853_v7, %v7851_v30  ;;  %v594_v7 = vld [vmem:[%s9038_s0 + $0x880] sm:$0xff] }
 0x366   : > { %v2369_v32 = vpop.f32.mrf.mxu2  ;;  %2970 = vmatpush.msra.mxu2 %v594_v7  ;;  %v8305_v7 = vld [vmem:[%s4989_s6 + $0xe0] sm:$0xff] }
 0x367   : > { %v2422_v10 = vpop.f32.mrf.mxu3  ;;  %3234 = vst [vmem:[%s5787_s22 + $0x1e0] sm:$0xff] %v2526_v39  ;;  %v3438_v20 = vmul.f32 %v2526_v39, %v2526_v39  ;;  %v2370_v40 = vadd.f32 %v2369_v32, %v2317_v48  ;;  %v8228_v26 = vadd.f32 %v9174_v22, %v2526_v39  ;;  %v9181_v22 = vld [vmem:[#allocation12_spill] sm:$0xff] }
 0x368   : > { %2874 = vmatmul.f32.gmra.mxu0 %v7810_v57  ;;  %2927 = vmatmul.f32.gmra.mxu1 %v9175_v12 }
 0x369   : > { %v2423_v14 = vadd.f32 %v2422_v10, %v2370_v40  ;;  %v8235_v36 = vadd.f32 %v9176_v29, %v3438_v20  ;;  %v9178_v10 = vld [vmem:[#allocation8_spill] sm:$0xff]  ;;  %v9179_v40 = vld [vmem:[#allocation7_spill] sm:$0xff]  ;;  %v8274_v29 = vld [vmem:[%s4989_s6 + $0xb8] sm:$0xff] }
 0x36a   : > { %v832_v20 = vld [vmem:[%s9038_s0 + $0xff0] sm:$0xff] }
 0x36b   : > { %9177 = vst [vmem:[#allocation11_spill] sm:$0xff] %v8235_v36  ;;  %v2476_v57 = vadd.f32 %v2475_v9, %v2423_v14  ;;  %2771 = vmatmul.f32.gmra.mxu2 %v8238_v16  ;;  %3074 = vmatpush.msra.mxu0 %v832_v20  ;;  %v895_v20 = vld [vmem:[%s9038_s0 + $0x11e8] sm:$0xff] }
 0x36c   : > { %4527 = vmatmul.msk.f32.gmra.mxu3 %vm910_vm0, %v8242_v35  ;;  %3134 = vmatpush.msra.mxu1 %v895_v20 }
 0x36d   : > { %v2478_v6 = vpop.f32.mrf.mxu0  ;;  %v2529_v37 = vadd.f32 %v2528_v55, %v2476_v57  ;;  %v2531_v51 = vpop.f32.mrf.mxu1  ;;  %v9182_v55 = vld [vmem:[#allocation13_spill] sm:$0xff]  ;;  %v706_v57 = vld [vmem:[%s9038_s0 + $0xc00] sm:$0xff]  ;;  %3075 = vmatpush.msra.mxu0 %v825_v45 }
 0x36e   : > { %v2372_v9 = vpop.f32.mrf.mxu2  ;;  %3023 = vmatpush.msra.mxu3 %v706_v57 }
 0x36f   : > { %v2425_v48 = vpop.f32.mrf.mxu3  ;;  %3241 = vst [vmem:[%s5787_s22 + $0x218] sm:$0xff] %v2529_v37  ;;  %v3445_v39 = vmul.f32 %v2529_v37, %v2529_v37  ;;  %v2373_v32 = vadd.f32 %v2372_v9, %v2320_v0  ;;  %v8260_v47 = vadd.f32 %v9179_v40, %v2529_v37  ;;  %v9186_v40 = vld [vmem:[#allocation2_spill] sm:$0xff] }
 0x370   : > { %2877 = vmatmul.f32.gmra.mxu0 %v9178_v10  ;;  %2930 = vmatmul.f32.gmra.mxu1 %v9181_v22  ;;  %v587_v10 = vld [vmem:[%s9038_s0 + $0x848] sm:$0xff] }
 0x371   : > { %9180 = vst [vmem:[#allocation9_spill] sm:$0xff] %v8260_v47  ;;  %v2426_v30 = vadd.f32 %v2425_v48, %v2373_v32  ;;  %v8267_v12 = vadd.f32 %v9182_v55, %v3445_v39  ;;  %2971 = vmatpush.msra.mxu2 %v587_v10  ;;  %v818_v55 = vld [vmem:[%s9038_s0 + $0xf80] sm:$0xff]  ;;  %v9189_v10 = vld [vmem:[#allocation5_spill] sm:$0xff] }
 0x372   : > { %3076 = vmatpush.msra.mxu0 %v818_v55  ;;  %v8337_v55 = vld [vmem:[%s4989_s6 + $0x110] sm:$0xff] }
 0x373   : > { %9183 = vst [vmem:[#allocation10_spill] sm:$0xff] %v8267_v12  ;;  %v2479_v14 = vadd.f32 %v2478_v6, %v2426_v30  ;;  %2774 = vmatmul.f32.gmra.mxu2 %v8270_v23  ;;  %v2323_v6 = vadd.f32 %v7893_v2, %v7891_v25  ;;  %v9185_v2 = vld [vmem:[#allocation14_spill] sm:$0xff] }
 0x374   : > { %4528 = vmatmul.msk.f32.gmra.mxu3 %vm910_vm0, %v8274_v29 }
 0x375   : > { %v2481_v34 = vpop.f32.mrf.mxu0  ;;  %v2532_v0 = vadd.f32 %v2531_v51, %v2479_v14  ;;  %v2534_v37 = vpop.f32.mrf.mxu1  ;;  %v580_v14 = vld [vmem:[%s9038_s0 + $0x810] sm:$0xff] }
 0x376   : > { %v2375_v9 = vpop.f32.mrf.mxu2  ;;  %2972 = vmatpush.msra.mxu2 %v580_v14  ;;  %v8341_v14 = vld [vmem:[%s4989_s6 + $0x118] sm:$0xff] }
 0x377   : > { %v2428_v48 = vpop.f32.mrf.mxu3  ;;  %3248 = vst [vmem:[%s5787_s22 + $0x250] sm:$0xff] %v2532_v0  ;;  %v3452_v39 = vmul.f32 %v2532_v0, %v2532_v0  ;;  %v2376_v32 = vadd.f32 %v2375_v9, %v2323_v6  ;;  %v8295_v25 = vadd.f32 %v7875_v24, %v2532_v0  ;;  %v8309_v24 = vld [vmem:[%s4989_s6 + $0xe8] sm:$0xff] }
 0x378   : > { %2880 = vmatmul.f32.gmra.mxu0 %v7878_v18  ;;  %2933 = vmatmul.f32.gmra.mxu1 %v9185_v2  ;;  %v699_v18 = vld [vmem:[%s9038_s0 + $0xbc8] sm:$0xff]  ;;  %v9191_v2 = vld [vmem:[#allocation22_spill] sm:$0xff] }
 0x379   : > { %9184 = vst [vmem:[#allocation15_spill] sm:$0xff] %v8295_v25  ;;  %v2429_v51 = vadd.f32 %v2428_v48, %v2376_v32  ;;  %v8302_v22 = vadd.f32 %v9186_v40, %v3452_v39  ;;  %3024 = vmatpush.msra.mxu3 %v699_v18  ;;  %v9188_v39 = vld [vmem:[#allocation3_spill] sm:$0xff]  ;;  %v692_v32 = vld [vmem:[%s9038_s0 + $0xb90] sm:$0xff] }
 0x37a   : > { %v9192_v18 = vld [vmem:[#allocation4_spill] sm:$0xff] }
 0x37b   : > { %9187 = vst [vmem:[#allocation16_spill] sm:$0xff] %v8302_v22  ;;  %v2482_v30 = vadd.f32 %v2481_v34, %v2429_v51  ;;  %2777 = vmatmul.f32.gmra.mxu2 %v8305_v7  ;;  %3025 = vmatpush.msra.mxu3 %v692_v32  ;;  %v811_v51 = vld [vmem:[%s9038_s0 + $0xf48] sm:$0xff]  ;;  %v9194_v32 = vld [vmem:[#allocation6_spill] sm:$0xff] }
 0x37c   : > { %4529 = vmatmul.msk.f32.gmra.mxu3 %vm910_vm0, %v8309_v24  ;;  %3077 = vmatpush.msra.mxu0 %v811_v51  ;;  %v8362_v51 = vld [vmem:[%s4989_s6 + $0x140] sm:$0xff] }
 0x37d   : > { %v2660_v57 = vpop.f32.mrf.mxu0  ;;  %v2535_v45 = vadd.f32 %v2534_v37, %v2482_v30  ;;  %v2713_v34 = vpop.f32.mrf.mxu1 }
 0x37e   : > { %v2554_v6 = vpop.f32.mrf.mxu2 }
 0x37f   : > { %v2607_v0 = vpop.f32.mrf.mxu3  ;;  %3255 = vst [vmem:[%s5787_s22 + $0x288] sm:$0xff] %v2535_v45  ;;  %v3459_v9 = vmul.f32 %v2535_v45, %v2535_v45  ;;  %v8325_v20 = vadd.f32 %v9189_v10, %v2535_v45  ;;  %v685_v45 = vld [vmem:[%s9038_s0 + $0xb58] sm:$0xff] }
 0x380   : > { %v2608_v48 = vadd.f32 %v2607_v0, %v2554_v6  ;;  %2883 = vmatmul.f32.gmra.mxu0 %v9188_v39  ;;  %2936 = vmatmul.f32.gmra.mxu1 %v9191_v2  ;;  %v804_v39 = vld [vmem:[%s9038_s0 + $0xf10] sm:$0xff]  ;;  %v566_v2 = vld [vmem:[%s9038_s0 + $0x7a0] sm:$0xff] }
 0x381   : > { %9190 = vst [vmem:[#allocation17_spill] sm:$0xff] %v8325_v20  ;;  %v8332_v40 = vadd.f32 %v9192_v18, %v3459_v9  ;;  %3026 = vmatpush.msra.mxu3 %v685_v45  ;;  %3078 = vmatpush.msra.mxu0 %v804_v39  ;;  %v678_v18 = vld [vmem:[%s9038_s0 + $0xb20] sm:$0xff]  ;;  %v888_v39 = vld [vmem:[%s9038_s0 + $0x11b0] sm:$0xff] }
 0x382   : > { %v2661_v37 = vadd.f32 %v2660_v57, %v2608_v48  ;;  %v573_v57 = vld [vmem:[%s9038_s0 + $0x7d8] sm:$0xff]  ;;  %3135 = vmatpush.msra.mxu1 %v888_v39 }
 0x383   : > { %9193 = vst [vmem:[#allocation18_spill] sm:$0xff] %v8332_v40  ;;  %2780 = vmatmul.f32.gmra.mxu2 %v8337_v55  ;;  %3027 = vmatpush.msra.mxu3 %v678_v18  ;;  %v8394_v18 = vld [vmem:[%s4989_s6 + $0x178] sm:$0xff] }
 0x384   : > { %v8334_v30 = vadd.f32 %v2713_v34, %v2661_v37  ;;  %4530 = vmatmul.msk.f32.gmra.mxu3 %vm910_vm0, %v8341_v14  ;;  %2973 = vmatpush.msra.mxu2 %v573_v57  ;;  %v797_v57 = vld [vmem:[%s9038_s0 + $0xed8] sm:$0xff] }
 0x385   : > { %v2663_v34 = vpop.f32.mrf.mxu0  ;;  %v2716_v6 = vpop.f32.mrf.mxu1  ;;  %3079 = vmatpush.msra.mxu0 %v797_v57  ;;  %v552_v57 = vld [vmem:[%s9038_s0 + $0x730] sm:$0xff] }
 0x386   : > { %v2557_v0 = vpop.f32.mrf.mxu2  ;;  %2974 = vmatpush.msra.mxu2 %v566_v2 }
 0x387   : > { %v2610_v9 = vpop.f32.mrf.mxu3 }
 0x388   : > { %v2611_v48 = vadd.f32 %v2610_v9, %v2557_v0  ;;  %2886 = vmatmul.f32.gmra.mxu0 %v7939_v33  ;;  %2939 = vmatmul.f32.gmra.mxu1 %v9194_v32  ;;  %v8366_v33 = vld [vmem:[%s4989_s6 + $0x148] sm:$0xff] }
 0x38a   : > { %v2664_v10 = vadd.f32 %v2663_v34, %v2611_v48  ;;  %v559_v48 = vld [vmem:[%s9038_s0 + $0x768] sm:$0xff] }
 0x38b   : > { %2783 = vmatmul.f32.gmra.mxu2 %v8362_v51 }
 0x38c   : > { %v8359_v37 = vadd.f32 %v2716_v6, %v2664_v10  ;;  %4531 = vmatmul.msk.f32.gmra.mxu3 %vm910_vm0, %v8366_v33  ;;  %2975 = vmatpush.msra.mxu2 %v559_v48  ;;  %v671_v10 = vld [vmem:[%s9038_s0 + $0xae8] sm:$0xff]  ;;  %v664_v48 = vld [vmem:[%s9038_s0 + $0xab0] sm:$0xff] }
 0x38d   : > { %v2666_v45 = vpop.f32.mrf.mxu0  ;;  %v2719_v34 = vpop.f32.mrf.mxu1  ;;  %3028 = vmatpush.msra.mxu3 %v671_v10 }
 0x38e   : > { %v2560_v6 = vpop.f32.mrf.mxu2  ;;  %2976 = vmatpush.msra.mxu2 %v552_v57 }
 0x38f   : > { %v2613_v0 = vpop.f32.mrf.mxu3  ;;  %3029 = vmatpush.msra.mxu3 %v664_v48 }
 0x390   : > { %v2614_v9 = vadd.f32 %v2613_v0, %v2560_v6  ;;  %2889 = vmatmul.f32.gmra.mxu0 %v7973_v28  ;;  %2942 = vmatmul.f32.gmra.mxu1 %v7977_v11  ;;  %v8390_v28 = vld [vmem:[%s4989_s6 + $0x170] sm:$0xff]  ;;  %v790_v11 = vld [vmem:[%s9038_s0 + $0xea0] sm:$0xff] }
 0x391   : > { %3080 = vmatpush.msra.mxu0 %v790_v11  ;;  %v8415_v11 = vld [vmem:[%s4989_s6 + $0x1a0] sm:$0xff] }
 0x392   : > { %v2667_v32 = vadd.f32 %v2666_v45, %v2614_v9 }
 0x393   : > { %2786 = vmatmul.f32.gmra.mxu2 %v8390_v28 }
 0x394   : > { %v8387_v2 = vadd.f32 %v2719_v34, %v2667_v32  ;;  %4532 = vmatmul.msk.f32.gmra.mxu3 %vm910_vm0, %v8394_v18  ;;  %v783_v32 = vld [vmem:[%s9038_s0 + $0xe68] sm:$0xff] }
 0x395   : > { %v2669_v45 = vpop.f32.mrf.mxu0  ;;  %v2722_v34 = vpop.f32.mrf.mxu1  ;;  %3081 = vmatpush.msra.mxu0 %v783_v32  ;;  %v8435_v32 = vld [vmem:[%s4989_s6 + $0x1d8] sm:$0xff] }
 0x396   : > { %v2563_v6 = vpop.f32.mrf.mxu2 }
 0x397   : > { %v2616_v0 = vpop.f32.mrf.mxu3 }
 0x398   : > { %v2617_v9 = vadd.f32 %v2616_v0, %v2563_v6  ;;  %2892 = vmatmul.f32.gmra.mxu0 %v8007_v44  ;;  %2945 = vmatmul.f32.gmra.mxu1 %v8011_v4  ;;  %v8419_v44 = vld [vmem:[%s4989_s6 + $0x1a8] sm:$0xff] }
 0x39a   : > { %v2670_v39 = vadd.f32 %v2669_v45, %v2617_v9 }
 0x39b   : > { %2789 = vmatmul.f32.gmra.mxu2 %v8415_v11 }
 0x39c   : > { %v8412_v10 = vadd.f32 %v2722_v34, %v2670_v39  ;;  %4533 = vmatmul.msk.f32.gmra.mxu3 %vm910_vm0, %v8419_v44  ;;  %v776_v34 = vld [vmem:[%s9038_s0 + $0xe30] sm:$0xff] }
 0x39d   : > { %v2672_v4 = vpop.f32.mrf.mxu0  ;;  %v2725_v57 = vpop.f32.mrf.mxu1  ;;  %3082 = vmatpush.msra.mxu0 %v776_v34  ;;  %v8431_v39 = vld [vmem:[%s4989_s6 + $0x1d0] sm:$0xff]  ;;  %v8448_v34 = vld [vmem:[%s4989_s6 + $0x208] sm:$0xff] }
 0x39e   : > { %v2566_v45 = vpop.f32.mrf.mxu2 }
 0x39f   : > { %v2619_v6 = vpop.f32.mrf.mxu3 }
 0x3a0   : > { %v2620_v0 = vadd.f32 %v2619_v6, %v2566_v45  ;;  %2895 = vmatmul.f32.gmra.mxu0 %v8035_v60  ;;  %2948 = vmatmul.f32.gmra.mxu1 %v8039_v8 }
 0x3a2   : > { %v2673_v9 = vadd.f32 %v2672_v4, %v2620_v0  ;;  %v8444_v0 = vld [vmem:[%s4989_s6 + $0x200] sm:$0xff] }
 0x3a3   : > { %2792 = vmatmul.f32.gmra.mxu2 %v8431_v39 }
 0x3a4   : > { %v8428_v48 = vadd.f32 %v2725_v57, %v2673_v9  ;;  %4534 = vmatmul.msk.f32.gmra.mxu3 %vm910_vm0, %v8435_v32 }
 0x3a5   : > { %v2675_v60 = vpop.f32.mrf.mxu0  ;;  %v2728_v45 = vpop.f32.mrf.mxu1 }
 0x3a6   : > { %v2569_v6 = vpop.f32.mrf.mxu2 }
 0x3a7   : > { %v2622_v40 = vpop.f32.mrf.mxu3 }
 0x3a8   : > { %v2623_v8 = vadd.f32 %v2622_v40, %v2569_v6  ;;  %2898 = vmatmul.f32.gmra.mxu0 %v8069_v49  ;;  %2951 = vmatmul.f32.gmra.mxu1 %v8073_v38 }
 0x3aa   : > { %v2676_v4 = vadd.f32 %v2675_v60, %v2623_v8  ;;  %v8461_v8 = vld [vmem:[%s4989_s6 + $0x238] sm:$0xff] }
 0x3ab   : > { %2795 = vmatmul.f32.gmra.mxu2 %v8444_v0 }
 0x3ac   : > { %v8441_v57 = vadd.f32 %v2728_v45, %v2676_v4  ;;  %4535 = vmatmul.msk.f32.gmra.mxu3 %vm910_vm0, %v8448_v34  ;;  %v8457_v45 = vld [vmem:[%s4989_s6 + $0x230] sm:$0xff] }
 0x3ad   : > { %v2678_v9 = vpop.f32.mrf.mxu0  ;;  %v2731_v40 = vpop.f32.mrf.mxu1 }
 0x3ae   : > { %v2572_v6 = vpop.f32.mrf.mxu2 }
 0x3af   : > { %v2625_v49 = vpop.f32.mrf.mxu3 }
 0x3b0   : > { %v2626_v20 = vadd.f32 %v2625_v49, %v2572_v6  ;;  %2901 = vmatmul.f32.gmra.mxu0 %v8106_v15  ;;  %2954 = vmatmul.f32.gmra.mxu1 %v8110_v59 }
 0x3b2   : > { %v2679_v38 = vadd.f32 %v2678_v9, %v2626_v20  ;;  %v4825_v9 = vld [vmem:[%s4989_s6 + $0x10] sm:$0xff] }
 0x3b3   : > { %2798 = vmatmul.f32.gmra.mxu2 %v8457_v45 }
 0x3b4   : > { %v8454_v60 = vadd.f32 %v2731_v40, %v2679_v38  ;;  %4536 = vmatmul.msk.f32.gmra.mxu3 %vm910_vm0, %v8461_v8  ;;  %v4826_v40 = vld [vmem:[%s4989_s6 + $0x18] sm:$0xff] }
 0x3b5   : > { %v2681_v4 = vpop.f32.mrf.mxu0  ;;  %v2734_v6 = vpop.f32.mrf.mxu1 }
 0x3b6   : > { %v2575_v49 = vpop.f32.mrf.mxu2 }
 0x3b7   : > { %v2628_v15 = vpop.f32.mrf.mxu3 }
 0x3b8   : > { %v2629_v22 = vadd.f32 %v2628_v15, %v2575_v49  ;;  %2904 = vmatmul.f32.gmra.mxu0 %v8137_v50  ;;  %2957 = vmatmul.f32.gmra.mxu1 %v8141_v21 }
 0x3ba   : > { %v2682_v59 = vadd.f32 %v2681_v4, %v2629_v22  ;;  %v4827_v22 = vld [vmem:[%s4989_s6 + $0x40] sm:$0xff]  ;;  %v4828_v4 = vld [vmem:[%s4989_s6 + $0x48] sm:$0xff] }
 0x3bb   : > { %2977 = vmatmul.f32.vlgmr.msra.gmra.mxu2 %v4825_v9 }
 0x3bc   : > { %v8467_v20 = vadd.f32 %v2734_v6, %v2682_v59  ;;  %3030 = vmatmul.f32.vlgmr.msra.gmra.mxu3 %v4826_v40 }
 0x3bd   : > { %v2684_v38 = vpop.f32.mrf.mxu0  ;;  %v2737_v25 = vpop.f32.mrf.mxu1 }
 0x3be   : > { %v2578_v12 = vpop.f32.mrf.mxu2 }
 0x3bf   : > { %v2631_v47 = vpop.f32.mrf.mxu3 }
 0x3c0   : > { %v2632_v36 = vadd.f32 %v2631_v47, %v2578_v12  ;;  %3083 = vmatmul.f32.vlgmr.msra.gmra.mxu0 %v8168_v41  ;;  %4537 = vmatmul.msk.f32.vlgmr.msra.gmra.mxu1 %vm910_vm0, %v8172_v46  ;;  %v4830_v47 = vld [vmem:[%s4989_s6 + $0x78] sm:$0xff] }
 0x3c2   : > { %v2685_v50 = vadd.f32 %v2684_v38, %v2632_v36  ;;  %v4829_v36 = vld [vmem:[%s4989_s6 + $0x70] sm:$0xff] }
 0x3c3   : > { %2980 = vmatmul.f32.gmra.mxu2 %v4827_v22  ;;  %v4831_v22 = vld [vmem:[%s4989_s6 + $0xa0] sm:$0xff] }
 0x3c4   : > { %v8474_v21 = vadd.f32 %v2737_v25, %v2685_v50  ;;  %3033 = vmatmul.f32.gmra.mxu3 %v4828_v4  ;;  %v4832_v4 = vld [vmem:[%s4989_s6 + $0xa8] sm:$0xff] }
 0x3c5   : > { %v2687_v6 = vpop.f32.mrf.mxu0  ;;  %v2740_v49 = vpop.f32.mrf.mxu1 }
 0x3c6   : > { %v2581_v15 = vpop.f32.mrf.mxu2 }
 0x3c7   : > { %v2634_v59 = vpop.f32.mrf.mxu3 }
 0x3c8   : > { %v2635_v9 = vadd.f32 %v2634_v59, %v2581_v15  ;;  %3086 = vmatmul.f32.gmra.mxu0 %v8206_v63  ;;  %4538 = vmatmul.msk.f32.gmra.mxu1 %vm910_vm0, %v8210_v52 }
 0x3ca   : > { %v2688_v41 = vadd.f32 %v2687_v6, %v2635_v9 }
 0x3cb   : > { %2983 = vmatmul.f32.gmra.mxu2 %v4829_v36  ;;  %v4834_v36 = vld [vmem:[%s4989_s6 + $0xd8] sm:$0xff] }
 0x3cc   : > { %v8481_v46 = vadd.f32 %v2740_v49, %v2688_v41  ;;  %3036 = vmatmul.f32.gmra.mxu3 %v4830_v47  ;;  %v4833_v41 = vld [vmem:[%s4989_s6 + $0xd0] sm:$0xff] }
 0x3cd   : > { %v2690_v12 = vpop.f32.mrf.mxu0  ;;  %v2743_v25 = vpop.f32.mrf.mxu1 }
 0x3ce   : > { %v2584_v40 = vpop.f32.mrf.mxu2 }
 0x3cf   : > { %v2637_v38 = vpop.f32.mrf.mxu3 }
 0x3d0   : > { %v2638_v50 = vadd.f32 %v2637_v38, %v2584_v40  ;;  %3089 = vmatmul.f32.gmra.mxu0 %v8238_v16  ;;  %4539 = vmatmul.msk.f32.gmra.mxu1 %vm910_vm0, %v8242_v35 }
 0x3d2   : > { %v2691_v63 = vadd.f32 %v2690_v12, %v2638_v50 }
 0x3d3   : > { %2986 = vmatmul.f32.gmra.mxu2 %v4831_v22  ;;  %v4836_v22 = vld [vmem:[%s4989_s6 + $0x108] sm:$0xff] }
 0x3d4   : > { %v8488_v52 = vadd.f32 %v2743_v25, %v2691_v63  ;;  %3039 = vmatmul.f32.gmra.mxu3 %v4832_v4  ;;  %v4835_v63 = vld [vmem:[%s4989_s6 + $0x100] sm:$0xff] }
 0x3d5   : > { %v2693_v6 = vpop.f32.mrf.mxu0  ;;  %v2746_v49 = vpop.f32.mrf.mxu1 }
 0x3d6   : > { %v2587_v15 = vpop.f32.mrf.mxu2 }
 0x3d7   : > { %v2640_v59 = vpop.f32.mrf.mxu3 }
 0x3d8   : > { %v2641_v9 = vadd.f32 %v2640_v59, %v2587_v15  ;;  %3092 = vmatmul.f32.gmra.mxu0 %v8270_v23  ;;  %4540 = vmatmul.msk.f32.gmra.mxu1 %vm910_vm0, %v8274_v29 }
 0x3da   : > { %v2694_v16 = vadd.f32 %v2693_v6, %v2641_v9 }
 0x3db   : > { %2989 = vmatmul.f32.gmra.mxu2 %v4833_v41 }
 0x3dc   : > { %v8495_v35 = vadd.f32 %v2746_v49, %v2694_v16  ;;  %3042 = vmatmul.f32.gmra.mxu3 %v4834_v36  ;;  %v4838_v16 = vld [vmem:[%s4989_s6 + $0x138] sm:$0xff] }
 0x3dd   : > { %v2872_v47 = vpop.f32.mrf.mxu0  ;;  %v2925_v12 = vpop.f32.mrf.mxu1 }
 0x3de   : > { %v2766_v25 = vpop.f32.mrf.mxu2  ;;  %v8499_v38 = vadd.f32 %v2925_v12, %v2872_v47 }
 0x3df   : > { %v2819_v40 = vpop.f32.mrf.mxu3  ;;  %v2767_v23 = vadd.f32 %v2766_v25, %v8334_v30 }
 0x3e0   : > { %3095 = vmatmul.f32.gmra.mxu0 %v8305_v7  ;;  %4541 = vmatmul.msk.f32.gmra.mxu1 %vm910_vm0, %v8309_v24 }
 0x3e1   : > { %v2820_v29 = vadd.f32 %v2819_v40, %v2767_v23  ;;  %v4840_v23 = vld [vmem:[%s4989_s6 + $0x168] sm:$0xff] }
 0x3e3   : > { %3178 = vst [vmem:[%s5787_s22 + $0x28] sm:$0xff] %v2820_v29  ;;  %v3383_v50 = vmul.f32 %v2820_v29, %v2820_v29  ;;  %2992 = vmatmul.f32.gmra.mxu2 %v4835_v63  ;;  %v8509_v4 = vadd.f32 %v7963_v42, %v2820_v29  ;;  %v4837_v42 = vld [vmem:[%s4989_s6 + $0x130] sm:$0xff] }
 0x3e4   : > { %3045 = vmatmul.f32.gmra.mxu3 %v4836_v22 }
 0x3e5   : > { %v2875_v6 = vpop.f32.mrf.mxu0  ;;  %v2928_v30 = vpop.f32.mrf.mxu1  ;;  %v8512_v7 = vadd.f32 %v7970_v54, %v3383_v50 }
 0x3e6   : > { %v2769_v49 = vpop.f32.mrf.mxu2  ;;  %v8514_v15 = vadd.f32 %v2928_v30, %v2875_v6 }
 0x3e7   : > { %v2822_v24 = vpop.f32.mrf.mxu3  ;;  %v2770_v59 = vadd.f32 %v2769_v49, %v8359_v37  ;;  %v4841_v49 = vld [vmem:[%s4989_s6 + $0x190] sm:$0xff] }
 0x3e8   : > { %3098 = vmatmul.f32.gmra.mxu0 %v8337_v55  ;;  %4542 = vmatmul.msk.f32.gmra.mxu1 %vm910_vm0, %v8341_v14 }
 0x3e9   : > { %v2823_v9 = vadd.f32 %v2822_v24, %v2770_v59 }
 0x3eb   : > { %3186 = vst [vmem:[%s5787_s22 + $0x60] sm:$0xff] %v2823_v9  ;;  %2995 = vmatmul.f32.gmra.mxu2 %v4837_v42  ;;  %v3390_v54 = vmul.f32 %v2823_v9, %v2823_v9  ;;  %v8524_v41 = vadd.f32 %v7994_v27, %v2823_v9  ;;  %v4839_v27 = vld [vmem:[%s4989_s6 + $0x160] sm:$0xff] }
 0x3ec   : > { %3048 = vmatmul.f32.gmra.mxu3 %v4838_v16 }
 0x3ed   : > { %v2878_v36 = vpop.f32.mrf.mxu0  ;;  %v2931_v37 = vpop.f32.mrf.mxu1  ;;  %v8527_v55 = vadd.f32 %v8004_v19, %v3390_v54 }
 0x3ee   : > { %v2772_v47 = vpop.f32.mrf.mxu2  ;;  %v8529_v12 = vadd.f32 %v2931_v37, %v2878_v36  ;;  %v4843_v36 = vld [vmem:[%s4989_s6 + $0x1c0] sm:$0xff] }
 0x3ef   : > { %v2825_v14 = vpop.f32.mrf.mxu3  ;;  %v2773_v25 = vadd.f32 %v2772_v47, %v8387_v2 }
 0x3f0   : > { %3101 = vmatmul.f32.gmra.mxu0 %v8362_v51  ;;  %4543 = vmatmul.msk.f32.gmra.mxu1 %vm910_vm0, %v8366_v33 }
 0x3f1   : > { %v2826_v40 = vadd.f32 %v2825_v14, %v2773_v25 }
 0x3f3   : > { %3193 = vst [vmem:[%s5787_s22 + $0x98] sm:$0xff] %v2826_v40  ;;  %2998 = vmatmul.f32.gmra.mxu2 %v4839_v27  ;;  %v3397_v19 = vmul.f32 %v2826_v40, %v2826_v40  ;;  %v8539_v29 = vadd.f32 %v8028_v17, %v2826_v40 }
 0x3f4   : > { %3051 = vmatmul.f32.gmra.mxu3 %v4840_v23  ;;  %v4845_v23 = vld [vmem:[%s4989_s6 + $0x1f0] sm:$0xff] }
 0x3f5   : > { %v2881_v50 = vpop.f32.mrf.mxu0  ;;  %v2934_v2 = vpop.f32.mrf.mxu1  ;;  %v8542_v51 = vadd.f32 %v8032_v62, %v3397_v19  ;;  %v4842_v62 = vld [vmem:[%s4989_s6 + $0x198] sm:$0xff] }
 0x3f6   : > { %v2775_v63 = vpop.f32.mrf.mxu2  ;;  %v8544_v22 = vadd.f32 %v2934_v2, %v2881_v50 }
 0x3f7   : > { %v2828_v33 = vpop.f32.mrf.mxu3  ;;  %v2776_v6 = vadd.f32 %v2775_v63, %v8412_v10 }
 0x3f8   : > { %3104 = vmatmul.f32.gmra.mxu0 %v8390_v28  ;;  %4544 = vmatmul.msk.f32.gmra.mxu1 %vm910_vm0, %v8394_v18 }
 0x3f9   : > { %v2829_v30 = vadd.f32 %v2828_v33, %v2776_v6 }
 0x3fb   : > { %3200 = vst [vmem:[%s5787_s22 + $0xd0] sm:$0xff] %v2829_v30  ;;  %v3404_v17 = vmul.f32 %v2829_v30, %v2829_v30  ;;  %3001 = vmatmul.f32.gmra.mxu2 %v4841_v49  ;;  %v8554_v24 = vadd.f32 %v8059_v43, %v2829_v30  ;;  %v4847_v30 = vld [vmem:[%s4989_s6 + $0x220] sm:$0xff] }
 0x3fc   : > { %3054 = vmatmul.f32.gmra.mxu3 %v4842_v62 }
 0x3fd   : > { %v2884_v59 = vpop.f32.mrf.mxu0  ;;  %v2937_v10 = vpop.f32.mrf.mxu1  ;;  %v8557_v28 = vadd.f32 %v8066_v1, %v3404_v17  ;;  %v4844_v1 = vld [vmem:[%s4989_s6 + $0x1c8] sm:$0xff] }
 0x3fe   : > { %v2778_v9 = vpop.f32.mrf.mxu2  ;;  %v8559_v42 = vadd.f32 %v2937_v10, %v2884_v59  ;;  %v4848_v17 = vld [vmem:[%s4989_s6 + $0x228] sm:$0xff] }
 0x3ff   : > { %v2831_v18 = vpop.f32.mrf.mxu3  ;;  %v2779_v16 = vadd.f32 %v2778_v9, %v8428_v48 }
 0x400   : > { %3107 = vmatmul.f32.gmra.mxu0 %v8415_v11  ;;  %4545 = vmatmul.msk.f32.gmra.mxu1 %vm910_vm0, %v8419_v44 }
 0x401   : > { %v2832_v54 = vadd.f32 %v2831_v18, %v2779_v16 }
 0x403   : > { %3207 = vst [vmem:[%s5787_s22 + $0x108] sm:$0xff] %v2832_v54  ;;  %v3411_v43 = vmul.f32 %v2832_v54, %v2832_v54  ;;  %3004 = vmatmul.f32.gmra.mxu2 %v4843_v36  ;;  %v8569_v37 = vadd.f32 %v8093_v13, %v2832_v54 }
 0x404   : > { %3057 = vmatmul.f32.gmra.mxu3 %v4844_v1 }
 0x405   : > { %v2887_v47 = vpop.f32.mrf.mxu0  ;;  %v2940_v48 = vpop.f32.mrf.mxu1  ;;  %v8572_v11 = vadd.f32 %v8103_v5, %v3411_v43  ;;  %v4846_v5 = vld [vmem:[%s4989_s6 + $0x1f8] sm:$0xff]  ;;  %s4462_s6 = sshll.u32 %s9203_s21, 3 }
 0x406   : > { %v2781_v14 = vpop.f32.mrf.mxu2  ;;  %v8574_v25 = vadd.f32 %v2940_v48, %v2887_v47  ;;  %s8759_s17 = scalar_lea.vmem %s9040_s2, %s4462_s6  ;;  %s8769_s19 = scalar_lea.vmem %s9041_s3, %s4462_s6 }
 0x407   : > { %v2834_v44 = vpop.f32.mrf.mxu3  ;;  %v2782_v40 = vadd.f32 %v2781_v14, %v8441_v57  ;;  %v9195_v14 = vld [vmem:[#allocation11_spill] sm:$0xff] }
 0x408   : > { %3110 = vmatmul.f32.gmra.mxu0 %v8431_v39  ;;  %4546 = vmatmul.msk.f32.gmra.mxu1 %vm910_vm0, %v8435_v32 }
 0x409   : > { %v2835_v27 = vadd.f32 %v2834_v44, %v2782_v40 }
 0x40b   : > { %3214 = vst [vmem:[%s5787_s22 + $0x140] sm:$0xff] %v2835_v27  ;;  %v3418_v13 = vmul.f32 %v2835_v27, %v2835_v27  ;;  %3007 = vmatmul.f32.gmra.mxu2 %v4845_v23  ;;  %v8584_v19 = vadd.f32 %v8127_v31, %v2835_v27 }
 0x40c   : > { %3060 = vmatmul.f32.gmra.mxu3 %v4846_v5  ;;  %v9196_v5 = vld [vmem:[#allocation9_spill] sm:$0xff] }
 0x40d   : > { %v2890_v50 = vpop.f32.mrf.mxu0  ;;  %v2943_v57 = vpop.f32.mrf.mxu1  ;;  %v8587_v39 = vadd.f32 %v8134_v61, %v3418_v13 }
 0x40e   : > { %v2784_v2 = vpop.f32.mrf.mxu2  ;;  %v8589_v63 = vadd.f32 %v2943_v57, %v2890_v50 }
 0x40f   : > { %v2837_v32 = vpop.f32.mrf.mxu3  ;;  %v2785_v33 = vadd.f32 %v2784_v2, %v8454_v60  ;;  %v9197_v2 = vld [vmem:[#allocation10_spill] sm:$0xff] }
 0x410   : > { %3113 = vmatmul.f32.gmra.mxu0 %v8444_v0  ;;  %4547 = vmatmul.msk.f32.gmra.mxu1 %vm910_vm0, %v8448_v34 }
 0x411   : > { %v2838_v6 = vadd.f32 %v2837_v32, %v2785_v33 }
 0x413   : > { %3221 = vst [vmem:[%s5787_s22 + $0x178] sm:$0xff] %v2838_v6  ;;  %v3425_v31 = vmul.f32 %v2838_v6, %v2838_v6  ;;  %3010 = vmatmul.f32.gmra.mxu2 %v4847_v30  ;;  %v8599_v61 = vadd.f32 %v8158_v58, %v2838_v6 }
 0x414   : > { %3063 = vmatmul.f32.gmra.mxu3 %v4848_v17 }
 0x415   : > { %v2893_v49 = vpop.f32.mrf.mxu0  ;;  %v2946_v62 = vpop.f32.mrf.mxu1  ;;  %v8602_v60 = vadd.f32 %v8165_v3, %v3425_v31 }
 0x416   : > { %v2787_v0 = vpop.f32.mrf.mxu2  ;;  %v8604_v10 = vadd.f32 %v2946_v62, %v2893_v49  ;;  %v9198_v49 = vld [vmem:[#allocation15_spill] sm:$0xff] }
 0x417   : > { %v2840_v59 = vpop.f32.mrf.mxu3  ;;  %v2788_v34 = vadd.f32 %v2787_v0, %v8467_v20 }
 0x418   : > { %3116 = vmatmul.f32.gmra.mxu0 %v8457_v45  ;;  %4548 = vmatmul.msk.f32.gmra.mxu1 %vm910_vm0, %v8461_v8 }
 0x419   : > { %v2841_v9 = vadd.f32 %v2840_v59, %v2788_v34  ;;  %v9199_v34 = vld [vmem:[#allocation16_spill] sm:$0xff] }
 0x41b   : > { %3228 = vst [vmem:[%s5787_s22 + $0x1b0] sm:$0xff] %v2841_v9  ;;  %v3432_v58 = vmul.f32 %v2841_v9, %v2841_v9  ;;  %v8612_v18 = vadd.f32 %v8193_v53, %v2841_v9 }
 0x41d   : > { %v2896_v3 = vpop.f32.mrf.mxu0  ;;  %v2949_v16 = vpop.f32.mrf.mxu1  ;;  %v8615_v54 = vadd.f32 %v8203_v56, %v3432_v58 }
 0x41e   : > { %v2790_v43 = vpop.f32.mrf.mxu2  ;;  %v8617_v20 = vadd.f32 %v2949_v16, %v2896_v3 }
 0x41f   : > { %v2843_v36 = vpop.f32.mrf.mxu3  ;;  %v2791_v45 = vadd.f32 %v2790_v43, %v8474_v21 }
 0x421   : > { %v2844_v1 = vadd.f32 %v2843_v36, %v2791_v45  ;;  %v9200_v45 = vld [vmem:[#allocation17_spill] sm:$0xff] }
 0x423   : > { %3235 = vst [vmem:[%s5787_s22 + $0x1e8] sm:$0xff] %v2844_v1  ;;  %v3439_v8 = vmul.f32 %v2844_v1, %v2844_v1  ;;  %v8622_v47 = vadd.f32 %v8228_v26, %v2844_v1 }
 0x425   : > { %v2899_v53 = vpop.f32.mrf.mxu0  ;;  %v2952_v48 = vpop.f32.mrf.mxu1  ;;  %v8625_v44 = vadd.f32 %v9195_v14, %v3439_v8 }
 0x426   : > { %v2793_v56 = vpop.f32.mrf.mxu2  ;;  %v8627_v27 = vadd.f32 %v2952_v48, %v2899_v53  ;;  %v9201_v48 = vld [vmem:[#allocation18_spill] sm:$0xff] }
 0x427   : > { %v2846_v40 = vpop.f32.mrf.mxu3  ;;  %v2794_v13 = vadd.f32 %v2793_v56, %v8481_v46 }
 0x429   : > { %v2847_v23 = vadd.f32 %v2846_v40, %v2794_v13 }
 0x42b   : > { %3242 = vst [vmem:[%s5787_s22 + $0x220] sm:$0xff] %v2847_v23  ;;  %v3446_v21 = vmul.f32 %v2847_v23, %v2847_v23  ;;  %v8632_v50 = vadd.f32 %v9196_v5, %v2847_v23 }
 0x42d   : > { %v2902_v26 = vpop.f32.mrf.mxu0  ;;  %v2955_v57 = vpop.f32.mrf.mxu1  ;;  %v8635_v32 = vadd.f32 %v9197_v2, %v3446_v21 }
 0x42e   : > { %v2796_v33 = vpop.f32.mrf.mxu2  ;;  %v8637_v31 = vadd.f32 %v2955_v57, %v2902_v26 }
 0x42f   : > { %v2849_v6 = vpop.f32.mrf.mxu3  ;;  %v2797_v30 = vadd.f32 %v2796_v33, %v8488_v52 }
 0x431   : > { %v2850_v17 = vadd.f32 %v2849_v6, %v2797_v30 }
 0x433   : > { %3249 = vst [vmem:[%s5787_s22 + $0x258] sm:$0xff] %v2850_v17  ;;  %v3453_v46 = vmul.f32 %v2850_v17, %v2850_v17  ;;  %v8642_v62 = vadd.f32 %v9198_v49, %v2850_v17 }
 0x435   : > { %v2905_v0 = vpop.f32.mrf.mxu0  ;;  %v2958_v59 = vpop.f32.mrf.mxu1  ;;  %v8645_v9 = vadd.f32 %v9199_v34, %v3453_v46 }
 0x436   : > { %v2799_v58 = vpop.f32.mrf.mxu2  ;;  %v8647_v16 = vadd.f32 %v2958_v59, %v2905_v0 }
 0x437   : > { %v2852_v3 = vpop.f32.mrf.mxu3  ;;  %v2800_v43 = vadd.f32 %v2799_v58, %v8495_v35 }
 0x439   : > { %v2853_v36 = vadd.f32 %v2852_v3, %v2800_v43 }
 0x43b   : > { %3256 = vst [vmem:[%s5787_s22 + $0x290] sm:$0xff] %v2853_v36  ;;  %v3460_v52 = vmul.f32 %v2853_v36, %v2853_v36  ;;  %v8652_v1 = vadd.f32 %v9200_v45, %v2853_v36 }
 0x43d   : > { %v3084_v8 = vpop.f32.mrf.mxu0  ;;  %v3137_v53 = vpop.f32.mrf.mxu1  ;;  %v8655_v14 = vadd.f32 %v9201_v48, %v3460_v52 }
 0x43e   : > { %v2978_v56 = vpop.f32.mrf.mxu2 }
 0x43f   : > { %v3031_v40 = vpop.f32.mrf.mxu3  ;;  %v2979_v13 = vadd.f32 %v2978_v56, %v8499_v38 }
 0x441   : > { %v3032_v23 = vadd.f32 %v3031_v40, %v2979_v13 }
 0x443   : > { %v3085_v21 = vadd.f32 %v3084_v8, %v3032_v23 }
 0x445   : > { %v3087_v35 = vpop.f32.mrf.mxu0  ;;  %v3138_v5 = vadd.f32 %v3137_v53, %v3085_v21  ;;  %v3140_v26 = vpop.f32.mrf.mxu1 }
 0x446   : > { %v2981_v57 = vpop.f32.mrf.mxu2 }
 0x447   : > { %v3034_v2 = vpop.f32.mrf.mxu3  ;;  %3180 = vst.msk [vmem:[%s5787_s22 + $0x30] sm:$0xff] %vm3179_vm1, %v3138_v5  ;;  %v2982_v33 = vadd.f32 %v2981_v57, %v8514_v15  ;;  %v3263_v6 = vsel %vm3179_vm1, %v3138_v5, 0.0  ;;  %v3384_v30 = vmul.f32 %v3138_v5, %v3138_v5 }
 0x448   : > { %v3264_v17 = vadd.f32 %v3263_v6, %v8509_v4 }
 0x449   : > { %v3035_v46 = vadd.f32 %v3034_v2, %v2982_v33  ;;  %v3467_v38 = vsel %vm3179_vm1, %v3384_v30, 0.0 }
 0x44a   : > { %3265 = vadd.xlane.f32.xlu0 %v3264_v17  ;;  %v3468_v49 = vadd.f32 %v3467_v38, %v8512_v7 }
 0x44b   : > { %v3088_v0 = vadd.f32 %v3087_v35, %v3035_v46 }
 0x44d   : > { %v3090_v59 = vpop.f32.mrf.mxu0  ;;  %v3141_v34 = vadd.f32 %v3140_v26, %v3088_v0  ;;  %v3143_v58 = vpop.f32.mrf.mxu1 }
 0x44e   : > { %v2984_v3 = vpop.f32.mrf.mxu2 }
 0x44f   : > { %v3037_v43 = vpop.f32.mrf.mxu3  ;;  %3187 = vst.msk [vmem:[%s5787_s22 + $0x68] sm:$0xff] %vm3179_vm1, %v3141_v34  ;;  %v2985_v15 = vadd.f32 %v2984_v3, %v8529_v12  ;;  %v3391_v36 = vmul.f32 %v3141_v34, %v3141_v34  ;;  %v3272_v4 = vsel %vm3179_vm1, %v3141_v34, 0.0 }
 0x450   : > { %v3273_v52 = vadd.f32 %v3272_v4, %v8524_v41 }
 0x451   : > { %v3038_v45 = vadd.f32 %v3037_v43, %v2985_v15  ;;  %v3476_v8 = vsel %vm3179_vm1, %v3391_v36, 0.0 }
 0x452   : > { %3469 = vadd.xlane.f32.xlu0 %v3468_v49  ;;  %v3477_v7 = vadd.f32 %v3476_v8, %v8527_v55 }
 0x453   : > { %v3091_v53 = vadd.f32 %v3090_v59, %v3038_v45 }
 0x454   : > { %3478 = vadd.xlane.f32.xlu1 %v3477_v7 }
 0x455   : > { %v3093_v48 = vpop.f32.mrf.mxu0  ;;  %v3144_v56 = vadd.f32 %v3143_v58, %v3091_v53  ;;  %v3146_v40 = vpop.f32.mrf.mxu1 }
 0x456   : > { %v2987_v13 = vpop.f32.mrf.mxu2 }
 0x457   : > { %v3040_v23 = vpop.f32.mrf.mxu3  ;;  %3194 = vst.msk [vmem:[%s5787_s22 + $0xa0] sm:$0xff] %vm3179_vm1, %v3144_v56  ;;  %v2988_v12 = vadd.f32 %v2987_v13, %v8544_v22  ;;  %v3398_v21 = vmul.f32 %v3144_v56, %v3144_v56  ;;  %v3281_v41 = vsel %vm3179_vm1, %v3144_v56, 0.0 }
 0x458   : > { %v3282_v35 = vadd.f32 %v3281_v41, %v8539_v29 }
 0x459   : > { %v3041_v5 = vadd.f32 %v3040_v23, %v2988_v12  ;;  %v3485_v55 = vsel %vm3179_vm1, %v3398_v21, 0.0 }
 0x45a   : > { %3274 = vadd.xlane.f32.xlu0 %v3273_v52  ;;  %v3486_v26 = vadd.f32 %v3485_v55, %v8542_v51 }
 0x45b   : > { %v3094_v57 = vadd.f32 %v3093_v48, %v3041_v5 }
 0x45c   : > { %3487 = vadd.xlane.f32.xlu2 %v3486_v26  ;;  %3283 = vadd.xlane.f32.xlu1 %v3282_v35 }
 0x45d   : > { %v3096_v2 = vpop.f32.mrf.mxu0  ;;  %v3147_v33 = vadd.f32 %v3146_v40, %v3094_v57  ;;  %v3149_v6 = vpop.f32.mrf.mxu1 }
 0x45e   : > { %v2990_v30 = vpop.f32.mrf.mxu2 }
 0x45f   : > { %v3043_v22 = vpop.f32.mrf.mxu3  ;;  %3201 = vst.msk [vmem:[%s5787_s22 + $0xd8] sm:$0xff] %vm3179_vm1, %v3147_v33  ;;  %v2991_v17 = vadd.f32 %v2990_v30, %v8559_v42  ;;  %v3290_v29 = vsel %vm3179_vm1, %v3147_v33, 0.0  ;;  %v3405_v46 = vmul.f32 %v3147_v33, %v3147_v33 }
 0x460   : > { %v3291_v38 = vadd.f32 %v3290_v29, %v8554_v24 }
 0x461   : > { %v3044_v49 = vadd.f32 %v3043_v22, %v2991_v17  ;;  %v3494_v51 = vsel %vm3179_vm1, %v3405_v46, 0.0 }
 0x462   : > { %v3495_v0 = vadd.f32 %v3494_v51, %v8557_v28 }
 0x463   : > { %v3097_v59 = vadd.f32 %v3096_v2, %v3044_v49 }
 0x464   : > { %3292 = vadd.xlane.f32.xlu1 %v3291_v38  ;;  %3496 = vadd.xlane.f32.xlu0 %v3495_v0 }
 0x465   : > { %v3099_v34 = vpop.f32.mrf.mxu0  ;;  %v3150_v58 = vadd.f32 %v3149_v6, %v3097_v59  ;;  %v3152_v3 = vpop.f32.mrf.mxu1 }
 0x466   : > { %v2993_v43 = vpop.f32.mrf.mxu2 }
 0x467   : > { %v3046_v15 = vpop.f32.mrf.mxu3  ;;  %3208 = vst.msk [vmem:[%s5787_s22 + $0x110] sm:$0xff] %vm3179_vm1, %v3150_v58  ;;  %v2994_v42 = vadd.f32 %v2993_v43, %v8574_v25  ;;  %v3299_v24 = vsel %vm3179_vm1, %v3150_v58, 0.0  ;;  %v3412_v36 = vmul.f32 %v3150_v58, %v3150_v58 }
 0x468   : > { %v3300_v4 = vadd.f32 %v3299_v24, %v8569_v37 }
 0x469   : > { %v3047_v52 = vadd.f32 %v3046_v15, %v2994_v42  ;;  %v3503_v28 = vsel %vm3179_vm1, %v3412_v36, 0.0 }
 0x46a   : > { %3301 = vadd.xlane.f32.xlu2 %v3300_v4  ;;  %v3504_v45 = vadd.f32 %v3503_v28, %v8572_v11 }
 0x46b   : > { %v3100_v8 = vadd.f32 %v3099_v34, %v3047_v52 }
 0x46c   : > { %3505 = vadd.xlane.f32.xlu1 %v3504_v45 }
 0x46d   : > { %v3102_v7 = vpop.f32.mrf.mxu0  ;;  %v3153_v53 = vadd.f32 %v3152_v3, %v3100_v8  ;;  %v3155_v48 = vpop.f32.mrf.mxu1 }
 0x46e   : > { %v2996_v56 = vpop.f32.mrf.mxu2 }
 0x46f   : > { %v3049_v40 = vpop.f32.mrf.mxu3  ;;  %3215 = vst.msk [vmem:[%s5787_s22 + $0x148] sm:$0xff] %vm3179_vm1, %v3153_v53  ;;  %v2997_v25 = vadd.f32 %v2996_v56, %v8589_v63  ;;  %v3308_v37 = vsel %vm3179_vm1, %v3153_v53, 0.0  ;;  %v3419_v13 = vmul.f32 %v3153_v53, %v3153_v53 }
 0x470   : > { %v3309_v23 = vadd.f32 %v3308_v37, %v8584_v19 }
 0x471   : > { %v3050_v12 = vadd.f32 %v3049_v40, %v2997_v25  ;;  %v3512_v11 = vsel %vm3179_vm1, %v3419_v13, 0.0 }
 0x472   : > { %3310 = vadd.xlane.f32.xlu2 %v3309_v23  ;;  %v3513_v21 = vadd.f32 %v3512_v11, %v8587_v39 }
 0x473   : > { %v3103_v41 = vadd.f32 %v3102_v7, %v3050_v12 }
 0x475   : > { %v3105_v35 = vpop.f32.mrf.mxu0  ;;  %v3156_v5 = vadd.f32 %v3155_v48, %v3103_v41  ;;  %v3158_v55 = vpop.f32.mrf.mxu1 }
 0x476   : > { %v2999_v26 = vpop.f32.mrf.mxu2 }
 0x477   : > { %v3052_v57 = vpop.f32.mrf.mxu3  ;;  %3222 = vst.msk [vmem:[%s5787_s22 + $0x180] sm:$0xff] %vm3179_vm1, %v3156_v5  ;;  %v3000_v63 = vadd.f32 %v2999_v26, %v8604_v10  ;;  %v3317_v2 = vsel %vm3179_vm1, %v3156_v5, 0.0  ;;  %v3426_v19 = vmul.f32 %v3156_v5, %v3156_v5 }
 0x478   : > { %v3318_v33 = vadd.f32 %v3317_v2, %v8599_v61 }
 0x479   : > { %v3053_v6 = vadd.f32 %v3052_v57, %v3000_v63  ;;  %v3521_v30 = vsel %vm3179_vm1, %v3426_v19, 0.0 }
 0x47a   : > { %3319 = vadd.xlane.f32.xlu0 %v3318_v33  ;;  %3514 = vadd.xlane.f32.xlu2 %v3513_v21  ;;  %v3522_v39 = vadd.f32 %v3521_v30, %v8602_v60 }
 0x47b   : > { %v3106_v22 = vadd.f32 %v3105_v35, %v3053_v6 }
 0x47d   : > { %v3108_v17 = vpop.f32.mrf.mxu0  ;;  %v3159_v29 = vadd.f32 %v3158_v55, %v3106_v22  ;;  %v3161_v46 = vpop.f32.mrf.mxu1 }
 0x47e   : > { %v3002_v38 = vpop.f32.mrf.mxu2 }
 0x47f   : > { %v3055_v49 = vpop.f32.mrf.mxu3  ;;  %3229 = vst.msk [vmem:[%s5787_s22 + $0x1b8] sm:$0xff] %vm3179_vm1, %v3159_v29  ;;  %v3003_v10 = vadd.f32 %v3002_v38, %v8617_v20  ;;  %v3326_v61 = vsel %vm3179_vm1, %v3159_v29, 0.0  ;;  %v3433_v51 = vmul.f32 %v3159_v29, %v3159_v29 }
 0x480   : > { %v3327_v0 = vadd.f32 %v3326_v61, %v8612_v18 }
 0x481   : > { %v3056_v59 = vadd.f32 %v3055_v49, %v3003_v10  ;;  %v3530_v34 = vsel %vm3179_vm1, %v3433_v51, 0.0 }
 0x482   : > { %3328 = vadd.xlane.f32.xlu1 %v3327_v0  ;;  %3523 = vadd.xlane.f32.xlu0 %v3522_v39  ;;  %v3531_v60 = vadd.f32 %v3530_v34, %v8615_v54 }
 0x483   : > { %v3109_v58 = vadd.f32 %v3108_v17, %v3056_v59 }
 0x485   : > { %v3111_v3 = vpop.f32.mrf.mxu0  ;;  %v3162_v43 = vadd.f32 %v3161_v46, %v3109_v58  ;;  %v3164_v15 = vpop.f32.mrf.mxu1 }
 0x486   : > { %v3005_v42 = vpop.f32.mrf.mxu2 }
 0x487   : > { %v3058_v24 = vpop.f32.mrf.mxu3  ;;  %3236 = vst.msk [vmem:[%s5787_s22 + $0x1f0] sm:$0xff] %vm3179_vm1, %v3162_v43  ;;  %v3006_v20 = vadd.f32 %v3005_v42, %v8627_v27  ;;  %v3335_v18 = vsel %vm3179_vm1, %v3162_v43, 0.0  ;;  %v3440_v36 = vmul.f32 %v3162_v43, %v3162_v43 }
 0x488   : > { %v3336_v4 = vadd.f32 %v3335_v18, %v8622_v47 }
 0x489   : > { %v3059_v52 = vadd.f32 %v3058_v24, %v3006_v20  ;;  %v3539_v28 = vsel %vm3179_vm1, %v3440_v36, 0.0 }
 0x48a   : > { %3532 = vadd.xlane.f32.xlu1 %v3531_v60  ;;  %3337 = vadd.xlane.f32.xlu2 %v3336_v4  ;;  %v3540_v54 = vadd.f32 %v3539_v28, %v8625_v44 }
 0x48b   : > { %v3112_v45 = vadd.f32 %v3111_v3, %v3059_v52 }
 0x48d   : > { %v3165_v8 = vadd.f32 %v3164_v15, %v3112_v45  ;;  %v3114_v7 = vpop.f32.mrf.mxu0  ;;  %v3167_v25 = vpop.f32.mrf.mxu1 }
 0x48e   : > { %v3008_v53 = vpop.f32.mrf.mxu2 }
 0x48f   : > { %v3061_v48 = vpop.f32.mrf.mxu3  ;;  %3243 = vst.msk [vmem:[%s5787_s22 + $0x228] sm:$0xff] %vm3179_vm1, %v3165_v8  ;;  %v3009_v27 = vadd.f32 %v3008_v53, %v8637_v31  ;;  %v3344_v56 = vsel %vm3179_vm1, %v3165_v8, 0.0  ;;  %v3447_v47 = vmul.f32 %v3165_v8, %v3165_v8 }
 0x490   : > { %v3345_v40 = vadd.f32 %v3344_v56, %v8632_v50  ;;  %v3642_v56 = vld [vmem:[%s8759_s17] sm:$0xff] }
 0x491   : > { %v3062_v37 = vadd.f32 %v3061_v48, %v3009_v27  ;;  %v3548_v13 = vsel %vm3179_vm1, %v3447_v47, 0.0 }
 0x492   : > { %3346 = vadd.xlane.f32.xlu0 %v3345_v40  ;;  %3541 = vadd.xlane.f32.xlu2 %v3540_v54  ;;  %v3549_v44 = vadd.f32 %v3548_v13, %v8635_v32 }
 0x493   : > { %v3115_v23 = vadd.f32 %v3114_v7, %v3062_v37 }
 0x495   : > { %v3168_v12 = vadd.f32 %v3167_v25, %v3115_v23  ;;  %v3117_v35 = vpop.f32.mrf.mxu0  ;;  %v3170_v32 = vpop.f32.mrf.mxu1 }
 0x496   : > { %v3011_v11 = vpop.f32.mrf.mxu2 }
 0x497   : > { %v3064_v21 = vpop.f32.mrf.mxu3  ;;  %3250 = vst.msk [vmem:[%s5787_s22 + $0x260] sm:$0xff] %vm3179_vm1, %v3168_v12  ;;  %v3012_v31 = vadd.f32 %v3011_v11, %v8647_v16  ;;  %v3353_v41 = vsel %vm3179_vm1, %v3168_v12, 0.0  ;;  %v3454_v50 = vmul.f32 %v3168_v12, %v3168_v12 }
 0x498   : > { %v3354_v5 = vadd.f32 %v3353_v41, %v8642_v62 }
 0x499   : > { %v3065_v55 = vadd.f32 %v3064_v21, %v3012_v31  ;;  %v3557_v26 = vsel %vm3179_vm1, %v3454_v50, 0.0 }
 0x49a   : > { %3355 = vadd.xlane.f32.xlu1 %v3354_v5  ;;  %3550 = vadd.xlane.f32.xlu0 %v3549_v44  ;;  %v3558_v57 = vadd.f32 %v3557_v26, %v8645_v9  ;;  %v4857_v9 = vmov 0   ;;  %v3798_v5 = vld [vmem:[%s8769_s19] sm:$0xff] }
 0x49b   : > { %v3118_v63 = vadd.f32 %v3117_v35, %v3065_v55  ;;  %4594 = vset.pattern.permute.xlu0 %v4857_v9  ;;  %4595 = vset.pattern.permute.xlu1 %v4857_v9 }
 0x49c   : > { %4596 = vset.pattern.permute.xlu2 %v4857_v9 }
 0x49d   : > { %v3171_v2 = vadd.f32 %v3170_v32, %v3118_v63 }
 0x49f   : > { %3257 = vst.msk [vmem:[%s5787_s22 + $0x298] sm:$0xff] %vm3179_vm1, %v3171_v2  ;;  %v3362_v16 = vsel %vm3179_vm1, %v3171_v2, 0.0  ;;  %v3461_v19 = vmul.f32 %v3171_v2, %v3171_v2 }
 0x4a0   : > { %v3363_v33 = vadd.f32 %v3362_v16, %v8652_v1 }
 0x4a1   : > { %v3566_v6 = vsel %vm3179_vm1, %v3461_v19, 0.0 }
 0x4a2   : > { %3559 = vadd.xlane.f32.xlu1 %v3558_v57  ;;  %3364 = vadd.xlane.f32.xlu2 %v3363_v33  ;;  %v3567_v62 = vadd.f32 %v3566_v6, %v8655_v14 }
 0x4aa   : > { %3568 = vadd.xlane.f32.xlu2 %v3567_v62  ;;  %v3643_v62 = vld [vmem:[%s8759_s17 + $0x8] sm:$0xff] }
 0x4bd   : > { %v3266_v30 = vpop.xlane.xlu0 %3265 }
 0x4be   : > { %v8741_v39 = vmul.f32 0.0012755102, %v3266_v30 }
 0x4c0   : > { %v3606_v17 = vmul.f32 %v8741_v39, %v8741_v39 }
 0x4c5   : > { %v3470_v22 = vpop.xlane.xlu0 %3469 }
 0x4c6   : > { %v3594_v29 = vmul.f32 0.0012755102, %v3470_v22 }
 0x4c7   : > { %v3479_v1 = vpop.xlane.xlu1 %3478 }
 0x4c8   : > { %v3618_v46 = vsub.f32 %v3594_v29, %v3606_v17  ;;  %v3595_v0 = vmul.f32 0.0012755102, %v3479_v1  ;;  %v3644_v17 = vld [vmem:[%s8759_s17 + $0x10] sm:$0xff] }
 0x4ca   : > { %v3630_v38 = vmax.f32 %v3618_v46, 0.0 }
 0x4cc   : > { %v3654_v49 = vadd.f32 1e-05, %v3630_v38 }
 0x4cd   : > { %v3275_v10 = vpop.xlane.xlu0 %3274 }
 0x4ce   : > { %4597 = vrsqrt.f32 %v3654_v49  ;;  %v8745_v14 = vmul.f32 0.0012755102, %v3275_v10  ;;  %vm3672_vm3 = vweird.f32 %v3654_v49 }
 0x4cf   : > { %v3488_v61 = vpop.xlane.xlu2 %3487  ;;  %v3284_v51 = vpop.xlane.xlu1 %3283 }
 0x4d0   : > { %v3607_v59 = vmul.f32 %v8745_v14, %v8745_v14  ;;  %v8749_v34 = vmul.f32 0.0012755102, %v3284_v51  ;;  %v3596_v58 = vmul.f32 0.0012755102, %v3488_v61  ;;  %v3799_v61 = vld [vmem:[%s8769_s19 + $0x8] sm:$0xff] }
 0x4d2   : > { %v3619_v60 = vsub.f32 %v3595_v0, %v3607_v59  ;;  %v3608_v3 = vmul.f32 %v8749_v34, %v8749_v34 }
 0x4d4   : > { %v4598_v43 = vpop.eup %4597  ;;  %v3631_v15 = vmax.f32 %v3619_v60, 0.0  ;;  %v3620_v42 = vsub.f32 %v3596_v58, %v3608_v3 }
 0x4d5   : > { %v3667_v24 = vmul.f32 %v4598_v43, %v3654_v49  ;;  %vm3673_vm2 = vweird.f32 %v4598_v43 }
 0x4d6   : > { %v3655_v20 = vadd.f32 1e-05, %v3631_v15  ;;  %v3632_v18 = vmax.f32 %v3620_v42, 0.0  ;;  %vm3674_vm4 = vmor %vm3672_vm3, %vm3673_vm2 }
 0x4d7   : > { %v3668_v36 = vmul.f32 %v4598_v43, %v3667_v24  ;;  %v3293_v4 = vpop.xlane.xlu1 %3292  ;;  %v3497_v52 = vpop.xlane.xlu0 %3496 }
 0x4d8   : > { %4599 = vrsqrt.f32 %v3655_v20  ;;  %v3656_v28 = vadd.f32 1e-05, %v3632_v18  ;;  %v8754_v54 = vmul.f32 0.0012755102, %v3293_v4  ;;  %v3597_v7 = vmul.f32 0.0012755102, %v3497_v52 }
 0x4d9   : > { %v3669_v45 = vmul.f32 0.5, %v3668_v36  ;;  %vm3682_vm6 = vweird.f32 %v3655_v20  ;;  %v3800_v52 = vld [vmem:[%s8769_s19 + $0x10] sm:$0xff] }
 0x4da   : > { %4601 = vrsqrt.f32 %v3656_v28  ;;  %v3609_v8 = vmul.f32 %v8754_v54, %v8754_v54  ;;  %vm3692_vm9 = vweird.f32 %v3656_v28 }
 0x4db   : > { %v3670_v53 = vsub.f32 1.5, %v3669_v45 }
 0x4dc   : > { %v3621_v48 = vsub.f32 %v3597_v7, %v3609_v8 }
 0x4dd   : > { %v3302_v27 = vpop.xlane.xlu2 %3301  ;;  %v3671_v47 = vmul.f32 %v4598_v43, %v3670_v53 }
 0x4de   : > { %v4600_v40 = vpop.eup %4599  ;;  %v3633_v25 = vmax.f32 %v3621_v48, 0.0  ;;  %v8764_v37 = vmul.f32 0.0012755102, %v3302_v27 }
 0x4df   : > { %v3677_v13 = vmul.f32 %v4600_v40, %v3655_v20  ;;  %v3506_v44 = vpop.xlane.xlu1 %3505  ;;  %v3675_v23 = vsel %vm3674_vm4, %v4598_v43, %v3671_v47  ;;  %vm3683_vm5 = vweird.f32 %v4600_v40 }
 0x4e0   : > { %v4602_v12 = vpop.eup %4601  ;;  %v3657_v11 = vadd.f32 1e-05, %v3633_v25  ;;  %v3610_v21 = vmul.f32 %v8764_v37, %v8764_v37  ;;  %v3598_v31 = vmul.f32 0.0012755102, %v3506_v44  ;;  %v3786_v41 = vmul.f32 %v3675_v23, %v3642_v56  ;;  %vm3684_vm8 = vmor %vm3682_vm6, %vm3683_vm5  ;;  %v3801_v44 = vld [vmem:[%s8769_s19 + $0x18] sm:$0xff] }
 0x4e1   : > { %v3678_v50 = vmul.f32 %v4600_v40, %v3677_v13  ;;  %v3687_v35 = vmul.f32 %v4602_v12, %v3656_v28  ;;  %vm3693_vm7 = vweird.f32 %v4602_v12  ;;  %v3645_v28 = vld [vmem:[%s8759_s17 + $0x18] sm:$0xff] }
 0x4e2   : > { %4603 = vrsqrt.f32 %v3657_v11  ;;  %v3622_v55 = vsub.f32 %v3598_v31, %v3610_v21  ;;  %3920 = vperm.xlu0 %4594, %v3786_v41   ;;  %v3810_v26 = vmul.f32 %v3786_v41, %v8741_v39  ;;  %vm3694_vm10 = vmor %vm3692_vm9, %vm3693_vm7  ;;  %vm3702_vm12 = vweird.f32 %v3657_v11 }
 0x4e3   : > { %v3679_v32 = vmul.f32 0.5, %v3678_v50  ;;  %v3688_v57 = vmul.f32 %v4602_v12, %v3687_v35 }
 0x4e4   : > { %v3634_v63 = vmax.f32 %v3622_v55, 0.0  ;;  %v3822_v2 = vsub.f32 %v3798_v5, %v3810_v26 }
 0x4e5   : > { %v3680_v16 = vsub.f32 1.5, %v3679_v32  ;;  %v3689_v19 = vmul.f32 0.5, %v3688_v57  ;;  %v3311_v33 = vpop.xlane.xlu2 %3310  ;;  %v3802_v32 = vld [vmem:[%s8769_s19 + $0x20] sm:$0xff] }
 0x4e6   : > { %v8775_v6 = vadd.f32 1e-05, %v3634_v63  ;;  %4064 = vperm.xlu1 %4595, %v3822_v2   ;;  %v8780_v38 = vmul.f32 0.0012755102, %v3311_v33 }
 0x4e7   : > { %v3681_v30 = vmul.f32 %v4600_v40, %v3680_v16  ;;  %v3690_v9 = vsub.f32 1.5, %v3689_v19 }
 0x4e8   : > { %v4604_v22 = vpop.eup %4603  ;;  %4605 = vrsqrt.f32 %v8775_v6  ;;  %v3611_v43 = vmul.f32 %v8780_v38, %v8780_v38  ;;  %vm3712_vm15 = vweird.f32 %v8775_v6 }
 0x4e9   : > { %v3685_v39 = vsel %vm3684_vm8, %v4600_v40, %v3681_v30  ;;  %v3691_v29 = vmul.f32 %v4602_v12, %v3690_v9  ;;  %v3697_v1 = vmul.f32 %v4604_v22, %v3657_v11  ;;  %vm3703_vm11 = vweird.f32 %v4604_v22  ;;  %v3646_v11 = vld [vmem:[%s8759_s17 + $0x20] sm:$0xff] }
 0x4ea   : > { %v3787_v46 = vmul.f32 %v3685_v39, %v3643_v62  ;;  %vm3704_vm13 = vmor %vm3702_vm12, %vm3703_vm11 }
 0x4eb   : > { %v3695_v49 = vsel %vm3694_vm10, %v4602_v12, %v3691_v29  ;;  %v3698_v10 = vmul.f32 %v4604_v22, %v3697_v1 }
 0x4ec   : > { %v3811_v51 = vmul.f32 %v3787_v46, %v8745_v14  ;;  %v3788_v0 = vmul.f32 %v3695_v49, %v3644_v17  ;;  %v3647_v49 = vld [vmem:[%s8759_s17 + $0x28] sm:$0xff] }
 0x4ed   : > { %v3699_v59 = vmul.f32 0.5, %v3698_v10  ;;  %v3320_v60 = vpop.xlane.xlu0 %3319  ;;  %v3515_v58 = vpop.xlane.xlu2 %3514 }
 0x4ee   : > { %v4606_v3 = vpop.eup %4605  ;;  %v3599_v15 = vmul.f32 0.0012755102, %v3515_v58  ;;  %3925 = vperm.xlu1 %4595, %v3787_v46   ;;  %3930 = vperm.xlu2 %4596, %v3788_v0   ;;  %v3823_v42 = vsub.f32 %v3799_v61, %v3811_v51  ;;  %v3812_v14 = vmul.f32 %v3788_v0, %v8749_v34  ;;  %v8790_v45 = vmul.f32 0.0012755102, %v3320_v60 }
 0x4ef   : > { %v3700_v24 = vsub.f32 1.5, %v3699_v59  ;;  %v3707_v20 = vmul.f32 %v4606_v3, %v8775_v6  ;;  %vm3713_vm14 = vweird.f32 %v4606_v3 }
 0x4f0   : > { %v3623_v18 = vsub.f32 %v3599_v15, %v3611_v43  ;;  %4069 = vperm.xlu0 %4594, %v3823_v42   ;;  %v3824_v27 = vsub.f32 %v3800_v52, %v3812_v14  ;;  %v3612_v25 = vmul.f32 %v8790_v45, %v8790_v45  ;;  %vm3714_vm0 = vmor %vm3712_vm15, %vm3713_vm14  ;;  %v3648_v52 = vld [vmem:[%s8759_s17 + $0x30] sm:$0xff] }
 0x4f1   : > { %v3701_v36 = vmul.f32 %v4604_v22, %v3700_v24  ;;  %v3708_v4 = vmul.f32 %v4606_v3, %v3707_v20 }
 0x4f2   : > { %v3635_v8 = vmax.f32 %v3623_v18, 0.0 }
 0x4f3   : > { %v3709_v7 = vmul.f32 0.5, %v3708_v4  ;;  %v3705_v53 = vsel %vm3704_vm13, %v4604_v22, %v3701_v36 }
 0x4f4   : > { %v3659_v48 = vadd.f32 1e-05, %v3635_v8  ;;  %v3789_v56 = vmul.f32 %v3705_v53, %v3645_v28  ;;  %v3803_v8 = vld [vmem:[%s8769_s19 + $0x28] sm:$0xff] }
 0x4f5   : > { %v3710_v47 = vsub.f32 1.5, %v3709_v7  ;;  %v3329_v34 = vpop.xlane.xlu1 %3328  ;;  %v3524_v40 = vpop.xlane.xlu0 %3523 }
 0x4f6   : > { %4607 = vrsqrt.f32 %v3659_v48  ;;  %v3600_v13 = vmul.f32 0.0012755102, %v3524_v40  ;;  %4074 = vperm.xlu2 %4596, %v3824_v27   ;;  %v3813_v12 = vmul.f32 %v3789_v56, %v8754_v54  ;;  %v8798_v50 = vmul.f32 0.0012755102, %v3329_v34 }
 0x4f7   : > { %v3711_v23 = vmul.f32 %v4606_v3, %v3710_v47  ;;  %vm3722_vm3 = vweird.f32 %v3659_v48 }
 0x4f8   : > { %v3624_v21 = vsub.f32 %v3600_v13, %v3612_v25  ;;  %v3825_v31 = vsub.f32 %v3801_v44, %v3813_v12  ;;  %v3613_v54 = vmul.f32 %v8798_v50, %v8798_v50 }
 0x4f9   : > { %v3715_v41 = vsel %vm3714_vm0, %v4606_v3, %v3711_v23 }
 0x4fa   : > { %v3636_v35 = vmax.f32 %v3624_v21, 0.0  ;;  %v3790_v5 = vmul.f32 %v3715_v41, %v3646_v11  ;;  %4079 = vperm.xlu1 %4595, %v3825_v31   ;;  %v3649_v41 = vld [vmem:[%s8759_s17 + $0x38] sm:$0xff] }
 0x4fc   : > { %v4608_v55 = vpop.eup %4607  ;;  %v3660_v26 = vadd.f32 1e-05, %v3636_v35  ;;  %v3814_v57 = vmul.f32 %v3790_v5, %v8764_v37 }
 0x4fd   : > { %v3717_v63 = vmul.f32 %v4608_v55, %v3659_v48  ;;  %v3533_v2 = vpop.xlane.xlu1 %3532  ;;  %v3338_v16 = vpop.xlane.xlu2 %3337  ;;  %vm3723_vm2 = vweird.f32 %v4608_v55 }
 0x4fe   : > { %4609 = vrsqrt.f32 %v3660_v26  ;;  %v3601_v19 = vmul.f32 0.0012755102, %v3533_v2  ;;  %3935 = vperm.xlu2 %4596, %v3789_v56   ;;  %v3826_v6 = vsub.f32 %v3802_v32, %v3814_v57  ;;  %v8804_v22 = vmul.f32 0.0012755102, %v3338_v16  ;;  %vm3724_vm4 = vmor %vm3722_vm3, %vm3723_vm2 }
 0x4ff   : > { %v3718_v33 = vmul.f32 %v4608_v55, %v3717_v63  ;;  %vm3732_vm6 = vweird.f32 %v3660_v26 }
 0x500   : > { %v3625_v62 = vsub.f32 %v3601_v19, %v3613_v54  ;;  %4084 = vperm.xlu0 %4594, %v3826_v6   ;;  %v3614_v61 = vmul.f32 %v8804_v22, %v8804_v22 }
 0x501   : > { %v3719_v30 = vmul.f32 0.5, %v3718_v33 }
 0x502   : > { %v3637_v9 = vmax.f32 %v3625_v62, 0.0  ;;  %3940 = vperm.xlu1 %4595, %v3790_v5   ;;  %v3804_v5 = vld [vmem:[%s8769_s19 + $0x30] sm:$0xff] }
 0x503   : > { %v3720_v39 = vsub.f32 1.5, %v3719_v30 }
 0x504   : > { %v4610_v37 = vpop.eup %4609  ;;  %v3661_v17 = vadd.f32 1e-05, %v3637_v9 }
 0x505   : > { %v3727_v29 = vmul.f32 %v4610_v37, %v3660_v26  ;;  %v3347_v1 = vpop.xlane.xlu0 %3346  ;;  %v3542_v46 = vpop.xlane.xlu2 %3541  ;;  %v3721_v10 = vmul.f32 %v4608_v55, %v3720_v39  ;;  %vm3733_vm5 = vweird.f32 %v4610_v37 }
 0x506   : > { %4611 = vrsqrt.f32 %v3661_v17  ;;  %v3602_v51 = vmul.f32 0.0012755102, %v3542_v46  ;;  %v8809_v43 = vmul.f32 0.0012755102, %v3347_v1  ;;  %vm3734_vm7 = vmor %vm3732_vm6, %vm3733_vm5  ;;  %vm3742_vm9 = vweird.f32 %v3661_v17 }
 0x507   : > { %v3728_v0 = vmul.f32 %v4610_v37, %v3727_v29  ;;  %v3725_v59 = vsel %vm3724_vm4, %v4608_v55, %v3721_v10 }
 0x508   : > { %v3626_v60 = vsub.f32 %v3602_v51, %v3614_v61  ;;  %v3791_v58 = vmul.f32 %v3725_v59, %v3647_v49  ;;  %v3615_v7 = vmul.f32 %v8809_v43, %v8809_v43 }
 0x509   : > { %v3729_v3 = vmul.f32 0.5, %v3728_v0 }
 0x50a   : > { %v3638_v15 = vmax.f32 %v3626_v60, 0.0  ;;  %3945 = vperm.xlu2 %4596, %v3791_v58   ;;  %v3815_v14 = vmul.f32 %v3791_v58, %v8780_v38 }
 0x50b   : > { %v3730_v42 = vsub.f32 1.5, %v3729_v3 }
 0x50c   : > { %v4612_v24 = vpop.eup %4611  ;;  %v8811_v20 = vadd.f32 1e-05, %v3638_v15  ;;  %v3827_v38 = vsub.f32 %v3803_v8, %v3815_v14  ;;  %v3806_v14 = vld [vmem:[%s8769_s19 + $0x40] sm:$0xff] }
 0x50d   : > { %v3737_v18 = vmul.f32 %v4612_v24, %v3661_v17  ;;  %v3356_v36 = vpop.xlane.xlu1 %3355  ;;  %v3551_v4 = vpop.xlane.xlu0 %3550  ;;  %v3731_v28 = vmul.f32 %v4610_v37, %v3730_v42  ;;  %vm3743_vm8 = vweird.f32 %v4612_v24  ;;  %v3650_v17 = vld [vmem:[%s8759_s17 + $0x40] sm:$0xff] }
 0x50e   : > { %4613 = vrsqrt.f32 %v8811_v20  ;;  %v3603_v53 = vmul.f32 0.0012755102, %v3551_v4  ;;  %v8819_v40 = vmul.f32 0.0012755102, %v3356_v36  ;;  %vm3744_vm10 = vmor %vm3742_vm9, %vm3743_vm8  ;;  %vm3752_vm12 = vweird.f32 %v8811_v20 }
 0x50f   : > { %v3738_v48 = vmul.f32 %v4612_v24, %v3737_v18  ;;  %v3735_v27 = vsel %vm3734_vm7, %v4610_v37, %v3731_v28  ;;  %v3805_v37 = vld [vmem:[%s8769_s19 + $0x38] sm:$0xff] }
 0x510   : > { %v3627_v56 = vsub.f32 %v3603_v53, %v3615_v7  ;;  %v3792_v47 = vmul.f32 %v3735_v27, %v3648_v52  ;;  %v3616_v55 = vmul.f32 %v8819_v40, %v8819_v40 }
 0x511   : > { %v3739_v34 = vmul.f32 0.5, %v3738_v48  ;;  %v3652_v48 = vld [vmem:[%s8759_s17 + $0x50] sm:$0xff] }
 0x512   : > { %v3639_v25 = vmax.f32 %v3627_v56, 0.0  ;;  %3950 = vperm.xlu1 %4595, %v3792_v47   ;;  %4089 = vperm.xlu2 %4596, %v3827_v38   ;;  %v3816_v12 = vmul.f32 %v3792_v47, %v8790_v45  ;;  %v3807_v56 = vld [vmem:[%s8769_s19 + $0x48] sm:$0xff] }
 0x513   : > { %v3740_v13 = vsub.f32 1.5, %v3739_v34 }
 0x514   : > { %v4614_v44 = vpop.eup %4613  ;;  %v3663_v23 = vadd.f32 1e-05, %v3639_v25  ;;  %v3828_v45 = vsub.f32 %v3804_v5, %v3816_v12  ;;  %v3653_v12 = vld [vmem:[%s8759_s17 + $0x58] sm:$0xff] }
 0x515   : > { %v3747_v11 = vmul.f32 %v4614_v44, %v8811_v20  ;;  %v3560_v21 = vpop.xlane.xlu1 %3559  ;;  %v3365_v31 = vpop.xlane.xlu2 %3364  ;;  %v3741_v35 = vmul.f32 %v4612_v24, %v3740_v13  ;;  %vm3753_vm11 = vweird.f32 %v4614_v44 }
 0x516   : > { %4615 = vrsqrt.f32 %v3663_v23  ;;  %v3604_v26 = vmul.f32 0.0012755102, %v3560_v21  ;;  %v8827_v19 = vmul.f32 0.0012755102, %v3365_v31  ;;  %vm3754_vm13 = vmor %vm3752_vm12, %vm3753_vm11  ;;  %vm3762_vm15 = vweird.f32 %v3663_v23 }
 0x517   : > { %v3748_v32 = vmul.f32 %v4614_v44, %v3747_v11  ;;  %v3745_v57 = vsel %vm3744_vm10, %v4612_v24, %v3741_v35  ;;  %v3651_v24 = vld [vmem:[%s8759_s17 + $0x48] sm:$0xff] }
 0x518   : > { %v3628_v63 = vsub.f32 %v3604_v26, %v3616_v55  ;;  %v3793_v2 = vmul.f32 %v3745_v57, %v3649_v41  ;;  %v3617_v1 = vmul.f32 %v8827_v19, %v8827_v19  ;;  %v3848_v26 = vld [vmem:[%s5787_s22 + $0x70] sm:$0xff]  ;;  %v3850_v57 = vld [vmem:[%s5787_s22 + $0x80] sm:$0xff] }
 0x519   : > { %v3749_v16 = vmul.f32 0.5, %v3748_v32  ;;  %v3849_v32 = vld [vmem:[%s5787_s22 + $0x78] sm:$0xff] }
 0x51a   : > { %v3640_v54 = vmax.f32 %v3628_v63, 0.0  ;;  %3955 = vperm.xlu0 %4594, %v3793_v2   ;;  %4094 = vperm.xlu1 %4595, %v3828_v45   ;;  %v3817_v30 = vmul.f32 %v3793_v2, %v8798_v50  ;;  %v3851_v63 = vld [vmem:[%s5787_s22 + $0x88] sm:$0xff]  ;;  %v3852_v2 = vld [vmem:[%s5787_s22 + $0x90] sm:$0xff]  ;;  %v3853_v45 = vld [vmem:[%s5787_s22 + $0x98] sm:$0xff] }
 0x51b   : > { %v3750_v33 = vsub.f32 1.5, %v3749_v16  ;;  %v3854_v16 = vld [vmem:[%s5787_s22 + $0xa0] sm:$0xff] }
 0x51c   : > { %v4616_v6 = vpop.eup %4615  ;;  %v3664_v62 = vadd.f32 1e-05, %v3640_v54  ;;  %v3829_v51 = vsub.f32 %v3805_v37, %v3817_v30 }
 0x51d   : > { %v3757_v9 = vmul.f32 %v4616_v6, %v3663_v23  ;;  %v3569_v39 = vpop.xlane.xlu2 %3568  ;;  %v3751_v29 = vmul.f32 %v4614_v44, %v3750_v33  ;;  %vm3763_vm14 = vweird.f32 %v4616_v6  ;;  %v3808_v23 = vld [vmem:[%s8769_s19 + $0x50] sm:$0xff] }
 0x51e   : > { %4617 = vrsqrt.f32 %v3664_v62  ;;  %v3605_v46 = vmul.f32 0.0012755102, %v3569_v39  ;;  %vm3764_vm0 = vmor %vm3762_vm15, %vm3763_vm14  ;;  %vm3772_vm3 = vweird.f32 %v3664_v62 }
 0x51f   : > { %v3758_v49 = vmul.f32 %v4616_v6, %v3757_v9  ;;  %v3755_v10 = vsel %vm3754_vm13, %v4614_v44, %v3751_v29 }
 0x520   : > { %v3629_v61 = vsub.f32 %v3605_v46, %v3617_v1  ;;  %v3794_v50 = vmul.f32 %v3755_v10, %v3650_v17 }
 0x521   : > { %v3759_v0 = vmul.f32 0.5, %v3758_v49 }
 0x522   : > { %v3641_v59 = vmax.f32 %v3629_v61, 0.0  ;;  %4099 = vperm.xlu0 %4594, %v3829_v51   ;;  %3960 = vperm.xlu2 %4596, %v3794_v50   ;;  %v3818_v15 = vmul.f32 %v3794_v50, %v8804_v22 }
 0x523   : > { %v3760_v60 = vsub.f32 1.5, %v3759_v0 }
 0x524   : > { %v4618_v58 = vpop.eup %4617  ;;  %v3665_v3 = vadd.f32 1e-05, %v3641_v59  ;;  %v3830_v52 = vsub.f32 %v3806_v14, %v3818_v15  ;;  %v3838_v14 = vld [vmem:[%s5787_s22 + $0x20] sm:$0xff] }
 0x525   : > { %v3767_v42 = vmul.f32 %v4618_v58, %v3664_v62  ;;  %v3761_v20 = vmul.f32 %v4616_v6, %v3760_v60  ;;  %vm3773_vm2 = vweird.f32 %v4618_v58 }
 0x526   : > { %4619 = vrsqrt.f32 %v3665_v3  ;;  %vm3774_vm4 = vmor %vm3772_vm3, %vm3773_vm2  ;;  %vm3782_vm6 = vweird.f32 %v3665_v3 }
 0x527   : > { %v3768_v18 = vmul.f32 %v4618_v58, %v3767_v42  ;;  %v3765_v36 = vsel %vm3764_vm0, %v4616_v6, %v3761_v20  ;;  %v3835_v42 = vld [vmem:[%s5787_s22 + $0x8] sm:$0xff]  ;;  %v3837_v20 = vld [vmem:[%s5787_s22 + $0x18] sm:$0xff] }
 0x528   : > { %v3795_v4 = vmul.f32 %v3765_v36, %v3651_v24  ;;  %v3836_v24 = vld [vmem:[%s5787_s22 + $0x10] sm:$0xff] }
 0x529   : > { %v3769_v28 = vmul.f32 0.5, %v3768_v18  ;;  %v3839_v18 = vld [vmem:[%s5787_s22 + $0x28] sm:$0xff]  ;;  %v3840_v36 = vld [vmem:[%s5787_s22 + $0x30] sm:$0xff] }
 0x52a   : > { %3965 = vperm.xlu1 %4595, %v3795_v4   ;;  %4104 = vperm.xlu2 %4596, %v3830_v52   ;;  %v3819_v22 = vmul.f32 %v3795_v4, %v8809_v43 }
 0x52b   : > { %v3770_v8 = vsub.f32 1.5, %v3769_v28 }
 0x52c   : > { %v4620_v7 = vpop.eup %4619  ;;  %v3831_v25 = vsub.f32 %v3807_v56, %v3819_v22 }
 0x52d   : > { %v3777_v53 = vmul.f32 %v4620_v7, %v3665_v3  ;;  %v3771_v27 = vmul.f32 %v4618_v58, %v3770_v8  ;;  %vm3783_vm5 = vweird.f32 %v4620_v7 }
 0x52e   : > { %vm3784_vm7 = vmor %vm3782_vm6, %vm3783_vm5 }
 0x52f   : > { %v3778_v47 = vmul.f32 %v4620_v7, %v3777_v53  ;;  %v3775_v38 = vsel %vm3774_vm4, %v4618_v58, %v3771_v27  ;;  %v3834_v58 = vld [vmem:[%s5787_s22] sm:$0xff] }
 0x530   : > { %v3796_v34 = vmul.f32 %v3775_v38, %v3652_v48 }
 0x531   : > { %v3779_v13 = vmul.f32 0.5, %v3778_v47 }
 0x532   : > { %3970 = vperm.xlu0 %4594, %v3796_v34   ;;  %4109 = vperm.xlu1 %4595, %v3831_v25   ;;  %v3820_v43 = vmul.f32 %v3796_v34, %v8819_v40  ;;  %v3809_v40 = vld [vmem:[%s8769_s19 + $0x58] sm:$0xff] }
 0x533   : > { %v3780_v44 = vsub.f32 1.5, %v3779_v13 }
 0x534   : > { %v3832_v31 = vsub.f32 %v3808_v23, %v3820_v43 }
 0x535   : > { %v3781_v11 = vmul.f32 %v4620_v7, %v3780_v44 }
 0x537   : > { %v3785_v21 = vsel %vm3784_vm7, %v4620_v7, %v3781_v11 }
 0x538   : > { %v3797_v41 = vmul.f32 %v3785_v21, %v3653_v12 }
 0x53a   : > { %4114 = vperm.xlu0 %4594, %v3832_v31   ;;  %3975 = vperm.xlu2 %4596, %v3797_v41   ;;  %v3821_v35 = vmul.f32 %v3797_v41, %v8827_v19 }
 0x53c   : > { %v3833_v5 = vsub.f32 %v3809_v40, %v3821_v35  ;;  %v3841_v35 = vld [vmem:[%s5787_s22 + $0x38] sm:$0xff]  ;;  %v3842_v40 = vld [vmem:[%s5787_s22 + $0x40] sm:$0xff] }
 0x542   : > { %4119 = vperm.xlu2 %4596, %v3833_v5   ;;  %v3843_v5 = vld [vmem:[%s5787_s22 + $0x48] sm:$0xff] }
 0x548   : > { %v3931_v55 = vpop.permute.xlu2 %3930 }
 0x549   : > { %v3992_v54 = vmul.f32 %v3931_v55, %v3848_v26  ;;  %v3993_v33 = vmul.f32 %v3931_v55, %v3849_v32  ;;  %v3994_v6 = vmul.f32 %v3931_v55, %v3850_v57  ;;  %v3995_v62 = vmul.f32 %v3931_v55, %v3851_v63  ;;  %v3845_v32 = vld [vmem:[%s5787_s22 + $0x58] sm:$0xff]  ;;  %v3846_v57 = vld [vmem:[%s5787_s22 + $0x60] sm:$0xff]  ;;  %v3847_v63 = vld [vmem:[%s5787_s22 + $0x68] sm:$0xff] }
 0x54a   : > { %v3996_v30 = vmul.f32 %v3931_v55, %v3852_v2  ;;  %v3997_v9 = vmul.f32 %v3931_v55, %v3853_v45  ;;  %v3998_v39 = vmul.f32 %v3931_v55, %v3854_v16  ;;  %v3844_v55 = vld [vmem:[%s5787_s22 + $0x50] sm:$0xff] }
 0x550   : > { %v4075_v19 = vpop.permute.xlu2 %4074 }
 0x551   : > { %v4136_v37 = vadd.f32 %v4075_v19, %v3992_v54  ;;  %v4137_v17 = vadd.f32 %v4075_v19, %v3993_v33  ;;  %v4138_v29 = vadd.f32 %v4075_v19, %v3994_v6  ;;  %v4139_v1 = vadd.f32 %v4075_v19, %v3995_v62 }
 0x552   : > { %v4140_v46 = vadd.f32 %v4075_v19, %v3996_v30  ;;  %v4141_v49 = vadd.f32 %v4075_v19, %v3997_v9  ;;  %v4142_v10 = vadd.f32 %v4075_v19, %v3998_v39 }
 0x553   : > { %v4220_v61 = vmax.f32 %v4136_v37, 0.0  ;;  %v4221_v51 = vmax.f32 %v4137_v17, 0.0  ;;  %v4222_v50 = vmax.f32 %v4138_v29, 0.0  ;;  %v4223_v0 = vmax.f32 %v4139_v1, 0.0 }
 0x554   : > { %v3921_v59 = vpop.permute.xlu0 %3920  ;;  %v4224_v60 = vmax.f32 %v4140_v46, 0.0  ;;  %v4225_v3 = vmax.f32 %v4141_v49, 0.0  ;;  %v4226_v15 = vmax.f32 %v4142_v10, 0.0 }
 0x555   : > { %4304 = vst [vmem:[%s5787_s22 + $0x70] sm:$0xff] %v4220_v61  ;;  %v3978_v4 = vmul.f32 %v3921_v59, %v3834_v58  ;;  %v3979_v52 = vmul.f32 %v3921_v59, %v3835_v42  ;;  %v3980_v28 = vmul.f32 %v3921_v59, %v3836_v24  ;;  %v3981_v8 = vmul.f32 %v3921_v59, %v3837_v20  ;;  %v3856_v58 = vld [vmem:[%s5787_s22 + $0xb0] sm:$0xff]  ;;  %v3859_v42 = vld [vmem:[%s5787_s22 + $0xc8] sm:$0xff]  ;;  %v3861_v20 = vld [vmem:[%s5787_s22 + $0xd8] sm:$0xff] }
 0x556   : > { %4305 = vst [vmem:[%s5787_s22 + $0x78] sm:$0xff] %v4221_v51  ;;  %v3982_v7 = vmul.f32 %v3921_v59, %v3838_v14  ;;  %v3983_v22 = vmul.f32 %v3921_v59, %v3839_v18  ;;  %v3984_v53 = vmul.f32 %v3921_v59, %v3840_v36  ;;  %v3860_v24 = vld [vmem:[%s5787_s22 + $0xd0] sm:$0xff] }
 0x557   : > { %4306 = vst [vmem:[%s5787_s22 + $0x80] sm:$0xff] %v4222_v50 }
 0x558   : > { %4307 = vst [vmem:[%s5787_s22 + $0x88] sm:$0xff] %v4223_v0  ;;  %v4065_v48 = vpop.permute.xlu1 %4064  ;;  %v3936_v11 = vpop.permute.xlu2 %3935 }
 0x559   : > { %4308 = vst [vmem:[%s5787_s22 + $0x90] sm:$0xff] %v4224_v60  ;;  %v4122_v27 = vadd.f32 %v4065_v48, %v3978_v4  ;;  %v4123_v56 = vadd.f32 %v4065_v48, %v3979_v52  ;;  %v4124_v47 = vadd.f32 %v4065_v48, %v3980_v28  ;;  %v4125_v38 = vadd.f32 %v4065_v48, %v3981_v8  ;;  %v3855_v60 = vld [vmem:[%s5787_s22 + $0xa8] sm:$0xff] }
 0x55a   : > { %4309 = vst [vmem:[%s5787_s22 + $0x98] sm:$0xff] %v4225_v3  ;;  %v4126_v34 = vadd.f32 %v4065_v48, %v3982_v7  ;;  %v4127_v25 = vadd.f32 %v4065_v48, %v3983_v22  ;;  %v4128_v13 = vadd.f32 %v4065_v48, %v3984_v53  ;;  %v3857_v3 = vld [vmem:[%s5787_s22 + $0xb8] sm:$0xff]  ;;  %v3999_v14 = vmul.f32 %v3936_v11, %v3855_v60  ;;  %v3870_v22 = vld [vmem:[%s5787_s22 + $0x120] sm:$0xff] }
 0x55b   : > { %4310 = vst.msk [vmem:[%s5787_s22 + $0xa0] sm:$0xff] %vm3179_vm1, %v4226_v15  ;;  %v4206_v44 = vmax.f32 %v4122_v27, 0.0  ;;  %v4207_v43 = vmax.f32 %v4123_v56, 0.0  ;;  %v4208_v23 = vmax.f32 %v4124_v47, 0.0  ;;  %v4209_v12 = vmax.f32 %v4125_v38, 0.0  ;;  %v3858_v15 = vld [vmem:[%s5787_s22 + $0xc0] sm:$0xff] }
 0x55c   : > { %v4210_v21 = vmax.f32 %v4126_v34, 0.0  ;;  %v4211_v31 = vmax.f32 %v4127_v25, 0.0  ;;  %v4212_v41 = vmax.f32 %v4128_v13, 0.0  ;;  %v4000_v18 = vmul.f32 %v3936_v11, %v3856_v58  ;;  %v3869_v53 = vld [vmem:[%s5787_s22 + $0x118] sm:$0xff] }
 0x55d   : > { %4290 = vst [vmem:[%s5787_s22] sm:$0xff] %v4206_v44  ;;  %v4001_v36 = vmul.f32 %v3936_v11, %v3857_v3  ;;  %v4002_v4 = vmul.f32 %v3936_v11, %v3858_v15  ;;  %v4003_v52 = vmul.f32 %v3936_v11, %v3859_v42  ;;  %v4004_v28 = vmul.f32 %v3936_v11, %v3860_v24  ;;  %v3867_v3 = vld [vmem:[%s5787_s22 + $0x108] sm:$0xff] }
 0x55e   : > { %4291 = vst [vmem:[%s5787_s22 + $0x8] sm:$0xff] %v4207_v43  ;;  %v4005_v8 = vmul.f32 %v3936_v11, %v3861_v20  ;;  %v3871_v43 = vld [vmem:[%s5787_s22 + $0x128] sm:$0xff]  ;;  %v3868_v20 = vld [vmem:[%s5787_s22 + $0x110] sm:$0xff] }
 0x55f   : > { %4292 = vst [vmem:[%s5787_s22 + $0x10] sm:$0xff] %v4208_v23 }
 0x560   : > { %4293 = vst [vmem:[%s5787_s22 + $0x18] sm:$0xff] %v4209_v12  ;;  %v3926_v26 = vpop.permute.xlu1 %3925 }
 0x561   : > { %4294 = vst [vmem:[%s5787_s22 + $0x20] sm:$0xff] %v4210_v21  ;;  %v3985_v2 = vmul.f32 %v3926_v26, %v3841_v35  ;;  %v3986_v45 = vmul.f32 %v3926_v26, %v3842_v40  ;;  %v3987_v16 = vmul.f32 %v3926_v26, %v3843_v5  ;;  %v3988_v54 = vmul.f32 %v3926_v26, %v3844_v55  ;;  %v3873_v5 = vld [vmem:[%s5787_s22 + $0x138] sm:$0xff]  ;;  %v3874_v55 = vld [vmem:[%s5787_s22 + $0x140] sm:$0xff] }
 0x562   : > { %4295 = vst [vmem:[%s5787_s22 + $0x28] sm:$0xff] %v4211_v31  ;;  %v3989_v33 = vmul.f32 %v3926_v26, %v3845_v32  ;;  %v3990_v6 = vmul.f32 %v3926_v26, %v3846_v57  ;;  %v3991_v62 = vmul.f32 %v3926_v26, %v3847_v63  ;;  %v4070_v30 = vpop.permute.xlu0 %4069  ;;  %v3872_v31 = vld [vmem:[%s5787_s22 + $0x130] sm:$0xff] }
 0x563   : > { %4296 = vst.msk [vmem:[%s5787_s22 + $0x30] sm:$0xff] %vm3179_vm1, %v4212_v41  ;;  %v4129_v9 = vadd.f32 %v4070_v30, %v3985_v2  ;;  %v4130_v39 = vadd.f32 %v4070_v30, %v3986_v45  ;;  %v4131_v19 = vadd.f32 %v4070_v30, %v3987_v16  ;;  %v4132_v37 = vadd.f32 %v4070_v30, %v3988_v54  ;;  %v3875_v54 = vld [vmem:[%s5787_s22 + $0x148] sm:$0xff] }
 0x564   : > { %v4133_v17 = vadd.f32 %v4070_v30, %v3989_v33  ;;  %v4134_v29 = vadd.f32 %v4070_v30, %v3990_v6  ;;  %v8883_v1 = vpop.permute.xlu2 %3945  ;;  %v4135_v46 = vadd.f32 %v4070_v30, %v3991_v62 }
 0x565   : > { %v4213_v49 = vmax.f32 %v4129_v9, 0.0  ;;  %v4214_v10 = vmax.f32 %v4130_v39, 0.0  ;;  %v4215_v61 = vmax.f32 %v4131_v19, 0.0  ;;  %v4216_v51 = vmax.f32 %v4132_v37, 0.0  ;;  %v3862_v19 = vld [vmem:[%s5787_s22 + $0xe0] sm:$0xff]  ;;  %v3863_v37 = vld [vmem:[%s5787_s22 + $0xe8] sm:$0xff] }
 0x566   : > { %v4217_v50 = vmax.f32 %v4133_v17, 0.0  ;;  %v4218_v0 = vmax.f32 %v4134_v29, 0.0  ;;  %v4219_v59 = vmax.f32 %v4135_v46, 0.0  ;;  %v4013_v34 = vmul.f32 %v8883_v1, %v3869_v53  ;;  %v3864_v17 = vld [vmem:[%s5787_s22 + $0xf0] sm:$0xff] }
 0x567   : > { %4297 = vst [vmem:[%s5787_s22 + $0x38] sm:$0xff] %v4213_v49  ;;  %v4014_v25 = vmul.f32 %v8883_v1, %v3870_v22  ;;  %v4015_v41 = vmul.f32 %v8883_v1, %v3871_v43  ;;  %v4016_v26 = vmul.f32 %v8883_v1, %v3872_v31  ;;  %v4017_v63 = vmul.f32 %v8883_v1, %v3873_v5  ;;  %v3865_v49 = vld [vmem:[%s5787_s22 + $0xf8] sm:$0xff]  ;;  %v3891_v43 = vld [vmem:[%s5787_s22 + $0x1c8] sm:$0xff] }
 0x568   : > { %4298 = vst [vmem:[%s5787_s22 + $0x40] sm:$0xff] %v4214_v10  ;;  %v4018_v2 = vmul.f32 %v8883_v1, %v3874_v55  ;;  %v4019_v62 = vmul.f32 %v8883_v1, %v3875_v54 }
 0x569   : > { %4299 = vst [vmem:[%s5787_s22 + $0x48] sm:$0xff] %v4215_v61 }
 0x56a   : > { %4300 = vst [vmem:[%s5787_s22 + $0x50] sm:$0xff] %v4216_v51 }
 0x56b   : > { %4301 = vst [vmem:[%s5787_s22 + $0x58] sm:$0xff] %v4217_v50 }
 0x56c   : > { %4302 = vst [vmem:[%s5787_s22 + $0x60] sm:$0xff] %v4218_v0  ;;  %v4080_v7 = vpop.permute.xlu1 %4079  ;;  %v4090_v38 = vpop.permute.xlu2 %4089 }
 0x56d   : > { %4303 = vst.msk [vmem:[%s5787_s22 + $0x68] sm:$0xff] %vm3179_vm1, %v4219_v59  ;;  %v4143_v48 = vadd.f32 %v4080_v7, %v3999_v14  ;;  %v4144_v27 = vadd.f32 %v4080_v7, %v4000_v18  ;;  %v4145_v56 = vadd.f32 %v4080_v7, %v4001_v36  ;;  %v4146_v47 = vadd.f32 %v4080_v7, %v4002_v4  ;;  %v3866_v59 = vld [vmem:[%s5787_s22 + $0x100] sm:$0xff] }
 0x56e   : > { %v4147_v13 = vadd.f32 %v4080_v7, %v4003_v52  ;;  %v4148_v44 = vadd.f32 %v4080_v7, %v4004_v28  ;;  %v4149_v23 = vadd.f32 %v4080_v7, %v4005_v8  ;;  %v4157_v40 = vadd.f32 %v4090_v38, %v4013_v34 }
 0x56f   : > { %v4227_v12 = vmax.f32 %v4143_v48, 0.0  ;;  %v4228_v11 = vmax.f32 %v4144_v27, 0.0  ;;  %v4229_v21 = vmax.f32 %v4145_v56, 0.0  ;;  %v4230_v35 = vmax.f32 %v4146_v47, 0.0 }
 0x570   : > { %v4231_v32 = vmax.f32 %v4147_v13, 0.0  ;;  %v4158_v57 = vadd.f32 %v4090_v38, %v4014_v25  ;;  %v4232_v45 = vmax.f32 %v4148_v44, 0.0  ;;  %v4159_v16 = vadd.f32 %v4090_v38, %v4015_v41  ;;  %v3890_v44 = vld [vmem:[%s5787_s22 + $0x1c0] sm:$0xff] }
 0x571   : > { %4311 = vst [vmem:[%s5787_s22 + $0xa8] sm:$0xff] %v4227_v12  ;;  %v4233_v33 = vmax.f32 %v4149_v23, 0.0  ;;  %v4160_v6 = vadd.f32 %v4090_v38, %v4016_v26  ;;  %v4161_v30 = vadd.f32 %v4090_v38, %v4017_v63  ;;  %v4162_v9 = vadd.f32 %v4090_v38, %v4018_v2  ;;  %v3892_v23 = vld [vmem:[%s5787_s22 + $0x1d0] sm:$0xff]  ;;  %v3893_v12 = vld [vmem:[%s5787_s22 + $0x1d8] sm:$0xff] }
 0x572   : > { %4312 = vst [vmem:[%s5787_s22 + $0xb0] sm:$0xff] %v4228_v11  ;;  %v4241_v39 = vmax.f32 %v4157_v40, 0.0  ;;  %v4242_v46 = vmax.f32 %v4158_v57, 0.0  ;;  %v4163_v1 = vadd.f32 %v4090_v38, %v4019_v62  ;;  %v4243_v50 = vmax.f32 %v4159_v16, 0.0  ;;  %v4085_v0 = vpop.permute.xlu0 %4084  ;;  %v3894_v11 = vld [vmem:[%s5787_s22 + $0x1e0] sm:$0xff]  ;;  %v3896_v40 = vld [vmem:[%s5787_s22 + $0x1f0] sm:$0xff] }
 0x573   : > { %4313 = vst [vmem:[%s5787_s22 + $0xb8] sm:$0xff] %v4229_v21  ;;  %v4244_v58 = vmax.f32 %v4160_v6, 0.0  ;;  %v4245_v24 = vmax.f32 %v4161_v30, 0.0  ;;  %v4246_v36 = vmax.f32 %v4162_v9, 0.0  ;;  %v3876_v9 = vld [vmem:[%s5787_s22 + $0x150] sm:$0xff] }
 0x574   : > { %4314 = vst [vmem:[%s5787_s22 + $0xc0] sm:$0xff] %v4230_v35  ;;  %v3941_v29 = vpop.permute.xlu1 %3940  ;;  %v4247_v28 = vmax.f32 %v4163_v1, 0.0  ;;  %v3895_v35 = vld [vmem:[%s5787_s22 + $0x1e8] sm:$0xff]  ;;  %v3882_v1 = vld [vmem:[%s5787_s22 + $0x180] sm:$0xff] }
 0x575   : > { %4315 = vst [vmem:[%s5787_s22 + $0xc8] sm:$0xff] %v4231_v32  ;;  %v4006_v10 = vmul.f32 %v3941_v29, %v3862_v19  ;;  %v4007_v61 = vmul.f32 %v3941_v29, %v3863_v37  ;;  %v4008_v51 = vmul.f32 %v3941_v29, %v3864_v17  ;;  %v4009_v60 = vmul.f32 %v3941_v29, %v3865_v49  ;;  %v3877_v17 = vld [vmem:[%s5787_s22 + $0x158] sm:$0xff] }
 0x576   : > { %4316 = vst [vmem:[%s5787_s22 + $0xd0] sm:$0xff] %v4232_v45  ;;  %v4010_v15 = vmul.f32 %v3941_v29, %v3866_v59  ;;  %v4011_v14 = vmul.f32 %v3941_v29, %v3867_v3  ;;  %v4012_v4 = vmul.f32 %v3941_v29, %v3868_v20  ;;  %v3878_v29 = vld [vmem:[%s5787_s22 + $0x160] sm:$0xff] }
 0x577   : > { %4317 = vst.msk [vmem:[%s5787_s22 + $0xd8] sm:$0xff] %vm3179_vm1, %v4233_v33  ;;  %v4150_v42 = vadd.f32 %v4085_v0, %v4006_v10  ;;  %v4151_v18 = vadd.f32 %v4085_v0, %v4007_v61  ;;  %v4152_v52 = vadd.f32 %v4085_v0, %v4008_v51  ;;  %v4153_v8 = vadd.f32 %v4085_v0, %v4009_v60  ;;  %v3880_v61 = vld [vmem:[%s5787_s22 + $0x170] sm:$0xff]  ;;  %v3881_v51 = vld [vmem:[%s5787_s22 + $0x178] sm:$0xff] }
 0x578   : > { %4325 = vst [vmem:[%s5787_s22 + $0x118] sm:$0xff] %v4241_v39  ;;  %v4154_v7 = vadd.f32 %v4085_v0, %v4010_v15  ;;  %v4155_v48 = vadd.f32 %v4085_v0, %v4011_v14  ;;  %v4156_v56 = vadd.f32 %v4085_v0, %v4012_v4 }
 0x579   : > { %4326 = vst [vmem:[%s5787_s22 + $0x120] sm:$0xff] %v4242_v46  ;;  %v4234_v22 = vmax.f32 %v4150_v42, 0.0  ;;  %v4235_v27 = vmax.f32 %v4151_v18, 0.0  ;;  %v4236_v47 = vmax.f32 %v4152_v52, 0.0  ;;  %v4237_v38 = vmax.f32 %v4153_v8, 0.0  ;;  %v3879_v46 = vld [vmem:[%s5787_s22 + $0x168] sm:$0xff] }
 0x57a   : > { %4327 = vst [vmem:[%s5787_s22 + $0x128] sm:$0xff] %v4243_v50  ;;  %v4238_v34 = vmax.f32 %v4154_v7, 0.0  ;;  %v4239_v25 = vmax.f32 %v4155_v48, 0.0  ;;  %v4240_v13 = vmax.f32 %v4156_v56, 0.0  ;;  %v3883_v56 = vld [vmem:[%s5787_s22 + $0x188] sm:$0xff] }
 0x57b   : > { %4328 = vst [vmem:[%s5787_s22 + $0x130] sm:$0xff] %v4244_v58 }
 0x57c   : > { %v3961_v53 = vpop.permute.xlu2 %3960  ;;  %4329 = vst [vmem:[%s5787_s22 + $0x138] sm:$0xff] %v4245_v24 }
 0x57d   : > { %4330 = vst [vmem:[%s5787_s22 + $0x140] sm:$0xff] %v4246_v36  ;;  %v4034_v21 = vmul.f32 %v3961_v53, %v3890_v44  ;;  %v4035_v5 = vmul.f32 %v3961_v53, %v3891_v43  ;;  %v4036_v55 = vmul.f32 %v3961_v53, %v3892_v23  ;;  %v4037_v26 = vmul.f32 %v3961_v53, %v3893_v12  ;;  %v3887_v43 = vld [vmem:[%s5787_s22 + $0x1a8] sm:$0xff]  ;;  %v3888_v23 = vld [vmem:[%s5787_s22 + $0x1b0] sm:$0xff]  ;;  %v3889_v12 = vld [vmem:[%s5787_s22 + $0x1b8] sm:$0xff] }
 0x57e   : > { %4331 = vst.msk [vmem:[%s5787_s22 + $0x148] sm:$0xff] %vm3179_vm1, %v4247_v28  ;;  %v4038_v32 = vmul.f32 %v3961_v53, %v3894_v11  ;;  %v4039_v57 = vmul.f32 %v3961_v53, %v3895_v35  ;;  %v4040_v63 = vmul.f32 %v3961_v53, %v3896_v40 }
 0x57f   : > { %4318 = vst [vmem:[%s5787_s22 + $0xe0] sm:$0xff] %v4234_v22 }
 0x580   : > { %4319 = vst [vmem:[%s5787_s22 + $0xe8] sm:$0xff] %v4235_v27 }
 0x581   : > { %4320 = vst [vmem:[%s5787_s22 + $0xf0] sm:$0xff] %v4236_v47 }
 0x582   : > { %4321 = vst [vmem:[%s5787_s22 + $0xf8] sm:$0xff] %v4237_v38  ;;  %v3884_v38 = vld [vmem:[%s5787_s22 + $0x190] sm:$0xff] }
 0x583   : > { %4322 = vst [vmem:[%s5787_s22 + $0x100] sm:$0xff] %v4238_v34  ;;  %v3885_v34 = vld [vmem:[%s5787_s22 + $0x198] sm:$0xff] }
 0x584   : > { %v3951_v31 = vpop.permute.xlu1 %3950  ;;  %v4105_v41 = vpop.permute.xlu2 %4104  ;;  %4323 = vst [vmem:[%s5787_s22 + $0x108] sm:$0xff] %v4239_v25  ;;  %v3886_v25 = vld [vmem:[%s5787_s22 + $0x1a0] sm:$0xff] }
 0x585   : > { %4324 = vst.msk [vmem:[%s5787_s22 + $0x110] sm:$0xff] %vm3179_vm1, %v4240_v13  ;;  %v4178_v2 = vadd.f32 %v4105_v41, %v4034_v21  ;;  %v4179_v45 = vadd.f32 %v4105_v41, %v4035_v5  ;;  %v4180_v16 = vadd.f32 %v4105_v41, %v4036_v55  ;;  %v4181_v54 = vadd.f32 %v4105_v41, %v4037_v26 }
 0x586   : > { %v4182_v33 = vadd.f32 %v4105_v41, %v4038_v32  ;;  %v4183_v6 = vadd.f32 %v4105_v41, %v4039_v57  ;;  %v4184_v62 = vadd.f32 %v4105_v41, %v4040_v63  ;;  %v4020_v49 = vmul.f32 %v3951_v31, %v3876_v9  ;;  %v3911_v9 = vld [vmem:[%s5787_s22 + $0x268] sm:$0xff] }
 0x587   : > { %v4262_v30 = vmax.f32 %v4178_v2, 0.0  ;;  %v4263_v39 = vmax.f32 %v4179_v45, 0.0  ;;  %v4264_v19 = vmax.f32 %v4180_v16, 0.0  ;;  %v4265_v37 = vmax.f32 %v4181_v54, 0.0 }
 0x588   : > { %v4266_v10 = vmax.f32 %v4182_v33, 0.0  ;;  %v4021_v50 = vmul.f32 %v3951_v31, %v3877_v17  ;;  %v4022_v0 = vmul.f32 %v3951_v31, %v3878_v29  ;;  %v4023_v59 = vmul.f32 %v3951_v31, %v3879_v46  ;;  %v3914_v17 = vld [vmem:[%s5787_s22 + $0x280] sm:$0xff] }
 0x589   : > { %4346 = vst [vmem:[%s5787_s22 + $0x1c0] sm:$0xff] %v4262_v30  ;;  %v4267_v60 = vmax.f32 %v4183_v6, 0.0  ;;  %v4024_v58 = vmul.f32 %v3951_v31, %v3880_v61  ;;  %v4025_v3 = vmul.f32 %v3951_v31, %v3881_v51  ;;  %v4026_v15 = vmul.f32 %v3951_v31, %v3882_v1  ;;  %v3917_v61 = vld [vmem:[%s5787_s22 + $0x298] sm:$0xff] }
 0x58a   : > { %4347 = vst [vmem:[%s5787_s22 + $0x1c8] sm:$0xff] %v4263_v39  ;;  %v4268_v42 = vmax.f32 %v4184_v62, 0.0 }
 0x58b   : > { %4348 = vst [vmem:[%s5787_s22 + $0x1d0] sm:$0xff] %v4264_v19  ;;  %v3912_v19 = vld [vmem:[%s5787_s22 + $0x270] sm:$0xff] }
 0x58c   : > { %v4095_v24 = vpop.permute.xlu1 %4094  ;;  %v3956_v20 = vpop.permute.xlu0 %3955  ;;  %4349 = vst [vmem:[%s5787_s22 + $0x1d8] sm:$0xff] %v4265_v37  ;;  %v3913_v37 = vld [vmem:[%s5787_s22 + $0x278] sm:$0xff] }
 0x58d   : > { %v4164_v14 = vadd.f32 %v4095_v24, %v4020_v49  ;;  %v4165_v18 = vadd.f32 %v4095_v24, %v4021_v50  ;;  %v4166_v36 = vadd.f32 %v4095_v24, %v4022_v0  ;;  %v4167_v4 = vadd.f32 %v4095_v24, %v4023_v59  ;;  %4350 = vst [vmem:[%s5787_s22 + $0x1e0] sm:$0xff] %v4266_v10  ;;  %v3915_v49 = vld [vmem:[%s5787_s22 + $0x288] sm:$0xff]  ;;  %v3916_v10 = vld [vmem:[%s5787_s22 + $0x290] sm:$0xff] }
 0x58e   : > { %v4168_v52 = vadd.f32 %v4095_v24, %v4024_v58  ;;  %v4169_v28 = vadd.f32 %v4095_v24, %v4025_v3  ;;  %4351 = vst [vmem:[%s5787_s22 + $0x1e8] sm:$0xff] %v4267_v60  ;;  %v4170_v8 = vadd.f32 %v4095_v24, %v4026_v15  ;;  %v4027_v13 = vmul.f32 %v3956_v20, %v3883_v56  ;;  %v3900_v56 = vld [vmem:[%s5787_s22 + $0x210] sm:$0xff] }
 0x58f   : > { %v4248_v7 = vmax.f32 %v4164_v14, 0.0  ;;  %v4249_v22 = vmax.f32 %v4165_v18, 0.0  ;;  %v4250_v53 = vmax.f32 %v4166_v36, 0.0  ;;  %4352 = vst.msk [vmem:[%s5787_s22 + $0x1f0] sm:$0xff] %vm3179_vm1, %v4268_v42  ;;  %v4251_v48 = vmax.f32 %v4167_v4, 0.0 }
 0x590   : > { %v4252_v27 = vmax.f32 %v4168_v52, 0.0  ;;  %v4253_v47 = vmax.f32 %v4169_v28, 0.0  ;;  %v4254_v44 = vmax.f32 %v4170_v8, 0.0  ;;  %v4028_v11 = vmul.f32 %v3956_v20, %v3884_v38 }
 0x591   : > { %4332 = vst [vmem:[%s5787_s22 + $0x150] sm:$0xff] %v4248_v7  ;;  %v4029_v21 = vmul.f32 %v3956_v20, %v3885_v34  ;;  %v4030_v31 = vmul.f32 %v3956_v20, %v3886_v25  ;;  %v4031_v41 = vmul.f32 %v3956_v20, %v3887_v43  ;;  %v4032_v35 = vmul.f32 %v3956_v20, %v3888_v23  ;;  %v3901_v34 = vld [vmem:[%s5787_s22 + $0x218] sm:$0xff]  ;;  %v3902_v25 = vld [vmem:[%s5787_s22 + $0x220] sm:$0xff] }
 0x592   : > { %4333 = vst [vmem:[%s5787_s22 + $0x158] sm:$0xff] %v4249_v22  ;;  %v4033_v40 = vmul.f32 %v3956_v20, %v3889_v12  ;;  %v3897_v22 = vld [vmem:[%s5787_s22 + $0x1f8] sm:$0xff] }
 0x593   : > { %4334 = vst [vmem:[%s5787_s22 + $0x160] sm:$0xff] %v4250_v53 }
 0x594   : > { %4335 = vst [vmem:[%s5787_s22 + $0x168] sm:$0xff] %v4251_v48  ;;  %v4100_v5 = vpop.permute.xlu0 %4099  ;;  %v3976_v55 = vpop.permute.xlu2 %3975  ;;  %v3898_v48 = vld [vmem:[%s5787_s22 + $0x200] sm:$0xff] }
 0x595   : > { %4336 = vst [vmem:[%s5787_s22 + $0x170] sm:$0xff] %v4252_v27  ;;  %v4171_v26 = vadd.f32 %v4100_v5, %v4027_v13  ;;  %v4172_v32 = vadd.f32 %v4100_v5, %v4028_v11  ;;  %v4173_v57 = vadd.f32 %v4100_v5, %v4029_v21  ;;  %v4174_v63 = vadd.f32 %v4100_v5, %v4030_v31  ;;  %v3899_v27 = vld [vmem:[%s5787_s22 + $0x208] sm:$0xff] }
 0x596   : > { %4337 = vst [vmem:[%s5787_s22 + $0x178] sm:$0xff] %v4253_v47  ;;  %v4175_v2 = vadd.f32 %v4100_v5, %v4031_v41  ;;  %v4176_v45 = vadd.f32 %v4100_v5, %v4032_v35  ;;  %v4177_v16 = vadd.f32 %v4100_v5, %v4033_v40  ;;  %v4055_v29 = vmul.f32 %v3976_v55, %v3911_v9  ;;  %v3903_v13 = vld [vmem:[%s5787_s22 + $0x228] sm:$0xff] }
 0x597   : > { %4338 = vst.msk [vmem:[%s5787_s22 + $0x180] sm:$0xff] %vm3179_vm1, %v4254_v44  ;;  %v4255_v54 = vmax.f32 %v4171_v26, 0.0  ;;  %v4256_v33 = vmax.f32 %v4172_v32, 0.0  ;;  %v4257_v6 = vmax.f32 %v4173_v57, 0.0  ;;  %v4258_v62 = vmax.f32 %v4174_v63, 0.0  ;;  %v3907_v9 = vld [vmem:[%s5787_s22 + $0x248] sm:$0xff] }
 0x598   : > { %v4259_v30 = vmax.f32 %v4175_v2, 0.0  ;;  %v4260_v39 = vmax.f32 %v4176_v45, 0.0  ;;  %v4261_v46 = vmax.f32 %v4177_v16, 0.0  ;;  %v4056_v51 = vmul.f32 %v3976_v55, %v3912_v19 }
 0x599   : > { %4339 = vst [vmem:[%s5787_s22 + $0x188] sm:$0xff] %v4255_v54  ;;  %v4057_v1 = vmul.f32 %v3976_v55, %v3913_v37  ;;  %v4058_v50 = vmul.f32 %v3976_v55, %v3914_v17  ;;  %v4059_v59 = vmul.f32 %v3976_v55, %v3915_v49  ;;  %v4060_v60 = vmul.f32 %v3976_v55, %v3916_v10  ;;  %v3908_v37 = vld [vmem:[%s5787_s22 + $0x250] sm:$0xff]  ;;  %v3909_v17 = vld [vmem:[%s5787_s22 + $0x258] sm:$0xff] }
 0x59a   : > { %4340 = vst [vmem:[%s5787_s22 + $0x190] sm:$0xff] %v4256_v33  ;;  %v4061_v58 = vmul.f32 %v3976_v55, %v3917_v61  ;;  %v3904_v33 = vld [vmem:[%s5787_s22 + $0x230] sm:$0xff] }
 0x59b   : > { %4341 = vst [vmem:[%s5787_s22 + $0x198] sm:$0xff] %v4257_v6 }
 0x59c   : > { %4342 = vst [vmem:[%s5787_s22 + $0x1a0] sm:$0xff] %v4258_v62  ;;  %v3966_v0 = vpop.permute.xlu1 %3965  ;;  %v4120_v3 = vpop.permute.xlu2 %4119  ;;  %v3905_v62 = vld [vmem:[%s5787_s22 + $0x238] sm:$0xff] }
 0x59d   : > { %4343 = vst [vmem:[%s5787_s22 + $0x1a8] sm:$0xff] %v4259_v30  ;;  %v4199_v15 = vadd.f32 %v4120_v3, %v4055_v29  ;;  %v4200_v42 = vadd.f32 %v4120_v3, %v4056_v51  ;;  %v4201_v24 = vadd.f32 %v4120_v3, %v4057_v1  ;;  %v4202_v20 = vadd.f32 %v4120_v3, %v4058_v50  ;;  %v3906_v30 = vld [vmem:[%s5787_s22 + $0x240] sm:$0xff] }
 0x59e   : > { %4344 = vst [vmem:[%s5787_s22 + $0x1b0] sm:$0xff] %v4260_v39  ;;  %v4203_v14 = vadd.f32 %v4120_v3, %v4059_v59  ;;  %v4204_v18 = vadd.f32 %v4120_v3, %v4060_v60  ;;  %v4205_v36 = vadd.f32 %v4120_v3, %v4061_v58  ;;  %v4041_v47 = vmul.f32 %v3966_v0, %v3897_v22  ;;  %v3910_v29 = vld [vmem:[%s5787_s22 + $0x260] sm:$0xff] }
 0x59f   : > { %4345 = vst.msk [vmem:[%s5787_s22 + $0x1b8] sm:$0xff] %vm3179_vm1, %v4261_v46  ;;  %v4283_v4 = vmax.f32 %v4199_v15, 0.0  ;;  %v4284_v52 = vmax.f32 %v4200_v42, 0.0  ;;  %v4285_v28 = vmax.f32 %v4201_v24, 0.0  ;;  %v4286_v8 = vmax.f32 %v4202_v20, 0.0 }
 0x5a0   : > { %v4287_v7 = vmax.f32 %v4203_v14, 0.0  ;;  %v4288_v53 = vmax.f32 %v4204_v18, 0.0  ;;  %v4289_v38 = vmax.f32 %v4205_v36, 0.0  ;;  %v4042_v44 = vmul.f32 %v3966_v0, %v3898_v48 }
 0x5a1   : > { %4367 = vst [vmem:[%s5787_s22 + $0x268] sm:$0xff] %v4283_v4  ;;  %v4043_v43 = vmul.f32 %v3966_v0, %v3899_v27  ;;  %v4044_v23 = vmul.f32 %v3966_v0, %v3900_v56  ;;  %v4045_v12 = vmul.f32 %v3966_v0, %v3901_v34  ;;  %v4046_v11 = vmul.f32 %v3966_v0, %v3902_v25 }
 0x5a2   : > { %4368 = vst [vmem:[%s5787_s22 + $0x270] sm:$0xff] %v4284_v52  ;;  %v4047_v21 = vmul.f32 %v3966_v0, %v3903_v13 }
 0x5a3   : > { %4369 = vst [vmem:[%s5787_s22 + $0x278] sm:$0xff] %v4285_v28 }
 0x5a4   : > { %4370 = vst [vmem:[%s5787_s22 + $0x280] sm:$0xff] %v4286_v8  ;;  %v4110_v31 = vpop.permute.xlu1 %4109  ;;  %v3971_v41 = vpop.permute.xlu0 %3970 }
 0x5a5   : > { %4371 = vst [vmem:[%s5787_s22 + $0x288] sm:$0xff] %v4287_v7  ;;  %v4185_v35 = vadd.f32 %v4110_v31, %v4041_v47  ;;  %v4186_v40 = vadd.f32 %v4110_v31, %v4042_v44  ;;  %v4187_v5 = vadd.f32 %v4110_v31, %v4043_v43  ;;  %v4188_v55 = vadd.f32 %v4110_v31, %v4044_v23 }
 0x5a6   : > { %4372 = vst [vmem:[%s5787_s22 + $0x290] sm:$0xff] %v4288_v53  ;;  %v4189_v26 = vadd.f32 %v4110_v31, %v4045_v12  ;;  %v4190_v32 = vadd.f32 %v4110_v31, %v4046_v11  ;;  %v4191_v57 = vadd.f32 %v4110_v31, %v4047_v21  ;;  %v4048_v39 = vmul.f32 %v3971_v41, %v3904_v33 }
 0x5a7   : > { %4373 = vst.msk [vmem:[%s5787_s22 + $0x298] sm:$0xff] %vm3179_vm1, %v4289_v38  ;;  %v4269_v63 = vmax.f32 %v4185_v35, 0.0  ;;  %v4270_v2 = vmax.f32 %v4186_v40, 0.0  ;;  %v4271_v45 = vmax.f32 %v4187_v5, 0.0  ;;  %v4272_v16 = vmax.f32 %v4188_v55, 0.0 }
 0x5a8   : > { %v4273_v54 = vmax.f32 %v4189_v26, 0.0  ;;  %v4274_v6 = vmax.f32 %v4190_v32, 0.0  ;;  %v4275_v19 = vmax.f32 %v4191_v57, 0.0  ;;  %v4049_v46 = vmul.f32 %v3971_v41, %v3905_v62 }
 0x5a9   : > { %4353 = vst [vmem:[%s5787_s22 + $0x1f8] sm:$0xff] %v4269_v63  ;;  %v4050_v49 = vmul.f32 %v3971_v41, %v3906_v30  ;;  %v4051_v10 = vmul.f32 %v3971_v41, %v3907_v9  ;;  %v4052_v61 = vmul.f32 %v3971_v41, %v3908_v37  ;;  %v4053_v51 = vmul.f32 %v3971_v41, %v3909_v17 }
 0x5aa   : > { %4354 = vst [vmem:[%s5787_s22 + $0x200] sm:$0xff] %v4270_v2  ;;  %v4054_v1 = vmul.f32 %v3971_v41, %v3910_v29 }
 0x5ab   : > { %4355 = vst [vmem:[%s5787_s22 + $0x208] sm:$0xff] %v4271_v45 }
 0x5ac   : > { %4356 = vst [vmem:[%s5787_s22 + $0x210] sm:$0xff] %v4272_v16  ;;  %v4115_v50 = vpop.permute.xlu0 %4114 }
 0x5ad   : > { %4357 = vst [vmem:[%s5787_s22 + $0x218] sm:$0xff] %v4273_v54  ;;  %v4192_v0 = vadd.f32 %v4115_v50, %v4048_v39  ;;  %v4193_v59 = vadd.f32 %v4115_v50, %v4049_v46  ;;  %v4194_v60 = vadd.f32 %v4115_v50, %v4050_v49  ;;  %v4195_v58 = vadd.f32 %v4115_v50, %v4051_v10 }
 0x5ae   : > { %4358 = vst [vmem:[%s5787_s22 + $0x220] sm:$0xff] %v4274_v6  ;;  %v4196_v3 = vadd.f32 %v4115_v50, %v4052_v61  ;;  %v4197_v15 = vadd.f32 %v4115_v50, %v4053_v51  ;;  %v4198_v42 = vadd.f32 %v4115_v50, %v4054_v1 }
 0x5af   : > { %4359 = vst.msk [vmem:[%s5787_s22 + $0x228] sm:$0xff] %vm3179_vm1, %v4275_v19  ;;  %v4276_v24 = vmax.f32 %v4192_v0, 0.0  ;;  %v4277_v20 = vmax.f32 %v4193_v59, 0.0  ;;  %v4278_v14 = vmax.f32 %v4194_v60, 0.0  ;;  %v4279_v18 = vmax.f32 %v4195_v58, 0.0 }
 0x5b0   : > { %v4280_v36 = vmax.f32 %v4196_v3, 0.0  ;;  %v4281_v4 = vmax.f32 %v4197_v15, 0.0  ;;  %v4282_v52 = vmax.f32 %v4198_v42, 0.0 }
 0x5b1   : > { %4360 = vst [vmem:[%s5787_s22 + $0x230] sm:$0xff] %v4276_v24 }
 0x5b2   : > { %4361 = vst [vmem:[%s5787_s22 + $0x238] sm:$0xff] %v4277_v20 }
 0x5b3   : > { %4362 = vst [vmem:[%s5787_s22 + $0x240] sm:$0xff] %v4278_v14 }
 0x5b4   : > { %4363 = vst [vmem:[%s5787_s22 + $0x248] sm:$0xff] %v4279_v18 }
 0x5b5   : > { %4364 = vst [vmem:[%s5787_s22 + $0x250] sm:$0xff] %v4280_v36 }
 0x5b6   : > { %4365 = vst [vmem:[%s5787_s22 + $0x258] sm:$0xff] %v4281_v4 }
 0x5b7   : > { %4366 = vst.msk [vmem:[%s5787_s22 + $0x260] sm:$0xff] %vm3179_vm1, %v4282_v52 }
 0x5b8 PF: > { %s14_s15 = sadd.s32 1, %s4855_s15  }
 0x5b9   : > { %p11_p4 = scmp.ge.s32.totalorder %s14_s15, 4  }
 0x5bb   :  { %13 = sbr.rel (!%p11_p4) target bundleno = 1 (0x1), region = 72 }

</bundles_post_ra>
